<compile_context>
chip_gen: v5e
topology: v5e:2x2
jax: 0.10.0
libtpu: 0.0.40
codegen_flags: <defaults>
</compile_context>

<pallas_src>
import jax
import jax.numpy as jnp
from jax.experimental import pallas as pl
from jax.experimental.pallas import tpu as pltpu

# ---------------- problem configuration (small, synthetic) ----------------
B = 2                      # batch
C_IN = 8                   # in_features
L = 128                    # tensor_length (lane-friendly)
KERNELS = [15, 17, 19, 21]
OUT_FEATS = [16, 16, 16, 16]
N_BRANCH = 4
C_OUT = 16                 # every branch has 16 output channels
TOTAL = sum(OUT_FEATS)     # 64
KMAX = max(KERNELS)        # 21 (all kernels zero-padded to this width)
PAD = (KMAX - 1) // 2      # 10
EPS = 1e-5
NEG_SLOPE = 0.2
BL = B * L                 # 256 lanes (batch-major blocks of L)
C1 = TOTAL + N_BRANCH * C_OUT   # 128 fused 1x1 output channels


# ------------------------------- kernel ------------------------------------
def inception_res_kernel(x_ref, w1_ref, b1_ref, wk_ref, bk_ref, out_ref,
                         col_ref):
    inv_n = 1.0 / float(BL)

    def batchnorm(y):
        # per-channel BN over the (B*L) lane axis; single-pass statistics
        s1 = jnp.sum(y, axis=1, keepdims=True)
        s2 = jnp.sum(y * y, axis=1, keepdims=True)
        mean = s1 * inv_n
        var = jnp.maximum(s2 * inv_n - mean * mean, 0.0)
        return (y - mean) * jax.lax.rsqrt(var + EPS)

    # ---- fused 1x1 convs: residual (64 ch) + four branch reducers (4x16) ----
    y1 = jnp.dot(w1_ref[...], x_ref[...],
                 preferred_element_type=jnp.float32) + b1_ref[...]
    y1 = batchnorm(y1)                          # all 128 channels at once
    res = y1[:TOTAL, :]                         # BN(res(x)) residual path
    h_all = y1[TOTAL:, :]
    h_all = jnp.where(h_all > 0, h_all, NEG_SLOPE * h_all)   # LeakyReLU(0.2)

    # lane position inside each length-L batch block (for conv edge masking);
    # hoisted once so the unrolled loops don't re-emit the iota/broadcast.
    lane = jax.lax.broadcasted_iota(jnp.int32, (C_OUT, BL), 1) % L

    # TODO(synk): on v7x the 4 branches could be split across the 2 TensorCores
    # via a grid=(2,) "parallel" axis; kept grid-less here (best for v5e/v6e).
    for i in range(N_BRANCH):
        wk_i = wk_ref[i]                        # (C_OUT, KMAX*C_OUT)
        bk_i = bk_ref[i]                        # (C_OUT, 1)
        h = h_all[i * C_OUT:(i + 1) * C_OUT, :]   # (16, 256)

        # im2col: KMAX lane-rotated, edge-masked copies of h stacked along
        # sublanes at aligned offsets (k*16 rows, full 256 lanes).
        for k in range(KMAX):
            s = k - PAD                         # tap shift in [-PAD, PAD]
            if s == 0:
                g = h
            else:
                g = pltpu.roll(h, shift=(-s) % BL, axis=1)
                lo_v, hi_v = max(0, -s), L - max(0, s)
                g = jnp.where((lane >= lo_v) & (lane < hi_v), g, 0.0)
            col_ref[k * C_OUT:(k + 1) * C_OUT, :] = g

        # one fat matmul per branch replaces 21 shifted (16,16)x(16,128) dots
        y = jnp.dot(wk_i, col_ref[...],
                    preferred_element_type=jnp.float32) + bk_i
        lo = i * C_OUT
        out_ref[lo:lo + C_OUT, :] = batchnorm(y) + res[lo:lo + C_OUT, :]


# ------------------------------ wrapper -------------------------------------
def inception_res_block(x, res_w, res_b, c0_w, c0_b, ck_w, ck_b):
    # --- wrapper-side layout plumbing (plain XLA, outside the kernel) ---
    # activations: (B, C_IN, L) -> (C_IN, B*L)
    x2 = jnp.transpose(x, (1, 0, 2)).reshape(C_IN, BL)
    # fuse residual 1x1 and the four branch 1x1 reducers into one weight/bias
    w1 = jnp.concatenate([res_w[:, :, 0]] + [w[:, :, 0] for w in c0_w], axis=0)
    b1 = jnp.concatenate([res_b] + list(c0_b), axis=0)[:, None]
    # wide-conv weights: zero-pad every kernel to KMAX taps and flatten to the
    # im2col contraction layout (C_OUT, KMAX*C_OUT) with index [o, k*C_OUT + c]
    wk_rows = []
    for i in range(N_BRANCH):
        off = (KMAX - KERNELS[i]) // 2
        wp = jnp.zeros((C_OUT, C_OUT, KMAX), jnp.float32)
        wp = wp.at[:, :, off:off + KERNELS[i]].set(ck_w[i])
        wk_rows.append(jnp.transpose(wp, (0, 2, 1)).reshape(C_OUT, KMAX * C_OUT))
    wk = jnp.stack(wk_rows)                               # (4, 16, 336)
    bk = jnp.stack([b[:, None] for b in ck_b])            # (4, 16, 1)

    vmem = pl.BlockSpec(memory_space=pltpu.MemorySpace.VMEM)
    out2 = pl.pallas_call(
        inception_res_kernel,
        out_shape=jax.ShapeDtypeStruct((TOTAL, BL), jnp.float32),
        in_specs=[vmem] * 5,
        out_specs=vmem,
        scratch_shapes=[pltpu.VMEM((KMAX * C_OUT, BL), jnp.float32)],
        cost_estimate=pl.CostEstimate(
            flops=2 * BL * (C1 * C_IN + N_BRANCH * C_OUT * KMAX * C_OUT),
            transcendentals=C1 + N_BRANCH * C_OUT,
            bytes_accessed=4 * (C_IN * BL + C1 * (C_IN + 1)
                                + N_BRANCH * C_OUT * (KMAX * C_OUT + 1)
                                + TOTAL * BL)),
    )(x2, w1, b1, wk, bk)

    # (TOTAL, B*L) -> (B, TOTAL, L)
    return jnp.transpose(out2.reshape(TOTAL, B, L), (1, 0, 2))


# --------------------------- pure-JAX reference ------------------------------
def _bn_ref(y):
    mean = jnp.mean(y, axis=(0, 2), keepdims=True)
    var = jnp.mean((y - mean) ** 2, axis=(0, 2), keepdims=True)
    return (y - mean) / jnp.sqrt(var + EPS)


def _conv1d_ref(x, w, b, pad):
    y = jax.lax.conv_general_dilated(
        x, w, window_strides=(1,), padding=[(pad, pad)],
        dimension_numbers=("NCH", "OIH", "NCH"))
    return y + b[None, :, None]


def reference(x, res_w, res_b, c0_w, c0_b, ck_w, ck_b):
    x_res = _bn_ref(_conv1d_ref(x, res_w, res_b, 0))
    outs = []
    for i in range(N_BRANCH):
        h = _bn_ref(_conv1d_ref(x, c0_w[i], c0_b[i], 0))
        h = jnp.where(h > 0, h, NEG_SLOPE * h)
        pad = (KERNELS[i] - 1) // 2
        y = _bn_ref(_conv1d_ref(h, ck_w[i], ck_b[i], pad))
        outs.append(y)
    return jnp.concatenate(outs, axis=1) + x_res


# ---------------------------------- main -------------------------------------
if __name__ == "__main__":
    key = jax.random.PRNGKey(0)
    ks = jax.random.split(key, 3 + 4 * N_BRANCH)

    x = jax.random.normal(ks[0], (B, C_IN, L), jnp.float32)

    # deterministic synthetic parameters (same shapes as the PyTorch module)
    res_w = jax.random.normal(ks[1], (TOTAL, C_IN, 1), jnp.float32) * 0.1
    res_b = jax.random.normal(ks[2], (TOTAL,), jnp.float32) * 0.1
    c0_w, c0_b, ck_w, ck_b = [], [], [], []
    for i in range(N_BRANCH):
        c0_w.append(jax.random.normal(ks[3 + 4 * i], (C_OUT, C_IN, 1)) * 0.1)
        c0_b.append(jax.random.normal(ks[4 + 4 * i], (C_OUT,)) * 0.1)
        ck_w.append(jax.random.normal(ks[5 + 4 * i],
                                      (C_OUT, C_OUT, KERNELS[i])) * 0.05)
        ck_b.append(jax.random.normal(ks[6 + 4 * i], (C_OUT,)) * 0.1)

    run = jax.jit(inception_res_block)
    out = run(x, res_w, res_b, c0_w, c0_b, ck_w, ck_b)
    out = jax.block_until_ready(out)

    ref = reference(x, res_w, res_b, c0_w, c0_b, ck_w, ck_b)
    ref = jax.block_until_ready(ref)

    if not bool(jnp.allclose(out, ref, atol=2e-4, rtol=2e-4)):
        raise AssertionError(
            f"mismatch, max abs err = {float(jnp.max(jnp.abs(out - ref)))}")
    print("KERNEL_OK")
</pallas_src>

<mosaic_0001>
module attributes {stable_mosaic.version = 11 : i64} {
  func.func @inception_res_kernel(%arg0: memref<8x256xf32, #tpu.memory_space<vmem>>, %arg1: memref<128x8xf32, #tpu.memory_space<vmem>>, %arg2: memref<128x1xf32, #tpu.memory_space<vmem>>, %arg3: memref<4x16x336xf32, #tpu.memory_space<vmem>>, %arg4: memref<4x16x1xf32, #tpu.memory_space<vmem>>, %arg5: memref<64x256xf32, #tpu.memory_space<vmem>>, %arg6: memref<336x256xf32, #tpu.memory_space<vmem>>) attributes {dimension_semantics = [], scalar_prefetch = 0 : i64, scratch_operands = 1 : i64, tpu.core_type = #tpu.core_type<tc>} {
    %c0 = arith.constant 0 : index
    %c0_0 = arith.constant 0 : index
    %0 = vector.load %arg1[%c0, %c0_0] : memref<128x8xf32, #tpu.memory_space<vmem>>, vector<128x8xf32>
    %c0_1 = arith.constant 0 : index
    %c0_2 = arith.constant 0 : index
    %1 = vector.load %arg0[%c0_1, %c0_2] : memref<8x256xf32, #tpu.memory_space<vmem>>, vector<8x256xf32>
    %cst = arith.constant dense<0.000000e+00> : vector<128x256xf32>
    %2 = tpu.matmul %0, %1, %cst {dimension_numbers = #tpu.dot_dimension_numbers<[1], [0], [0], [1], [0, 0, 1, 1], [], []>} : vector<128x8xf32>, vector<8x256xf32>, vector<128x256xf32> -> vector<128x256xf32>
    %c0_3 = arith.constant 0 : index
    %c0_4 = arith.constant 0 : index
    %3 = vector.load %arg2[%c0_3, %c0_4] : memref<128x1xf32, #tpu.memory_space<vmem>>, vector<128x1xf32>
    %4 = vector.broadcast %3 : vector<128x1xf32> to vector<128x256xf32>
    %5 = arith.addf %2, %4 : vector<128x256xf32>
    %cst_5 = arith.constant dense<0.000000e+00> : vector<128xf32>
    %6 = vector.multi_reduction <add>, %5, %cst_5 [1] : vector<128x256xf32> to vector<128xf32>
    %7 = vector.shape_cast %6 : vector<128xf32> to vector<128x1xf32>
    %8 = arith.mulf %5, %5 : vector<128x256xf32>
    %cst_6 = arith.constant dense<0.000000e+00> : vector<128xf32>
    %9 = vector.multi_reduction <add>, %8, %cst_6 [1] : vector<128x256xf32> to vector<128xf32>
    %10 = vector.shape_cast %9 : vector<128xf32> to vector<128x1xf32>
    %cst_7 = arith.constant 3.906250e-03 : f32
    %11 = vector.broadcast %cst_7 : f32 to vector<128x1xf32>
    %12 = arith.mulf %7, %11 : vector<128x1xf32>
    %cst_8 = arith.constant 3.906250e-03 : f32
    %13 = vector.broadcast %cst_8 : f32 to vector<128x1xf32>
    %14 = arith.mulf %10, %13 : vector<128x1xf32>
    %15 = arith.mulf %12, %12 : vector<128x1xf32>
    %16 = arith.subf %14, %15 : vector<128x1xf32>
    %cst_9 = arith.constant 0.000000e+00 : f32
    %17 = vector.broadcast %cst_9 : f32 to vector<128x1xf32>
    %18 = arith.maximumf %16, %17 : vector<128x1xf32>
    %19 = vector.broadcast %12 : vector<128x1xf32> to vector<128x256xf32>
    %20 = arith.subf %5, %19 : vector<128x256xf32>
    %cst_10 = arith.constant 9.99999974E-6 : f32
    %21 = vector.broadcast %cst_10 : f32 to vector<128x1xf32>
    %22 = arith.addf %18, %21 : vector<128x1xf32>
    %23 = math.rsqrt %22 : vector<128x1xf32>
    %24 = vector.broadcast %23 : vector<128x1xf32> to vector<128x256xf32>
    %25 = arith.mulf %20, %24 : vector<128x256xf32>
    %26 = vector.extract_strided_slice %25 {offsets = [0, 0], sizes = [64, 256], strides = [1, 1]} : vector<128x256xf32> to vector<64x256xf32>
    %27 = vector.extract_strided_slice %25 {offsets = [64, 0], sizes = [64, 256], strides = [1, 1]} : vector<128x256xf32> to vector<64x256xf32>
    %cst_11 = arith.constant 0.000000e+00 : f32
    %28 = vector.broadcast %cst_11 : f32 to vector<64x256xf32>
    %29 = arith.cmpf ogt, %27, %28 : vector<64x256xf32>
    %cst_12 = arith.constant 2.000000e-01 : f32
    %30 = vector.broadcast %cst_12 : f32 to vector<64x256xf32>
    %31 = arith.mulf %30, %27 : vector<64x256xf32>
    %32 = arith.select %29, %27, %31 : vector<64x256xi1>, vector<64x256xf32>
    %33 = tpu.iota {dimensions = array<i32: 1>} : vector<16x256xi32>
    %c128_i32 = arith.constant 128 : i32
    %c0_i32 = arith.constant 0 : i32
    %34 = arith.cmpi eq, %c128_i32, %c0_i32 : i32
    %c1_i32 = arith.constant 1 : i32
    %35 = arith.select %34, %c1_i32, %c128_i32 : i32
    %36 = vector.broadcast %35 : i32 to vector<16x256xi32>
    %37 = arith.remsi %33, %36 : vector<16x256xi32>
    %c0_i32_13 = arith.constant 0 : i32
    %38 = vector.broadcast %c0_i32_13 : i32 to vector<16x256xi32>
    %39 = arith.cmpi ne, %37, %38 : vector<16x256xi32>
    %c0_i32_14 = arith.constant 0 : i32
    %40 = vector.broadcast %c0_i32_14 : i32 to vector<16x256xi32>
    %41 = arith.cmpi slt, %37, %40 : vector<16x256xi32>
    %c0_i32_15 = arith.constant 0 : i32
    %42 = arith.cmpi slt, %35, %c0_i32_15 : i32
    %43 = vector.broadcast %42 : i1 to vector<16x256xi1>
    %44 = vector.broadcast %43 : vector<16x256xi1> to vector<16x256xi1>
    %45 = arith.xori %41, %44 : vector<16x256xi1>
    %46 = arith.andi %45, %39 : vector<16x256xi1>
    %47 = vector.broadcast %35 : i32 to vector<16x256xi32>
    %48 = arith.addi %37, %47 : vector<16x256xi32>
    %49 = arith.select %46, %48, %37 : vector<16x256xi1>, vector<16x256xi32>
    %c0_16 = arith.constant 0 : index
    %c0_17 = arith.constant 0 : index
    %c0_18 = arith.constant 0 : index
    %50 = vector.load %arg3[%c0_16, %c0_17, %c0_18] : memref<4x16x336xf32, #tpu.memory_space<vmem>>, vector<1x16x336xf32>
    %51 = vector.shape_cast %50 : vector<1x16x336xf32> to vector<16x336xf32>
    %c0_19 = arith.constant 0 : index
    %c0_20 = arith.constant 0 : index
    %c0_21 = arith.constant 0 : index
    %52 = vector.load %arg4[%c0_19, %c0_20, %c0_21] : memref<4x16x1xf32, #tpu.memory_space<vmem>>, vector<1x16x1xf32>
    %53 = vector.shape_cast %52 : vector<1x16x1xf32> to vector<16x1xf32>
    %54 = vector.extract_strided_slice %32 {offsets = [0, 0], sizes = [16, 256], strides = [1, 1]} : vector<64x256xf32> to vector<16x256xf32>
    %c10_i32 = arith.constant 10 : i32
    %55 = tpu.dynamic_rotate %54 by %c10_i32 dim 1 : vector<16x256xf32>, i32 -> vector<16x256xf32>
    %c10_i32_22 = arith.constant 10 : i32
    %56 = vector.broadcast %c10_i32_22 : i32 to vector<16x256xi32>
    %57 = arith.cmpi sge, %49, %56 : vector<16x256xi32>
    %c128_i32_23 = arith.constant 128 : i32
    %58 = vector.broadcast %c128_i32_23 : i32 to vector<16x256xi32>
    %59 = arith.cmpi slt, %49, %58 : vector<16x256xi32>
    %60 = arith.andi %57, %59 : vector<16x256xi1>
    %cst_24 = arith.constant 0.000000e+00 : f32
    %61 = vector.broadcast %cst_24 : f32 to vector<16x256xf32>
    %62 = arith.select %60, %55, %61 : vector<16x256xi1>, vector<16x256xf32>
    %c0_25 = arith.constant 0 : index
    %c0_26 = arith.constant 0 : index
    %63 = vector.load %arg6[%c0_25, %c0_26] : memref<336x256xf32, #tpu.memory_space<vmem>>, vector<16x256xf32>
    tpu.vector_store %arg6[%c0_25, %c0_26], %62 {strides = array<i32>} : memref<336x256xf32, #tpu.memory_space<vmem>>, vector<16x256xf32>,
    %c9_i32 = arith.constant 9 : i32
    %64 = tpu.dynamic_rotate %54 by %c9_i32 dim 1 : vector<16x256xf32>, i32 -> vector<16x256xf32>
    %c9_i32_27 = arith.constant 9 : i32
    %65 = vector.broadcast %c9_i32_27 : i32 to vector<16x256xi32>
    %66 = arith.cmpi sge, %49, %65 : vector<16x256xi32>
    %c128_i32_28 = arith.constant 128 : i32
    %67 = vector.broadcast %c128_i32_28 : i32 to vector<16x256xi32>
    %68 = arith.cmpi slt, %49, %67 : vector<16x256xi32>
    %69 = arith.andi %66, %68 : vector<16x256xi1>
    %cst_29 = arith.constant 0.000000e+00 : f32
    %70 = vector.broadcast %cst_29 : f32 to vector<16x256xf32>
    %71 = arith.select %69, %64, %70 : vector<16x256xi1>, vector<16x256xf32>
    %c16 = arith.constant 16 : index
    %c0_30 = arith.constant 0 : index
    %72 = vector.load %arg6[%c16, %c0_30] : memref<336x256xf32, #tpu.memory_space<vmem>>, vector<16x256xf32>
    tpu.vector_store %arg6[%c16, %c0_30], %71 {strides = array<i32>} : memref<336x256xf32, #tpu.memory_space<vmem>>, vector<16x256xf32>,
    %c8_i32 = arith.constant 8 : i32
    %73 = tpu.dynamic_rotate %54 by %c8_i32 dim 1 : vector<16x256xf32>, i32 -> vector<16x256xf32>
    %c8_i32_31 = arith.constant 8 : i32
    %74 = vector.broadcast %c8_i32_31 : i32 to vector<16x256xi32>
    %75 = arith.cmpi sge, %49, %74 : vector<16x256xi32>
    %c128_i32_32 = arith.constant 128 : i32
    %76 = vector.broadcast %c128_i32_32 : i32 to vector<16x256xi32>
    %77 = arith.cmpi slt, %49, %76 : vector<16x256xi32>
    %78 = arith.andi %75, %77 : vector<16x256xi1>
    %cst_33 = arith.constant 0.000000e+00 : f32
    %79 = vector.broadcast %cst_33 : f32 to vector<16x256xf32>
    %80 = arith.select %78, %73, %79 : vector<16x256xi1>, vector<16x256xf32>
    %c32 = arith.constant 32 : index
    %c0_34 = arith.constant 0 : index
    %81 = vector.load %arg6[%c32, %c0_34] : memref<336x256xf32, #tpu.memory_space<vmem>>, vector<16x256xf32>
    tpu.vector_store %arg6[%c32, %c0_34], %80 {strides = array<i32>} : memref<336x256xf32, #tpu.memory_space<vmem>>, vector<16x256xf32>,
    %c7_i32 = arith.constant 7 : i32
    %82 = tpu.dynamic_rotate %54 by %c7_i32 dim 1 : vector<16x256xf32>, i32 -> vector<16x256xf32>
    %c7_i32_35 = arith.constant 7 : i32
    %83 = vector.broadcast %c7_i32_35 : i32 to vector<16x256xi32>
    %84 = arith.cmpi sge, %49, %83 : vector<16x256xi32>
    %c128_i32_36 = arith.constant 128 : i32
    %85 = vector.broadcast %c128_i32_36 : i32 to vector<16x256xi32>
    %86 = arith.cmpi slt, %49, %85 : vector<16x256xi32>
    %87 = arith.andi %84, %86 : vector<16x256xi1>
    %cst_37 = arith.constant 0.000000e+00 : f32
    %88 = vector.broadcast %cst_37 : f32 to vector<16x256xf32>
    %89 = arith.select %87, %82, %88 : vector<16x256xi1>, vector<16x256xf32>
    %c48 = arith.constant 48 : index
    %c0_38 = arith.constant 0 : index
    %90 = vector.load %arg6[%c48, %c0_38] : memref<336x256xf32, #tpu.memory_space<vmem>>, vector<16x256xf32>
    tpu.vector_store %arg6[%c48, %c0_38], %89 {strides = array<i32>} : memref<336x256xf32, #tpu.memory_space<vmem>>, vector<16x256xf32>,
    %c6_i32 = arith.constant 6 : i32
    %91 = tpu.dynamic_rotate %54 by %c6_i32 dim 1 : vector<16x256xf32>, i32 -> vector<16x256xf32>
    %c6_i32_39 = arith.constant 6 : i32
    %92 = vector.broadcast %c6_i32_39 : i32 to vector<16x256xi32>
    %93 = arith.cmpi sge, %49, %92 : vector<16x256xi32>
    %c128_i32_40 = arith.constant 128 : i32
    %94 = vector.broadcast %c128_i32_40 : i32 to vector<16x256xi32>
    %95 = arith.cmpi slt, %49, %94 : vector<16x256xi32>
    %96 = arith.andi %93, %95 : vector<16x256xi1>
    %cst_41 = arith.constant 0.000000e+00 : f32
    %97 = vector.broadcast %cst_41 : f32 to vector<16x256xf32>
    %98 = arith.select %96, %91, %97 : vector<16x256xi1>, vector<16x256xf32>
    %c64 = arith.constant 64 : index
    %c0_42 = arith.constant 0 : index
    %99 = vector.load %arg6[%c64, %c0_42] : memref<336x256xf32, #tpu.memory_space<vmem>>, vector<16x256xf32>
    tpu.vector_store %arg6[%c64, %c0_42], %98 {strides = array<i32>} : memref<336x256xf32, #tpu.memory_space<vmem>>, vector<16x256xf32>,
    %c5_i32 = arith.constant 5 : i32
    %100 = tpu.dynamic_rotate %54 by %c5_i32 dim 1 : vector<16x256xf32>, i32 -> vector<16x256xf32>
    %c5_i32_43 = arith.constant 5 : i32
    %101 = vector.broadcast %c5_i32_43 : i32 to vector<16x256xi32>
    %102 = arith.cmpi sge, %49, %101 : vector<16x256xi32>
    %c128_i32_44 = arith.constant 128 : i32
    %103 = vector.broadcast %c128_i32_44 : i32 to vector<16x256xi32>
    %104 = arith.cmpi slt, %49, %103 : vector<16x256xi32>
    %105 = arith.andi %102, %104 : vector<16x256xi1>
    %cst_45 = arith.constant 0.000000e+00 : f32
    %106 = vector.broadcast %cst_45 : f32 to vector<16x256xf32>
    %107 = arith.select %105, %100, %106 : vector<16x256xi1>, vector<16x256xf32>
    %c80 = arith.constant 80 : index
    %c0_46 = arith.constant 0 : index
    %108 = vector.load %arg6[%c80, %c0_46] : memref<336x256xf32, #tpu.memory_space<vmem>>, vector<16x256xf32>
    tpu.vector_store %arg6[%c80, %c0_46], %107 {strides = array<i32>} : memref<336x256xf32, #tpu.memory_space<vmem>>, vector<16x256xf32>,
    %c4_i32 = arith.constant 4 : i32
    %109 = tpu.dynamic_rotate %54 by %c4_i32 dim 1 : vector<16x256xf32>, i32 -> vector<16x256xf32>
    %c4_i32_47 = arith.constant 4 : i32
    %110 = vector.broadcast %c4_i32_47 : i32 to vector<16x256xi32>
    %111 = arith.cmpi sge, %49, %110 : vector<16x256xi32>
    %c128_i32_48 = arith.constant 128 : i32
    %112 = vector.broadcast %c128_i32_48 : i32 to vector<16x256xi32>
    %113 = arith.cmpi slt, %49, %112 : vector<16x256xi32>
    %114 = arith.andi %111, %113 : vector<16x256xi1>
    %cst_49 = arith.constant 0.000000e+00 : f32
    %115 = vector.broadcast %cst_49 : f32 to vector<16x256xf32>
    %116 = arith.select %114, %109, %115 : vector<16x256xi1>, vector<16x256xf32>
    %c96 = arith.constant 96 : index
    %c0_50 = arith.constant 0 : index
    %117 = vector.load %arg6[%c96, %c0_50] : memref<336x256xf32, #tpu.memory_space<vmem>>, vector<16x256xf32>
    tpu.vector_store %arg6[%c96, %c0_50], %116 {strides = array<i32>} : memref<336x256xf32, #tpu.memory_space<vmem>>, vector<16x256xf32>,
    %c3_i32 = arith.constant 3 : i32
    %118 = tpu.dynamic_rotate %54 by %c3_i32 dim 1 : vector<16x256xf32>, i32 -> vector<16x256xf32>
    %c3_i32_51 = arith.constant 3 : i32
    %119 = vector.broadcast %c3_i32_51 : i32 to vector<16x256xi32>
    %120 = arith.cmpi sge, %49, %119 : vector<16x256xi32>
    %c128_i32_52 = arith.constant 128 : i32
    %121 = vector.broadcast %c128_i32_52 : i32 to vector<16x256xi32>
    %122 = arith.cmpi slt, %49, %121 : vector<16x256xi32>
    %123 = arith.andi %120, %122 : vector<16x256xi1>
    %cst_53 = arith.constant 0.000000e+00 : f32
    %124 = vector.broadcast %cst_53 : f32 to vector<16x256xf32>
    %125 = arith.select %123, %118, %124 : vector<16x256xi1>, vector<16x256xf32>
    %c112 = arith.constant 112 : index
    %c0_54 = arith.constant 0 : index
    %126 = vector.load %arg6[%c112, %c0_54] : memref<336x256xf32, #tpu.memory_space<vmem>>, vector<16x256xf32>
    tpu.vector_store %arg6[%c112, %c0_54], %125 {strides = array<i32>} : memref<336x256xf32, #tpu.memory_space<vmem>>, vector<16x256xf32>,
    %c2_i32 = arith.constant 2 : i32
    %127 = tpu.dynamic_rotate %54 by %c2_i32 dim 1 : vector<16x256xf32>, i32 -> vector<16x256xf32>
    %c2_i32_55 = arith.constant 2 : i32
    %128 = vector.broadcast %c2_i32_55 : i32 to vector<16x256xi32>
    %129 = arith.cmpi sge, %49, %128 : vector<16x256xi32>
    %c128_i32_56 = arith.constant 128 : i32
    %130 = vector.broadcast %c128_i32_56 : i32 to vector<16x256xi32>
    %131 = arith.cmpi slt, %49, %130 : vector<16x256xi32>
    %132 = arith.andi %129, %131 : vector<16x256xi1>
    %cst_57 = arith.constant 0.000000e+00 : f32
    %133 = vector.broadcast %cst_57 : f32 to vector<16x256xf32>
    %134 = arith.select %132, %127, %133 : vector<16x256xi1>, vector<16x256xf32>
    %c128 = arith.constant 128 : index
    %c0_58 = arith.constant 0 : index
    %135 = vector.load %arg6[%c128, %c0_58] : memref<336x256xf32, #tpu.memory_space<vmem>>, vector<16x256xf32>
    tpu.vector_store %arg6[%c128, %c0_58], %134 {strides = array<i32>} : memref<336x256xf32, #tpu.memory_space<vmem>>, vector<16x256xf32>,
    %c1_i32_59 = arith.constant 1 : i32
    %136 = tpu.dynamic_rotate %54 by %c1_i32_59 dim 1 : vector<16x256xf32>, i32 -> vector<16x256xf32>
    %c1_i32_60 = arith.constant 1 : i32
    %137 = vector.broadcast %c1_i32_60 : i32 to vector<16x256xi32>
    %138 = arith.cmpi sge, %49, %137 : vector<16x256xi32>
    %c128_i32_61 = arith.constant 128 : i32
    %139 = vector.broadcast %c128_i32_61 : i32 to vector<16x256xi32>
    %140 = arith.cmpi slt, %49, %139 : vector<16x256xi32>
    %141 = arith.andi %138, %140 : vector<16x256xi1>
    %cst_62 = arith.constant 0.000000e+00 : f32
    %142 = vector.broadcast %cst_62 : f32 to vector<16x256xf32>
    %143 = arith.select %141, %136, %142 : vector<16x256xi1>, vector<16x256xf32>
    %c144 = arith.constant 144 : index
    %c0_63 = arith.constant 0 : index
    %144 = vector.load %arg6[%c144, %c0_63] : memref<336x256xf32, #tpu.memory_space<vmem>>, vector<16x256xf32>
    tpu.vector_store %arg6[%c144, %c0_63], %143 {strides = array<i32>} : memref<336x256xf32, #tpu.memory_space<vmem>>, vector<16x256xf32>,
    %c160 = arith.constant 160 : index
    %c0_64 = arith.constant 0 : index
    %145 = vector.load %arg6[%c160, %c0_64] : memref<336x256xf32, #tpu.memory_space<vmem>>, vector<16x256xf32>
    tpu.vector_store %arg6[%c160, %c0_64], %54 {strides = array<i32>} : memref<336x256xf32, #tpu.memory_space<vmem>>, vector<16x256xf32>,
    %c255_i32 = arith.constant 255 : i32
    %146 = tpu.dynamic_rotate %54 by %c255_i32 dim 1 : vector<16x256xf32>, i32 -> vector<16x256xf32>
    %c0_i32_65 = arith.constant 0 : i32
    %147 = vector.broadcast %c0_i32_65 : i32 to vector<16x256xi32>
    %148 = arith.cmpi sge, %49, %147 : vector<16x256xi32>
    %c127_i32 = arith.constant 127 : i32
    %149 = vector.broadcast %c127_i32 : i32 to vector<16x256xi32>
    %150 = arith.cmpi slt, %49, %149 : vector<16x256xi32>
    %151 = arith.andi %148, %150 : vector<16x256xi1>
    %cst_66 = arith.constant 0.000000e+00 : f32
    %152 = vector.broadcast %cst_66 : f32 to vector<16x256xf32>
    %153 = arith.select %151, %146, %152 : vector<16x256xi1>, vector<16x256xf32>
    %c176 = arith.constant 176 : index
    %c0_67 = arith.constant 0 : index
    %154 = vector.load %arg6[%c176, %c0_67] : memref<336x256xf32, #tpu.memory_space<vmem>>, vector<16x256xf32>
    tpu.vector_store %arg6[%c176, %c0_67], %153 {strides = array<i32>} : memref<336x256xf32, #tpu.memory_space<vmem>>, vector<16x256xf32>,
    %c254_i32 = arith.constant 254 : i32
    %155 = tpu.dynamic_rotate %54 by %c254_i32 dim 1 : vector<16x256xf32>, i32 -> vector<16x256xf32>
    %c0_i32_68 = arith.constant 0 : i32
    %156 = vector.broadcast %c0_i32_68 : i32 to vector<16x256xi32>
    %157 = arith.cmpi sge, %49, %156 : vector<16x256xi32>
    %c126_i32 = arith.constant 126 : i32
    %158 = vector.broadcast %c126_i32 : i32 to vector<16x256xi32>
    %159 = arith.cmpi slt, %49, %158 : vector<16x256xi32>
    %160 = arith.andi %157, %159 : vector<16x256xi1>
    %cst_69 = arith.constant 0.000000e+00 : f32
    %161 = vector.broadcast %cst_69 : f32 to vector<16x256xf32>
    %162 = arith.select %160, %155, %161 : vector<16x256xi1>, vector<16x256xf32>
    %c192 = arith.constant 192 : index
    %c0_70 = arith.constant 0 : index
    %163 = vector.load %arg6[%c192, %c0_70] : memref<336x256xf32, #tpu.memory_space<vmem>>, vector<16x256xf32>
    tpu.vector_store %arg6[%c192, %c0_70], %162 {strides = array<i32>} : memref<336x256xf32, #tpu.memory_space<vmem>>, vector<16x256xf32>,
    %c253_i32 = arith.constant 253 : i32
    %164 = tpu.dynamic_rotate %54 by %c253_i32 dim 1 : vector<16x256xf32>, i32 -> vector<16x256xf32>
    %c0_i32_71 = arith.constant 0 : i32
    %165 = vector.broadcast %c0_i32_71 : i32 to vector<16x256xi32>
    %166 = arith.cmpi sge, %49, %165 : vector<16x256xi32>
    %c125_i32 = arith.constant 125 : i32
    %167 = vector.broadcast %c125_i32 : i32 to vector<16x256xi32>
    %168 = arith.cmpi slt, %49, %167 : vector<16x256xi32>
    %169 = arith.andi %166, %168 : vector<16x256xi1>
    %cst_72 = arith.constant 0.000000e+00 : f32
    %170 = vector.broadcast %cst_72 : f32 to vector<16x256xf32>
    %171 = arith.select %169, %164, %170 : vector<16x256xi1>, vector<16x256xf32>
    %c208 = arith.constant 208 : index
    %c0_73 = arith.constant 0 : index
    %172 = vector.load %arg6[%c208, %c0_73] : memref<336x256xf32, #tpu.memory_space<vmem>>, vector<16x256xf32>
    tpu.vector_store %arg6[%c208, %c0_73], %171 {strides = array<i32>} : memref<336x256xf32, #tpu.memory_space<vmem>>, vector<16x256xf32>,
    %c252_i32 = arith.constant 252 : i32
    %173 = tpu.dynamic_rotate %54 by %c252_i32 dim 1 : vector<16x256xf32>, i32 -> vector<16x256xf32>
    %c0_i32_74 = arith.constant 0 : i32
    %174 = vector.broadcast %c0_i32_74 : i32 to vector<16x256xi32>
    %175 = arith.cmpi sge, %49, %174 : vector<16x256xi32>
    %c124_i32 = arith.constant 124 : i32
    %176 = vector.broadcast %c124_i32 : i32 to vector<16x256xi32>
    %177 = arith.cmpi slt, %49, %176 : vector<16x256xi32>
    %178 = arith.andi %175, %177 : vector<16x256xi1>
    %cst_75 = arith.constant 0.000000e+00 : f32
    %179 = vector.broadcast %cst_75 : f32 to vector<16x256xf32>
    %180 = arith.select %178, %173, %179 : vector<16x256xi1>, vector<16x256xf32>
    %c224 = arith.constant 224 : index
    %c0_76 = arith.constant 0 : index
    %181 = vector.load %arg6[%c224, %c0_76] : memref<336x256xf32, #tpu.memory_space<vmem>>, vector<16x256xf32>
    tpu.vector_store %arg6[%c224, %c0_76], %180 {strides = array<i32>} : memref<336x256xf32, #tpu.memory_space<vmem>>, vector<16x256xf32>,
    %c251_i32 = arith.constant 251 : i32
    %182 = tpu.dynamic_rotate %54 by %c251_i32 dim 1 : vector<16x256xf32>, i32 -> vector<16x256xf32>
    %c0_i32_77 = arith.constant 0 : i32
    %183 = vector.broadcast %c0_i32_77 : i32 to vector<16x256xi32>
    %184 = arith.cmpi sge, %49, %183 : vector<16x256xi32>
    %c123_i32 = arith.constant 123 : i32
    %185 = vector.broadcast %c123_i32 : i32 to vector<16x256xi32>
    %186 = arith.cmpi slt, %49, %185 : vector<16x256xi32>
    %187 = arith.andi %184, %186 : vector<16x256xi1>
    %cst_78 = arith.constant 0.000000e+00 : f32
    %188 = vector.broadcast %cst_78 : f32 to vector<16x256xf32>
    %189 = arith.select %187, %182, %188 : vector<16x256xi1>, vector<16x256xf32>
    %c240 = arith.constant 240 : index
    %c0_79 = arith.constant 0 : index
    %190 = vector.load %arg6[%c240, %c0_79] : memref<336x256xf32, #tpu.memory_space<vmem>>, vector<16x256xf32>
    tpu.vector_store %arg6[%c240, %c0_79], %189 {strides = array<i32>} : memref<336x256xf32, #tpu.memory_space<vmem>>, vector<16x256xf32>,
    %c250_i32 = arith.constant 250 : i32
    %191 = tpu.dynamic_rotate %54 by %c250_i32 dim 1 : vector<16x256xf32>, i32 -> vector<16x256xf32>
    %c0_i32_80 = arith.constant 0 : i32
    %192 = vector.broadcast %c0_i32_80 : i32 to vector<16x256xi32>
    %193 = arith.cmpi sge, %49, %192 : vector<16x256xi32>
    %c122_i32 = arith.constant 122 : i32
    %194 = vector.broadcast %c122_i32 : i32 to vector<16x256xi32>
    %195 = arith.cmpi slt, %49, %194 : vector<16x256xi32>
    %196 = arith.andi %193, %195 : vector<16x256xi1>
    %cst_81 = arith.constant 0.000000e+00 : f32
    %197 = vector.broadcast %cst_81 : f32 to vector<16x256xf32>
    %198 = arith.select %196, %191, %197 : vector<16x256xi1>, vector<16x256xf32>
    %c256 = arith.constant 256 : index
    %c0_82 = arith.constant 0 : index
    %199 = vector.load %arg6[%c256, %c0_82] : memref<336x256xf32, #tpu.memory_space<vmem>>, vector<16x256xf32>
    tpu.vector_store %arg6[%c256, %c0_82], %198 {strides = array<i32>} : memref<336x256xf32, #tpu.memory_space<vmem>>, vector<16x256xf32>,
    %c249_i32 = arith.constant 249 : i32
    %200 = tpu.dynamic_rotate %54 by %c249_i32 dim 1 : vector<16x256xf32>, i32 -> vector<16x256xf32>
    %c0_i32_83 = arith.constant 0 : i32
    %201 = vector.broadcast %c0_i32_83 : i32 to vector<16x256xi32>
    %202 = arith.cmpi sge, %49, %201 : vector<16x256xi32>
    %c121_i32 = arith.constant 121 : i32
    %203 = vector.broadcast %c121_i32 : i32 to vector<16x256xi32>
    %204 = arith.cmpi slt, %49, %203 : vector<16x256xi32>
    %205 = arith.andi %202, %204 : vector<16x256xi1>
    %cst_84 = arith.constant 0.000000e+00 : f32
    %206 = vector.broadcast %cst_84 : f32 to vector<16x256xf32>
    %207 = arith.select %205, %200, %206 : vector<16x256xi1>, vector<16x256xf32>
    %c272 = arith.constant 272 : index
    %c0_85 = arith.constant 0 : index
    %208 = vector.load %arg6[%c272, %c0_85] : memref<336x256xf32, #tpu.memory_space<vmem>>, vector<16x256xf32>
    tpu.vector_store %arg6[%c272, %c0_85], %207 {strides = array<i32>} : memref<336x256xf32, #tpu.memory_space<vmem>>, vector<16x256xf32>,
    %c248_i32 = arith.constant 248 : i32
    %209 = tpu.dynamic_rotate %54 by %c248_i32 dim 1 : vector<16x256xf32>, i32 -> vector<16x256xf32>
    %c0_i32_86 = arith.constant 0 : i32
    %210 = vector.broadcast %c0_i32_86 : i32 to vector<16x256xi32>
    %211 = arith.cmpi sge, %49, %210 : vector<16x256xi32>
    %c120_i32 = arith.constant 120 : i32
    %212 = vector.broadcast %c120_i32 : i32 to vector<16x256xi32>
    %213 = arith.cmpi slt, %49, %212 : vector<16x256xi32>
    %214 = arith.andi %211, %213 : vector<16x256xi1>
    %cst_87 = arith.constant 0.000000e+00 : f32
    %215 = vector.broadcast %cst_87 : f32 to vector<16x256xf32>
    %216 = arith.select %214, %209, %215 : vector<16x256xi1>, vector<16x256xf32>
    %c288 = arith.constant 288 : index
    %c0_88 = arith.constant 0 : index
    %217 = vector.load %arg6[%c288, %c0_88] : memref<336x256xf32, #tpu.memory_space<vmem>>, vector<16x256xf32>
    tpu.vector_store %arg6[%c288, %c0_88], %216 {strides = array<i32>} : memref<336x256xf32, #tpu.memory_space<vmem>>, vector<16x256xf32>,
    %c247_i32 = arith.constant 247 : i32
    %218 = tpu.dynamic_rotate %54 by %c247_i32 dim 1 : vector<16x256xf32>, i32 -> vector<16x256xf32>
    %c0_i32_89 = arith.constant 0 : i32
    %219 = vector.broadcast %c0_i32_89 : i32 to vector<16x256xi32>
    %220 = arith.cmpi sge, %49, %219 : vector<16x256xi32>
    %c119_i32 = arith.constant 119 : i32
    %221 = vector.broadcast %c119_i32 : i32 to vector<16x256xi32>
    %222 = arith.cmpi slt, %49, %221 : vector<16x256xi32>
    %223 = arith.andi %220, %222 : vector<16x256xi1>
    %cst_90 = arith.constant 0.000000e+00 : f32
    %224 = vector.broadcast %cst_90 : f32 to vector<16x256xf32>
    %225 = arith.select %223, %218, %224 : vector<16x256xi1>, vector<16x256xf32>
    %c304 = arith.constant 304 : index
    %c0_91 = arith.constant 0 : index
    %226 = vector.load %arg6[%c304, %c0_91] : memref<336x256xf32, #tpu.memory_space<vmem>>, vector<16x256xf32>
    tpu.vector_store %arg6[%c304, %c0_91], %225 {strides = array<i32>} : memref<336x256xf32, #tpu.memory_space<vmem>>, vector<16x256xf32>,
    %c246_i32 = arith.constant 246 : i32
    %227 = tpu.dynamic_rotate %54 by %c246_i32 dim 1 : vector<16x256xf32>, i32 -> vector<16x256xf32>
    %c0_i32_92 = arith.constant 0 : i32
    %228 = vector.broadcast %c0_i32_92 : i32 to vector<16x256xi32>
    %229 = arith.cmpi sge, %49, %228 : vector<16x256xi32>
    %c118_i32 = arith.constant 118 : i32
    %230 = vector.broadcast %c118_i32 : i32 to vector<16x256xi32>
    %231 = arith.cmpi slt, %49, %230 : vector<16x256xi32>
    %232 = arith.andi %229, %231 : vector<16x256xi1>
    %cst_93 = arith.constant 0.000000e+00 : f32
    %233 = vector.broadcast %cst_93 : f32 to vector<16x256xf32>
    %234 = arith.select %232, %227, %233 : vector<16x256xi1>, vector<16x256xf32>
    %c320 = arith.constant 320 : index
    %c0_94 = arith.constant 0 : index
    %235 = vector.load %arg6[%c320, %c0_94] : memref<336x256xf32, #tpu.memory_space<vmem>>, vector<16x256xf32>
    tpu.vector_store %arg6[%c320, %c0_94], %234 {strides = array<i32>} : memref<336x256xf32, #tpu.memory_space<vmem>>, vector<16x256xf32>,
    %c0_95 = arith.constant 0 : index
    %c0_96 = arith.constant 0 : index
    %236 = vector.load %arg6[%c0_95, %c0_96] : memref<336x256xf32, #tpu.memory_space<vmem>>, vector<336x256xf32>
    %cst_97 = arith.constant dense<0.000000e+00> : vector<16x256xf32>
    %237 = tpu.matmul %51, %236, %cst_97 {dimension_numbers = #tpu.dot_dimension_numbers<[1], [0], [0], [1], [0, 0, 1, 1], [], []>} : vector<16x336xf32>, vector<336x256xf32>, vector<16x256xf32> -> vector<16x256xf32>
    %238 = vector.broadcast %53 : vector<16x1xf32> to vector<16x256xf32>
    %239 = arith.addf %237, %238 : vector<16x256xf32>
    %cst_98 = arith.constant dense<0.000000e+00> : vector<16xf32>
    %240 = vector.multi_reduction <add>, %239, %cst_98 [1] : vector<16x256xf32> to vector<16xf32>
    %241 = vector.shape_cast %240 : vector<16xf32> to vector<16x1xf32>
    %242 = arith.mulf %239, %239 : vector<16x256xf32>
    %cst_99 = arith.constant dense<0.000000e+00> : vector<16xf32>
    %243 = vector.multi_reduction <add>, %242, %cst_99 [1] : vector<16x256xf32> to vector<16xf32>
    %244 = vector.shape_cast %243 : vector<16xf32> to vector<16x1xf32>
    %cst_100 = arith.constant 3.906250e-03 : f32
    %245 = vector.broadcast %cst_100 : f32 to vector<16x1xf32>
    %246 = arith.mulf %241, %245 : vector<16x1xf32>
    %cst_101 = arith.constant 3.906250e-03 : f32
    %247 = vector.broadcast %cst_101 : f32 to vector<16x1xf32>
    %248 = arith.mulf %244, %247 : vector<16x1xf32>
    %249 = arith.mulf %246, %246 : vector<16x1xf32>
    %250 = arith.subf %248, %249 : vector<16x1xf32>
    %cst_102 = arith.constant 0.000000e+00 : f32
    %251 = vector.broadcast %cst_102 : f32 to vector<16x1xf32>
    %252 = arith.maximumf %250, %251 : vector<16x1xf32>
    %253 = vector.broadcast %246 : vector<16x1xf32> to vector<16x256xf32>
    %254 = arith.subf %239, %253 : vector<16x256xf32>
    %cst_103 = arith.constant 9.99999974E-6 : f32
    %255 = vector.broadcast %cst_103 : f32 to vector<16x1xf32>
    %256 = arith.addf %252, %255 : vector<16x1xf32>
    %257 = math.rsqrt %256 : vector<16x1xf32>
    %258 = vector.broadcast %257 : vector<16x1xf32> to vector<16x256xf32>
    %259 = arith.mulf %254, %258 : vector<16x256xf32>
    %260 = vector.extract_strided_slice %26 {offsets = [0, 0], sizes = [16, 256], strides = [1, 1]} : vector<64x256xf32> to vector<16x256xf32>
    %261 = arith.addf %259, %260 : vector<16x256xf32>
    %c0_104 = arith.constant 0 : index
    %c0_105 = arith.constant 0 : index
    %262 = vector.load %arg5[%c0_104, %c0_105] : memref<64x256xf32, #tpu.memory_space<vmem>>, vector<16x256xf32>
    tpu.vector_store %arg5[%c0_104, %c0_105], %261 {strides = array<i32>} : memref<64x256xf32, #tpu.memory_space<vmem>>, vector<16x256xf32>,
    %c1 = arith.constant 1 : index
    %c0_106 = arith.constant 0 : index
    %c0_107 = arith.constant 0 : index
    %263 = vector.load %arg3[%c1, %c0_106, %c0_107] : memref<4x16x336xf32, #tpu.memory_space<vmem>>, vector<1x16x336xf32>
    %264 = vector.shape_cast %263 : vector<1x16x336xf32> to vector<16x336xf32>
    %c1_108 = arith.constant 1 : index
    %c0_109 = arith.constant 0 : index
    %c0_110 = arith.constant 0 : index
    %265 = vector.load %arg4[%c1_108, %c0_109, %c0_110] : memref<4x16x1xf32, #tpu.memory_space<vmem>>, vector<1x16x1xf32>
    %266 = vector.shape_cast %265 : vector<1x16x1xf32> to vector<16x1xf32>
    %267 = vector.extract_strided_slice %32 {offsets = [16, 0], sizes = [16, 256], strides = [1, 1]} : vector<64x256xf32> to vector<16x256xf32>
    %c10_i32_111 = arith.constant 10 : i32
    %268 = tpu.dynamic_rotate %267 by %c10_i32_111 dim 1 : vector<16x256xf32>, i32 -> vector<16x256xf32>
    %c10_i32_112 = arith.constant 10 : i32
    %269 = vector.broadcast %c10_i32_112 : i32 to vector<16x256xi32>
    %270 = arith.cmpi sge, %49, %269 : vector<16x256xi32>
    %c128_i32_113 = arith.constant 128 : i32
    %271 = vector.broadcast %c128_i32_113 : i32 to vector<16x256xi32>
    %272 = arith.cmpi slt, %49, %271 : vector<16x256xi32>
    %273 = arith.andi %270, %272 : vector<16x256xi1>
    %cst_114 = arith.constant 0.000000e+00 : f32
    %274 = vector.broadcast %cst_114 : f32 to vector<16x256xf32>
    %275 = arith.select %273, %268, %274 : vector<16x256xi1>, vector<16x256xf32>
    %c0_115 = arith.constant 0 : index
    %c0_116 = arith.constant 0 : index
    %276 = vector.load %arg6[%c0_115, %c0_116] : memref<336x256xf32, #tpu.memory_space<vmem>>, vector<16x256xf32>
    tpu.vector_store %arg6[%c0_115, %c0_116], %275 {strides = array<i32>} : memref<336x256xf32, #tpu.memory_space<vmem>>, vector<16x256xf32>,
    %c9_i32_117 = arith.constant 9 : i32
    %277 = tpu.dynamic_rotate %267 by %c9_i32_117 dim 1 : vector<16x256xf32>, i32 -> vector<16x256xf32>
    %c9_i32_118 = arith.constant 9 : i32
    %278 = vector.broadcast %c9_i32_118 : i32 to vector<16x256xi32>
    %279 = arith.cmpi sge, %49, %278 : vector<16x256xi32>
    %c128_i32_119 = arith.constant 128 : i32
    %280 = vector.broadcast %c128_i32_119 : i32 to vector<16x256xi32>
    %281 = arith.cmpi slt, %49, %280 : vector<16x256xi32>
    %282 = arith.andi %279, %281 : vector<16x256xi1>
    %cst_120 = arith.constant 0.000000e+00 : f32
    %283 = vector.broadcast %cst_120 : f32 to vector<16x256xf32>
    %284 = arith.select %282, %277, %283 : vector<16x256xi1>, vector<16x256xf32>
    %c16_121 = arith.constant 16 : index
    %c0_122 = arith.constant 0 : index
    %285 = vector.load %arg6[%c16_121, %c0_122] : memref<336x256xf32, #tpu.memory_space<vmem>>, vector<16x256xf32>
    tpu.vector_store %arg6[%c16_121, %c0_122], %284 {strides = array<i32>} : memref<336x256xf32, #tpu.memory_space<vmem>>, vector<16x256xf32>,
    %c8_i32_123 = arith.constant 8 : i32
    %286 = tpu.dynamic_rotate %267 by %c8_i32_123 dim 1 : vector<16x256xf32>, i32 -> vector<16x256xf32>
    %c8_i32_124 = arith.constant 8 : i32
    %287 = vector.broadcast %c8_i32_124 : i32 to vector<16x256xi32>
    %288 = arith.cmpi sge, %49, %287 : vector<16x256xi32>
    %c128_i32_125 = arith.constant 128 : i32
    %289 = vector.broadcast %c128_i32_125 : i32 to vector<16x256xi32>
    %290 = arith.cmpi slt, %49, %289 : vector<16x256xi32>
    %291 = arith.andi %288, %290 : vector<16x256xi1>
    %cst_126 = arith.constant 0.000000e+00 : f32
    %292 = vector.broadcast %cst_126 : f32 to vector<16x256xf32>
    %293 = arith.select %291, %286, %292 : vector<16x256xi1>, vector<16x256xf32>
    %c32_127 = arith.constant 32 : index
    %c0_128 = arith.constant 0 : index
    %294 = vector.load %arg6[%c32_127, %c0_128] : memref<336x256xf32, #tpu.memory_space<vmem>>, vector<16x256xf32>
    tpu.vector_store %arg6[%c32_127, %c0_128], %293 {strides = array<i32>} : memref<336x256xf32, #tpu.memory_space<vmem>>, vector<16x256xf32>,
    %c7_i32_129 = arith.constant 7 : i32
    %295 = tpu.dynamic_rotate %267 by %c7_i32_129 dim 1 : vector<16x256xf32>, i32 -> vector<16x256xf32>
    %c7_i32_130 = arith.constant 7 : i32
    %296 = vector.broadcast %c7_i32_130 : i32 to vector<16x256xi32>
    %297 = arith.cmpi sge, %49, %296 : vector<16x256xi32>
    %c128_i32_131 = arith.constant 128 : i32
    %298 = vector.broadcast %c128_i32_131 : i32 to vector<16x256xi32>
    %299 = arith.cmpi slt, %49, %298 : vector<16x256xi32>
    %300 = arith.andi %297, %299 : vector<16x256xi1>
    %cst_132 = arith.constant 0.000000e+00 : f32
    %301 = vector.broadcast %cst_132 : f32 to vector<16x256xf32>
    %302 = arith.select %300, %295, %301 : vector<16x256xi1>, vector<16x256xf32>
    %c48_133 = arith.constant 48 : index
    %c0_134 = arith.constant 0 : index
    %303 = vector.load %arg6[%c48_133, %c0_134] : memref<336x256xf32, #tpu.memory_space<vmem>>, vector<16x256xf32>
    tpu.vector_store %arg6[%c48_133, %c0_134], %302 {strides = array<i32>} : memref<336x256xf32, #tpu.memory_space<vmem>>, vector<16x256xf32>,
    %c6_i32_135 = arith.constant 6 : i32
    %304 = tpu.dynamic_rotate %267 by %c6_i32_135 dim 1 : vector<16x256xf32>, i32 -> vector<16x256xf32>
    %c6_i32_136 = arith.constant 6 : i32
    %305 = vector.broadcast %c6_i32_136 : i32 to vector<16x256xi32>
    %306 = arith.cmpi sge, %49, %305 : vector<16x256xi32>
    %c128_i32_137 = arith.constant 128 : i32
    %307 = vector.broadcast %c128_i32_137 : i32 to vector<16x256xi32>
    %308 = arith.cmpi slt, %49, %307 : vector<16x256xi32>
    %309 = arith.andi %306, %308 : vector<16x256xi1>
    %cst_138 = arith.constant 0.000000e+00 : f32
    %310 = vector.broadcast %cst_138 : f32 to vector<16x256xf32>
    %311 = arith.select %309, %304, %310 : vector<16x256xi1>, vector<16x256xf32>
    %c64_139 = arith.constant 64 : index
    %c0_140 = arith.constant 0 : index
    %312 = vector.load %arg6[%c64_139, %c0_140] : memref<336x256xf32, #tpu.memory_space<vmem>>, vector<16x256xf32>
    tpu.vector_store %arg6[%c64_139, %c0_140], %311 {strides = array<i32>} : memref<336x256xf32, #tpu.memory_space<vmem>>, vector<16x256xf32>,
    %c5_i32_141 = arith.constant 5 : i32
    %313 = tpu.dynamic_rotate %267 by %c5_i32_141 dim 1 : vector<16x256xf32>, i32 -> vector<16x256xf32>
    %c5_i32_142 = arith.constant 5 : i32
    %314 = vector.broadcast %c5_i32_142 : i32 to vector<16x256xi32>
    %315 = arith.cmpi sge, %49, %314 : vector<16x256xi32>
    %c128_i32_143 = arith.constant 128 : i32
    %316 = vector.broadcast %c128_i32_143 : i32 to vector<16x256xi32>
    %317 = arith.cmpi slt, %49, %316 : vector<16x256xi32>
    %318 = arith.andi %315, %317 : vector<16x256xi1>
    %cst_144 = arith.constant 0.000000e+00 : f32
    %319 = vector.broadcast %cst_144 : f32 to vector<16x256xf32>
    %320 = arith.select %318, %313, %319 : vector<16x256xi1>, vector<16x256xf32>
    %c80_145 = arith.constant 80 : index
    %c0_146 = arith.constant 0 : index
    %321 = vector.load %arg6[%c80_145, %c0_146] : memref<336x256xf32, #tpu.memory_space<vmem>>, vector<16x256xf32>
    tpu.vector_store %arg6[%c80_145, %c0_146], %320 {strides = array<i32>} : memref<336x256xf32, #tpu.memory_space<vmem>>, vector<16x256xf32>,
    %c4_i32_147 = arith.constant 4 : i32
    %322 = tpu.dynamic_rotate %267 by %c4_i32_147 dim 1 : vector<16x256xf32>, i32 -> vector<16x256xf32>
    %c4_i32_148 = arith.constant 4 : i32
    %323 = vector.broadcast %c4_i32_148 : i32 to vector<16x256xi32>
    %324 = arith.cmpi sge, %49, %323 : vector<16x256xi32>
    %c128_i32_149 = arith.constant 128 : i32
    %325 = vector.broadcast %c128_i32_149 : i32 to vector<16x256xi32>
    %326 = arith.cmpi slt, %49, %325 : vector<16x256xi32>
    %327 = arith.andi %324, %326 : vector<16x256xi1>
    %cst_150 = arith.constant 0.000000e+00 : f32
    %328 = vector.broadcast %cst_150 : f32 to vector<16x256xf32>
    %329 = arith.select %327, %322, %328 : vector<16x256xi1>, vector<16x256xf32>
    %c96_151 = arith.constant 96 : index
    %c0_152 = arith.constant 0 : index
    %330 = vector.load %arg6[%c96_151, %c0_152] : memref<336x256xf32, #tpu.memory_space<vmem>>, vector<16x256xf32>
    tpu.vector_store %arg6[%c96_151, %c0_152], %329 {strides = array<i32>} : memref<336x256xf32, #tpu.memory_space<vmem>>, vector<16x256xf32>,
    %c3_i32_153 = arith.constant 3 : i32
    %331 = tpu.dynamic_rotate %267 by %c3_i32_153 dim 1 : vector<16x256xf32>, i32 -> vector<16x256xf32>
    %c3_i32_154 = arith.constant 3 : i32
    %332 = vector.broadcast %c3_i32_154 : i32 to vector<16x256xi32>
    %333 = arith.cmpi sge, %49, %332 : vector<16x256xi32>
    %c128_i32_155 = arith.constant 128 : i32
    %334 = vector.broadcast %c128_i32_155 : i32 to vector<16x256xi32>
    %335 = arith.cmpi slt, %49, %334 : vector<16x256xi32>
    %336 = arith.andi %333, %335 : vector<16x256xi1>
    %cst_156 = arith.constant 0.000000e+00 : f32
    %337 = vector.broadcast %cst_156 : f32 to vector<16x256xf32>
    %338 = arith.select %336, %331, %337 : vector<16x256xi1>, vector<16x256xf32>
    %c112_157 = arith.constant 112 : index
    %c0_158 = arith.constant 0 : index
    %339 = vector.load %arg6[%c112_157, %c0_158] : memref<336x256xf32, #tpu.memory_space<vmem>>, vector<16x256xf32>
    tpu.vector_store %arg6[%c112_157, %c0_158], %338 {strides = array<i32>} : memref<336x256xf32, #tpu.memory_space<vmem>>, vector<16x256xf32>,
    %c2_i32_159 = arith.constant 2 : i32
    %340 = tpu.dynamic_rotate %267 by %c2_i32_159 dim 1 : vector<16x256xf32>, i32 -> vector<16x256xf32>
    %c2_i32_160 = arith.constant 2 : i32
    %341 = vector.broadcast %c2_i32_160 : i32 to vector<16x256xi32>
    %342 = arith.cmpi sge, %49, %341 : vector<16x256xi32>
    %c128_i32_161 = arith.constant 128 : i32
    %343 = vector.broadcast %c128_i32_161 : i32 to vector<16x256xi32>
    %344 = arith.cmpi slt, %49, %343 : vector<16x256xi32>
    %345 = arith.andi %342, %344 : vector<16x256xi1>
    %cst_162 = arith.constant 0.000000e+00 : f32
    %346 = vector.broadcast %cst_162 : f32 to vector<16x256xf32>
    %347 = arith.select %345, %340, %346 : vector<16x256xi1>, vector<16x256xf32>
    %c128_163 = arith.constant 128 : index
    %c0_164 = arith.constant 0 : index
    %348 = vector.load %arg6[%c128_163, %c0_164] : memref<336x256xf32, #tpu.memory_space<vmem>>, vector<16x256xf32>
    tpu.vector_store %arg6[%c128_163, %c0_164], %347 {strides = array<i32>} : memref<336x256xf32, #tpu.memory_space<vmem>>, vector<16x256xf32>,
    %c1_i32_165 = arith.constant 1 : i32
    %349 = tpu.dynamic_rotate %267 by %c1_i32_165 dim 1 : vector<16x256xf32>, i32 -> vector<16x256xf32>
    %c1_i32_166 = arith.constant 1 : i32
    %350 = vector.broadcast %c1_i32_166 : i32 to vector<16x256xi32>
    %351 = arith.cmpi sge, %49, %350 : vector<16x256xi32>
    %c128_i32_167 = arith.constant 128 : i32
    %352 = vector.broadcast %c128_i32_167 : i32 to vector<16x256xi32>
    %353 = arith.cmpi slt, %49, %352 : vector<16x256xi32>
    %354 = arith.andi %351, %353 : vector<16x256xi1>
    %cst_168 = arith.constant 0.000000e+00 : f32
    %355 = vector.broadcast %cst_168 : f32 to vector<16x256xf32>
    %356 = arith.select %354, %349, %355 : vector<16x256xi1>, vector<16x256xf32>
    %c144_169 = arith.constant 144 : index
    %c0_170 = arith.constant 0 : index
    %357 = vector.load %arg6[%c144_169, %c0_170] : memref<336x256xf32, #tpu.memory_space<vmem>>, vector<16x256xf32>
    tpu.vector_store %arg6[%c144_169, %c0_170], %356 {strides = array<i32>} : memref<336x256xf32, #tpu.memory_space<vmem>>, vector<16x256xf32>,
    %c160_171 = arith.constant 160 : index
    %c0_172 = arith.constant 0 : index
    %358 = vector.load %arg6[%c160_171, %c0_172] : memref<336x256xf32, #tpu.memory_space<vmem>>, vector<16x256xf32>
    tpu.vector_store %arg6[%c160_171, %c0_172], %267 {strides = array<i32>} : memref<336x256xf32, #tpu.memory_space<vmem>>, vector<16x256xf32>,
    %c255_i32_173 = arith.constant 255 : i32
    %359 = tpu.dynamic_rotate %267 by %c255_i32_173 dim 1 : vector<16x256xf32>, i32 -> vector<16x256xf32>
    %c0_i32_174 = arith.constant 0 : i32
    %360 = vector.broadcast %c0_i32_174 : i32 to vector<16x256xi32>
    %361 = arith.cmpi sge, %49, %360 : vector<16x256xi32>
    %c127_i32_175 = arith.constant 127 : i32
    %362 = vector.broadcast %c127_i32_175 : i32 to vector<16x256xi32>
    %363 = arith.cmpi slt, %49, %362 : vector<16x256xi32>
    %364 = arith.andi %361, %363 : vector<16x256xi1>
    %cst_176 = arith.constant 0.000000e+00 : f32
    %365 = vector.broadcast %cst_176 : f32 to vector<16x256xf32>
    %366 = arith.select %364, %359, %365 : vector<16x256xi1>, vector<16x256xf32>
    %c176_177 = arith.constant 176 : index
    %c0_178 = arith.constant 0 : index
    %367 = vector.load %arg6[%c176_177, %c0_178] : memref<336x256xf32, #tpu.memory_space<vmem>>, vector<16x256xf32>
    tpu.vector_store %arg6[%c176_177, %c0_178], %366 {strides = array<i32>} : memref<336x256xf32, #tpu.memory_space<vmem>>, vector<16x256xf32>,
    %c254_i32_179 = arith.constant 254 : i32
    %368 = tpu.dynamic_rotate %267 by %c254_i32_179 dim 1 : vector<16x256xf32>, i32 -> vector<16x256xf32>
    %c0_i32_180 = arith.constant 0 : i32
    %369 = vector.broadcast %c0_i32_180 : i32 to vector<16x256xi32>
    %370 = arith.cmpi sge, %49, %369 : vector<16x256xi32>
    %c126_i32_181 = arith.constant 126 : i32
    %371 = vector.broadcast %c126_i32_181 : i32 to vector<16x256xi32>
    %372 = arith.cmpi slt, %49, %371 : vector<16x256xi32>
    %373 = arith.andi %370, %372 : vector<16x256xi1>
    %cst_182 = arith.constant 0.000000e+00 : f32
    %374 = vector.broadcast %cst_182 : f32 to vector<16x256xf32>
    %375 = arith.select %373, %368, %374 : vector<16x256xi1>, vector<16x256xf32>
    %c192_183 = arith.constant 192 : index
    %c0_184 = arith.constant 0 : index
    %376 = vector.load %arg6[%c192_183, %c0_184] : memref<336x256xf32, #tpu.memory_space<vmem>>, vector<16x256xf32>
    tpu.vector_store %arg6[%c192_183, %c0_184], %375 {strides = array<i32>} : memref<336x256xf32, #tpu.memory_space<vmem>>, vector<16x256xf32>,
    %c253_i32_185 = arith.constant 253 : i32
    %377 = tpu.dynamic_rotate %267 by %c253_i32_185 dim 1 : vector<16x256xf32>, i32 -> vector<16x256xf32>
    %c0_i32_186 = arith.constant 0 : i32
    %378 = vector.broadcast %c0_i32_186 : i32 to vector<16x256xi32>
    %379 = arith.cmpi sge, %49, %378 : vector<16x256xi32>
    %c125_i32_187 = arith.constant 125 : i32
    %380 = vector.broadcast %c125_i32_187 : i32 to vector<16x256xi32>
    %381 = arith.cmpi slt, %49, %380 : vector<16x256xi32>
    %382 = arith.andi %379, %381 : vector<16x256xi1>
    %cst_188 = arith.constant 0.000000e+00 : f32
    %383 = vector.broadcast %cst_188 : f32 to vector<16x256xf32>
    %384 = arith.select %382, %377, %383 : vector<16x256xi1>, vector<16x256xf32>
    %c208_189 = arith.constant 208 : index
    %c0_190 = arith.constant 0 : index
    %385 = vector.load %arg6[%c208_189, %c0_190] : memref<336x256xf32, #tpu.memory_space<vmem>>, vector<16x256xf32>
    tpu.vector_store %arg6[%c208_189, %c0_190], %384 {strides = array<i32>} : memref<336x256xf32, #tpu.memory_space<vmem>>, vector<16x256xf32>,
    %c252_i32_191 = arith.constant 252 : i32
    %386 = tpu.dynamic_rotate %267 by %c252_i32_191 dim 1 : vector<16x256xf32>, i32 -> vector<16x256xf32>
    %c0_i32_192 = arith.constant 0 : i32
    %387 = vector.broadcast %c0_i32_192 : i32 to vector<16x256xi32>
    %388 = arith.cmpi sge, %49, %387 : vector<16x256xi32>
    %c124_i32_193 = arith.constant 124 : i32
    %389 = vector.broadcast %c124_i32_193 : i32 to vector<16x256xi32>
    %390 = arith.cmpi slt, %49, %389 : vector<16x256xi32>
    %391 = arith.andi %388, %390 : vector<16x256xi1>
    %cst_194 = arith.constant 0.000000e+00 : f32
    %392 = vector.broadcast %cst_194 : f32 to vector<16x256xf32>
    %393 = arith.select %391, %386, %392 : vector<16x256xi1>, vector<16x256xf32>
    %c224_195 = arith.constant 224 : index
    %c0_196 = arith.constant 0 : index
    %394 = vector.load %arg6[%c224_195, %c0_196] : memref<336x256xf32, #tpu.memory_space<vmem>>, vector<16x256xf32>
    tpu.vector_store %arg6[%c224_195, %c0_196], %393 {strides = array<i32>} : memref<336x256xf32, #tpu.memory_space<vmem>>, vector<16x256xf32>,
    %c251_i32_197 = arith.constant 251 : i32
    %395 = tpu.dynamic_rotate %267 by %c251_i32_197 dim 1 : vector<16x256xf32>, i32 -> vector<16x256xf32>
    %c0_i32_198 = arith.constant 0 : i32
    %396 = vector.broadcast %c0_i32_198 : i32 to vector<16x256xi32>
    %397 = arith.cmpi sge, %49, %396 : vector<16x256xi32>
    %c123_i32_199 = arith.constant 123 : i32
    %398 = vector.broadcast %c123_i32_199 : i32 to vector<16x256xi32>
    %399 = arith.cmpi slt, %49, %398 : vector<16x256xi32>
    %400 = arith.andi %397, %399 : vector<16x256xi1>
    %cst_200 = arith.constant 0.000000e+00 : f32
    %401 = vector.broadcast %cst_200 : f32 to vector<16x256xf32>
    %402 = arith.select %400, %395, %401 : vector<16x256xi1>, vector<16x256xf32>
    %c240_201 = arith.constant 240 : index
    %c0_202 = arith.constant 0 : index
    %403 = vector.load %arg6[%c240_201, %c0_202] : memref<336x256xf32, #tpu.memory_space<vmem>>, vector<16x256xf32>
    tpu.vector_store %arg6[%c240_201, %c0_202], %402 {strides = array<i32>} : memref<336x256xf32, #tpu.memory_space<vmem>>, vector<16x256xf32>,
    %c250_i32_203 = arith.constant 250 : i32
    %404 = tpu.dynamic_rotate %267 by %c250_i32_203 dim 1 : vector<16x256xf32>, i32 -> vector<16x256xf32>
    %c0_i32_204 = arith.constant 0 : i32
    %405 = vector.broadcast %c0_i32_204 : i32 to vector<16x256xi32>
    %406 = arith.cmpi sge, %49, %405 : vector<16x256xi32>
    %c122_i32_205 = arith.constant 122 : i32
    %407 = vector.broadcast %c122_i32_205 : i32 to vector<16x256xi32>
    %408 = arith.cmpi slt, %49, %407 : vector<16x256xi32>
    %409 = arith.andi %406, %408 : vector<16x256xi1>
    %cst_206 = arith.constant 0.000000e+00 : f32
    %410 = vector.broadcast %cst_206 : f32 to vector<16x256xf32>
    %411 = arith.select %409, %404, %410 : vector<16x256xi1>, vector<16x256xf32>
    %c256_207 = arith.constant 256 : index
    %c0_208 = arith.constant 0 : index
    %412 = vector.load %arg6[%c256_207, %c0_208] : memref<336x256xf32, #tpu.memory_space<vmem>>, vector<16x256xf32>
    tpu.vector_store %arg6[%c256_207, %c0_208], %411 {strides = array<i32>} : memref<336x256xf32, #tpu.memory_space<vmem>>, vector<16x256xf32>,
    %c249_i32_209 = arith.constant 249 : i32
    %413 = tpu.dynamic_rotate %267 by %c249_i32_209 dim 1 : vector<16x256xf32>, i32 -> vector<16x256xf32>
    %c0_i32_210 = arith.constant 0 : i32
    %414 = vector.broadcast %c0_i32_210 : i32 to vector<16x256xi32>
    %415 = arith.cmpi sge, %49, %414 : vector<16x256xi32>
    %c121_i32_211 = arith.constant 121 : i32
    %416 = vector.broadcast %c121_i32_211 : i32 to vector<16x256xi32>
    %417 = arith.cmpi slt, %49, %416 : vector<16x256xi32>
    %418 = arith.andi %415, %417 : vector<16x256xi1>
    %cst_212 = arith.constant 0.000000e+00 : f32
    %419 = vector.broadcast %cst_212 : f32 to vector<16x256xf32>
    %420 = arith.select %418, %413, %419 : vector<16x256xi1>, vector<16x256xf32>
    %c272_213 = arith.constant 272 : index
    %c0_214 = arith.constant 0 : index
    %421 = vector.load %arg6[%c272_213, %c0_214] : memref<336x256xf32, #tpu.memory_space<vmem>>, vector<16x256xf32>
    tpu.vector_store %arg6[%c272_213, %c0_214], %420 {strides = array<i32>} : memref<336x256xf32, #tpu.memory_space<vmem>>, vector<16x256xf32>,
    %c248_i32_215 = arith.constant 248 : i32
    %422 = tpu.dynamic_rotate %267 by %c248_i32_215 dim 1 : vector<16x256xf32>, i32 -> vector<16x256xf32>
    %c0_i32_216 = arith.constant 0 : i32
    %423 = vector.broadcast %c0_i32_216 : i32 to vector<16x256xi32>
    %424 = arith.cmpi sge, %49, %423 : vector<16x256xi32>
    %c120_i32_217 = arith.constant 120 : i32
    %425 = vector.broadcast %c120_i32_217 : i32 to vector<16x256xi32>
    %426 = arith.cmpi slt, %49, %425 : vector<16x256xi32>
    %427 = arith.andi %424, %426 : vector<16x256xi1>
    %cst_218 = arith.constant 0.000000e+00 : f32
    %428 = vector.broadcast %cst_218 : f32 to vector<16x256xf32>
    %429 = arith.select %427, %422, %428 : vector<16x256xi1>, vector<16x256xf32>
    %c288_219 = arith.constant 288 : index
    %c0_220 = arith.constant 0 : index
    %430 = vector.load %arg6[%c288_219, %c0_220] : memref<336x256xf32, #tpu.memory_space<vmem>>, vector<16x256xf32>
    tpu.vector_store %arg6[%c288_219, %c0_220], %429 {strides = array<i32>} : memref<336x256xf32, #tpu.memory_space<vmem>>, vector<16x256xf32>,
    %c247_i32_221 = arith.constant 247 : i32
    %431 = tpu.dynamic_rotate %267 by %c247_i32_221 dim 1 : vector<16x256xf32>, i32 -> vector<16x256xf32>
    %c0_i32_222 = arith.constant 0 : i32
    %432 = vector.broadcast %c0_i32_222 : i32 to vector<16x256xi32>
    %433 = arith.cmpi sge, %49, %432 : vector<16x256xi32>
    %c119_i32_223 = arith.constant 119 : i32
    %434 = vector.broadcast %c119_i32_223 : i32 to vector<16x256xi32>
    %435 = arith.cmpi slt, %49, %434 : vector<16x256xi32>
    %436 = arith.andi %433, %435 : vector<16x256xi1>
    %cst_224 = arith.constant 0.000000e+00 : f32
    %437 = vector.broadcast %cst_224 : f32 to vector<16x256xf32>
    %438 = arith.select %436, %431, %437 : vector<16x256xi1>, vector<16x256xf32>
    %c304_225 = arith.constant 304 : index
    %c0_226 = arith.constant 0 : index
    %439 = vector.load %arg6[%c304_225, %c0_226] : memref<336x256xf32, #tpu.memory_space<vmem>>, vector<16x256xf32>
    tpu.vector_store %arg6[%c304_225, %c0_226], %438 {strides = array<i32>} : memref<336x256xf32, #tpu.memory_space<vmem>>, vector<16x256xf32>,
    %c246_i32_227 = arith.constant 246 : i32
    %440 = tpu.dynamic_rotate %267 by %c246_i32_227 dim 1 : vector<16x256xf32>, i32 -> vector<16x256xf32>
    %c0_i32_228 = arith.constant 0 : i32
    %441 = vector.broadcast %c0_i32_228 : i32 to vector<16x256xi32>
    %442 = arith.cmpi sge, %49, %441 : vector<16x256xi32>
    %c118_i32_229 = arith.constant 118 : i32
    %443 = vector.broadcast %c118_i32_229 : i32 to vector<16x256xi32>
    %444 = arith.cmpi slt, %49, %443 : vector<16x256xi32>
    %445 = arith.andi %442, %444 : vector<16x256xi1>
    %cst_230 = arith.constant 0.000000e+00 : f32
    %446 = vector.broadcast %cst_230 : f32 to vector<16x256xf32>
    %447 = arith.select %445, %440, %446 : vector<16x256xi1>, vector<16x256xf32>
    %c320_231 = arith.constant 320 : index
    %c0_232 = arith.constant 0 : index
    %448 = vector.load %arg6[%c320_231, %c0_232] : memref<336x256xf32, #tpu.memory_space<vmem>>, vector<16x256xf32>
    tpu.vector_store %arg6[%c320_231, %c0_232], %447 {strides = array<i32>} : memref<336x256xf32, #tpu.memory_space<vmem>>, vector<16x256xf32>,
    %c0_233 = arith.constant 0 : index
    %c0_234 = arith.constant 0 : index
    %449 = vector.load %arg6[%c0_233, %c0_234] : memref<336x256xf32, #tpu.memory_space<vmem>>, vector<336x256xf32>
    %cst_235 = arith.constant dense<0.000000e+00> : vector<16x256xf32>
    %450 = tpu.matmul %264, %449, %cst_235 {dimension_numbers = #tpu.dot_dimension_numbers<[1], [0], [0], [1], [0, 0, 1, 1], [], []>} : vector<16x336xf32>, vector<336x256xf32>, vector<16x256xf32> -> vector<16x256xf32>
    %451 = vector.broadcast %266 : vector<16x1xf32> to vector<16x256xf32>
    %452 = arith.addf %450, %451 : vector<16x256xf32>
    %cst_236 = arith.constant dense<0.000000e+00> : vector<16xf32>
    %453 = vector.multi_reduction <add>, %452, %cst_236 [1] : vector<16x256xf32> to vector<16xf32>
    %454 = vector.shape_cast %453 : vector<16xf32> to vector<16x1xf32>
    %455 = arith.mulf %452, %452 : vector<16x256xf32>
    %cst_237 = arith.constant dense<0.000000e+00> : vector<16xf32>
    %456 = vector.multi_reduction <add>, %455, %cst_237 [1] : vector<16x256xf32> to vector<16xf32>
    %457 = vector.shape_cast %456 : vector<16xf32> to vector<16x1xf32>
    %cst_238 = arith.constant 3.906250e-03 : f32
    %458 = vector.broadcast %cst_238 : f32 to vector<16x1xf32>
    %459 = arith.mulf %454, %458 : vector<16x1xf32>
    %cst_239 = arith.constant 3.906250e-03 : f32
    %460 = vector.broadcast %cst_239 : f32 to vector<16x1xf32>
    %461 = arith.mulf %457, %460 : vector<16x1xf32>
    %462 = arith.mulf %459, %459 : vector<16x1xf32>
    %463 = arith.subf %461, %462 : vector<16x1xf32>
    %cst_240 = arith.constant 0.000000e+00 : f32
    %464 = vector.broadcast %cst_240 : f32 to vector<16x1xf32>
    %465 = arith.maximumf %463, %464 : vector<16x1xf32>
    %466 = vector.broadcast %459 : vector<16x1xf32> to vector<16x256xf32>
    %467 = arith.subf %452, %466 : vector<16x256xf32>
    %cst_241 = arith.constant 9.99999974E-6 : f32
    %468 = vector.broadcast %cst_241 : f32 to vector<16x1xf32>
    %469 = arith.addf %465, %468 : vector<16x1xf32>
    %470 = math.rsqrt %469 : vector<16x1xf32>
    %471 = vector.broadcast %470 : vector<16x1xf32> to vector<16x256xf32>
    %472 = arith.mulf %467, %471 : vector<16x256xf32>
    %473 = vector.extract_strided_slice %26 {offsets = [16, 0], sizes = [16, 256], strides = [1, 1]} : vector<64x256xf32> to vector<16x256xf32>
    %474 = arith.addf %472, %473 : vector<16x256xf32>
    %c16_242 = arith.constant 16 : index
    %c0_243 = arith.constant 0 : index
    %475 = vector.load %arg5[%c16_242, %c0_243] : memref<64x256xf32, #tpu.memory_space<vmem>>, vector<16x256xf32>
    tpu.vector_store %arg5[%c16_242, %c0_243], %474 {strides = array<i32>} : memref<64x256xf32, #tpu.memory_space<vmem>>, vector<16x256xf32>,
    %c2 = arith.constant 2 : index
    %c0_244 = arith.constant 0 : index
    %c0_245 = arith.constant 0 : index
    %476 = vector.load %arg3[%c2, %c0_244, %c0_245] : memref<4x16x336xf32, #tpu.memory_space<vmem>>, vector<1x16x336xf32>
    %477 = vector.shape_cast %476 : vector<1x16x336xf32> to vector<16x336xf32>
    %c2_246 = arith.constant 2 : index
    %c0_247 = arith.constant 0 : index
    %c0_248 = arith.constant 0 : index
    %478 = vector.load %arg4[%c2_246, %c0_247, %c0_248] : memref<4x16x1xf32, #tpu.memory_space<vmem>>, vector<1x16x1xf32>
    %479 = vector.shape_cast %478 : vector<1x16x1xf32> to vector<16x1xf32>
    %480 = vector.extract_strided_slice %32 {offsets = [32, 0], sizes = [16, 256], strides = [1, 1]} : vector<64x256xf32> to vector<16x256xf32>
    %c10_i32_249 = arith.constant 10 : i32
    %481 = tpu.dynamic_rotate %480 by %c10_i32_249 dim 1 : vector<16x256xf32>, i32 -> vector<16x256xf32>
    %c10_i32_250 = arith.constant 10 : i32
    %482 = vector.broadcast %c10_i32_250 : i32 to vector<16x256xi32>
    %483 = arith.cmpi sge, %49, %482 : vector<16x256xi32>
    %c128_i32_251 = arith.constant 128 : i32
    %484 = vector.broadcast %c128_i32_251 : i32 to vector<16x256xi32>
    %485 = arith.cmpi slt, %49, %484 : vector<16x256xi32>
    %486 = arith.andi %483, %485 : vector<16x256xi1>
    %cst_252 = arith.constant 0.000000e+00 : f32
    %487 = vector.broadcast %cst_252 : f32 to vector<16x256xf32>
    %488 = arith.select %486, %481, %487 : vector<16x256xi1>, vector<16x256xf32>
    %c0_253 = arith.constant 0 : index
    %c0_254 = arith.constant 0 : index
    %489 = vector.load %arg6[%c0_253, %c0_254] : memref<336x256xf32, #tpu.memory_space<vmem>>, vector<16x256xf32>
    tpu.vector_store %arg6[%c0_253, %c0_254], %488 {strides = array<i32>} : memref<336x256xf32, #tpu.memory_space<vmem>>, vector<16x256xf32>,
    %c9_i32_255 = arith.constant 9 : i32
    %490 = tpu.dynamic_rotate %480 by %c9_i32_255 dim 1 : vector<16x256xf32>, i32 -> vector<16x256xf32>
    %c9_i32_256 = arith.constant 9 : i32
    %491 = vector.broadcast %c9_i32_256 : i32 to vector<16x256xi32>
    %492 = arith.cmpi sge, %49, %491 : vector<16x256xi32>
    %c128_i32_257 = arith.constant 128 : i32
    %493 = vector.broadcast %c128_i32_257 : i32 to vector<16x256xi32>
    %494 = arith.cmpi slt, %49, %493 : vector<16x256xi32>
    %495 = arith.andi %492, %494 : vector<16x256xi1>
    %cst_258 = arith.constant 0.000000e+00 : f32
    %496 = vector.broadcast %cst_258 : f32 to vector<16x256xf32>
    %497 = arith.select %495, %490, %496 : vector<16x256xi1>, vector<16x256xf32>
    %c16_259 = arith.constant 16 : index
    %c0_260 = arith.constant 0 : index
    %498 = vector.load %arg6[%c16_259, %c0_260] : memref<336x256xf32, #tpu.memory_space<vmem>>, vector<16x256xf32>
    tpu.vector_store %arg6[%c16_259, %c0_260], %497 {strides = array<i32>} : memref<336x256xf32, #tpu.memory_space<vmem>>, vector<16x256xf32>,
    %c8_i32_261 = arith.constant 8 : i32
    %499 = tpu.dynamic_rotate %480 by %c8_i32_261 dim 1 : vector<16x256xf32>, i32 -> vector<16x256xf32>
    %c8_i32_262 = arith.constant 8 : i32
    %500 = vector.broadcast %c8_i32_262 : i32 to vector<16x256xi32>
    %501 = arith.cmpi sge, %49, %500 : vector<16x256xi32>
    %c128_i32_263 = arith.constant 128 : i32
    %502 = vector.broadcast %c128_i32_263 : i32 to vector<16x256xi32>
    %503 = arith.cmpi slt, %49, %502 : vector<16x256xi32>
    %504 = arith.andi %501, %503 : vector<16x256xi1>
    %cst_264 = arith.constant 0.000000e+00 : f32
    %505 = vector.broadcast %cst_264 : f32 to vector<16x256xf32>
    %506 = arith.select %504, %499, %505 : vector<16x256xi1>, vector<16x256xf32>
    %c32_265 = arith.constant 32 : index
    %c0_266 = arith.constant 0 : index
    %507 = vector.load %arg6[%c32_265, %c0_266] : memref<336x256xf32, #tpu.memory_space<vmem>>, vector<16x256xf32>
    tpu.vector_store %arg6[%c32_265, %c0_266], %506 {strides = array<i32>} : memref<336x256xf32, #tpu.memory_space<vmem>>, vector<16x256xf32>,
    %c7_i32_267 = arith.constant 7 : i32
    %508 = tpu.dynamic_rotate %480 by %c7_i32_267 dim 1 : vector<16x256xf32>, i32 -> vector<16x256xf32>
    %c7_i32_268 = arith.constant 7 : i32
    %509 = vector.broadcast %c7_i32_268 : i32 to vector<16x256xi32>
    %510 = arith.cmpi sge, %49, %509 : vector<16x256xi32>
    %c128_i32_269 = arith.constant 128 : i32
    %511 = vector.broadcast %c128_i32_269 : i32 to vector<16x256xi32>
    %512 = arith.cmpi slt, %49, %511 : vector<16x256xi32>
    %513 = arith.andi %510, %512 : vector<16x256xi1>
    %cst_270 = arith.constant 0.000000e+00 : f32
    %514 = vector.broadcast %cst_270 : f32 to vector<16x256xf32>
    %515 = arith.select %513, %508, %514 : vector<16x256xi1>, vector<16x256xf32>
    %c48_271 = arith.constant 48 : index
    %c0_272 = arith.constant 0 : index
    %516 = vector.load %arg6[%c48_271, %c0_272] : memref<336x256xf32, #tpu.memory_space<vmem>>, vector<16x256xf32>
    tpu.vector_store %arg6[%c48_271, %c0_272], %515 {strides = array<i32>} : memref<336x256xf32, #tpu.memory_space<vmem>>, vector<16x256xf32>,
    %c6_i32_273 = arith.constant 6 : i32
    %517 = tpu.dynamic_rotate %480 by %c6_i32_273 dim 1 : vector<16x256xf32>, i32 -> vector<16x256xf32>
    %c6_i32_274 = arith.constant 6 : i32
    %518 = vector.broadcast %c6_i32_274 : i32 to vector<16x256xi32>
    %519 = arith.cmpi sge, %49, %518 : vector<16x256xi32>
    %c128_i32_275 = arith.constant 128 : i32
    %520 = vector.broadcast %c128_i32_275 : i32 to vector<16x256xi32>
    %521 = arith.cmpi slt, %49, %520 : vector<16x256xi32>
    %522 = arith.andi %519, %521 : vector<16x256xi1>
    %cst_276 = arith.constant 0.000000e+00 : f32
    %523 = vector.broadcast %cst_276 : f32 to vector<16x256xf32>
    %524 = arith.select %522, %517, %523 : vector<16x256xi1>, vector<16x256xf32>
    %c64_277 = arith.constant 64 : index
    %c0_278 = arith.constant 0 : index
    %525 = vector.load %arg6[%c64_277, %c0_278] : memref<336x256xf32, #tpu.memory_space<vmem>>, vector<16x256xf32>
    tpu.vector_store %arg6[%c64_277, %c0_278], %524 {strides = array<i32>} : memref<336x256xf32, #tpu.memory_space<vmem>>, vector<16x256xf32>,
    %c5_i32_279 = arith.constant 5 : i32
    %526 = tpu.dynamic_rotate %480 by %c5_i32_279 dim 1 : vector<16x256xf32>, i32 -> vector<16x256xf32>
    %c5_i32_280 = arith.constant 5 : i32
    %527 = vector.broadcast %c5_i32_280 : i32 to vector<16x256xi32>
    %528 = arith.cmpi sge, %49, %527 : vector<16x256xi32>
    %c128_i32_281 = arith.constant 128 : i32
    %529 = vector.broadcast %c128_i32_281 : i32 to vector<16x256xi32>
    %530 = arith.cmpi slt, %49, %529 : vector<16x256xi32>
    %531 = arith.andi %528, %530 : vector<16x256xi1>
    %cst_282 = arith.constant 0.000000e+00 : f32
    %532 = vector.broadcast %cst_282 : f32 to vector<16x256xf32>
    %533 = arith.select %531, %526, %532 : vector<16x256xi1>, vector<16x256xf32>
    %c80_283 = arith.constant 80 : index
    %c0_284 = arith.constant 0 : index
    %534 = vector.load %arg6[%c80_283, %c0_284] : memref<336x256xf32, #tpu.memory_space<vmem>>, vector<16x256xf32>
    tpu.vector_store %arg6[%c80_283, %c0_284], %533 {strides = array<i32>} : memref<336x256xf32, #tpu.memory_space<vmem>>, vector<16x256xf32>,
    %c4_i32_285 = arith.constant 4 : i32
    %535 = tpu.dynamic_rotate %480 by %c4_i32_285 dim 1 : vector<16x256xf32>, i32 -> vector<16x256xf32>
    %c4_i32_286 = arith.constant 4 : i32
    %536 = vector.broadcast %c4_i32_286 : i32 to vector<16x256xi32>
    %537 = arith.cmpi sge, %49, %536 : vector<16x256xi32>
    %c128_i32_287 = arith.constant 128 : i32
    %538 = vector.broadcast %c128_i32_287 : i32 to vector<16x256xi32>
    %539 = arith.cmpi slt, %49, %538 : vector<16x256xi32>
    %540 = arith.andi %537, %539 : vector<16x256xi1>
    %cst_288 = arith.constant 0.000000e+00 : f32
    %541 = vector.broadcast %cst_288 : f32 to vector<16x256xf32>
    %542 = arith.select %540, %535, %541 : vector<16x256xi1>, vector<16x256xf32>
    %c96_289 = arith.constant 96 : index
    %c0_290 = arith.constant 0 : index
    %543 = vector.load %arg6[%c96_289, %c0_290] : memref<336x256xf32, #tpu.memory_space<vmem>>, vector<16x256xf32>
    tpu.vector_store %arg6[%c96_289, %c0_290], %542 {strides = array<i32>} : memref<336x256xf32, #tpu.memory_space<vmem>>, vector<16x256xf32>,
    %c3_i32_291 = arith.constant 3 : i32
    %544 = tpu.dynamic_rotate %480 by %c3_i32_291 dim 1 : vector<16x256xf32>, i32 -> vector<16x256xf32>
    %c3_i32_292 = arith.constant 3 : i32
    %545 = vector.broadcast %c3_i32_292 : i32 to vector<16x256xi32>
    %546 = arith.cmpi sge, %49, %545 : vector<16x256xi32>
    %c128_i32_293 = arith.constant 128 : i32
    %547 = vector.broadcast %c128_i32_293 : i32 to vector<16x256xi32>
    %548 = arith.cmpi slt, %49, %547 : vector<16x256xi32>
    %549 = arith.andi %546, %548 : vector<16x256xi1>
    %cst_294 = arith.constant 0.000000e+00 : f32
    %550 = vector.broadcast %cst_294 : f32 to vector<16x256xf32>
    %551 = arith.select %549, %544, %550 : vector<16x256xi1>, vector<16x256xf32>
    %c112_295 = arith.constant 112 : index
    %c0_296 = arith.constant 0 : index
    %552 = vector.load %arg6[%c112_295, %c0_296] : memref<336x256xf32, #tpu.memory_space<vmem>>, vector<16x256xf32>
    tpu.vector_store %arg6[%c112_295, %c0_296], %551 {strides = array<i32>} : memref<336x256xf32, #tpu.memory_space<vmem>>, vector<16x256xf32>,
    %c2_i32_297 = arith.constant 2 : i32
    %553 = tpu.dynamic_rotate %480 by %c2_i32_297 dim 1 : vector<16x256xf32>, i32 -> vector<16x256xf32>
    %c2_i32_298 = arith.constant 2 : i32
    %554 = vector.broadcast %c2_i32_298 : i32 to vector<16x256xi32>
    %555 = arith.cmpi sge, %49, %554 : vector<16x256xi32>
    %c128_i32_299 = arith.constant 128 : i32
    %556 = vector.broadcast %c128_i32_299 : i32 to vector<16x256xi32>
    %557 = arith.cmpi slt, %49, %556 : vector<16x256xi32>
    %558 = arith.andi %555, %557 : vector<16x256xi1>
    %cst_300 = arith.constant 0.000000e+00 : f32
    %559 = vector.broadcast %cst_300 : f32 to vector<16x256xf32>
    %560 = arith.select %558, %553, %559 : vector<16x256xi1>, vector<16x256xf32>
    %c128_301 = arith.constant 128 : index
    %c0_302 = arith.constant 0 : index
    %561 = vector.load %arg6[%c128_301, %c0_302] : memref<336x256xf32, #tpu.memory_space<vmem>>, vector<16x256xf32>
    tpu.vector_store %arg6[%c128_301, %c0_302], %560 {strides = array<i32>} : memref<336x256xf32, #tpu.memory_space<vmem>>, vector<16x256xf32>,
    %c1_i32_303 = arith.constant 1 : i32
    %562 = tpu.dynamic_rotate %480 by %c1_i32_303 dim 1 : vector<16x256xf32>, i32 -> vector<16x256xf32>
    %c1_i32_304 = arith.constant 1 : i32
    %563 = vector.broadcast %c1_i32_304 : i32 to vector<16x256xi32>
    %564 = arith.cmpi sge, %49, %563 : vector<16x256xi32>
    %c128_i32_305 = arith.constant 128 : i32
    %565 = vector.broadcast %c128_i32_305 : i32 to vector<16x256xi32>
    %566 = arith.cmpi slt, %49, %565 : vector<16x256xi32>
    %567 = arith.andi %564, %566 : vector<16x256xi1>
    %cst_306 = arith.constant 0.000000e+00 : f32
    %568 = vector.broadcast %cst_306 : f32 to vector<16x256xf32>
    %569 = arith.select %567, %562, %568 : vector<16x256xi1>, vector<16x256xf32>
    %c144_307 = arith.constant 144 : index
    %c0_308 = arith.constant 0 : index
    %570 = vector.load %arg6[%c144_307, %c0_308] : memref<336x256xf32, #tpu.memory_space<vmem>>, vector<16x256xf32>
    tpu.vector_store %arg6[%c144_307, %c0_308], %569 {strides = array<i32>} : memref<336x256xf32, #tpu.memory_space<vmem>>, vector<16x256xf32>,
    %c160_309 = arith.constant 160 : index
    %c0_310 = arith.constant 0 : index
    %571 = vector.load %arg6[%c160_309, %c0_310] : memref<336x256xf32, #tpu.memory_space<vmem>>, vector<16x256xf32>
    tpu.vector_store %arg6[%c160_309, %c0_310], %480 {strides = array<i32>} : memref<336x256xf32, #tpu.memory_space<vmem>>, vector<16x256xf32>,
    %c255_i32_311 = arith.constant 255 : i32
    %572 = tpu.dynamic_rotate %480 by %c255_i32_311 dim 1 : vector<16x256xf32>, i32 -> vector<16x256xf32>
    %c0_i32_312 = arith.constant 0 : i32
    %573 = vector.broadcast %c0_i32_312 : i32 to vector<16x256xi32>
    %574 = arith.cmpi sge, %49, %573 : vector<16x256xi32>
    %c127_i32_313 = arith.constant 127 : i32
    %575 = vector.broadcast %c127_i32_313 : i32 to vector<16x256xi32>
    %576 = arith.cmpi slt, %49, %575 : vector<16x256xi32>
    %577 = arith.andi %574, %576 : vector<16x256xi1>
    %cst_314 = arith.constant 0.000000e+00 : f32
    %578 = vector.broadcast %cst_314 : f32 to vector<16x256xf32>
    %579 = arith.select %577, %572, %578 : vector<16x256xi1>, vector<16x256xf32>
    %c176_315 = arith.constant 176 : index
    %c0_316 = arith.constant 0 : index
    %580 = vector.load %arg6[%c176_315, %c0_316] : memref<336x256xf32, #tpu.memory_space<vmem>>, vector<16x256xf32>
    tpu.vector_store %arg6[%c176_315, %c0_316], %579 {strides = array<i32>} : memref<336x256xf32, #tpu.memory_space<vmem>>, vector<16x256xf32>,
    %c254_i32_317 = arith.constant 254 : i32
    %581 = tpu.dynamic_rotate %480 by %c254_i32_317 dim 1 : vector<16x256xf32>, i32 -> vector<16x256xf32>
    %c0_i32_318 = arith.constant 0 : i32
    %582 = vector.broadcast %c0_i32_318 : i32 to vector<16x256xi32>
    %583 = arith.cmpi sge, %49, %582 : vector<16x256xi32>
    %c126_i32_319 = arith.constant 126 : i32
    %584 = vector.broadcast %c126_i32_319 : i32 to vector<16x256xi32>
    %585 = arith.cmpi slt, %49, %584 : vector<16x256xi32>
    %586 = arith.andi %583, %585 : vector<16x256xi1>
    %cst_320 = arith.constant 0.000000e+00 : f32
    %587 = vector.broadcast %cst_320 : f32 to vector<16x256xf32>
    %588 = arith.select %586, %581, %587 : vector<16x256xi1>, vector<16x256xf32>
    %c192_321 = arith.constant 192 : index
    %c0_322 = arith.constant 0 : index
    %589 = vector.load %arg6[%c192_321, %c0_322] : memref<336x256xf32, #tpu.memory_space<vmem>>, vector<16x256xf32>
    tpu.vector_store %arg6[%c192_321, %c0_322], %588 {strides = array<i32>} : memref<336x256xf32, #tpu.memory_space<vmem>>, vector<16x256xf32>,
    %c253_i32_323 = arith.constant 253 : i32
    %590 = tpu.dynamic_rotate %480 by %c253_i32_323 dim 1 : vector<16x256xf32>, i32 -> vector<16x256xf32>
    %c0_i32_324 = arith.constant 0 : i32
    %591 = vector.broadcast %c0_i32_324 : i32 to vector<16x256xi32>
    %592 = arith.cmpi sge, %49, %591 : vector<16x256xi32>
    %c125_i32_325 = arith.constant 125 : i32
    %593 = vector.broadcast %c125_i32_325 : i32 to vector<16x256xi32>
    %594 = arith.cmpi slt, %49, %593 : vector<16x256xi32>
    %595 = arith.andi %592, %594 : vector<16x256xi1>
    %cst_326 = arith.constant 0.000000e+00 : f32
    %596 = vector.broadcast %cst_326 : f32 to vector<16x256xf32>
    %597 = arith.select %595, %590, %596 : vector<16x256xi1>, vector<16x256xf32>
    %c208_327 = arith.constant 208 : index
    %c0_328 = arith.constant 0 : index
    %598 = vector.load %arg6[%c208_327, %c0_328] : memref<336x256xf32, #tpu.memory_space<vmem>>, vector<16x256xf32>
    tpu.vector_store %arg6[%c208_327, %c0_328], %597 {strides = array<i32>} : memref<336x256xf32, #tpu.memory_space<vmem>>, vector<16x256xf32>,
    %c252_i32_329 = arith.constant 252 : i32
    %599 = tpu.dynamic_rotate %480 by %c252_i32_329 dim 1 : vector<16x256xf32>, i32 -> vector<16x256xf32>
    %c0_i32_330 = arith.constant 0 : i32
    %600 = vector.broadcast %c0_i32_330 : i32 to vector<16x256xi32>
    %601 = arith.cmpi sge, %49, %600 : vector<16x256xi32>
    %c124_i32_331 = arith.constant 124 : i32
    %602 = vector.broadcast %c124_i32_331 : i32 to vector<16x256xi32>
    %603 = arith.cmpi slt, %49, %602 : vector<16x256xi32>
    %604 = arith.andi %601, %603 : vector<16x256xi1>
    %cst_332 = arith.constant 0.000000e+00 : f32
    %605 = vector.broadcast %cst_332 : f32 to vector<16x256xf32>
    %606 = arith.select %604, %599, %605 : vector<16x256xi1>, vector<16x256xf32>
    %c224_333 = arith.constant 224 : index
    %c0_334 = arith.constant 0 : index
    %607 = vector.load %arg6[%c224_333, %c0_334] : memref<336x256xf32, #tpu.memory_space<vmem>>, vector<16x256xf32>
    tpu.vector_store %arg6[%c224_333, %c0_334], %606 {strides = array<i32>} : memref<336x256xf32, #tpu.memory_space<vmem>>, vector<16x256xf32>,
    %c251_i32_335 = arith.constant 251 : i32
    %608 = tpu.dynamic_rotate %480 by %c251_i32_335 dim 1 : vector<16x256xf32>, i32 -> vector<16x256xf32>
    %c0_i32_336 = arith.constant 0 : i32
    %609 = vector.broadcast %c0_i32_336 : i32 to vector<16x256xi32>
    %610 = arith.cmpi sge, %49, %609 : vector<16x256xi32>
    %c123_i32_337 = arith.constant 123 : i32
    %611 = vector.broadcast %c123_i32_337 : i32 to vector<16x256xi32>
    %612 = arith.cmpi slt, %49, %611 : vector<16x256xi32>
    %613 = arith.andi %610, %612 : vector<16x256xi1>
    %cst_338 = arith.constant 0.000000e+00 : f32
    %614 = vector.broadcast %cst_338 : f32 to vector<16x256xf32>
    %615 = arith.select %613, %608, %614 : vector<16x256xi1>, vector<16x256xf32>
    %c240_339 = arith.constant 240 : index
    %c0_340 = arith.constant 0 : index
    %616 = vector.load %arg6[%c240_339, %c0_340] : memref<336x256xf32, #tpu.memory_space<vmem>>, vector<16x256xf32>
    tpu.vector_store %arg6[%c240_339, %c0_340], %615 {strides = array<i32>} : memref<336x256xf32, #tpu.memory_space<vmem>>, vector<16x256xf32>,
    %c250_i32_341 = arith.constant 250 : i32
    %617 = tpu.dynamic_rotate %480 by %c250_i32_341 dim 1 : vector<16x256xf32>, i32 -> vector<16x256xf32>
    %c0_i32_342 = arith.constant 0 : i32
    %618 = vector.broadcast %c0_i32_342 : i32 to vector<16x256xi32>
    %619 = arith.cmpi sge, %49, %618 : vector<16x256xi32>
    %c122_i32_343 = arith.constant 122 : i32
    %620 = vector.broadcast %c122_i32_343 : i32 to vector<16x256xi32>
    %621 = arith.cmpi slt, %49, %620 : vector<16x256xi32>
    %622 = arith.andi %619, %621 : vector<16x256xi1>
    %cst_344 = arith.constant 0.000000e+00 : f32
    %623 = vector.broadcast %cst_344 : f32 to vector<16x256xf32>
    %624 = arith.select %622, %617, %623 : vector<16x256xi1>, vector<16x256xf32>
    %c256_345 = arith.constant 256 : index
    %c0_346 = arith.constant 0 : index
    %625 = vector.load %arg6[%c256_345, %c0_346] : memref<336x256xf32, #tpu.memory_space<vmem>>, vector<16x256xf32>
    tpu.vector_store %arg6[%c256_345, %c0_346], %624 {strides = array<i32>} : memref<336x256xf32, #tpu.memory_space<vmem>>, vector<16x256xf32>,
    %c249_i32_347 = arith.constant 249 : i32
    %626 = tpu.dynamic_rotate %480 by %c249_i32_347 dim 1 : vector<16x256xf32>, i32 -> vector<16x256xf32>
    %c0_i32_348 = arith.constant 0 : i32
    %627 = vector.broadcast %c0_i32_348 : i32 to vector<16x256xi32>
    %628 = arith.cmpi sge, %49, %627 : vector<16x256xi32>
    %c121_i32_349 = arith.constant 121 : i32
    %629 = vector.broadcast %c121_i32_349 : i32 to vector<16x256xi32>
    %630 = arith.cmpi slt, %49, %629 : vector<16x256xi32>
    %631 = arith.andi %628, %630 : vector<16x256xi1>
    %cst_350 = arith.constant 0.000000e+00 : f32
    %632 = vector.broadcast %cst_350 : f32 to vector<16x256xf32>
    %633 = arith.select %631, %626, %632 : vector<16x256xi1>, vector<16x256xf32>
    %c272_351 = arith.constant 272 : index
    %c0_352 = arith.constant 0 : index
    %634 = vector.load %arg6[%c272_351, %c0_352] : memref<336x256xf32, #tpu.memory_space<vmem>>, vector<16x256xf32>
    tpu.vector_store %arg6[%c272_351, %c0_352], %633 {strides = array<i32>} : memref<336x256xf32, #tpu.memory_space<vmem>>, vector<16x256xf32>,
    %c248_i32_353 = arith.constant 248 : i32
    %635 = tpu.dynamic_rotate %480 by %c248_i32_353 dim 1 : vector<16x256xf32>, i32 -> vector<16x256xf32>
    %c0_i32_354 = arith.constant 0 : i32
    %636 = vector.broadcast %c0_i32_354 : i32 to vector<16x256xi32>
    %637 = arith.cmpi sge, %49, %636 : vector<16x256xi32>
    %c120_i32_355 = arith.constant 120 : i32
    %638 = vector.broadcast %c120_i32_355 : i32 to vector<16x256xi32>
    %639 = arith.cmpi slt, %49, %638 : vector<16x256xi32>
    %640 = arith.andi %637, %639 : vector<16x256xi1>
    %cst_356 = arith.constant 0.000000e+00 : f32
    %641 = vector.broadcast %cst_356 : f32 to vector<16x256xf32>
    %642 = arith.select %640, %635, %641 : vector<16x256xi1>, vector<16x256xf32>
    %c288_357 = arith.constant 288 : index
    %c0_358 = arith.constant 0 : index
    %643 = vector.load %arg6[%c288_357, %c0_358] : memref<336x256xf32, #tpu.memory_space<vmem>>, vector<16x256xf32>
    tpu.vector_store %arg6[%c288_357, %c0_358], %642 {strides = array<i32>} : memref<336x256xf32, #tpu.memory_space<vmem>>, vector<16x256xf32>,
    %c247_i32_359 = arith.constant 247 : i32
    %644 = tpu.dynamic_rotate %480 by %c247_i32_359 dim 1 : vector<16x256xf32>, i32 -> vector<16x256xf32>
    %c0_i32_360 = arith.constant 0 : i32
    %645 = vector.broadcast %c0_i32_360 : i32 to vector<16x256xi32>
    %646 = arith.cmpi sge, %49, %645 : vector<16x256xi32>
    %c119_i32_361 = arith.constant 119 : i32
    %647 = vector.broadcast %c119_i32_361 : i32 to vector<16x256xi32>
    %648 = arith.cmpi slt, %49, %647 : vector<16x256xi32>
    %649 = arith.andi %646, %648 : vector<16x256xi1>
    %cst_362 = arith.constant 0.000000e+00 : f32
    %650 = vector.broadcast %cst_362 : f32 to vector<16x256xf32>
    %651 = arith.select %649, %644, %650 : vector<16x256xi1>, vector<16x256xf32>
    %c304_363 = arith.constant 304 : index
    %c0_364 = arith.constant 0 : index
    %652 = vector.load %arg6[%c304_363, %c0_364] : memref<336x256xf32, #tpu.memory_space<vmem>>, vector<16x256xf32>
    tpu.vector_store %arg6[%c304_363, %c0_364], %651 {strides = array<i32>} : memref<336x256xf32, #tpu.memory_space<vmem>>, vector<16x256xf32>,
    %c246_i32_365 = arith.constant 246 : i32
    %653 = tpu.dynamic_rotate %480 by %c246_i32_365 dim 1 : vector<16x256xf32>, i32 -> vector<16x256xf32>
    %c0_i32_366 = arith.constant 0 : i32
    %654 = vector.broadcast %c0_i32_366 : i32 to vector<16x256xi32>
    %655 = arith.cmpi sge, %49, %654 : vector<16x256xi32>
    %c118_i32_367 = arith.constant 118 : i32
    %656 = vector.broadcast %c118_i32_367 : i32 to vector<16x256xi32>
    %657 = arith.cmpi slt, %49, %656 : vector<16x256xi32>
    %658 = arith.andi %655, %657 : vector<16x256xi1>
    %cst_368 = arith.constant 0.000000e+00 : f32
    %659 = vector.broadcast %cst_368 : f32 to vector<16x256xf32>
    %660 = arith.select %658, %653, %659 : vector<16x256xi1>, vector<16x256xf32>
    %c320_369 = arith.constant 320 : index
    %c0_370 = arith.constant 0 : index
    %661 = vector.load %arg6[%c320_369, %c0_370] : memref<336x256xf32, #tpu.memory_space<vmem>>, vector<16x256xf32>
    tpu.vector_store %arg6[%c320_369, %c0_370], %660 {strides = array<i32>} : memref<336x256xf32, #tpu.memory_space<vmem>>, vector<16x256xf32>,
    %c0_371 = arith.constant 0 : index
    %c0_372 = arith.constant 0 : index
    %662 = vector.load %arg6[%c0_371, %c0_372] : memref<336x256xf32, #tpu.memory_space<vmem>>, vector<336x256xf32>
    %cst_373 = arith.constant dense<0.000000e+00> : vector<16x256xf32>
    %663 = tpu.matmul %477, %662, %cst_373 {dimension_numbers = #tpu.dot_dimension_numbers<[1], [0], [0], [1], [0, 0, 1, 1], [], []>} : vector<16x336xf32>, vector<336x256xf32>, vector<16x256xf32> -> vector<16x256xf32>
    %664 = vector.broadcast %479 : vector<16x1xf32> to vector<16x256xf32>
    %665 = arith.addf %663, %664 : vector<16x256xf32>
    %cst_374 = arith.constant dense<0.000000e+00> : vector<16xf32>
    %666 = vector.multi_reduction <add>, %665, %cst_374 [1] : vector<16x256xf32> to vector<16xf32>
    %667 = vector.shape_cast %666 : vector<16xf32> to vector<16x1xf32>
    %668 = arith.mulf %665, %665 : vector<16x256xf32>
    %cst_375 = arith.constant dense<0.000000e+00> : vector<16xf32>
    %669 = vector.multi_reduction <add>, %668, %cst_375 [1] : vector<16x256xf32> to vector<16xf32>
    %670 = vector.shape_cast %669 : vector<16xf32> to vector<16x1xf32>
    %cst_376 = arith.constant 3.906250e-03 : f32
    %671 = vector.broadcast %cst_376 : f32 to vector<16x1xf32>
    %672 = arith.mulf %667, %671 : vector<16x1xf32>
    %cst_377 = arith.constant 3.906250e-03 : f32
    %673 = vector.broadcast %cst_377 : f32 to vector<16x1xf32>
    %674 = arith.mulf %670, %673 : vector<16x1xf32>
    %675 = arith.mulf %672, %672 : vector<16x1xf32>
    %676 = arith.subf %674, %675 : vector<16x1xf32>
    %cst_378 = arith.constant 0.000000e+00 : f32
    %677 = vector.broadcast %cst_378 : f32 to vector<16x1xf32>
    %678 = arith.maximumf %676, %677 : vector<16x1xf32>
    %679 = vector.broadcast %672 : vector<16x1xf32> to vector<16x256xf32>
    %680 = arith.subf %665, %679 : vector<16x256xf32>
    %cst_379 = arith.constant 9.99999974E-6 : f32
    %681 = vector.broadcast %cst_379 : f32 to vector<16x1xf32>
    %682 = arith.addf %678, %681 : vector<16x1xf32>
    %683 = math.rsqrt %682 : vector<16x1xf32>
    %684 = vector.broadcast %683 : vector<16x1xf32> to vector<16x256xf32>
    %685 = arith.mulf %680, %684 : vector<16x256xf32>
    %686 = vector.extract_strided_slice %26 {offsets = [32, 0], sizes = [16, 256], strides = [1, 1]} : vector<64x256xf32> to vector<16x256xf32>
    %687 = arith.addf %685, %686 : vector<16x256xf32>
    %c32_380 = arith.constant 32 : index
    %c0_381 = arith.constant 0 : index
    %688 = vector.load %arg5[%c32_380, %c0_381] : memref<64x256xf32, #tpu.memory_space<vmem>>, vector<16x256xf32>
    tpu.vector_store %arg5[%c32_380, %c0_381], %687 {strides = array<i32>} : memref<64x256xf32, #tpu.memory_space<vmem>>, vector<16x256xf32>,
    %c3 = arith.constant 3 : index
    %c0_382 = arith.constant 0 : index
    %c0_383 = arith.constant 0 : index
    %689 = vector.load %arg3[%c3, %c0_382, %c0_383] : memref<4x16x336xf32, #tpu.memory_space<vmem>>, vector<1x16x336xf32>
    %690 = vector.shape_cast %689 : vector<1x16x336xf32> to vector<16x336xf32>
    %c3_384 = arith.constant 3 : index
    %c0_385 = arith.constant 0 : index
    %c0_386 = arith.constant 0 : index
    %691 = vector.load %arg4[%c3_384, %c0_385, %c0_386] : memref<4x16x1xf32, #tpu.memory_space<vmem>>, vector<1x16x1xf32>
    %692 = vector.shape_cast %691 : vector<1x16x1xf32> to vector<16x1xf32>
    %693 = vector.extract_strided_slice %32 {offsets = [48, 0], sizes = [16, 256], strides = [1, 1]} : vector<64x256xf32> to vector<16x256xf32>
    %c10_i32_387 = arith.constant 10 : i32
    %694 = tpu.dynamic_rotate %693 by %c10_i32_387 dim 1 : vector<16x256xf32>, i32 -> vector<16x256xf32>
    %c10_i32_388 = arith.constant 10 : i32
    %695 = vector.broadcast %c10_i32_388 : i32 to vector<16x256xi32>
    %696 = arith.cmpi sge, %49, %695 : vector<16x256xi32>
    %c128_i32_389 = arith.constant 128 : i32
    %697 = vector.broadcast %c128_i32_389 : i32 to vector<16x256xi32>
    %698 = arith.cmpi slt, %49, %697 : vector<16x256xi32>
    %699 = arith.andi %696, %698 : vector<16x256xi1>
    %cst_390 = arith.constant 0.000000e+00 : f32
    %700 = vector.broadcast %cst_390 : f32 to vector<16x256xf32>
    %701 = arith.select %699, %694, %700 : vector<16x256xi1>, vector<16x256xf32>
    %c0_391 = arith.constant 0 : index
    %c0_392 = arith.constant 0 : index
    %702 = vector.load %arg6[%c0_391, %c0_392] : memref<336x256xf32, #tpu.memory_space<vmem>>, vector<16x256xf32>
    tpu.vector_store %arg6[%c0_391, %c0_392], %701 {strides = array<i32>} : memref<336x256xf32, #tpu.memory_space<vmem>>, vector<16x256xf32>,
    %c9_i32_393 = arith.constant 9 : i32
    %703 = tpu.dynamic_rotate %693 by %c9_i32_393 dim 1 : vector<16x256xf32>, i32 -> vector<16x256xf32>
    %c9_i32_394 = arith.constant 9 : i32
    %704 = vector.broadcast %c9_i32_394 : i32 to vector<16x256xi32>
    %705 = arith.cmpi sge, %49, %704 : vector<16x256xi32>
    %c128_i32_395 = arith.constant 128 : i32
    %706 = vector.broadcast %c128_i32_395 : i32 to vector<16x256xi32>
    %707 = arith.cmpi slt, %49, %706 : vector<16x256xi32>
    %708 = arith.andi %705, %707 : vector<16x256xi1>
    %cst_396 = arith.constant 0.000000e+00 : f32
    %709 = vector.broadcast %cst_396 : f32 to vector<16x256xf32>
    %710 = arith.select %708, %703, %709 : vector<16x256xi1>, vector<16x256xf32>
    %c16_397 = arith.constant 16 : index
    %c0_398 = arith.constant 0 : index
    %711 = vector.load %arg6[%c16_397, %c0_398] : memref<336x256xf32, #tpu.memory_space<vmem>>, vector<16x256xf32>
    tpu.vector_store %arg6[%c16_397, %c0_398], %710 {strides = array<i32>} : memref<336x256xf32, #tpu.memory_space<vmem>>, vector<16x256xf32>,
    %c8_i32_399 = arith.constant 8 : i32
    %712 = tpu.dynamic_rotate %693 by %c8_i32_399 dim 1 : vector<16x256xf32>, i32 -> vector<16x256xf32>
    %c8_i32_400 = arith.constant 8 : i32
    %713 = vector.broadcast %c8_i32_400 : i32 to vector<16x256xi32>
    %714 = arith.cmpi sge, %49, %713 : vector<16x256xi32>
    %c128_i32_401 = arith.constant 128 : i32
    %715 = vector.broadcast %c128_i32_401 : i32 to vector<16x256xi32>
    %716 = arith.cmpi slt, %49, %715 : vector<16x256xi32>
    %717 = arith.andi %714, %716 : vector<16x256xi1>
    %cst_402 = arith.constant 0.000000e+00 : f32
    %718 = vector.broadcast %cst_402 : f32 to vector<16x256xf32>
    %719 = arith.select %717, %712, %718 : vector<16x256xi1>, vector<16x256xf32>
    %c32_403 = arith.constant 32 : index
    %c0_404 = arith.constant 0 : index
    %720 = vector.load %arg6[%c32_403, %c0_404] : memref<336x256xf32, #tpu.memory_space<vmem>>, vector<16x256xf32>
    tpu.vector_store %arg6[%c32_403, %c0_404], %719 {strides = array<i32>} : memref<336x256xf32, #tpu.memory_space<vmem>>, vector<16x256xf32>,
    %c7_i32_405 = arith.constant 7 : i32
    %721 = tpu.dynamic_rotate %693 by %c7_i32_405 dim 1 : vector<16x256xf32>, i32 -> vector<16x256xf32>
    %c7_i32_406 = arith.constant 7 : i32
    %722 = vector.broadcast %c7_i32_406 : i32 to vector<16x256xi32>
    %723 = arith.cmpi sge, %49, %722 : vector<16x256xi32>
    %c128_i32_407 = arith.constant 128 : i32
    %724 = vector.broadcast %c128_i32_407 : i32 to vector<16x256xi32>
    %725 = arith.cmpi slt, %49, %724 : vector<16x256xi32>
    %726 = arith.andi %723, %725 : vector<16x256xi1>
    %cst_408 = arith.constant 0.000000e+00 : f32
    %727 = vector.broadcast %cst_408 : f32 to vector<16x256xf32>
    %728 = arith.select %726, %721, %727 : vector<16x256xi1>, vector<16x256xf32>
    %c48_409 = arith.constant 48 : index
    %c0_410 = arith.constant 0 : index
    %729 = vector.load %arg6[%c48_409, %c0_410] : memref<336x256xf32, #tpu.memory_space<vmem>>, vector<16x256xf32>
    tpu.vector_store %arg6[%c48_409, %c0_410], %728 {strides = array<i32>} : memref<336x256xf32, #tpu.memory_space<vmem>>, vector<16x256xf32>,
    %c6_i32_411 = arith.constant 6 : i32
    %730 = tpu.dynamic_rotate %693 by %c6_i32_411 dim 1 : vector<16x256xf32>, i32 -> vector<16x256xf32>
    %c6_i32_412 = arith.constant 6 : i32
    %731 = vector.broadcast %c6_i32_412 : i32 to vector<16x256xi32>
    %732 = arith.cmpi sge, %49, %731 : vector<16x256xi32>
    %c128_i32_413 = arith.constant 128 : i32
    %733 = vector.broadcast %c128_i32_413 : i32 to vector<16x256xi32>
    %734 = arith.cmpi slt, %49, %733 : vector<16x256xi32>
    %735 = arith.andi %732, %734 : vector<16x256xi1>
    %cst_414 = arith.constant 0.000000e+00 : f32
    %736 = vector.broadcast %cst_414 : f32 to vector<16x256xf32>
    %737 = arith.select %735, %730, %736 : vector<16x256xi1>, vector<16x256xf32>
    %c64_415 = arith.constant 64 : index
    %c0_416 = arith.constant 0 : index
    %738 = vector.load %arg6[%c64_415, %c0_416] : memref<336x256xf32, #tpu.memory_space<vmem>>, vector<16x256xf32>
    tpu.vector_store %arg6[%c64_415, %c0_416], %737 {strides = array<i32>} : memref<336x256xf32, #tpu.memory_space<vmem>>, vector<16x256xf32>,
    %c5_i32_417 = arith.constant 5 : i32
    %739 = tpu.dynamic_rotate %693 by %c5_i32_417 dim 1 : vector<16x256xf32>, i32 -> vector<16x256xf32>
    %c5_i32_418 = arith.constant 5 : i32
    %740 = vector.broadcast %c5_i32_418 : i32 to vector<16x256xi32>
    %741 = arith.cmpi sge, %49, %740 : vector<16x256xi32>
    %c128_i32_419 = arith.constant 128 : i32
    %742 = vector.broadcast %c128_i32_419 : i32 to vector<16x256xi32>
    %743 = arith.cmpi slt, %49, %742 : vector<16x256xi32>
    %744 = arith.andi %741, %743 : vector<16x256xi1>
    %cst_420 = arith.constant 0.000000e+00 : f32
    %745 = vector.broadcast %cst_420 : f32 to vector<16x256xf32>
    %746 = arith.select %744, %739, %745 : vector<16x256xi1>, vector<16x256xf32>
    %c80_421 = arith.constant 80 : index
    %c0_422 = arith.constant 0 : index
    %747 = vector.load %arg6[%c80_421, %c0_422] : memref<336x256xf32, #tpu.memory_space<vmem>>, vector<16x256xf32>
    tpu.vector_store %arg6[%c80_421, %c0_422], %746 {strides = array<i32>} : memref<336x256xf32, #tpu.memory_space<vmem>>, vector<16x256xf32>,
    %c4_i32_423 = arith.constant 4 : i32
    %748 = tpu.dynamic_rotate %693 by %c4_i32_423 dim 1 : vector<16x256xf32>, i32 -> vector<16x256xf32>
    %c4_i32_424 = arith.constant 4 : i32
    %749 = vector.broadcast %c4_i32_424 : i32 to vector<16x256xi32>
    %750 = arith.cmpi sge, %49, %749 : vector<16x256xi32>
    %c128_i32_425 = arith.constant 128 : i32
    %751 = vector.broadcast %c128_i32_425 : i32 to vector<16x256xi32>
    %752 = arith.cmpi slt, %49, %751 : vector<16x256xi32>
    %753 = arith.andi %750, %752 : vector<16x256xi1>
    %cst_426 = arith.constant 0.000000e+00 : f32
    %754 = vector.broadcast %cst_426 : f32 to vector<16x256xf32>
    %755 = arith.select %753, %748, %754 : vector<16x256xi1>, vector<16x256xf32>
    %c96_427 = arith.constant 96 : index
    %c0_428 = arith.constant 0 : index
    %756 = vector.load %arg6[%c96_427, %c0_428] : memref<336x256xf32, #tpu.memory_space<vmem>>, vector<16x256xf32>
    tpu.vector_store %arg6[%c96_427, %c0_428], %755 {strides = array<i32>} : memref<336x256xf32, #tpu.memory_space<vmem>>, vector<16x256xf32>,
    %c3_i32_429 = arith.constant 3 : i32
    %757 = tpu.dynamic_rotate %693 by %c3_i32_429 dim 1 : vector<16x256xf32>, i32 -> vector<16x256xf32>
    %c3_i32_430 = arith.constant 3 : i32
    %758 = vector.broadcast %c3_i32_430 : i32 to vector<16x256xi32>
    %759 = arith.cmpi sge, %49, %758 : vector<16x256xi32>
    %c128_i32_431 = arith.constant 128 : i32
    %760 = vector.broadcast %c128_i32_431 : i32 to vector<16x256xi32>
    %761 = arith.cmpi slt, %49, %760 : vector<16x256xi32>
    %762 = arith.andi %759, %761 : vector<16x256xi1>
    %cst_432 = arith.constant 0.000000e+00 : f32
    %763 = vector.broadcast %cst_432 : f32 to vector<16x256xf32>
    %764 = arith.select %762, %757, %763 : vector<16x256xi1>, vector<16x256xf32>
    %c112_433 = arith.constant 112 : index
    %c0_434 = arith.constant 0 : index
    %765 = vector.load %arg6[%c112_433, %c0_434] : memref<336x256xf32, #tpu.memory_space<vmem>>, vector<16x256xf32>
    tpu.vector_store %arg6[%c112_433, %c0_434], %764 {strides = array<i32>} : memref<336x256xf32, #tpu.memory_space<vmem>>, vector<16x256xf32>,
    %c2_i32_435 = arith.constant 2 : i32
    %766 = tpu.dynamic_rotate %693 by %c2_i32_435 dim 1 : vector<16x256xf32>, i32 -> vector<16x256xf32>
    %c2_i32_436 = arith.constant 2 : i32
    %767 = vector.broadcast %c2_i32_436 : i32 to vector<16x256xi32>
    %768 = arith.cmpi sge, %49, %767 : vector<16x256xi32>
    %c128_i32_437 = arith.constant 128 : i32
    %769 = vector.broadcast %c128_i32_437 : i32 to vector<16x256xi32>
    %770 = arith.cmpi slt, %49, %769 : vector<16x256xi32>
    %771 = arith.andi %768, %770 : vector<16x256xi1>
    %cst_438 = arith.constant 0.000000e+00 : f32
    %772 = vector.broadcast %cst_438 : f32 to vector<16x256xf32>
    %773 = arith.select %771, %766, %772 : vector<16x256xi1>, vector<16x256xf32>
    %c128_439 = arith.constant 128 : index
    %c0_440 = arith.constant 0 : index
    %774 = vector.load %arg6[%c128_439, %c0_440] : memref<336x256xf32, #tpu.memory_space<vmem>>, vector<16x256xf32>
    tpu.vector_store %arg6[%c128_439, %c0_440], %773 {strides = array<i32>} : memref<336x256xf32, #tpu.memory_space<vmem>>, vector<16x256xf32>,
    %c1_i32_441 = arith.constant 1 : i32
    %775 = tpu.dynamic_rotate %693 by %c1_i32_441 dim 1 : vector<16x256xf32>, i32 -> vector<16x256xf32>
    %c1_i32_442 = arith.constant 1 : i32
    %776 = vector.broadcast %c1_i32_442 : i32 to vector<16x256xi32>
    %777 = arith.cmpi sge, %49, %776 : vector<16x256xi32>
    %c128_i32_443 = arith.constant 128 : i32
    %778 = vector.broadcast %c128_i32_443 : i32 to vector<16x256xi32>
    %779 = arith.cmpi slt, %49, %778 : vector<16x256xi32>
    %780 = arith.andi %777, %779 : vector<16x256xi1>
    %cst_444 = arith.constant 0.000000e+00 : f32
    %781 = vector.broadcast %cst_444 : f32 to vector<16x256xf32>
    %782 = arith.select %780, %775, %781 : vector<16x256xi1>, vector<16x256xf32>
    %c144_445 = arith.constant 144 : index
    %c0_446 = arith.constant 0 : index
    %783 = vector.load %arg6[%c144_445, %c0_446] : memref<336x256xf32, #tpu.memory_space<vmem>>, vector<16x256xf32>
    tpu.vector_store %arg6[%c144_445, %c0_446], %782 {strides = array<i32>} : memref<336x256xf32, #tpu.memory_space<vmem>>, vector<16x256xf32>,
    %c160_447 = arith.constant 160 : index
    %c0_448 = arith.constant 0 : index
    %784 = vector.load %arg6[%c160_447, %c0_448] : memref<336x256xf32, #tpu.memory_space<vmem>>, vector<16x256xf32>
    tpu.vector_store %arg6[%c160_447, %c0_448], %693 {strides = array<i32>} : memref<336x256xf32, #tpu.memory_space<vmem>>, vector<16x256xf32>,
    %c255_i32_449 = arith.constant 255 : i32
    %785 = tpu.dynamic_rotate %693 by %c255_i32_449 dim 1 : vector<16x256xf32>, i32 -> vector<16x256xf32>
    %c0_i32_450 = arith.constant 0 : i32
    %786 = vector.broadcast %c0_i32_450 : i32 to vector<16x256xi32>
    %787 = arith.cmpi sge, %49, %786 : vector<16x256xi32>
    %c127_i32_451 = arith.constant 127 : i32
    %788 = vector.broadcast %c127_i32_451 : i32 to vector<16x256xi32>
    %789 = arith.cmpi slt, %49, %788 : vector<16x256xi32>
    %790 = arith.andi %787, %789 : vector<16x256xi1>
    %cst_452 = arith.constant 0.000000e+00 : f32
    %791 = vector.broadcast %cst_452 : f32 to vector<16x256xf32>
    %792 = arith.select %790, %785, %791 : vector<16x256xi1>, vector<16x256xf32>
    %c176_453 = arith.constant 176 : index
    %c0_454 = arith.constant 0 : index
    %793 = vector.load %arg6[%c176_453, %c0_454] : memref<336x256xf32, #tpu.memory_space<vmem>>, vector<16x256xf32>
    tpu.vector_store %arg6[%c176_453, %c0_454], %792 {strides = array<i32>} : memref<336x256xf32, #tpu.memory_space<vmem>>, vector<16x256xf32>,
    %c254_i32_455 = arith.constant 254 : i32
    %794 = tpu.dynamic_rotate %693 by %c254_i32_455 dim 1 : vector<16x256xf32>, i32 -> vector<16x256xf32>
    %c0_i32_456 = arith.constant 0 : i32
    %795 = vector.broadcast %c0_i32_456 : i32 to vector<16x256xi32>
    %796 = arith.cmpi sge, %49, %795 : vector<16x256xi32>
    %c126_i32_457 = arith.constant 126 : i32
    %797 = vector.broadcast %c126_i32_457 : i32 to vector<16x256xi32>
    %798 = arith.cmpi slt, %49, %797 : vector<16x256xi32>
    %799 = arith.andi %796, %798 : vector<16x256xi1>
    %cst_458 = arith.constant 0.000000e+00 : f32
    %800 = vector.broadcast %cst_458 : f32 to vector<16x256xf32>
    %801 = arith.select %799, %794, %800 : vector<16x256xi1>, vector<16x256xf32>
    %c192_459 = arith.constant 192 : index
    %c0_460 = arith.constant 0 : index
    %802 = vector.load %arg6[%c192_459, %c0_460] : memref<336x256xf32, #tpu.memory_space<vmem>>, vector<16x256xf32>
    tpu.vector_store %arg6[%c192_459, %c0_460], %801 {strides = array<i32>} : memref<336x256xf32, #tpu.memory_space<vmem>>, vector<16x256xf32>,
    %c253_i32_461 = arith.constant 253 : i32
    %803 = tpu.dynamic_rotate %693 by %c253_i32_461 dim 1 : vector<16x256xf32>, i32 -> vector<16x256xf32>
    %c0_i32_462 = arith.constant 0 : i32
    %804 = vector.broadcast %c0_i32_462 : i32 to vector<16x256xi32>
    %805 = arith.cmpi sge, %49, %804 : vector<16x256xi32>
    %c125_i32_463 = arith.constant 125 : i32
    %806 = vector.broadcast %c125_i32_463 : i32 to vector<16x256xi32>
    %807 = arith.cmpi slt, %49, %806 : vector<16x256xi32>
    %808 = arith.andi %805, %807 : vector<16x256xi1>
    %cst_464 = arith.constant 0.000000e+00 : f32
    %809 = vector.broadcast %cst_464 : f32 to vector<16x256xf32>
    %810 = arith.select %808, %803, %809 : vector<16x256xi1>, vector<16x256xf32>
    %c208_465 = arith.constant 208 : index
    %c0_466 = arith.constant 0 : index
    %811 = vector.load %arg6[%c208_465, %c0_466] : memref<336x256xf32, #tpu.memory_space<vmem>>, vector<16x256xf32>
    tpu.vector_store %arg6[%c208_465, %c0_466], %810 {strides = array<i32>} : memref<336x256xf32, #tpu.memory_space<vmem>>, vector<16x256xf32>,
    %c252_i32_467 = arith.constant 252 : i32
    %812 = tpu.dynamic_rotate %693 by %c252_i32_467 dim 1 : vector<16x256xf32>, i32 -> vector<16x256xf32>
    %c0_i32_468 = arith.constant 0 : i32
    %813 = vector.broadcast %c0_i32_468 : i32 to vector<16x256xi32>
    %814 = arith.cmpi sge, %49, %813 : vector<16x256xi32>
    %c124_i32_469 = arith.constant 124 : i32
    %815 = vector.broadcast %c124_i32_469 : i32 to vector<16x256xi32>
    %816 = arith.cmpi slt, %49, %815 : vector<16x256xi32>
    %817 = arith.andi %814, %816 : vector<16x256xi1>
    %cst_470 = arith.constant 0.000000e+00 : f32
    %818 = vector.broadcast %cst_470 : f32 to vector<16x256xf32>
    %819 = arith.select %817, %812, %818 : vector<16x256xi1>, vector<16x256xf32>
    %c224_471 = arith.constant 224 : index
    %c0_472 = arith.constant 0 : index
    %820 = vector.load %arg6[%c224_471, %c0_472] : memref<336x256xf32, #tpu.memory_space<vmem>>, vector<16x256xf32>
    tpu.vector_store %arg6[%c224_471, %c0_472], %819 {strides = array<i32>} : memref<336x256xf32, #tpu.memory_space<vmem>>, vector<16x256xf32>,
    %c251_i32_473 = arith.constant 251 : i32
    %821 = tpu.dynamic_rotate %693 by %c251_i32_473 dim 1 : vector<16x256xf32>, i32 -> vector<16x256xf32>
    %c0_i32_474 = arith.constant 0 : i32
    %822 = vector.broadcast %c0_i32_474 : i32 to vector<16x256xi32>
    %823 = arith.cmpi sge, %49, %822 : vector<16x256xi32>
    %c123_i32_475 = arith.constant 123 : i32
    %824 = vector.broadcast %c123_i32_475 : i32 to vector<16x256xi32>
    %825 = arith.cmpi slt, %49, %824 : vector<16x256xi32>
    %826 = arith.andi %823, %825 : vector<16x256xi1>
    %cst_476 = arith.constant 0.000000e+00 : f32
    %827 = vector.broadcast %cst_476 : f32 to vector<16x256xf32>
    %828 = arith.select %826, %821, %827 : vector<16x256xi1>, vector<16x256xf32>
    %c240_477 = arith.constant 240 : index
    %c0_478 = arith.constant 0 : index
    %829 = vector.load %arg6[%c240_477, %c0_478] : memref<336x256xf32, #tpu.memory_space<vmem>>, vector<16x256xf32>
    tpu.vector_store %arg6[%c240_477, %c0_478], %828 {strides = array<i32>} : memref<336x256xf32, #tpu.memory_space<vmem>>, vector<16x256xf32>,
    %c250_i32_479 = arith.constant 250 : i32
    %830 = tpu.dynamic_rotate %693 by %c250_i32_479 dim 1 : vector<16x256xf32>, i32 -> vector<16x256xf32>
    %c0_i32_480 = arith.constant 0 : i32
    %831 = vector.broadcast %c0_i32_480 : i32 to vector<16x256xi32>
    %832 = arith.cmpi sge, %49, %831 : vector<16x256xi32>
    %c122_i32_481 = arith.constant 122 : i32
    %833 = vector.broadcast %c122_i32_481 : i32 to vector<16x256xi32>
    %834 = arith.cmpi slt, %49, %833 : vector<16x256xi32>
    %835 = arith.andi %832, %834 : vector<16x256xi1>
    %cst_482 = arith.constant 0.000000e+00 : f32
    %836 = vector.broadcast %cst_482 : f32 to vector<16x256xf32>
    %837 = arith.select %835, %830, %836 : vector<16x256xi1>, vector<16x256xf32>
    %c256_483 = arith.constant 256 : index
    %c0_484 = arith.constant 0 : index
    %838 = vector.load %arg6[%c256_483, %c0_484] : memref<336x256xf32, #tpu.memory_space<vmem>>, vector<16x256xf32>
    tpu.vector_store %arg6[%c256_483, %c0_484], %837 {strides = array<i32>} : memref<336x256xf32, #tpu.memory_space<vmem>>, vector<16x256xf32>,
    %c249_i32_485 = arith.constant 249 : i32
    %839 = tpu.dynamic_rotate %693 by %c249_i32_485 dim 1 : vector<16x256xf32>, i32 -> vector<16x256xf32>
    %c0_i32_486 = arith.constant 0 : i32
    %840 = vector.broadcast %c0_i32_486 : i32 to vector<16x256xi32>
    %841 = arith.cmpi sge, %49, %840 : vector<16x256xi32>
    %c121_i32_487 = arith.constant 121 : i32
    %842 = vector.broadcast %c121_i32_487 : i32 to vector<16x256xi32>
    %843 = arith.cmpi slt, %49, %842 : vector<16x256xi32>
    %844 = arith.andi %841, %843 : vector<16x256xi1>
    %cst_488 = arith.constant 0.000000e+00 : f32
    %845 = vector.broadcast %cst_488 : f32 to vector<16x256xf32>
    %846 = arith.select %844, %839, %845 : vector<16x256xi1>, vector<16x256xf32>
    %c272_489 = arith.constant 272 : index
    %c0_490 = arith.constant 0 : index
    %847 = vector.load %arg6[%c272_489, %c0_490] : memref<336x256xf32, #tpu.memory_space<vmem>>, vector<16x256xf32>
    tpu.vector_store %arg6[%c272_489, %c0_490], %846 {strides = array<i32>} : memref<336x256xf32, #tpu.memory_space<vmem>>, vector<16x256xf32>,
    %c248_i32_491 = arith.constant 248 : i32
    %848 = tpu.dynamic_rotate %693 by %c248_i32_491 dim 1 : vector<16x256xf32>, i32 -> vector<16x256xf32>
    %c0_i32_492 = arith.constant 0 : i32
    %849 = vector.broadcast %c0_i32_492 : i32 to vector<16x256xi32>
    %850 = arith.cmpi sge, %49, %849 : vector<16x256xi32>
    %c120_i32_493 = arith.constant 120 : i32
    %851 = vector.broadcast %c120_i32_493 : i32 to vector<16x256xi32>
    %852 = arith.cmpi slt, %49, %851 : vector<16x256xi32>
    %853 = arith.andi %850, %852 : vector<16x256xi1>
    %cst_494 = arith.constant 0.000000e+00 : f32
    %854 = vector.broadcast %cst_494 : f32 to vector<16x256xf32>
    %855 = arith.select %853, %848, %854 : vector<16x256xi1>, vector<16x256xf32>
    %c288_495 = arith.constant 288 : index
    %c0_496 = arith.constant 0 : index
    %856 = vector.load %arg6[%c288_495, %c0_496] : memref<336x256xf32, #tpu.memory_space<vmem>>, vector<16x256xf32>
    tpu.vector_store %arg6[%c288_495, %c0_496], %855 {strides = array<i32>} : memref<336x256xf32, #tpu.memory_space<vmem>>, vector<16x256xf32>,
    %c247_i32_497 = arith.constant 247 : i32
    %857 = tpu.dynamic_rotate %693 by %c247_i32_497 dim 1 : vector<16x256xf32>, i32 -> vector<16x256xf32>
    %c0_i32_498 = arith.constant 0 : i32
    %858 = vector.broadcast %c0_i32_498 : i32 to vector<16x256xi32>
    %859 = arith.cmpi sge, %49, %858 : vector<16x256xi32>
    %c119_i32_499 = arith.constant 119 : i32
    %860 = vector.broadcast %c119_i32_499 : i32 to vector<16x256xi32>
    %861 = arith.cmpi slt, %49, %860 : vector<16x256xi32>
    %862 = arith.andi %859, %861 : vector<16x256xi1>
    %cst_500 = arith.constant 0.000000e+00 : f32
    %863 = vector.broadcast %cst_500 : f32 to vector<16x256xf32>
    %864 = arith.select %862, %857, %863 : vector<16x256xi1>, vector<16x256xf32>
    %c304_501 = arith.constant 304 : index
    %c0_502 = arith.constant 0 : index
    %865 = vector.load %arg6[%c304_501, %c0_502] : memref<336x256xf32, #tpu.memory_space<vmem>>, vector<16x256xf32>
    tpu.vector_store %arg6[%c304_501, %c0_502], %864 {strides = array<i32>} : memref<336x256xf32, #tpu.memory_space<vmem>>, vector<16x256xf32>,
    %c246_i32_503 = arith.constant 246 : i32
    %866 = tpu.dynamic_rotate %693 by %c246_i32_503 dim 1 : vector<16x256xf32>, i32 -> vector<16x256xf32>
    %c0_i32_504 = arith.constant 0 : i32
    %867 = vector.broadcast %c0_i32_504 : i32 to vector<16x256xi32>
    %868 = arith.cmpi sge, %49, %867 : vector<16x256xi32>
    %c118_i32_505 = arith.constant 118 : i32
    %869 = vector.broadcast %c118_i32_505 : i32 to vector<16x256xi32>
    %870 = arith.cmpi slt, %49, %869 : vector<16x256xi32>
    %871 = arith.andi %868, %870 : vector<16x256xi1>
    %cst_506 = arith.constant 0.000000e+00 : f32
    %872 = vector.broadcast %cst_506 : f32 to vector<16x256xf32>
    %873 = arith.select %871, %866, %872 : vector<16x256xi1>, vector<16x256xf32>
    %c320_507 = arith.constant 320 : index
    %c0_508 = arith.constant 0 : index
    %874 = vector.load %arg6[%c320_507, %c0_508] : memref<336x256xf32, #tpu.memory_space<vmem>>, vector<16x256xf32>
    tpu.vector_store %arg6[%c320_507, %c0_508], %873 {strides = array<i32>} : memref<336x256xf32, #tpu.memory_space<vmem>>, vector<16x256xf32>,
    %c0_509 = arith.constant 0 : index
    %c0_510 = arith.constant 0 : index
    %875 = vector.load %arg6[%c0_509, %c0_510] : memref<336x256xf32, #tpu.memory_space<vmem>>, vector<336x256xf32>
    %cst_511 = arith.constant dense<0.000000e+00> : vector<16x256xf32>
    %876 = tpu.matmul %690, %875, %cst_511 {dimension_numbers = #tpu.dot_dimension_numbers<[1], [0], [0], [1], [0, 0, 1, 1], [], []>} : vector<16x336xf32>, vector<336x256xf32>, vector<16x256xf32> -> vector<16x256xf32>
    %877 = vector.broadcast %692 : vector<16x1xf32> to vector<16x256xf32>
    %878 = arith.addf %876, %877 : vector<16x256xf32>
    %cst_512 = arith.constant dense<0.000000e+00> : vector<16xf32>
    %879 = vector.multi_reduction <add>, %878, %cst_512 [1] : vector<16x256xf32> to vector<16xf32>
    %880 = vector.shape_cast %879 : vector<16xf32> to vector<16x1xf32>
    %881 = arith.mulf %878, %878 : vector<16x256xf32>
    %cst_513 = arith.constant dense<0.000000e+00> : vector<16xf32>
    %882 = vector.multi_reduction <add>, %881, %cst_513 [1] : vector<16x256xf32> to vector<16xf32>
    %883 = vector.shape_cast %882 : vector<16xf32> to vector<16x1xf32>
    %cst_514 = arith.constant 3.906250e-03 : f32
    %884 = vector.broadcast %cst_514 : f32 to vector<16x1xf32>
    %885 = arith.mulf %880, %884 : vector<16x1xf32>
    %cst_515 = arith.constant 3.906250e-03 : f32
    %886 = vector.broadcast %cst_515 : f32 to vector<16x1xf32>
    %887 = arith.mulf %883, %886 : vector<16x1xf32>
    %888 = arith.mulf %885, %885 : vector<16x1xf32>
    %889 = arith.subf %887, %888 : vector<16x1xf32>
    %cst_516 = arith.constant 0.000000e+00 : f32
    %890 = vector.broadcast %cst_516 : f32 to vector<16x1xf32>
    %891 = arith.maximumf %889, %890 : vector<16x1xf32>
    %892 = vector.broadcast %885 : vector<16x1xf32> to vector<16x256xf32>
    %893 = arith.subf %878, %892 : vector<16x256xf32>
    %cst_517 = arith.constant 9.99999974E-6 : f32
    %894 = vector.broadcast %cst_517 : f32 to vector<16x1xf32>
    %895 = arith.addf %891, %894 : vector<16x1xf32>
    %896 = math.rsqrt %895 : vector<16x1xf32>
    %897 = vector.broadcast %896 : vector<16x1xf32> to vector<16x256xf32>
    %898 = arith.mulf %893, %897 : vector<16x256xf32>
    %899 = vector.extract_strided_slice %26 {offsets = [48, 0], sizes = [16, 256], strides = [1, 1]} : vector<64x256xf32> to vector<16x256xf32>
    %900 = arith.addf %898, %899 : vector<16x256xf32>
    %c48_518 = arith.constant 48 : index
    %c0_519 = arith.constant 0 : index
    %901 = vector.load %arg5[%c48_518, %c0_519] : memref<64x256xf32, #tpu.memory_space<vmem>>, vector<16x256xf32>
    tpu.vector_store %arg5[%c48_518, %c0_519], %900 {strides = array<i32>} : memref<64x256xf32, #tpu.memory_space<vmem>>, vector<16x256xf32>,
    return
  }
}

</mosaic_0001>

<bundles_post_ra>
// kernel: inception_res_block.1
= control target key start
LH: loop header
LB: loop body
LE: loop exit
PB: predicated region body
PF: predicated region fallthrough
CT: control target
= control target key end

     0   :  { %vm134_vm0 = vcmask 64512   ;;  %v4271_v0 = vmov 0   ;;  %s4273_s7 = smov 10   ;;  %s4274_s8 = smov 7   ;;  %s8165_s2 = inlined_call_operand.vmem [shape: f32[128,1], index: 2, kind: input, shape index: {}]   ;;  %s8166_s0 = inlined_call_operand.vmem [shape: f32[8,256], index: 0, kind: input, shape index: {}]   ;;  %s8167_s1 = inlined_call_operand.vmem [shape: f32[128,8], index: 1, kind: input, shape index: {}]   ;;  %s8168_s4 = inlined_call_operand.vmem [shape: f32[4,16,1], index: 4, kind: input, shape index: {}]   ;;  %s8169_s3 = inlined_call_operand.vmem [shape: f32[4,16,336], index: 3, kind: input, shape index: {}]   ;;  %s8170_s5 = inlined_call_operand.vmem [shape: f32[64,256], index: 5, kind: output, shape index: {}]  }
   0x1   :  { %4220 = vset.pattern.permute.xlu0 %v4271_v0  ;;  %v38_v1 = vld [vmem:[%s8165_s2] sm:$0xff]  ;;  %v37_v3 = vld [vmem:[%s8166_s0 + $0x8] sm:$0xff]  ;;  %4221 = vset.pattern.permute.xlu1 %v4271_v0  ;;  %v40_v5 = vld [vmem:[%s8165_s2 + $0x10] sm:$0xff]  ;;  %s4275_s9 = smov 8   ;;  %s4276_s10 = smov 6  }
   0x2   :  { %v36_v2 = vld [vmem:[%s8166_s0] sm:$0xff]  ;;  %56 = vperm.xlu0 %4220, %v38_v1   ;;  %263 = vmatpush.msra.mxu1 %v37_v3  ;;  %v39_v6 = vld [vmem:[%s8165_s2 + $0x8] sm:$0xff]  ;;  %v41_v8 = vld [vmem:[%s8165_s2 + $0x18] sm:$0xff]  ;;  %s4277_s11 = smov 4   ;;  %s4278_s12 = smov 5  }
   0x3   :  { %198 = vmatpush.msra.mxu0 %v36_v2  ;;  %v20_v4 = vld [vmem:[%s8167_s1] sm:$0xff]  ;;  %66 = vperm.xlu1 %4221, %v40_v5   ;;  %v21_v7 = vld [vmem:[%s8167_s1 + $0x8] sm:$0xff]  ;;  %v44_v10 = vld [vmem:[%s8165_s2 + $0x30] sm:$0xff]  ;;  %s4279_s13 = smov 3   ;;  %s4280_s14 = smov 1  }
   0x4   :  { %3807 = vmatmul.msk.f32.vlgmr.msra.gmra.mxu0 %vm134_vm0, %v20_v4  ;;  %3823 = vmatmul.msk.f32.vlgmr.msra.gmra.mxu1 %vm134_vm0, %v20_v4  ;;  %v42_v9 = vld [vmem:[%s8165_s2 + $0x20] sm:$0xff]  ;;  %v22_v11 = vld [vmem:[%s8167_s1 + $0x10] sm:$0xff]  ;;  %v45_v12 = vld [vmem:[%s8165_s2 + $0x38] sm:$0xff]  ;;  %s4281_s15 = smov 2   ;;  %s4282_s16 = smov 127  }
   0x5   :  { %4222 = vset.pattern.permute.xlu2 %v4271_v0  ;;  %v43_v13 = vld [vmem:[%s8165_s2 + $0x28] sm:$0xff]  ;;  %v23_v15 = vld [vmem:[%s8167_s1 + $0x18] sm:$0xff]  ;;  %v48_v16 = vld [vmem:[%s8165_s2 + $0x50] sm:$0xff]  ;;  %s4283_s17 = smov 125   ;;  %s4284_s18 = smov 126  }
   0x6   :  { %76 = vperm.xlu2 %4222, %v42_v9   ;;  %v47_v14 = vld [vmem:[%s8165_s2 + $0x48] sm:$0xff]  ;;  %v46_v17 = vld [vmem:[%s8165_s2 + $0x40] sm:$0xff]  ;;  %v49_v21 = vld [vmem:[%s8165_s2 + $0x58] sm:$0xff]  ;;  %s4285_s19 = smov 124   ;;  %s4287_s20 = smov 123  }
   0x7   :  { %v50_v18 = vld [vmem:[%s8165_s2 + $0x60] sm:$0xff]  ;;  %v51_v20 = vld [vmem:[%s8165_s2 + $0x68] sm:$0xff]  ;;  %v53_v22 = vld [vmem:[%s8165_s2 + $0x78] sm:$0xff]  ;;  %s4288_s21 = smov 121   ;;  %s4289_s22 = smov 120  }
   0x8   :  { %v24_v19 = vld [vmem:[%s8167_s1 + $0x20] sm:$0xff]  ;;  %v25_v23 = vld [vmem:[%s8167_s1 + $0x28] sm:$0xff]  ;;  %v52_v24 = vld [vmem:[%s8165_s2 + $0x70] sm:$0xff]  ;;  %s4286_s2 = smov 122   ;;  %s4290_s23 = smov 119  }
   0x9   :  { %v26_v25 = vld [vmem:[%s8167_s1 + $0x30] sm:$0xff]  ;;  %v27_v26 = vld [vmem:[%s8167_s1 + $0x38] sm:$0xff]  ;;  %v28_v27 = vld [vmem:[%s8167_s1 + $0x40] sm:$0xff]  ;;  %s4291_s24 = smov 118  }
   0xa   :  { %61 = vperm.xlu0 %4220, %v39_v6   ;;  %v29_v28 = vld [vmem:[%s8167_s1 + $0x48] sm:$0xff]  ;;  %v30_v29 = vld [vmem:[%s8167_s1 + $0x50] sm:$0xff]  ;;  %v31_v30 = vld [vmem:[%s8167_s1 + $0x58] sm:$0xff] }
   0xb   :  { %71 = vperm.xlu1 %4221, %v41_v8   ;;  %v32_v31 = vld [vmem:[%s8167_s1 + $0x60] sm:$0xff]  ;;  %v33_v32 = vld [vmem:[%s8167_s1 + $0x68] sm:$0xff]  ;;  %v34_v33 = vld [vmem:[%s8167_s1 + $0x70] sm:$0xff] }
   0xc   :  { %3808 = vmatmul.msk.f32.gmra.mxu0 %vm134_vm0, %v21_v7  ;;  %3824 = vmatmul.msk.f32.gmra.mxu1 %vm134_vm0, %v21_v7  ;;  %v35_v34 = vld [vmem:[%s8167_s1 + $0x78] sm:$0xff]  ;;  %s4272_s1 = smov 9  }
   0xe   :  { %81 = vperm.xlu2 %4222, %v43_v13  }
  0x12   :  { %86 = vperm.xlu0 %4220, %v44_v10  }
  0x13   :  { %91 = vperm.xlu1 %4221, %v45_v12  }
  0x14   :  { %3809 = vmatmul.msk.f32.gmra.mxu0 %vm134_vm0, %v22_v11  ;;  %3825 = vmatmul.msk.f32.gmra.mxu1 %vm134_vm0, %v22_v11 }
  0x16   :  { %96 = vperm.xlu2 %4222, %v46_v17  }
  0x1a   :  { %101 = vperm.xlu0 %4220, %v47_v14  }
  0x1b   :  { %106 = vperm.xlu1 %4221, %v48_v16  }
  0x1c   :  { %3810 = vmatmul.msk.f32.gmra.mxu0 %vm134_vm0, %v23_v15  ;;  %3826 = vmatmul.msk.f32.gmra.mxu1 %vm134_vm0, %v23_v15 }
  0x1e   :  { %111 = vperm.xlu2 %4222, %v49_v21  }
  0x22   :  { %116 = vperm.xlu0 %4220, %v50_v18  }
  0x23   :  { %121 = vperm.xlu1 %4221, %v51_v20  }
  0x24   :  { %3811 = vmatmul.msk.f32.gmra.mxu0 %vm134_vm0, %v24_v19  ;;  %3827 = vmatmul.msk.f32.gmra.mxu1 %vm134_vm0, %v24_v19 }
  0x26   :  { %126 = vperm.xlu2 %4222, %v52_v24  }
  0x2a   :  { %131 = vperm.xlu0 %4220, %v53_v22  }
  0x2c   :  { %3812 = vmatmul.msk.f32.gmra.mxu0 %vm134_vm0, %v25_v23  ;;  %3828 = vmatmul.msk.f32.gmra.mxu1 %vm134_vm0, %v25_v23 }
  0x34   :  { %3813 = vmatmul.msk.f32.gmra.mxu0 %vm134_vm0, %v26_v25  ;;  %3829 = vmatmul.msk.f32.gmra.mxu1 %vm134_vm0, %v26_v25 }
  0x3c   :  { %3814 = vmatmul.msk.f32.gmra.mxu0 %vm134_vm0, %v27_v26  ;;  %3830 = vmatmul.msk.f32.gmra.mxu1 %vm134_vm0, %v27_v26 }
  0x44   :  { %3815 = vmatmul.msk.f32.gmra.mxu0 %vm134_vm0, %v28_v27  ;;  %3831 = vmatmul.msk.f32.gmra.mxu1 %vm134_vm0, %v28_v27 }
  0x4c   :  { %3816 = vmatmul.msk.f32.gmra.mxu0 %vm134_vm0, %v29_v28  ;;  %3832 = vmatmul.msk.f32.gmra.mxu1 %vm134_vm0, %v29_v28 }
  0x54   :  { %3817 = vmatmul.msk.f32.gmra.mxu0 %vm134_vm0, %v30_v29  ;;  %3833 = vmatmul.msk.f32.gmra.mxu1 %vm134_vm0, %v30_v29 }
  0x5c   :  { %3818 = vmatmul.msk.f32.gmra.mxu0 %vm134_vm0, %v31_v30  ;;  %3834 = vmatmul.msk.f32.gmra.mxu1 %vm134_vm0, %v31_v30 }
  0x60   :  { %v77_v6 = vpop.permute.xlu2 %76 }
  0x64   :  { %3819 = vmatmul.msk.f32.gmra.mxu0 %vm134_vm0, %v32_v31  ;;  %3835 = vmatmul.msk.f32.gmra.mxu1 %vm134_vm0, %v32_v31 }
  0x68   :  { %v82_v16 = vpop.permute.xlu2 %81 }
  0x6c   :  { %3820 = vmatmul.msk.f32.gmra.mxu0 %vm134_vm0, %v33_v32  ;;  %3836 = vmatmul.msk.f32.gmra.mxu1 %vm134_vm0, %v33_v32 }
  0x74   :  { %3821 = vmatmul.msk.f32.gmra.mxu0 %vm134_vm0, %v34_v33  ;;  %3837 = vmatmul.msk.f32.gmra.mxu1 %vm134_vm0, %v34_v33  ;;  %v57_v35 = vpop.permute.xlu0 %56 }
  0x75   :  { %v67_v50 = vpop.permute.xlu1 %66 }
  0x7c   :  { %3822 = vmatmul.msk.f32.gmra.mxu0 %vm134_vm0, %v35_v34  ;;  %3838 = vmatmul.msk.f32.gmra.mxu1 %vm134_vm0, %v35_v34  ;;  %v62_v41 = vpop.permute.xlu0 %61 }
  0x7d   :  { %v72_v59 = vpop.permute.xlu1 %71 }
  0x81   :  { %v200_v36 = vpop.f32.mrf.mxu0  ;;  %v265_v38 = vpop.f32.mrf.mxu1 }
  0x82   :  { %v4456_v37 = vadd.f32 %v200_v36, %v57_v35  ;;  %v4458_v39 = vadd.f32 %v265_v38, %v57_v35 }
  0x84   :  { %8268 = vst [vmem:[#allocation3_spill] sm:$0xff] %v4456_v37  ;;  %v313_v40 = vadd.f32 %v4458_v39, %v4456_v37  ;;  %v361_v43 = vmul.f32 %v4456_v37, %v4456_v37  ;;  %v362_v44 = vmul.f32 %v4458_v39, %v4458_v39  ;;  %v87_v25 = vpop.permute.xlu0 %86  ;;  %v842_v37 = vld [vmem:[%s8168_s4] sm:$0xff] }
  0x85   :  { %8269 = vst [vmem:[#allocation4_spill] sm:$0xff] %v4458_v39  ;;  %v92_v34 = vpop.permute.xlu1 %91 }
  0x86   :  { %314 = vadd.xlane.f32.xlu1 %v313_v40  ;;  %v393_v49 = vadd.f32 %v362_v44, %v361_v43 }
  0x89   :  { %v203_v42 = vpop.f32.mrf.mxu0  ;;  %v268_v46 = vpop.f32.mrf.mxu1 }
  0x8a   :  { %v4466_v45 = vadd.f32 %v203_v42, %v62_v41  ;;  %v4468_v47 = vadd.f32 %v268_v46, %v62_v41  ;;  %v97_v46 = vpop.permute.xlu2 %96 }
  0x8c   :  { %8270 = vst [vmem:[#allocation5_spill] sm:$0xff] %v4466_v45  ;;  %v316_v48 = vadd.f32 %v4468_v47, %v4466_v45  ;;  %v363_v52 = vmul.f32 %v4466_v45, %v4466_v45  ;;  %v364_v53 = vmul.f32 %v4468_v47, %v4468_v47 }
  0x8d   :  { %8271 = vst [vmem:[#allocation6_spill] sm:$0xff] %v4468_v47 }
  0x8e   :  { %317 = vadd.xlane.f32.xlu2 %v316_v48  ;;  %394 = vadd.xlane.f32.xlu1 %v393_v49  ;;  %v396_v58 = vadd.f32 %v364_v53, %v363_v52 }
  0x91   :  { %v206_v51 = vpop.f32.mrf.mxu0  ;;  %v271_v55 = vpop.f32.mrf.mxu1 }
  0x92   :  { %v4476_v54 = vadd.f32 %v206_v51, %v67_v50  ;;  %v4478_v56 = vadd.f32 %v271_v55, %v67_v50 }
  0x94   :  { %8272 = vst [vmem:[#allocation7_spill] sm:$0xff] %v4476_v54  ;;  %v319_v57 = vadd.f32 %v4478_v56, %v4476_v54  ;;  %v365_v61 = vmul.f32 %v4476_v54, %v4476_v54  ;;  %v366_v62 = vmul.f32 %v4478_v56, %v4478_v56 }
  0x95   :  { %8273 = vst [vmem:[#allocation8_spill] sm:$0xff] %v4478_v56 }
  0x96   :  { %320 = vadd.xlane.f32.xlu0 %v319_v57  ;;  %397 = vadd.xlane.f32.xlu2 %v396_v58  ;;  %v399_v3 = vadd.f32 %v366_v62, %v365_v61  ;;  %v102_v58 = vpop.permute.xlu0 %101 }
  0x99   :  { %v209_v60 = vpop.f32.mrf.mxu0  ;;  %v274_v0 = vpop.f32.mrf.mxu1 }
  0x9a   :  { %v4486_v63 = vadd.f32 %v209_v60, %v72_v59  ;;  %v4488_v1 = vadd.f32 %v274_v0, %v72_v59 }
  0x9c   :  { %8274 = vst [vmem:[#allocation9_spill] sm:$0xff] %v4486_v63  ;;  %v367_v2 = vmul.f32 %v4486_v63, %v4486_v63  ;;  %v322_v4 = vadd.f32 %v4488_v1, %v4486_v63  ;;  %v368_v5 = vmul.f32 %v4488_v1, %v4488_v1 }
  0x9d   :  { %8275 = vst [vmem:[#allocation10_spill] sm:$0xff] %v4488_v1 }
  0x9e   :  { %400 = vadd.xlane.f32.xlu0 %v399_v3  ;;  %323 = vadd.xlane.f32.xlu2 %v322_v4  ;;  %v402_v7 = vadd.f32 %v368_v5, %v367_v2  ;;  %v107_v5 = vpop.permute.xlu1 %106 }
  0xa0   :  { %403 = vadd.xlane.f32.xlu1 %v402_v7 }
  0xa1   :  { %v212_v8 = vpop.f32.mrf.mxu0  ;;  %v277_v10 = vpop.f32.mrf.mxu1 }
  0xa2   :  { %v4496_v9 = vadd.f32 %v212_v8, %v77_v6  ;;  %v4498_v11 = vadd.f32 %v277_v10, %v77_v6 }
  0xa4   :  { %8276 = vst [vmem:[#allocation11_spill] sm:$0xff] %v4496_v9  ;;  %v369_v12 = vmul.f32 %v4496_v9, %v4496_v9  ;;  %v370_v13 = vmul.f32 %v4498_v11, %v4498_v11  ;;  %v325_v15 = vadd.f32 %v4498_v11, %v4496_v9 }
  0xa5   :  { %8277 = vst [vmem:[#allocation12_spill] sm:$0xff] %v4498_v11 }
  0xa6   :  { %v405_v14 = vadd.f32 %v370_v13, %v369_v12 }
  0xa8   :  { %406 = vadd.xlane.f32.xlu2 %v405_v14  ;;  %326 = vadd.xlane.f32.xlu1 %v325_v15 }
  0xa9   :  { %v215_v17 = vpop.f32.mrf.mxu0  ;;  %v280_v19 = vpop.f32.mrf.mxu1 }
  0xaa   :  { %v4506_v18 = vadd.f32 %v215_v17, %v82_v16  ;;  %v4508_v20 = vadd.f32 %v280_v19, %v82_v16  ;;  %v112_v16 = vpop.permute.xlu2 %111 }
  0xac   :  { %8278 = vst [vmem:[#allocation13_spill] sm:$0xff] %v4506_v18  ;;  %v371_v21 = vmul.f32 %v4506_v18, %v4506_v18  ;;  %v372_v22 = vmul.f32 %v4508_v20, %v4508_v20  ;;  %v328_v24 = vadd.f32 %v4508_v20, %v4506_v18 }
  0xad   :  { %8279 = vst [vmem:[#allocation14_spill] sm:$0xff] %v4508_v20 }
  0xae   :  { %v408_v23 = vadd.f32 %v372_v22, %v371_v21 }
  0xb0   :  { %409 = vadd.xlane.f32.xlu0 %v408_v23  ;;  %329 = vadd.xlane.f32.xlu2 %v328_v24 }
  0xb1   :  { %v218_v26 = vpop.f32.mrf.mxu0  ;;  %v283_v28 = vpop.f32.mrf.mxu1 }
  0xb2   :  { %v4516_v27 = vadd.f32 %v218_v26, %v87_v25  ;;  %v4518_v29 = vadd.f32 %v283_v28, %v87_v25  ;;  %v117_v28 = vpop.permute.xlu0 %116 }
  0xb4   :  { %8280 = vst [vmem:[#allocation15_spill] sm:$0xff] %v4516_v27  ;;  %v373_v30 = vmul.f32 %v4516_v27, %v4516_v27  ;;  %v374_v31 = vmul.f32 %v4518_v29, %v4518_v29  ;;  %v331_v32 = vadd.f32 %v4518_v29, %v4516_v27 }
  0xb5   :  { %8281 = vst [vmem:[#allocation16_spill] sm:$0xff] %v4518_v29 }
  0xb6   :  { %v411_v33 = vadd.f32 %v374_v31, %v373_v30 }
  0xb8   :  { %332 = vadd.xlane.f32.xlu0 %v331_v32  ;;  %412 = vadd.xlane.f32.xlu1 %v411_v33 }
  0xb9   :  { %v221_v35 = vpop.f32.mrf.mxu0  ;;  %v286_v38 = vpop.f32.mrf.mxu1 }
  0xba   :  { %v4526_v36 = vadd.f32 %v221_v35, %v92_v34  ;;  %v4528_v40 = vadd.f32 %v286_v38, %v92_v34 }
  0xbc   :  { %8282 = vst [vmem:[#allocation17_spill] sm:$0xff] %v4526_v36  ;;  %v375_v41 = vmul.f32 %v4526_v36, %v4526_v36  ;;  %v376_v42 = vmul.f32 %v4528_v40, %v4528_v40  ;;  %v334_v44 = vadd.f32 %v4528_v40, %v4526_v36 }
  0xbd   :  { %8283 = vst [vmem:[#allocation18_spill] sm:$0xff] %v4528_v40 }
  0xbe   :  { %v414_v43 = vadd.f32 %v376_v42, %v375_v41  ;;  %v122_v42 = vpop.permute.xlu1 %121 }
  0xc0   :  { %415 = vadd.xlane.f32.xlu2 %v414_v43  ;;  %335 = vadd.xlane.f32.xlu1 %v334_v44 }
  0xc1   :  { %v224_v48 = vpop.f32.mrf.mxu0  ;;  %v289_v50 = vpop.f32.mrf.mxu1 }
  0xc2   :  { %v4536_v49 = vadd.f32 %v224_v48, %v97_v46  ;;  %v4538_v51 = vadd.f32 %v289_v50, %v97_v46 }
  0xc4   :  { %v377_v52 = vmul.f32 %v4536_v49, %v4536_v49  ;;  %v378_v53 = vmul.f32 %v4538_v51, %v4538_v51  ;;  %v337_v57 = vadd.f32 %v4538_v51, %v4536_v49 }
  0xc6   :  { %v417_v55 = vadd.f32 %v378_v53, %v377_v52 }
  0xc8   :  { %418 = vadd.xlane.f32.xlu0 %v417_v55  ;;  %338 = vadd.xlane.f32.xlu2 %v337_v57  ;;  %v127_v57 = vpop.permute.xlu2 %126 }
  0xc9   :  { %v227_v59 = vpop.f32.mrf.mxu0  ;;  %v292_v61 = vpop.f32.mrf.mxu1 }
  0xca   :  { %v4546_v60 = vadd.f32 %v227_v59, %v102_v58  ;;  %v4548_v62 = vadd.f32 %v292_v61, %v102_v58 }
  0xcc   :  { %v379_v0 = vmul.f32 %v4546_v60, %v4546_v60  ;;  %v380_v2 = vmul.f32 %v4548_v62, %v4548_v62  ;;  %v340_v3 = vadd.f32 %v4548_v62, %v4546_v60 }
  0xce   :  { %v420_v4 = vadd.f32 %v380_v2, %v379_v0 }
  0xd0   :  { %341 = vadd.xlane.f32.xlu0 %v340_v3  ;;  %421 = vadd.xlane.f32.xlu1 %v420_v4 }
  0xd1   :  { %v230_v6 = vpop.f32.mrf.mxu0  ;;  %v295_v8 = vpop.f32.mrf.mxu1 }
  0xd2   :  { %v4556_v7 = vadd.f32 %v230_v6, %v107_v5  ;;  %v4558_v10 = vadd.f32 %v295_v8, %v107_v5  ;;  %v132_v6 = vpop.permute.xlu0 %131 }
  0xd4   :  { %v381_v12 = vmul.f32 %v4556_v7, %v4556_v7  ;;  %v382_v13 = vmul.f32 %v4558_v10, %v4558_v10  ;;  %v343_v15 = vadd.f32 %v4558_v10, %v4556_v7 }
  0xd6   :  { %v423_v14 = vadd.f32 %v382_v13, %v381_v12 }
  0xd8   :  { %424 = vadd.xlane.f32.xlu2 %v423_v14  ;;  %344 = vadd.xlane.f32.xlu1 %v343_v15 }
  0xd9   :  { %v233_v17 = vpop.f32.mrf.mxu0  ;;  %v298_v21 = vpop.f32.mrf.mxu1 }
  0xda   :  { %v4566_v19 = vadd.f32 %v233_v17, %v112_v16  ;;  %v4568_v22 = vadd.f32 %v298_v21, %v112_v16 }
  0xdc   :  { %v383_v23 = vmul.f32 %v4566_v19, %v4566_v19  ;;  %v384_v24 = vmul.f32 %v4568_v22, %v4568_v22  ;;  %v346_v26 = vadd.f32 %v4568_v22, %v4566_v19 }
  0xde   :  { %v426_v25 = vadd.f32 %v384_v24, %v383_v23 }
  0xe0   :  { %427 = vadd.xlane.f32.xlu0 %v426_v25  ;;  %347 = vadd.xlane.f32.xlu2 %v346_v26 }
  0xe1   :  { %v236_v30 = vpop.f32.mrf.mxu0  ;;  %v301_v32 = vpop.f32.mrf.mxu1 }
  0xe2   :  { %v4576_v31 = vadd.f32 %v236_v30, %v117_v28  ;;  %v4578_v33 = vadd.f32 %v301_v32, %v117_v28 }
  0xe4   :  { %8284 = vst [vmem:[#allocation19_spill] sm:$0xff] %v4576_v31  ;;  %v385_v34 = vmul.f32 %v4576_v31, %v4576_v31  ;;  %v386_v35 = vmul.f32 %v4578_v33, %v4578_v33  ;;  %v349_v38 = vadd.f32 %v4578_v33, %v4576_v31 }
  0xe5   :  { %8285 = vst [vmem:[#allocation20_spill] sm:$0xff] %v4578_v33 }
  0xe6   :  { %v429_v41 = vadd.f32 %v386_v35, %v385_v34 }
  0xe8   :  { %350 = vadd.xlane.f32.xlu0 %v349_v38  ;;  %430 = vadd.xlane.f32.xlu1 %v429_v41 }
  0xe9   :  { %v239_v43 = vpop.f32.mrf.mxu0  ;;  %v304_v46 = vpop.f32.mrf.mxu1 }
  0xea   :  { %v4586_v44 = vadd.f32 %v239_v43, %v122_v42  ;;  %v4588_v48 = vadd.f32 %v304_v46, %v122_v42 }
  0xec   :  { %8286 = vst [vmem:[#allocation21_spill] sm:$0xff] %v4586_v44  ;;  %v387_v50 = vmul.f32 %v4586_v44, %v4586_v44  ;;  %v388_v52 = vmul.f32 %v4588_v48, %v4588_v48  ;;  %v352_v55 = vadd.f32 %v4588_v48, %v4586_v44 }
  0xed   :  { %8287 = vst [vmem:[#allocation22_spill] sm:$0xff] %v4588_v48 }
  0xee   :  { %v432_v53 = vadd.f32 %v388_v52, %v387_v50 }
  0xf0   :  { %433 = vadd.xlane.f32.xlu2 %v432_v53  ;;  %353 = vadd.xlane.f32.xlu1 %v352_v55 }
  0xf1   :  { %v242_v58 = vpop.f32.mrf.mxu0  ;;  %v307_v61 = vpop.f32.mrf.mxu1 }
  0xf2   :  { %v4596_v59 = vadd.f32 %v242_v58, %v127_v57  ;;  %v4598_v0 = vadd.f32 %v307_v61, %v127_v57 }
  0xf4   :  { %8288 = vst [vmem:[#allocation23_spill] sm:$0xff] %v4596_v59  ;;  %v389_v2 = vmul.f32 %v4596_v59, %v4596_v59  ;;  %v390_v3 = vmul.f32 %v4598_v0, %v4598_v0  ;;  %v355_v5 = vadd.f32 %v4598_v0, %v4596_v59 }
  0xf5   :  { %8289 = vst [vmem:[#allocation24_spill] sm:$0xff] %v4598_v0 }
  0xf6   :  { %v435_v4 = vadd.f32 %v390_v3, %v389_v2 }
  0xf8   :  { %436 = vadd.xlane.f32.xlu0 %v435_v4  ;;  %356 = vadd.xlane.f32.xlu2 %v355_v5 }
  0xf9   :  { %v245_v8 = vpop.f32.mrf.mxu0  ;;  %v310_v13 = vpop.f32.mrf.mxu1 }
  0xfa   :  { %v4606_v12 = vadd.f32 %v245_v8, %v132_v6  ;;  %v4608_v14 = vadd.f32 %v310_v13, %v132_v6  ;;  %v4636_v57 = vpop.xlane.xlu1 %314 }
  0xfb   :  { %8302 = vst [vmem:[#allocation37_spill] sm:$0xff] %v4636_v57 }
  0xfc   :  { %8290 = vst [vmem:[#allocation25_spill] sm:$0xff] %v4606_v12  ;;  %v391_v15 = vmul.f32 %v4606_v12, %v4606_v12  ;;  %v392_v16 = vmul.f32 %v4608_v14, %v4608_v14  ;;  %v358_v17 = vadd.f32 %v4608_v14, %v4606_v12 }
  0xfd   :  { %8291 = vst [vmem:[#allocation26_spill] sm:$0xff] %v4608_v14 }
  0xfe   :  { %v438_v21 = vadd.f32 %v392_v16, %v391_v15 }
 0x100   :  { %359 = vadd.xlane.f32.xlu0 %v358_v17  ;;  %439 = vadd.xlane.f32.xlu1 %v438_v21 }
 0x101   :  { %v4616_v23 = vpop.xlane.xlu2 %317 }
 0x102   :  { %8292 = vst [vmem:[#allocation27_spill] sm:$0xff] %v4616_v23  ;;  %v4638_v2 = vpop.xlane.xlu1 %394 }
 0x103   :  { %8303 = vst [vmem:[#allocation38_spill] sm:$0xff] %v4638_v2 }
 0x109   :  { %v4618_v24 = vpop.xlane.xlu2 %397  ;;  %v4620_v25 = vpop.xlane.xlu0 %320 }
 0x10a   :  { %8293 = vst [vmem:[#allocation28_spill] sm:$0xff] %v4618_v24 }
 0x10b   :  { %8294 = vst [vmem:[#allocation29_spill] sm:$0xff] %v4620_v25 }
 0x111   :  { %v4622_v26 = vpop.xlane.xlu2 %323  ;;  %v4624_v28 = vpop.xlane.xlu0 %400 }
 0x112   :  { %8295 = vst [vmem:[#allocation30_spill] sm:$0xff] %v4622_v26 }
 0x113   :  { %8296 = vst [vmem:[#allocation31_spill] sm:$0xff] %v4624_v28  ;;  %v4642_v15 = vpop.xlane.xlu1 %403 }
 0x114   :  { %8304 = vst [vmem:[#allocation39_spill] sm:$0xff] %v4642_v15 }
 0x11b   :  { %v4626_v30 = vpop.xlane.xlu2 %406 }
 0x11c   :  { %8297 = vst [vmem:[#allocation32_spill] sm:$0xff] %v4626_v30 }
 0x123   :  { %v4628_v32 = vpop.xlane.xlu0 %409  ;;  %v4630_v34 = vpop.xlane.xlu2 %329 }
 0x124   :  { %8298 = vst [vmem:[#allocation33_spill] sm:$0xff] %v4628_v32 }
 0x125   :  { %8299 = vst [vmem:[#allocation34_spill] sm:$0xff] %v4630_v34 }
 0x12b   :  { %v4632_v35 = vpop.xlane.xlu0 %332 }
 0x12c   :  { %8300 = vst [vmem:[#allocation35_spill] sm:$0xff] %v4632_v35 }
 0x133   :  { %v4634_v38 = vpop.xlane.xlu2 %415 }
 0x134   :  { %8301 = vst [vmem:[#allocation36_spill] sm:$0xff] %v4634_v38 }
 0x13b   :  { %v419_v41 = vpop.xlane.xlu0 %418  ;;  %v339_v42 = vpop.xlane.xlu2 %338 }
 0x13c   :  { %v449_v43 = vmul.f32 0.00390625, %v339_v42  ;;  %v465_v46 = vmul.f32 0.00390625, %v419_v41 }
 0x13e   :  { %v481_v50 = vmul.f32 %v449_v43, %v449_v43  ;;  %v537_v8 = vsub.f32 %v4536_v49, %v449_v43  ;;  %v538_v13 = vsub.f32 %v4538_v51, %v449_v43  ;;  %v4654_v49 = vpop.xlane.xlu1 %326 }
 0x13f   :  { %8306 = vst [vmem:[#allocation41_spill] sm:$0xff] %v4654_v49 }
 0x140   :  { %v497_v52 = vsub.f32 %v465_v46, %v481_v50 }
 0x142   :  { %v513_v53 = vmax.f32 %v497_v52, 0.0 }
 0x143   :  { %v342_v52 = vpop.xlane.xlu0 %341 }
 0x144   :  { %v561_v55 = vadd.f32 1e-05, %v513_v53  ;;  %v450_v53 = vmul.f32 0.00390625, %v342_v52 }
 0x146   :  { %4223 = vrsqrt.f32 %v561_v55  ;;  %vm655_vm2 = vweird.f32 %v561_v55  ;;  %v4662_v51 = vpop.xlane.xlu1 %412 }
 0x147   :  { %8307 = vst [vmem:[#allocation42_spill] sm:$0xff] %v4662_v51 }
 0x14c   :  { %v4224_v58 = vpop.eup %4223 }
 0x14d   :  { %v650_v61 = vmul.f32 %v4224_v58, %v561_v55  ;;  %vm656_vm1 = vweird.f32 %v4224_v58 }
 0x14e   :  { %vm657_vm3 = vmor %vm655_vm2, %vm656_vm1  ;;  %v4670_v43 = vpop.xlane.xlu1 %335 }
 0x14f   :  { %v651_v3 = vmul.f32 %v4224_v58, %v650_v61  ;;  %8308 = vst [vmem:[#allocation43_spill] sm:$0xff] %v4670_v43 }
 0x151   :  { %v652_v4 = vmul.f32 0.5, %v651_v3 }
 0x153   :  { %v653_v5 = vsub.f32 1.5, %v652_v4 }
 0x155   :  { %v654_v6 = vmul.f32 %v4224_v58, %v653_v5 }
 0x156   :  { %v422_v55 = vpop.xlane.xlu1 %421 }
 0x157   :  { %v658_v16 = vsel %vm657_vm3, %v4224_v58, %v654_v6  ;;  %v482_v58 = vmul.f32 %v450_v53, %v450_v53  ;;  %v466_v61 = vmul.f32 0.00390625, %v422_v55 }
 0x158   :  { %v745_v17 = vmul.f32 %v658_v16, %v537_v8  ;;  %v746_v21 = vmul.f32 %v658_v16, %v538_v13  ;;  %v4696_v8 = vpop.xlane.xlu2 %424 }
 0x159   :  { %v498_v3 = vsub.f32 %v466_v61, %v482_v58  ;;  %v539_v58 = vsub.f32 %v4546_v60, %v450_v53  ;;  %v4721_v61 = vpop.xlane.xlu0 %427  ;;  %v540_v60 = vsub.f32 %v4548_v62, %v450_v53  ;;  %v467_v12 = vmul.f32 0.00390625, %v4696_v8 }
 0x15a   :  { %vm761_vm4 = vcmp.gt.f32.partialorder %v745_v17, 0.0  ;;  %vm762_vm5 = vcmp.gt.f32.partialorder %v746_v21, 0.0  ;;  %v777_v41 = vmul.f32 0.2, %v745_v17  ;;  %v778_v42 = vmul.f32 0.2, %v746_v21 }
 0x15b   :  { %v514_v4 = vmax.f32 %v498_v3, 0.0  ;;  %v468_v8 = vmul.f32 0.00390625, %v4721_v61 }
 0x15c   :  { %v4644_v46 = vsel %vm761_vm4, %v745_v17, %v777_v41  ;;  %v4646_v50 = vsel %vm762_vm5, %v746_v21, %v778_v42 }
 0x15d   :  { %8305 = vst [vmem:[#allocation40_spill] sm:$0xff] %v4646_v50  ;;  %875 = vrot.lane.b32.xlu0 %v4646_v50, %s4272_s1  ;;  %844 = vrot.lane.b32.xlu2 %v4644_v46, %s4273_s7  ;;  %v562_v5 = vadd.f32 1e-05, %v514_v4 }
 0x15e   :  { %848 = vrot.lane.b32.xlu1 %v4646_v50, %s4273_s7  ;;  %v4727_v4 = vpop.xlane.xlu1 %344 }
 0x15f   :  { %4225 = vrsqrt.f32 %v562_v5  ;;  %vm665_vm7 = vweird.f32 %v562_v5  ;;  %v4845_v59 = vmul.f32 0.00390625, %v4727_v4 }
 0x160   :  { %v4704_v21 = vpop.xlane.xlu2 %347 }
 0x161   :  { %v483_v63 = vmul.f32 %v4845_v59, %v4845_v59  ;;  %v4863_v15 = vmul.f32 0.00390625, %v4704_v21  ;;  %v541_v39 = vsub.f32 %v4556_v7, %v4845_v59 }
 0x163   :  { %v499_v14 = vsub.f32 %v467_v12, %v483_v63 }
 0x165   :  { %921 = vrot.lane.b32.xlu0 %v4644_v46, %s4274_s8  ;;  %871 = vrot.lane.b32.xlu2 %v4644_v46, %s4272_s1  ;;  %v4226_v6 = vpop.eup %4225 }
 0x166   :  { %896 = vrot.lane.b32.xlu1 %v4644_v46, %s4275_s9  ;;  %v660_v13 = vmul.f32 %v4226_v6, %v562_v5  ;;  %vm666_vm6 = vweird.f32 %v4226_v6 }
 0x167   :  { %vm667_vm8 = vmor %vm665_vm7, %vm666_vm6 }
 0x168   :  { %v661_v16 = vmul.f32 %v4226_v6, %v660_v13  ;;  %v4712_v52 = vpop.xlane.xlu2 %433 }
 0x169   :  { %8309 = vst [vmem:[#allocation44_spill] sm:$0xff] %v4712_v52 }
 0x16a   :  { %v662_v17 = vmul.f32 0.5, %v661_v16 }
 0x16c   :  { %v663_v41 = vsub.f32 1.5, %v662_v17  ;;  %v4736_v17 = vpop.xlane.xlu0 %350 }
 0x16d   :  { %950 = vrot.lane.b32.xlu0 %v4646_v50, %s4276_s10  ;;  %900 = vrot.lane.b32.xlu2 %v4646_v50, %s4275_s9  ;;  %8311 = vst [vmem:[#allocation46_spill] sm:$0xff] %v4736_v17 }
 0x16e   :  { %925 = vrot.lane.b32.xlu1 %v4646_v50, %s4274_s8  ;;  %v664_v42 = vmul.f32 %v4226_v6, %v663_v41  ;;  %v4742_v41 = vpop.xlane.xlu1 %430 }
 0x16f   :  { %8312 = vst [vmem:[#allocation47_spill] sm:$0xff] %v4742_v41 }
 0x170   :  { %v668_v55 = vsel %vm667_vm8, %v4226_v6, %v664_v42  ;;  %v4731_v5 = vpop.xlane.xlu2 %356 }
 0x171   :  { %v747_v3 = vmul.f32 %v668_v55, %v539_v58  ;;  %8310 = vst [vmem:[#allocation45_spill] sm:$0xff] %v4731_v5  ;;  %v748_v13 = vmul.f32 %v668_v55, %v540_v60  ;;  %v484_v5 = vmul.f32 %v4863_v15, %v4863_v15 }
 0x173   :  { %v779_v6 = vmul.f32 0.2, %v747_v3  ;;  %vm763_vm9 = vcmp.gt.f32.partialorder %v747_v3, 0.0  ;;  %v780_v58 = vmul.f32 0.2, %v748_v13  ;;  %vm764_vm10 = vcmp.gt.f32.partialorder %v748_v13, 0.0 }
 0x174   :  { %v4750_v53 = vpop.xlane.xlu0 %436 }
 0x175   :  { %996 = vrot.lane.b32.xlu0 %v4644_v46, %s4277_s11  ;;  %946 = vrot.lane.b32.xlu2 %v4644_v46, %s4276_s10  ;;  %v4734_v16 = vsel %vm763_vm9, %v747_v3, %v779_v6  ;;  %v4748_v62 = vsel %vm764_vm10, %v748_v13, %v780_v58  ;;  %8315 = vst [vmem:[#allocation50_spill] sm:$0xff] %v4750_v53  ;;  %v515_v53 = vmax.f32 %v499_v14, 0.0 }
 0x176   :  { %971 = vrot.lane.b32.xlu1 %v4644_v46, %s4278_s12  ;;  %8314 = vst [vmem:[#allocation49_spill] sm:$0xff] %v4748_v62  ;;  %v4760_v3 = vpop.xlane.xlu1 %353  ;;  %v500_v14 = vsub.f32 %v468_v8, %v484_v5 }
 0x177   :  { %8317 = vst [vmem:[#allocation52_spill] sm:$0xff] %v4760_v3  ;;  %v563_v21 = vadd.f32 1e-05, %v515_v53 }
 0x179   :  { %4227 = vrsqrt.f32 %v563_v21  ;;  %vm675_vm12 = vweird.f32 %v563_v21 }
 0x17c   :  { %v4768_v6 = vpop.xlane.xlu0 %359 }
 0x17d   :  { %1025 = vrot.lane.b32.xlu0 %v4646_v50, %s4279_s13  ;;  %975 = vrot.lane.b32.xlu2 %v4646_v50, %s4278_s12  ;;  %8318 = vst [vmem:[#allocation53_spill] sm:$0xff] %v4768_v6  ;;  %v516_v6 = vmax.f32 %v500_v14, 0.0 }
 0x17e   :  { %1000 = vrot.lane.b32.xlu1 %v4646_v50, %s4277_s11  ;;  %v4772_v13 = vpop.xlane.xlu1 %439 }
 0x17f   :  { %8319 = vst [vmem:[#allocation54_spill] sm:$0xff] %v4772_v13  ;;  %v564_v53 = vadd.f32 1e-05, %v516_v6  ;;  %v4228_v8 = vpop.eup %4227 }
 0x180   :  { %v670_v14 = vmul.f32 %v4228_v8, %v563_v21  ;;  %vm676_vm11 = vweird.f32 %v4228_v8 }
 0x181   :  { %4229 = vrsqrt.f32 %v564_v53  ;;  %vm677_vm13 = vmor %vm675_vm12, %vm676_vm11  ;;  %vm685_vm15 = vweird.f32 %v564_v53 }
 0x182   :  { %v671_v6 = vmul.f32 %v4228_v8, %v670_v14 }
 0x184   :  { %v672_v33 = vmul.f32 0.5, %v671_v6 }
 0x185   :  { %1071 = vrot.lane.b32.xlu0 %v4644_v46, %s4280_s14  ;;  %1021 = vrot.lane.b32.xlu2 %v4644_v46, %s4279_s13 }
 0x186   :  { %1046 = vrot.lane.b32.xlu1 %v4644_v46, %s4281_s15  ;;  %v673_v14 = vsub.f32 1.5, %v672_v33 }
 0x187   :  { %v4230_v31 = vpop.eup %4229 }
 0x188   :  { %v680_v48 = vmul.f32 %v4230_v31, %v564_v53  ;;  %v674_v6 = vmul.f32 %v4228_v8, %v673_v14  ;;  %v542_v14 = vsub.f32 %v4558_v10, %v4845_v59  ;;  %vm686_vm14 = vweird.f32 %v4230_v31 }
 0x189   :  { %vm687_vm0 = vmor %vm685_vm15, %vm686_vm14 }
 0x18a   :  { %v681_v52 = vmul.f32 %v4230_v31, %v680_v48  ;;  %v678_v48 = vsel %vm677_vm13, %v4228_v8, %v674_v6  ;;  %v543_v6 = vsub.f32 %v4566_v19, %v4863_v15 }
 0x18b   :  { %v750_v21 = vmul.f32 %v678_v48, %v542_v14  ;;  %v749_v24 = vmul.f32 %v678_v48, %v541_v39 }
 0x18c   :  { %v682_v3 = vmul.f32 0.5, %v681_v52 }
 0x18d   :  { %1104 = vrot.lane.b32.xlu0 %v4646_v50, %s4282_s16  ;;  %1050 = vrot.lane.b32.xlu2 %v4646_v50, %s4281_s15  ;;  %v782_v7 = vmul.f32 0.2, %v750_v21  ;;  %vm766_vm1 = vcmp.gt.f32.partialorder %v750_v21, 0.0  ;;  %v781_v39 = vmul.f32 0.2, %v749_v24  ;;  %vm765_vm2 = vcmp.gt.f32.partialorder %v749_v24, 0.0 }
 0x18e   :  { %1075 = vrot.lane.b32.xlu1 %v4646_v50, %s4280_s14  ;;  %v683_v52 = vsub.f32 1.5, %v682_v3 }
 0x18f   :  { %v4952_v53 = vsel %vm766_vm1, %v750_v21, %v782_v7  ;;  %v544_v21 = vsub.f32 %v4568_v22, %v4863_v15  ;;  %v809_v22 = vlaneseq }
 0x190   :  { %v684_v23 = vmul.f32 %v4230_v31, %v683_v52  ;;  %v4954_v52 = vsel %vm765_vm2, %v749_v24, %v781_v39 }
 0x192   :  { %v688_v8 = vsel %vm687_vm0, %v4230_v31, %v684_v23 }
 0x193   :  { %v751_v48 = vmul.f32 %v688_v8, %v543_v6  ;;  %v752_v24 = vmul.f32 %v688_v8, %v544_v21  ;;  %v4988_v8 = vand.u32 127, %v809_v22 }
 0x195   :  { %1152 = vrot.lane.b32.xlu0 %v4644_v46, %s4283_s17  ;;  %1100 = vrot.lane.b32.xlu2 %v4644_v46, %s4282_s16  ;;  %v783_v19 = vmul.f32 0.2, %v751_v48  ;;  %vm767_vm3 = vcmp.gt.f32.partialorder %v751_v48, 0.0  ;;  %vm768_vm4 = vcmp.gt.f32.partialorder %v752_v24, 0.0  ;;  %vm8229_vm5 = vcmp.ge.s32.totalorder %v4988_v8, 3 }
 0x196   :  { %1127 = vrot.lane.b32.xlu1 %v4644_v46, %s4284_s18  ;;  %vm8249_vm6 = vcmp.lt.s32.totalorder %v4988_v8, 3  ;;  %vm8227_vm7 = vcmp.ge.s32.totalorder %v4988_v8, 4  ;;  %vm8240_vm8 = vcmp.lt.s32.totalorder %v4988_v8, 4  ;;  %vm8225_vm9 = vcmp.ge.s32.totalorder %v4988_v8, 5 }
 0x197   :  { %v4968_v7 = vsel %vm767_vm3, %v751_v48, %v783_v19  ;;  %vm8242_vm10 = vcmp.lt.s32.totalorder %v4988_v8, 5  ;;  %vm8222_vm11 = vcmp.ge.s32.totalorder %v4988_v8, 6  ;;  %vm8244_vm12 = vcmp.lt.s32.totalorder %v4988_v8, 6 }
 0x198   :  { %vm8220_vm13 = vcmp.ge.s32.totalorder %v4988_v8, 7  ;;  %vm8246_vm14 = vcmp.lt.s32.totalorder %v4988_v8, 7  ;;  %vm8217_vm15 = vcmp.ge.s32.totalorder %v4988_v8, 8  ;;  %vm8248_vm0 = vcmp.lt.s32.totalorder %v4988_v8, 8 }
 0x199   :  { %vm8214_vm1 = vcmp.ge.s32.totalorder %v4988_v8, 9  ;;  %vm879_vm2 = vcmp.lt.s32.totalorder %v4988_v8, 9  ;;  %vm8209_vm3 = vcmp.ge.s32.totalorder %v4988_v8, 10 }
 0x19d   :  { %1181 = vrot.lane.b32.xlu0 %v4646_v50, %s4285_s19  ;;  %1131 = vrot.lane.b32.xlu2 %v4646_v50, %s4284_s18 }
 0x19e   :  { %1156 = vrot.lane.b32.xlu1 %v4646_v50, %s4283_s17 }
 0x1a5   :  { %1227 = vrot.lane.b32.xlu0 %v4644_v46, %s4286_s2  ;;  %1177 = vrot.lane.b32.xlu2 %v4644_v46, %s4285_s19 }
 0x1a6   :  { %1202 = vrot.lane.b32.xlu1 %v4644_v46, %s4287_s20 }
 0x1ad   :  { %1256 = vrot.lane.b32.xlu0 %v4646_v50, %s4288_s21  ;;  %1206 = vrot.lane.b32.xlu2 %v4646_v50, %s4287_s20 }
 0x1ae   :  { %1231 = vrot.lane.b32.xlu1 %v4646_v50, %s4286_s2 }
 0x1b5   :  { %1252 = vrot.lane.b32.xlu2 %v4644_v46, %s4288_s21  ;;  %846 = vrot.lane.b32.xlu0 %v4734_v16, %s4273_s7 }
 0x1b6   :  { %873 = vrot.lane.b32.xlu1 %v4734_v16, %s4272_s1 }
 0x1b7   :  { %v4746_v42 = vpop.permute.xlu2 %844 }
 0x1b8   :  { %8313 = vst [vmem:[#allocation48_spill] sm:$0xff] %v4746_v42 }
 0x1bd   :  { %877 = vrot.lane.b32.xlu2 %v4748_v62, %s4272_s1  ;;  %850 = vrot.lane.b32.xlu0 %v4748_v62, %s4273_s7 }
 0x1be   :  { %902 = vrot.lane.b32.xlu1 %v4748_v62, %s4275_s9 }
 0x1bf   :  { %v4758_v55 = vpop.permute.xlu2 %871 }
 0x1c0   :  { %8316 = vst [vmem:[#allocation51_spill] sm:$0xff] %v4758_v55 }
 0x1c5   :  { %923 = vrot.lane.b32.xlu2 %v4734_v16, %s4274_s8  ;;  %898 = vrot.lane.b32.xlu0 %v4734_v16, %s4275_s9 }
 0x1c6   :  { %948 = vrot.lane.b32.xlu1 %v4734_v16, %s4276_s10 }
 0x1c7   :  { %v4770_v60 = vpop.permute.xlu2 %900 }
 0x1cd   :  { %952 = vrot.lane.b32.xlu2 %v4748_v62, %s4276_s10  ;;  %927 = vrot.lane.b32.xlu0 %v4748_v62, %s4274_s8 }
 0x1ce   :  { %977 = vrot.lane.b32.xlu1 %v4748_v62, %s4278_s12 }
 0x1cf   :  { %v4780_v58 = vpop.permute.xlu0 %875  ;;  %v4782_v29 = vpop.permute.xlu2 %946 }
 0x1d0   :  { %8320 = vst [vmem:[#allocation55_spill] sm:$0xff] %v4780_v58  ;;  %v4784_v27 = vpop.permute.xlu1 %848 }
 0x1d1   :  { %8321 = vst [vmem:[#allocation56_spill] sm:$0xff] %v4784_v27 }
 0x1d5   :  { %998 = vrot.lane.b32.xlu2 %v4734_v16, %s4277_s11  ;;  %973 = vrot.lane.b32.xlu0 %v4734_v16, %s4278_s12 }
 0x1d6   :  { %1023 = vrot.lane.b32.xlu1 %v4734_v16, %s4279_s13 }
 0x1d7   :  { %v4792_v40 = vpop.permute.xlu0 %921  ;;  %v4794_v36 = vpop.permute.xlu2 %975 }
 0x1d8   :  { %v4796_v20 = vpop.permute.xlu1 %896 }
 0x1d9   :  { %8322 = vst [vmem:[#allocation57_spill] sm:$0xff] %v4796_v20 }
 0x1dd   :  { %1027 = vrot.lane.b32.xlu2 %v4748_v62, %s4279_s13  ;;  %1002 = vrot.lane.b32.xlu0 %v4748_v62, %s4277_s11 }
 0x1de   :  { %1052 = vrot.lane.b32.xlu1 %v4748_v62, %s4281_s15 }
 0x1df   :  { %v4804_v18 = vpop.permute.xlu0 %950  ;;  %v4806_v51 = vpop.permute.xlu2 %1021 }
 0x1e0   :  { %v4808_v38 = vpop.permute.xlu1 %925 }
 0x1e5   :  { %1073 = vrot.lane.b32.xlu2 %v4734_v16, %s4280_s14  ;;  %1048 = vrot.lane.b32.xlu0 %v4734_v16, %s4281_s15 }
 0x1e6   :  { %1102 = vrot.lane.b32.xlu1 %v4734_v16, %s4282_s16 }
 0x1e7   :  { %v4816_v35 = vpop.permute.xlu0 %996  ;;  %v4818_v32 = vpop.permute.xlu2 %1050 }
 0x1e8   :  { %v4820_v43 = vpop.permute.xlu1 %971 }
 0x1ed   :  { %1106 = vrot.lane.b32.xlu2 %v4748_v62, %s4282_s16  ;;  %1077 = vrot.lane.b32.xlu0 %v4748_v62, %s4280_s14 }
 0x1ee   :  { %1133 = vrot.lane.b32.xlu1 %v4748_v62, %s4284_s18 }
 0x1ef   :  { %v4828_v34 = vpop.permute.xlu0 %1025  ;;  %v4830_v11 = vpop.permute.xlu2 %1100 }
 0x1f0   :  { %8323 = vst [vmem:[#allocation58_spill] sm:$0xff] %v4830_v11  ;;  %v4832_v9 = vpop.permute.xlu1 %1000 }
 0x1f5   :  { %1154 = vrot.lane.b32.xlu2 %v4734_v16, %s4283_s17  ;;  %1129 = vrot.lane.b32.xlu0 %v4734_v16, %s4284_s18 }
 0x1f6   :  { %1179 = vrot.lane.b32.xlu1 %v4734_v16, %s4285_s19 }
 0x1f7   :  { %v4840_v30 = vpop.permute.xlu0 %1071  ;;  %v4842_v49 = vpop.permute.xlu2 %1131 }
 0x1f8   :  { %8324 = vst [vmem:[#allocation59_spill] sm:$0xff] %v4842_v49  ;;  %v4847_v1 = vpop.permute.xlu1 %1046 }
 0x1f9   :  { %8325 = vst [vmem:[#allocation60_spill] sm:$0xff] %v4847_v1 }
 0x1fd   :  { %1183 = vrot.lane.b32.xlu2 %v4748_v62, %s4285_s19  ;;  %1158 = vrot.lane.b32.xlu0 %v4748_v62, %s4283_s17 }
 0x1fe   :  { %1208 = vrot.lane.b32.xlu1 %v4748_v62, %s4287_s20 }
 0x1ff   :  { %v4858_v0 = vpop.permute.xlu0 %1104  ;;  %v4860_v4 = vpop.permute.xlu2 %1177 }
 0x200   :  { %8326 = vst [vmem:[#allocation61_spill] sm:$0xff] %v4858_v0  ;;  %v4865_v26 = vpop.permute.xlu1 %1075 }
 0x205   :  { %1229 = vrot.lane.b32.xlu2 %v4734_v16, %s4286_s2  ;;  %1204 = vrot.lane.b32.xlu0 %v4734_v16, %s4287_s20 }
 0x206   :  { %1254 = vrot.lane.b32.xlu1 %v4734_v16, %s4288_s21 }
 0x207   :  { %v4876_v63 = vpop.permute.xlu0 %1152  ;;  %v4878_v12 = vpop.permute.xlu2 %1206 }
 0x208   :  { %v4880_v13 = vpop.permute.xlu1 %1127 }
 0x20d   :  { %1258 = vrot.lane.b32.xlu2 %v4748_v62, %s4288_s21  ;;  %1233 = vrot.lane.b32.xlu0 %v4748_v62, %s4286_s2 }
 0x20e   :  { %1277 = vrot.lane.b32.xlu1 %v4644_v46, %s4289_s22 }
 0x20f   :  { %v4888_v61 = vpop.permute.xlu0 %1181  ;;  %v4890_v56 = vpop.permute.xlu2 %1252 }
 0x210   :  { %8327 = vst [vmem:[#allocation62_spill] sm:$0xff] %v4888_v61  ;;  %v4892_v5 = vpop.permute.xlu1 %1156 }
 0x211   :  { %8328 = vst [vmem:[#allocation63_spill] sm:$0xff] %v4890_v56  ;;  %v957_v56 = vsel %vm8244_vm12, %v4804_v18, %v4782_v29 }
 0x215   :  { %1281 = vrot.lane.b32.xlu2 %v4646_v50, %s4289_s22  ;;  %1279 = vrot.lane.b32.xlu0 %v4734_v16, %s4289_s22 }
 0x216   :  { %1283 = vrot.lane.b32.xlu1 %v4748_v62, %s4289_s22 }
 0x217   :  { %v4900_v54 = vpop.permute.xlu0 %1227  ;;  %v4902_v28 = vpop.permute.xlu2 %877 }
 0x218   :  { %8329 = vst [vmem:[#allocation64_spill] sm:$0xff] %v4900_v54  ;;  %v4904_v25 = vpop.permute.xlu1 %1202  ;;  %v982_v54 = vsel %vm8242_vm10, %v4794_v36, %v4820_v43 }
 0x219   :  { %8330 = vst [vmem:[#allocation65_spill] sm:$0xff] %v4902_v28 }
 0x21d   :  { %1304 = vrot.lane.b32.xlu2 %v4734_v16, %s4290_s23  ;;  %1302 = vrot.lane.b32.xlu0 %v4644_v46, %s4290_s23 }
 0x21e   :  { %1306 = vrot.lane.b32.xlu1 %v4646_v50, %s4290_s23 }
 0x21f   :  { %v4912_v44 = vpop.permute.xlu0 %1256  ;;  %v4914_v41 = vpop.permute.xlu2 %923 }
 0x220   :  { %8331 = vst [vmem:[#allocation66_spill] sm:$0xff] %v4912_v44  ;;  %v4916_v17 = vpop.permute.xlu1 %1231  ;;  %v932_v44 = vsel %vm8246_vm14, %v4808_v38, %v4792_v40 }
 0x221   :  { %8332 = vst [vmem:[#allocation67_spill] sm:$0xff] %v4914_v41 }
 0x222   :  { %8333 = vst [vmem:[#allocation68_spill] sm:$0xff] %v4916_v17 }
 0x225   :  { %1327 = vrot.lane.b32.xlu2 %v4644_v46, %s4291_s24  ;;  %1308 = vrot.lane.b32.xlu0 %v4748_v62, %s4290_s23 }
 0x226   :  { %1329 = vrot.lane.b32.xlu1 %v4734_v16, %s4291_s24 }
 0x227   :  { %v4924_v47 = vpop.permute.xlu2 %952  ;;  %v4926_v45 = vpop.permute.xlu0 %846 }
 0x228   :  { %8334 = vst [vmem:[#allocation69_spill] sm:$0xff] %v4926_v45  ;;  %v4928_v33 = vpop.permute.xlu1 %873 }
 0x229   :  { %8335 = vst [vmem:[#allocation70_spill] sm:$0xff] %v4928_v33 }
 0x22d   :  { %1333 = vrot.lane.b32.xlu2 %v4748_v62, %s4291_s24  ;;  %1331 = vrot.lane.b32.xlu0 %v4646_v50, %s4291_s24  ;;  %v1007_v50 = vsel %vm8240_vm8, %v4832_v9, %v4816_v35 }
 0x22e   :  { %1438 = vperm.xlu1 %4221, %v842_v37   ;;  %v843_v37 = vld [vmem:[%s8168_s4 + $0x8] sm:$0xff] }
 0x22f   :  { %v4941_v10 = vpop.permute.xlu2 %998  ;;  %v4943_v3 = vpop.permute.xlu0 %850 }
 0x230   :  { %8336 = vst [vmem:[#allocation71_spill] sm:$0xff] %v4943_v3  ;;  %v4945_v59 = vpop.permute.xlu1 %902 }
 0x235   :  { %1443 = vperm.xlu0 %4220, %v843_v37   ;;  %1669 = vrot.lane.b32.xlu2 %v4952_v53, %s4273_s7  ;;  %v784_v37 = vmul.f32 0.2, %v752_v24 }
 0x236   :  { %1665 = vrot.lane.b32.xlu1 %v4954_v52, %s4273_s7 }
 0x237   :  { %v4960_v31 = vpop.permute.xlu2 %1027  ;;  %v4962_v23 = vpop.permute.xlu0 %898  ;;  %v4982_v15 = vsel %vm768_vm4, %v752_v24, %v784_v37  ;;  %v1032_v37 = vsel %vm8249_vm6, %v4828_v34, %v4806_v51  ;;  %vm8267_vm4 = vcmp.lt.s32.totalorder %v4988_v8, 10 }
 0x238   :  { %v4964_v14 = vpop.permute.xlu1 %948 }
 0x23d   :  { %1667 = vrot.lane.b32.xlu0 %v4968_v7, %s4273_s7  ;;  %1687 = vrot.lane.b32.xlu2 %v4968_v7, %s4272_s1 }
 0x23e   :  { %1685 = vrot.lane.b32.xlu1 %v4954_v52, %s4272_s1 }
 0x23f   :  { %v4976_v39 = vpop.permute.xlu2 %1073  ;;  %v4978_v6 = vpop.permute.xlu0 %927 }
 0x240   :  { %v4980_v2 = vpop.permute.xlu1 %977 }
 0x245   :  { %1671 = vrot.lane.b32.xlu0 %v4982_v15, %s4273_s7  ;;  %1705 = vrot.lane.b32.xlu2 %v4954_v52, %s4275_s9 }
 0x246   :  { %1691 = vrot.lane.b32.xlu1 %v4982_v15, %s4272_s1 }
 0x247   :  { %v4992_v48 = vpop.permute.xlu2 %1106  ;;  %v4994_v19 = vpop.permute.xlu0 %973 }
 0x248   :  { %v4997_v21 = vpop.permute.xlu1 %1023 }
 0x249   :  { %v1033_v24 = vsel %vm8249_vm6, %v4960_v31, %v4997_v21 }
 0x24a   :  { %3879 = vmatpush.msk.msra.mxu2 %vm8229_vm5, %v1033_v24 }
 0x24c   :  { %3880 = vmatpush.msk.msra.mxu2 %vm8229_vm5, %v1032_v37  ;;  %vm8237_vm5 = vcmp.ge.s32.totalorder %v4988_v8, 2 }
 0x24d   :  { %1689 = vrot.lane.b32.xlu0 %v4952_v53, %s4272_s1  ;;  %1711 = vrot.lane.b32.xlu2 %v4982_v15, %s4275_s9 }
 0x24e   :  { %1709 = vrot.lane.b32.xlu1 %v4952_v53, %s4275_s9 }
 0x24f   :  { %v5019_v22 = vpop.permute.xlu2 %1154  ;;  %v5021_v24 = vpop.permute.xlu0 %1002 }
 0x250   :  { %v5024_v57 = vpop.permute.xlu1 %1052  ;;  %v1008_v37 = vsel %vm8240_vm8, %v5021_v24, %v4941_v10 }
 0x251   :  { %3881 = vmatpush.msk.msra.mxu2 %vm8227_vm7, %v1008_v37  ;;  %v983_v37 = vsel %vm8242_vm10, %v4980_v2, %v4994_v19 }
 0x253   :  { %3882 = vmatpush.msk.msra.mxu2 %vm8227_vm7, %v1007_v50  ;;  %vm8233_vm7 = vcmp.lt.s32.totalorder %v4988_v8, 1 }
 0x255   :  { %1707 = vrot.lane.b32.xlu0 %v4968_v7, %s4275_s9  ;;  %1729 = vrot.lane.b32.xlu2 %v4952_v53, %s4274_s8 }
 0x256   :  { %1727 = vrot.lane.b32.xlu1 %v4968_v7, %s4274_s8  ;;  %3883 = vmatpush.msk.msra.mxu2 %vm8225_vm9, %v983_v37  ;;  %v958_v37 = vsel %vm8244_vm12, %v4924_v47, %v4964_v14 }
 0x257   :  { %v5052_v50 = vpop.permute.xlu2 %1183  ;;  %v5054_v62 = vpop.permute.xlu0 %1048 }
 0x258   :  { %8337 = vst [vmem:[#allocation72_spill] sm:$0xff] %v5052_v50  ;;  %3884 = vmatpush.msk.msra.mxu2 %vm8225_vm9, %v982_v54  ;;  %v5063_v17 = vpop.permute.xlu1 %1102  ;;  %v933_v54 = vsel %vm8246_vm14, %v4978_v6, %v4914_v41  ;;  %vm8232_vm9 = vcmp.ge.s32.totalorder %v4988_v8, 1 }
 0x259   :  { %8338 = vst [vmem:[#allocation73_spill] sm:$0xff] %v5054_v62 }
 0x25a   :  { %3885 = vmatpush.msk.msra.mxu2 %vm8222_vm11, %v958_v37 }
 0x25c   :  { %3886 = vmatpush.msk.msra.mxu2 %vm8222_vm11, %v957_v56  ;;  %vm8230_vm11 = vcmp.lt.s32.totalorder %v4988_v8, 127 }
 0x25d   :  { %1725 = vrot.lane.b32.xlu0 %v4954_v52, %s4274_s8  ;;  %1747 = vrot.lane.b32.xlu2 %v4968_v7, %s4276_s10 }
 0x25e   :  { %1745 = vrot.lane.b32.xlu1 %v4954_v52, %s4276_s10  ;;  %3887 = vmatpush.msk.msra.mxu2 %vm8220_vm13, %v933_v54  ;;  %v908_v54 = vsel %vm8248_vm0, %v4945_v59, %v4962_v23 }
 0x25f   :  { %v5092_v56 = vpop.permute.xlu2 %1229  ;;  %v5094_v37 = vpop.permute.xlu0 %1077 }
 0x260   :  { %8339 = vst [vmem:[#allocation74_spill] sm:$0xff] %v5092_v56  ;;  %3888 = vmatpush.msk.msra.mxu2 %vm8220_vm13, %v932_v44  ;;  %v5103_v41 = vpop.permute.xlu1 %1133  ;;  %v907_v56 = vsel %vm8248_vm0, %v4770_v60, %v4796_v20  ;;  %v883_v44 = vsel %vm879_vm2, %v4902_v28, %v4928_v33  ;;  %v882_v20 = vsel %vm879_vm2, %v4780_v58, %v4758_v55  ;;  %v5155_v55 = vld [vmem:[%s8169_s3] sm:$0xff]  ;;  %vm1135_vm13 = vcmp.lt.s32.totalorder %v4988_v8, 126 }
 0x261   :  { %8340 = vst [vmem:[#allocation75_spill] sm:$0xff] %v5103_v41 }
 0x262   :  { %3889 = vmatpush.msk.msra.mxu2 %vm8217_vm15, %v908_v54  ;;  %8343 = vst [vmem:[#allocation78_spill] sm:$0xff] %v5155_v55 }
 0x264   :  { %3890 = vmatpush.msk.msra.mxu2 %vm8217_vm15, %v907_v56  ;;  %vm1160_vm15 = vcmp.lt.s32.totalorder %v4988_v8, 125 }
 0x265   :  { %1731 = vrot.lane.b32.xlu0 %v4982_v15, %s4274_s8  ;;  %1765 = vrot.lane.b32.xlu2 %v4954_v52, %s4278_s12 }
 0x266   :  { %1751 = vrot.lane.b32.xlu1 %v4982_v15, %s4276_s10  ;;  %3891 = vmatpush.msk.msra.mxu2 %vm8214_vm1, %v883_v44  ;;  %v856_v44 = vsel %vm8267_vm4, %v4943_v3, %v4926_v45 }
 0x267   :  { %v5132_v56 = vpop.permute.xlu2 %1258  ;;  %v5134_v54 = vpop.permute.xlu0 %1129 }
 0x268   :  { %8341 = vst [vmem:[#allocation76_spill] sm:$0xff] %v5134_v54  ;;  %3892 = vmatpush.msk.msra.mxu2 %vm8214_vm1, %v882_v20  ;;  %v5143_v33 = vpop.permute.xlu1 %1179  ;;  %v855_v20 = vsel %vm8267_vm4, %v4784_v27, %v4746_v42  ;;  %vm1185_vm1 = vcmp.lt.s32.totalorder %v4988_v8, 124 }
 0x269   :  { %8342 = vst [vmem:[#allocation77_spill] sm:$0xff] %v5143_v33  ;;  %v1187_v28 = vsel %vm1185_vm1, %v5143_v33, %v5052_v50 }
 0x26a   :  { %3893 = vmatpush.msk.msra.mxu2 %vm8209_vm3, %v856_v44 }
 0x26c   :  { %3894 = vmatpush.msk.msra.mxu2 %vm8209_vm3, %v855_v20  ;;  %v5179_v20 = vld [vmem:[%s8169_s3 + $0x18] sm:$0xff]  ;;  %vm8251_vm3 = vcmp.lt.s32.totalorder %v4988_v8, 123 }
 0x26d   :  { %1469 = vmatmul.f32.vlgmr.msra.gmra.mxu2 %v5155_v55  ;;  %1749 = vrot.lane.b32.xlu0 %v4952_v53, %s4276_s10  ;;  %8344 = vst [vmem:[#allocation79_spill] sm:$0xff] %v5179_v20  ;;  %v1211_v58 = vsel %vm8251_vm3, %v4904_v25, %v4878_v12 }
 0x26e   :  { %1771 = vrot.lane.b32.xlu2 %v4982_v15, %s4278_s12  ;;  %1769 = vrot.lane.b32.xlu1 %v4952_v53, %s4278_s12 }
 0x26f   :  { %v5170_v44 = vpop.permute.xlu2 %1281  ;;  %v5172_v45 = vpop.permute.xlu0 %1158 }
 0x270   :  { %v5174_v3 = vpop.permute.xlu1 %1208  ;;  %v1162_v33 = vsel %vm1160_vm15, %v5019_v22, %v5172_v45 }
 0x275   :  { %1472 = vmatmul.f32.gmra.mxu2 %v5179_v20  ;;  %1767 = vrot.lane.b32.xlu0 %v4968_v7, %s4278_s12 }
 0x276   :  { %1789 = vrot.lane.b32.xlu2 %v4952_v53, %s4277_s11  ;;  %1787 = vrot.lane.b32.xlu1 %v4968_v7, %s4277_s11 }
 0x277   :  { %v5188_v55 = vpop.permute.xlu2 %1304  ;;  %v5191_v42 = vpop.permute.xlu0 %1204 }
 0x278   :  { %v5193_v27 = vpop.permute.xlu1 %1254  ;;  %v1212_v20 = vsel %vm8251_vm3, %v5191_v42, %v5174_v3 }
 0x279   :  { %3895 = vmatpush.msk.msra.mxu3 %vm8251_vm3, %v1212_v20 }
 0x27b   :  { %3896 = vmatpush.msk.msra.mxu3 %vm8251_vm3, %v1211_v58  ;;  %v1186_v58 = vsel %vm1185_vm1, %v4860_v4, %v4888_v61  ;;  %v1161_v61 = vsel %vm1160_vm15, %v4876_v63, %v4892_v5 }
 0x27d   :  { %1785 = vrot.lane.b32.xlu0 %v4954_v52, %s4277_s11  ;;  %3897 = vmatpush.msk.msra.mxu3 %vm1185_vm1, %v1187_v28 }
 0x27e   :  { %1807 = vrot.lane.b32.xlu2 %v4968_v7, %s4279_s13  ;;  %1805 = vrot.lane.b32.xlu1 %v4954_v52, %s4279_s13 }
 0x27f   :  { %v5224_v20 = vpop.permute.xlu2 %1327  ;;  %v5226_v50 = vpop.permute.xlu0 %1233  ;;  %3898 = vmatpush.msk.msra.mxu3 %vm1185_vm1, %v1186_v58  ;;  %v1137_v58 = vsel %vm1135_vm13, %v5134_v54, %v5103_v41  ;;  %v1110_v54 = vsel %vm8230_vm11, %v5063_v17, %v4992_v48 }
 0x280   :  { %v5231_v28 = vpop.permute.xlu1 %1277 }
 0x281   :  { %3899 = vmatpush.msk.msra.mxu3 %vm1160_vm15, %v1162_v33 }
 0x283   :  { %3900 = vmatpush.msk.msra.mxu3 %vm1160_vm15, %v1161_v61  ;;  %v1136_v61 = vsel %vm1135_vm13, %v4880_v13, %v4842_v49  ;;  %v1109_v49 = vsel %vm8230_vm11, %v4830_v11, %v4858_v0  ;;  %v1082_v11 = vsel %vm8233_vm7, %v4865_v26, %v4840_v30 }
 0x285   :  { %1791 = vrot.lane.b32.xlu0 %v4982_v15, %s4277_s11  ;;  %3901 = vmatpush.msk.msra.mxu3 %vm1135_vm13, %v1137_v58 }
 0x286   :  { %1825 = vrot.lane.b32.xlu2 %v4954_v52, %s4281_s15  ;;  %1811 = vrot.lane.b32.xlu1 %v4982_v15, %s4279_s13 }
 0x287   :  { %v5262_v33 = vpop.permute.xlu2 %1333  ;;  %v5264_v41 = vpop.permute.xlu0 %1279  ;;  %3902 = vmatpush.msk.msra.mxu3 %vm1135_vm13, %v1136_v61 }
 0x288   :  { %v5269_v58 = vpop.permute.xlu1 %1283 }
 0x289   :  { %3903 = vmatpush.msk.msra.mxu3 %vm8230_vm11, %v1110_v54  ;;  %v811_v54 = vadd.s32 128, %v4988_v8 }
 0x28b   :  { %3904 = vmatpush.msk.msra.mxu3 %vm8230_vm11, %v1109_v49  ;;  %vm1054_vm11 = vcmp.lt.s32.totalorder %v4988_v8, 2 }
 0x28d   :  { %1809 = vrot.lane.b32.xlu0 %v4952_v53, %s4279_s13  ;;  %1486 = vmatpush.msra.mxu3 %v4734_v16  ;;  %v1083_v16 = vsel %vm8233_vm7, %v5094_v37, %v4976_v39 }
 0x28e   :  { %1831 = vrot.lane.b32.xlu2 %v4982_v15, %s4281_s15  ;;  %1829 = vrot.lane.b32.xlu1 %v4952_v53, %s4281_s15 }
 0x28f   :  { %v5292_v61 = vpop.permute.xlu0 %1302  ;;  %v5294_v0 = vpop.permute.xlu2 %1669  ;;  %1487 = vmatpush.msra.mxu3 %v4644_v46  ;;  %v5311_v46 = vand.u32 127, %v811_v54  ;;  %v5327_v54 = vld [vmem:[%s8169_s3 + $0x8] sm:$0xff] }
 0x290   :  { %8345 = vst [vmem:[#allocation80_spill] sm:$0xff] %v5294_v0  ;;  %v5298_v49 = vpop.permute.xlu1 %1306  ;;  %v1058_v0 = vsel %vm1054_vm11, %v5024_v57, %v5054_v62 }
 0x291   :  { %3905 = vmatpush.msk.msra.mxu3 %vm8232_vm9, %v1083_v16  ;;  %vm8238_vm7 = vcmp.ge.s32.totalorder %v5311_v46, 3 }
 0x293   :  { %3906 = vmatpush.msk.msra.mxu3 %vm8232_vm9, %v1082_v11  ;;  %v1057_v11 = vsel %vm1054_vm11, %v4818_v32, %v4847_v1  ;;  %vm8255_vm9 = vcmp.lt.s32.totalorder %v4988_v8, 118  ;;  %v1031_v1 = vsel %vm8249_vm6, %v4997_v21, %v4960_v31 }
 0x295   :  { %1827 = vrot.lane.b32.xlu0 %v4968_v7, %s4281_s15  ;;  %3907 = vmatpush.msk.msra.mxu3 %vm8237_vm5, %v1058_v0 }
 0x296   :  { %1849 = vrot.lane.b32.xlu2 %v4952_v53, %s4280_s14  ;;  %1847 = vrot.lane.b32.xlu1 %v4968_v7, %s4280_s14 }
 0x297   :  { %v5339_v0 = vpop.permute.xlu0 %1308  ;;  %v5341_v16 = vpop.permute.xlu2 %1687  ;;  %3908 = vmatpush.msk.msra.mxu3 %vm8237_vm5, %v1057_v11  ;;  %v1030_v11 = vsel %vm8249_vm6, %v4806_v51, %v4828_v34  ;;  %vm8239_vm5 = vcmp.ge.s32.totalorder %v5311_v46, 4  ;;  %v5378_v34 = vld [vmem:[%s8169_s3 + $0x20] sm:$0xff]  ;;  %v1005_v51 = vsel %vm8240_vm8, %v4816_v35, %v4832_v9  ;;  %v980_v35 = vsel %vm8242_vm10, %v4820_v43, %v4794_v36 }
 0x298   :  { %8346 = vst [vmem:[#allocation81_spill] sm:$0xff] %v5341_v16  ;;  %v5345_v62 = vpop.permute.xlu1 %1329  ;;  %1492 = vmatmul.f32.vlgmr.msra.gmra.mxu3 %v5327_v54  ;;  %vm8253_vm6 = vcmp.ge.s32.totalorder %v5311_v46, 10 }
 0x299   :  { %3919 = vmatpush.msk.msrb.mxu3 %vm8238_vm7, %v1031_v1  ;;  %v1337_v16 = vsel %vm8255_vm9, %v5345_v62, %v5262_v33  ;;  %v1006_v1 = vsel %vm8240_vm8, %v4941_v10, %v5021_v24  ;;  %v981_v24 = vsel %vm8242_vm10, %v4994_v19, %v4980_v2  ;;  %vm8243_vm8 = vcmp.ge.s32.totalorder %v5311_v46, 6 }
 0x29a   :  { %3909 = vmatpush.msk.msrb.mxu2 %vm8255_vm9, %v1337_v16  ;;  %v956_v19 = vsel %vm8244_vm12, %v4964_v14, %v4924_v47  ;;  %v955_v47 = vsel %vm8244_vm12, %v4782_v29, %v4804_v18  ;;  %vm8265_vm10 = vcmp.lt.s32.totalorder %v4988_v8, 120  ;;  %v8347_v29 = vld [vmem:[#allocation67_spill] sm:$0xff]  ;;  %vm8261_vm12 = vcmp.lt.s32.totalorder %v4988_v8, 121 }
 0x29b   :  { %3920 = vmatpush.msk.msrb.mxu3 %vm8238_vm7, %v1030_v11  ;;  %vm8241_vm7 = vcmp.ge.s32.totalorder %v5311_v46, 5  ;;  %v1287_v16 = vsel %vm8265_vm10, %v5264_v41, %v5269_v58  ;;  %v931_v11 = vsel %vm8246_vm14, %v8347_v29, %v4978_v6  ;;  %v1262_v6 = vsel %vm8261_vm12, %v5193_v27, %v5132_v56 }
 0x29d   :  { %3921 = vmatpush.msk.msrb.mxu3 %vm8239_vm5, %v1006_v1  ;;  %1845 = vrot.lane.b32.xlu0 %v4954_v52, %s4280_s14  ;;  %v1286_v1 = vsel %vm8265_vm10, %v5231_v28, %v5170_v44 }
 0x29e   :  { %1871 = vrot.lane.b32.xlu2 %v4968_v7, %s4282_s16  ;;  %1869 = vrot.lane.b32.xlu1 %v4954_v52, %s4282_s16 }
 0x29f   :  { %3922 = vmatpush.msk.msrb.mxu3 %vm8239_vm5, %v1005_v51  ;;  %v5391_v10 = vpop.permute.xlu0 %1331  ;;  %v5393_v31 = vpop.permute.xlu2 %1705  ;;  %vm8257_vm5 = vcmp.lt.s32.totalorder %v4988_v8, 119  ;;  %v930_v51 = vsel %vm8246_vm14, %v4792_v40, %v4808_v38  ;;  %v906_v40 = vsel %vm8248_vm0, %v4962_v23, %v4945_v59  ;;  %v8348_v38 = vld [vmem:[#allocation66_spill] sm:$0xff]  ;;  %v8350_v59 = vld [vmem:[#allocation57_spill] sm:$0xff]  ;;  %vm8250_vm14 = vcmp.ge.s32.totalorder %v5311_v46, 9 }
 0x2a0   :  { %v5395_v21 = vpop.permute.xlu1 %1438  ;;  %1495 = vmatmul.f32.gmra.mxu3 %v5378_v34  ;;  %v1336_v9 = vsel %vm8255_vm9, %v5224_v20, %v5391_v10  ;;  %v1312_v2 = vsel %vm8257_vm5, %v5188_v55, %v5339_v0  ;;  %v1311_v36 = vsel %vm8257_vm5, %v5292_v61, %v5298_v49  ;;  %v905_v23 = vsel %vm8248_vm0, %v8350_v59, %v4770_v60  ;;  %v8352_v60 = vld [vmem:[#allocation65_spill] sm:$0xff] }
 0x2a1   :  { %3923 = vmatpush.msk.msrb.mxu3 %vm8241_vm7, %v981_v24  ;;  %3910 = vmatpush.msk.msrb.mxu2 %vm8255_vm9, %v1336_v9  ;;  %v8349_v24 = vld [vmem:[#allocation63_spill] sm:$0xff]  ;;  %vm8252_vm0 = vcmp.lt.s32.totalorder %v5311_v46, 123 }
 0x2a2   :  { %v1261_v9 = vsel %vm8261_vm12, %v8349_v24, %v8348_v38 }
 0x2a3   :  { %3924 = vmatpush.msk.msrb.mxu3 %vm8241_vm7, %v980_v35  ;;  %3911 = vmatpush.msk.msrb.mxu2 %vm8257_vm5, %v1312_v2  ;;  %vm8245_vm7 = vcmp.ge.s32.totalorder %v5311_v46, 7 }
 0x2a5   :  { %3925 = vmatpush.msk.msrb.mxu3 %vm8243_vm8, %v956_v19  ;;  %1851 = vrot.lane.b32.xlu0 %v4982_v15, %s4280_s14  ;;  %v8351_v19 = vld [vmem:[#allocation74_spill] sm:$0xff] }
 0x2a6   :  { %1889 = vrot.lane.b32.xlu2 %v4954_v52, %s4284_s18  ;;  %1875 = vrot.lane.b32.xlu1 %v4982_v15, %s4282_s16 }
 0x2a7   :  { %3912 = vmatpush.msk.msrb.mxu2 %vm8257_vm5, %v1311_v36  ;;  %3926 = vmatpush.msk.msrb.mxu3 %vm8243_vm8, %v955_v47  ;;  %v5449_v43 = vpop.permute.xlu0 %1443  ;;  %v5451_v14 = vpop.permute.xlu2 %1711  ;;  %vm8247_vm8 = vcmp.ge.s32.totalorder %v5311_v46, 8 }
 0x2a8   :  { %v5458_v18 = vpop.permute.xlu1 %1665 }
 0x2a9   :  { %3913 = vmatpush.msk.msrb.mxu2 %vm8265_vm10, %v1287_v16  ;;  %3927 = vmatpush.msk.msrb.mxu3 %vm8245_vm7, %v931_v11  ;;  %v8353_v16 = vld [vmem:[#allocation70_spill] sm:$0xff]  ;;  %v5533_v11 = vld [vmem:[%s8169_s3 + $0x10] sm:$0xff] }
 0x2aa   :  { %v881_v29 = vsel %vm879_vm2, %v8353_v16, %v8352_v60  ;;  %v8359_v60 = vld [vmem:[#allocation69_spill] sm:$0xff] }
 0x2ab   :  { %3914 = vmatpush.msk.msrb.mxu2 %vm8265_vm10, %v1286_v1  ;;  %3928 = vmatpush.msk.msrb.mxu3 %vm8245_vm7, %v930_v51  ;;  %vm8264_vm7 = vcmp.lt.s32.totalorder %v4988_v8, 122  ;;  %v8354_v1 = vld [vmem:[#allocation68_spill] sm:$0xff] }
 0x2ac   :  { %v1237_v36 = vsel %vm8264_vm7, %v8351_v19, %v5226_v50  ;;  %v8355_v51 = vld [vmem:[#allocation64_spill] sm:$0xff] }
 0x2ad   :  { %3915 = vmatpush.msk.msrb.mxu2 %vm8261_vm12, %v1262_v6  ;;  %3929 = vmatpush.msk.msrb.mxu3 %vm8247_vm8, %v906_v40  ;;  %v1236_v6 = vsel %vm8264_vm7, %v8355_v51, %v8354_v1  ;;  %v8356_v40 = vld [vmem:[#allocation55_spill] sm:$0xff] }
 0x2ae   :  { %1873 = vrot.lane.b32.xlu0 %v4952_v53, %s4282_s16  ;;  %1895 = vrot.lane.b32.xlu2 %v4982_v15, %s4284_s18 }
 0x2af   :  { %1893 = vrot.lane.b32.xlu1 %v4952_v53, %s4284_s18  ;;  %3916 = vmatpush.msk.msrb.mxu2 %vm8261_vm12, %v1261_v9  ;;  %v5510_v35 = vpop.permute.xlu0 %1667  ;;  %v5512_v2 = vpop.permute.xlu2 %1729  ;;  %v8357_v9 = vld [vmem:[#allocation51_spill] sm:$0xff] }
 0x2b0   :  { %3930 = vmatpush.msk.msrb.mxu3 %vm8247_vm8, %v905_v23  ;;  %v5522_v47 = vpop.permute.xlu1 %1685  ;;  %vm8263_vm8 = vcmask 654336   ;;  %v880_v59 = vsel %vm879_vm2, %v8357_v9, %v8356_v40  ;;  %v1214_v23 = vsel %vm8251_vm3, %v5174_v3, %v5191_v42  ;;  %v1213_v42 = vsel %vm8251_vm3, %v4878_v12, %v4904_v25  ;;  %v8360_v3 = vld [vmem:[#allocation56_spill] sm:$0xff]  ;;  %v8362_v25 = vld [vmem:[#allocation77_spill] sm:$0xff] }
 0x2b1   :  { %3917 = vmatpush.msk.msrb.mxu2 %vm8264_vm7, %v1237_v36  ;;  %v8358_v36 = vld [vmem:[#allocation71_spill] sm:$0xff]  ;;  %vm8254_vm3 = vcmp.lt.s32.totalorder %v5311_v46, 118  ;;  %v8363_v12 = vld [vmem:[#allocation72_spill] sm:$0xff] }
 0x2b2   :  { %3931 = vmatpush.msk.msrb.mxu3 %vm8250_vm14, %v881_v29  ;;  %v854_v16 = vsel %vm8267_vm4, %v8359_v60, %v8358_v36  ;;  %v8361_v29 = vld [vmem:[#allocation48_spill] sm:$0xff]  ;;  %v1339_v36 = vsel %vm8255_vm9, %v5262_v33, %v5345_v62  ;;  %v8364_v60 = vld [vmem:[#allocation78_spill] sm:$0xff]  ;;  %v1338_v62 = vsel %vm8255_vm9, %v5391_v10, %v5224_v20  ;;  %v1314_v20 = vsel %vm8257_vm5, %v5339_v0, %v5188_v55 }
 0x2b3   :  { %3918 = vmatpush.msk.msrb.mxu2 %vm8264_vm7, %v1236_v6  ;;  %v853_v6 = vsel %vm8267_vm4, %v8361_v29, %v8360_v3  ;;  %v1163_v33 = vsel %vm1160_vm15, %v4892_v5, %v4876_v63  ;;  %vm8259_vm9 = vcmp.lt.s32.totalorder %v5311_v46, 120  ;;  %v8366_v63 = vld [vmem:[#allocation76_spill] sm:$0xff]  ;;  %v8367_v5 = vld [vmem:[#allocation75_spill] sm:$0xff] }
 0x2b4   :  { %3839 = vmatmul.msk.f32.vlgmr.msrb.gmra.mxu2 %vm8263_vm8, %v5533_v11  ;;  %3932 = vmatpush.msk.msrb.mxu3 %vm8250_vm14, %v880_v59  ;;  %vm1191_vm14 = vcmp.lt.s32.totalorder %v5311_v46, 124  ;;  %v1189_v59 = vsel %vm1185_vm1, %v8363_v12, %v8362_v25  ;;  %v1139_v0 = vsel %vm1135_vm13, %v8367_v5, %v8366_v63  ;;  %v8369_v29 = vld [vmem:[#allocation59_spill] sm:$0xff]  ;;  %v1288_v25 = vsel %vm8265_vm10, %v5170_v44, %v5231_v28  ;;  %v8371_v44 = vld [vmem:[#allocation58_spill] sm:$0xff]  ;;  %v8372_v28 = vld [vmem:[#allocation61_spill] sm:$0xff] }
 0x2b5   :  { %3935 = vmatpush.msk.msra.mxu2 %vm8252_vm0, %v1214_v23  ;;  %v8374_v12 = vld [vmem:[#allocation49_spill] sm:$0xff] }
 0x2b6   :  { %3933 = vmatpush.msk.msrb.mxu3 %vm8253_vm6, %v854_v16  ;;  %1891 = vrot.lane.b32.xlu0 %v4968_v7, %s4284_s18  ;;  %v5605_v16 = vld [vmem:[%s8169_s3 + $0x28] sm:$0xff] }
 0x2b7   :  { %3936 = vmatpush.msk.msra.mxu2 %vm8252_vm0, %v1213_v42  ;;  %1913 = vrot.lane.b32.xlu2 %v4952_v53, %s4283_s17  ;;  %v5580_v40 = vpop.permute.xlu0 %1671  ;;  %v5582_v9 = vpop.permute.xlu2 %1747  ;;  %v8365_v42 = vld [vmem:[#allocation62_spill] sm:$0xff]  ;;  %vm8258_vm0 = vcmp.lt.s32.totalorder %v5311_v46, 125 }
 0x2b8   :  { %1911 = vrot.lane.b32.xlu1 %v4968_v7, %s4283_s17  ;;  %3934 = vmatpush.msk.msrb.mxu3 %vm8253_vm6, %v853_v6  ;;  %v5593_v23 = vpop.permute.xlu1 %1691  ;;  %v1188_v3 = vsel %vm1185_vm1, %v8365_v42, %v4860_v4  ;;  %vm8256_vm6 = vcmp.lt.s32.totalorder %v5311_v46, 119  ;;  %v1164_v4 = vsel %vm1160_vm15, %v5172_v45, %v5019_v22  ;;  %v1313_v45 = vsel %vm8257_vm5, %v5298_v49, %v5292_v61  ;;  %v8368_v61 = vld [vmem:[#allocation79_spill] sm:$0xff] }
 0x2b9   :  { %3937 = vmatpush.msk.msra.mxu2 %vm1191_vm14, %v1189_v59  ;;  %1538 = vmatmul.f32.vlgmr.msrb.gmra.mxu3 %v8364_v60  ;;  %v1289_v49 = vsel %vm8265_vm10, %v5269_v58, %v5264_v41  ;;  %v1138_v6 = vsel %vm1135_vm13, %v8369_v29, %v4880_v13  ;;  %vm8260_vm5 = vcmp.lt.s32.totalorder %v5311_v46, 121  ;;  %v1264_v13 = vsel %vm8261_vm12, %v5132_v56, %v5193_v27 }
 0x2ba   :  { %3949 = vmatpush.msk.msra.mxu3 %vm8254_vm3, %v1339_v36  ;;  %v1263_v27 = vsel %vm8261_vm12, %v8348_v38, %v8349_v24  ;;  %v1239_v38 = vsel %vm8264_vm7, %v5226_v50, %v8351_v19  ;;  %v8375_v24 = vld [vmem:[#allocation40_spill] sm:$0xff]  ;;  %v1238_v59 = vsel %vm8264_vm7, %v8354_v1, %v8355_v51  ;;  %vm8383_vm7 = vcmp.ge.s32.totalorder %v5311_v46, 3 }
 0x2bb   :  { %3938 = vmatpush.msk.msra.mxu2 %vm1191_vm14, %v1188_v3  ;;  %v8379_v1 = vld [vmem:[#allocation60_spill] sm:$0xff]  ;;  %vm8387_vm10 = vcmp.lt.s32.totalorder %v4988_v8, 4 }
 0x2bc   :  { %3950 = vmatpush.msk.msra.mxu3 %vm8254_vm3, %v1338_v62  ;;  %3840 = vmatmul.msk.f32.gmra.mxu2 %vm8263_vm8, %v5605_v16  ;;  %vm1141_vm3 = vcmp.lt.s32.totalorder %v5311_v46, 126  ;;  %v1055_v51 = vsel %vm1054_vm11, %v8379_v1, %v4818_v32 }
 0x2bd   :  { %3939 = vmatpush.msk.msra.mxu2 %vm8258_vm0, %v1164_v4 }
 0x2be   :  { %3951 = vmatpush.msk.msra.mxu3 %vm8256_vm6, %v1314_v20  ;;  %1909 = vrot.lane.b32.xlu0 %v4954_v52, %s4283_s17 }
 0x2bf   :  { %3940 = vmatpush.msk.msra.mxu2 %vm8258_vm0, %v1163_v33  ;;  %1931 = vrot.lane.b32.xlu2 %v4968_v7, %s4285_s19  ;;  %v5652_v55 = vpop.permute.xlu0 %1689  ;;  %v5654_v22 = vpop.permute.xlu2 %1765  ;;  %vm8370_vm0 = vcmp.lt.s32.totalorder %v4988_v8, 127 }
 0x2c0   :  { %1929 = vrot.lane.b32.xlu1 %v4954_v52, %s4285_s19  ;;  %3952 = vmatpush.msk.msra.mxu3 %vm8256_vm6, %v1313_v45  ;;  %v5665_v10 = vpop.permute.xlu1 %1709  ;;  %vm1116_vm6 = vcmp.lt.s32.totalorder %v5311_v46, 127  ;;  %v1112_v41 = vsel %vm8370_vm0, %v4992_v48, %v5063_v17 }
 0x2c1   :  { %3941 = vmatpush.msk.msra.mxu2 %vm1141_vm3, %v1139_v0  ;;  %1541 = vmatmul.f32.gmra.mxu3 %v8368_v61 }
 0x2c2   :  { %3953 = vmatpush.msk.msra.mxu3 %vm8259_vm9, %v1289_v49 }
 0x2c3   :  { %3942 = vmatpush.msk.msra.mxu2 %vm1141_vm3, %v1138_v6 }
 0x2c4   :  { %3954 = vmatpush.msk.msra.mxu3 %vm8259_vm9, %v1288_v25  ;;  %vm8373_vm9 = vmmov %vm8370_vm0  ;;  %vm8262_vm0 = vcmp.lt.s32.totalorder %v5311_v46, 122 }
 0x2c5   :  { %3943 = vmatpush.msk.msra.mxu2 %vm1116_vm6, %v1112_v41  ;;  %v1111_v58 = vsel %vm8373_vm9, %v8372_v28, %v8371_v44  ;;  %vm1085_vm9 = vcmp.ge.s32.totalorder %v5311_v46, 1 }
 0x2c6   :  { %3955 = vmatpush.msk.msra.mxu3 %vm8260_vm5, %v1264_v13  ;;  %1915 = vrot.lane.b32.xlu0 %v4982_v15, %s4283_s17  ;;  %v3849_v13 = vld [vmem:[%s8168_s4 + $0x10] sm:$0xff] }
 0x2c7   :  { %3944 = vmatpush.msk.msra.mxu2 %vm1116_vm6, %v1111_v58  ;;  %1949 = vrot.lane.b32.xlu2 %v4954_v52, %s4287_s20  ;;  %v5716_v17 = vpop.permute.xlu0 %1707 }
 0x2c8   :  { %1935 = vrot.lane.b32.xlu1 %v4982_v15, %s4285_s19  ;;  %3956 = vmatpush.msk.msra.mxu3 %vm8260_vm5, %v1263_v27  ;;  %v5723_v48 = vpop.permute.xlu2 %1771  ;;  %v5725_v56 = vpop.permute.xlu1 %1727  ;;  %vm8376_vm5 = vcmp.lt.s32.totalorder %v4988_v8, 1 }
 0x2c9   :  { %1555 = vmatpush.msra.mxu2 %v8374_v12  ;;  %v1081_v50 = vsel %vm8376_vm5, %v4976_v39, %v5094_v37  ;;  %vm8377_vm12 = vmmov %vm8376_vm5  ;;  %v8378_v37 = vld [vmem:[#allocation73_spill] sm:$0xff]  ;;  %vm8380_vm5 = vcmp.lt.s32.totalorder %v4988_v8, 3 }
 0x2ca   :  { %3957 = vmatpush.msk.msra.mxu3 %vm8262_vm0, %v1239_v38  ;;  %v1080_v19 = vsel %vm8377_vm12, %v4840_v30, %v4865_v26  ;;  %v1056_v26 = vsel %vm1054_vm11, %v8378_v37, %v5024_v57  ;;  %vm8381_vm12 = vmmov %vm8380_vm5 }
 0x2cb   :  { %1556 = vmatpush.msra.mxu2 %v8375_v24 }
 0x2cc   :  { %3958 = vmatpush.msk.msra.mxu3 %vm8262_vm0, %v1238_v59  ;;  %vm8266_vm0 = vcmp.ge.s32.totalorder %v5311_v46, 2 }
 0x2cd   :  { %3945 = vmatpush.msk.msra.mxu2 %vm1085_vm9, %v1081_v50  ;;  %3841 = vmatmul.msk.f32.vlgmr.msra.gmra.mxu3 %vm8263_vm8, %v5533_v11 }
 0x2ce   :  { %1933 = vrot.lane.b32.xlu0 %v4952_v53, %s4285_s19 }
 0x2cf   :  { %3946 = vmatpush.msk.msra.mxu2 %vm1085_vm9, %v1080_v19  ;;  %1955 = vrot.lane.b32.xlu2 %v4982_v15, %s4287_s20  ;;  %v5761_v39 = vpop.permute.xlu0 %1725 }
 0x2d0   :  { %1953 = vrot.lane.b32.xlu1 %v4952_v53, %s4287_s20  ;;  %v1790_v30 = vpop.permute.xlu2 %1789  ;;  %v5769_v11 = vpop.permute.xlu1 %1745 }
 0x2d1   :  { %3947 = vmatpush.msk.msra.mxu2 %vm8266_vm0, %v1056_v26 }
 0x2d3   :  { %3948 = vmatpush.msk.msra.mxu2 %vm8266_vm0, %v1055_v51  ;;  %vm8388_vm0 = vmmov %vm8387_vm10 }
 0x2d4   :  { %1561 = vmatmul.f32.vlgmr.msra.gmra.mxu2 %v5327_v54 }
 0x2d5   :  { %3842 = vmatmul.msk.f32.gmra.mxu3 %vm8263_vm8, %v5605_v16  ;;  %vm8382_vm8 = vcmp.ge.s32.totalorder %v4988_v8, 3 }
 0x2d6   :  { %1951 = vrot.lane.b32.xlu0 %v4968_v7, %s4287_s20 }
 0x2d7   :  { %1973 = vrot.lane.b32.xlu2 %v4952_v53, %s4286_s2  ;;  %v5786_v57 = vpop.permute.xlu0 %1731 }
 0x2d8   :  { %1971 = vrot.lane.b32.xlu1 %v4968_v7, %s4286_s2  ;;  %v5790_v32 = vpop.permute.xlu1 %1751  ;;  %v1808_v36 = vpop.permute.xlu2 %1807 }
 0x2dc   :  { %1564 = vmatmul.f32.gmra.mxu2 %v5378_v34 }
 0x2de   :  { %1969 = vrot.lane.b32.xlu0 %v4954_v52, %s4286_s2 }
 0x2df   :  { %1991 = vrot.lane.b32.xlu2 %v4968_v7, %s4288_s21  ;;  %v5797_v54 = vpop.permute.xlu0 %1749 }
 0x2e0   :  { %1989 = vrot.lane.b32.xlu1 %v4954_v52, %s4288_s21  ;;  %v1770_v60 = vpop.permute.xlu1 %1769  ;;  %v5801_v16 = vpop.permute.xlu2 %1825 }
 0x2e6   :  { %1975 = vrot.lane.b32.xlu0 %v4982_v15, %s4286_s2 }
 0x2e7   :  { %2009 = vrot.lane.b32.xlu2 %v4954_v52, %s4289_s22  ;;  %v1768_v34 = vpop.permute.xlu0 %1767 }
 0x2e8   :  { %1995 = vrot.lane.b32.xlu1 %v4982_v15, %s4288_s21  ;;  %v1788_v42 = vpop.permute.xlu1 %1787  ;;  %v5809_v3 = vpop.permute.xlu2 %1831 }
 0x2ee   :  { %1993 = vrot.lane.b32.xlu0 %v4952_v53, %s4288_s21 }
 0x2ef   :  { %2015 = vrot.lane.b32.xlu2 %v4982_v15, %s4289_s22  ;;  %v1786_v62 = vpop.permute.xlu0 %1785 }
 0x2f0   :  { %2013 = vrot.lane.b32.xlu1 %v4952_v53, %s4289_s22  ;;  %v1806_v4 = vpop.permute.xlu1 %1805  ;;  %v5821_v33 = vpop.permute.xlu2 %1849 }
 0x2f6   :  { %2011 = vrot.lane.b32.xlu0 %v4968_v7, %s4289_s22 }
 0x2f7   :  { %2033 = vrot.lane.b32.xlu2 %v4952_v53, %s4290_s23  ;;  %v1792_v20 = vpop.permute.xlu0 %1791 }
 0x2f8   :  { %2031 = vrot.lane.b32.xlu1 %v4968_v7, %s4290_s23  ;;  %v1812_v45 = vpop.permute.xlu1 %1811  ;;  %v5849_v6 = vpop.permute.xlu2 %1871  ;;  %v1796_v25 = vsel %vm8387_vm10, %v1792_v20, %v1788_v42  ;;  %v1794_v41 = vsel %vm8388_vm0, %v1788_v42, %v1792_v20 }
 0x2f9   :  { %v1816_v63 = vsel %vm8380_vm5, %v1812_v45, %v1808_v36  ;;  %v1814_v5 = vsel %vm8381_vm12, %v1808_v36, %v1812_v45  ;;  %vm8384_vm12 = vmmov %vm8380_vm5 }
 0x2fa   :  { %3959 = vmatpush.msk.msrb.mxu2 %vm8382_vm8, %v1816_v63  ;;  %3999 = vmatpush.msk.msrb.mxu1 %vm8383_vm7, %v1814_v5  ;;  %vm8385_vm7 = vmmov %vm8382_vm8  ;;  %vm8386_vm8 = vcmp.ge.s32.totalorder %v5311_v46, 3 }
 0x2fe   :  { %2029 = vrot.lane.b32.xlu0 %v4954_v52, %s4290_s23 }
 0x2ff   :  { %2051 = vrot.lane.b32.xlu2 %v4968_v7, %s4291_s24  ;;  %v1810_v0 = vpop.permute.xlu0 %1809 }
 0x300   :  { %2049 = vrot.lane.b32.xlu1 %v4954_v52, %s4291_s24  ;;  %v1815_v61 = vsel %vm8380_vm5, %v1810_v0, %v1806_v4  ;;  %v1813_v49 = vsel %vm8384_vm12, %v1806_v4, %v1810_v0  ;;  %v5843_v29 = vpop.permute.xlu1 %1829  ;;  %vm8389_vm5 = vcmp.ge.s32.totalorder %v4988_v8, 4  ;;  %vm8390_vm12 = vcmp.ge.s32.totalorder %v5311_v46, 4  ;;  %v5908_v19 = vpop.permute.xlu2 %1889 }
 0x301   :  { %3960 = vmatpush.msk.msrb.mxu2 %vm8385_vm7, %v1815_v61  ;;  %4000 = vmatpush.msk.msrb.mxu1 %vm8386_vm8, %v1813_v49  ;;  %vm8391_vm7 = vmmov %vm8388_vm0  ;;  %v1470_v49 = vpop.f32.mrf.mxu2 }
 0x302   :  { %v1795_v44 = vsel %vm8391_vm7, %v1790_v30, %v1786_v62  ;;  %vm8392_vm8 = vmmov %vm8388_vm0 }
 0x303   :  { %3961 = vmatpush.msk.msrb.mxu2 %vm8389_vm5, %v1796_v25  ;;  %4001 = vmatpush.msk.msrb.mxu1 %vm8390_vm12, %v1794_v41  ;;  %v1793_v28 = vsel %vm8392_vm8, %v1786_v62, %v1790_v30  ;;  %vm8393_vm10 = vmmov %vm8389_vm5  ;;  %vm8395_vm5 = vcmp.lt.s32.totalorder %v4988_v8, 5  ;;  %vm8398_vm8 = vcmp.ge.s32.totalorder %v5311_v46, 5 }
 0x304   :  { %vm8394_vm0 = vmmov %vm8390_vm12  ;;  %v1776_v58 = vsel %vm8395_vm5, %v5723_v48, %v1768_v34  ;;  %vm8396_vm12 = vcmp.ge.s32.totalorder %v4988_v8, 5  ;;  %v1773_v59 = vsel %vm8395_vm5, %v5654_v22, %v1770_v60 }
 0x305   :  { %3962 = vmatpush.msk.msrb.mxu2 %vm8393_vm10, %v1795_v44  ;;  %4002 = vmatpush.msk.msrb.mxu1 %vm8394_vm0, %v1793_v28  ;;  %vm8397_vm7 = vmmov %vm8395_vm5 }
 0x306   :  { %2035 = vrot.lane.b32.xlu0 %v4982_v15, %s4290_s23  ;;  %v1774_v12 = vsel %vm8397_vm7, %v1768_v34, %v5723_v48  ;;  %vm8399_vm10 = vmmov %vm8395_vm5  ;;  %vm8402_vm7 = vcmp.lt.s32.totalorder %v4988_v8, 6  ;;  %v1674_v34 = vsel %vm8267_vm4, %v5510_v35, %v5580_v40 }
 0x307   :  { %2155 = vperm.xlu2 %4222, %v3849_v13   ;;  %v5875_v27 = vpop.permute.xlu0 %1827  ;;  %3963 = vmatpush.msk.msrb.mxu2 %vm8396_vm12, %v1776_v58  ;;  %v1775_v38 = vsel %vm8399_vm10, %v1770_v60, %v5654_v22  ;;  %vm8400_vm0 = vmmov %vm8396_vm12  ;;  %v1756_v48 = vsel %vm8402_vm7, %v5790_v32, %v5582_v9  ;;  %v1693_v60 = vsel %vm879_vm2, %v5522_v47, %v5652_v55 }
 0x308   :  { %2055 = vrot.lane.b32.xlu1 %v4982_v15, %s4291_s24  ;;  %4003 = vmatpush.msk.msrb.mxu1 %vm8398_vm8, %v1774_v12  ;;  %v5889_v24 = vpop.permute.xlu1 %1847  ;;  %vm8401_vm12 = vmmov %vm8398_vm8  ;;  %vm8403_vm8 = vcmp.ge.s32.totalorder %v4988_v8, 6 }
 0x309   :  { %3964 = vmatpush.msk.msrb.mxu2 %vm8400_vm0, %v1775_v38  ;;  %vm8404_vm10 = vmmov %vm8402_vm7  ;;  %vm8405_vm0 = vcmp.ge.s32.totalorder %v5311_v46, 6  ;;  %v6041_v44 = vpop.f32.mrf.mxu2 }
 0x30a   :  { %4004 = vmatpush.msk.msrb.mxu1 %vm8401_vm12, %v1773_v59  ;;  %v1754_v50 = vsel %vm8404_vm10, %v5582_v9, %v5790_v32  ;;  %vm8406_vm5 = vmmov %vm8402_vm7  ;;  %vm8410_vm10 = vcmp.lt.s32.totalorder %v4988_v8, 7  ;;  %v5976_v32 = vpop.permute.xlu2 %1895  ;;  %v3846_v59 = vld [vmem:[%s8169_s3 + $0x48] sm:$0xff] }
 0x30b   :  { %3965 = vmatpush.msk.msrb.mxu2 %vm8403_vm8, %v1756_v48  ;;  %v1755_v22 = vsel %vm8406_vm5, %v5797_v54, %v5769_v11  ;;  %vm8407_vm12 = vmmov %vm8403_vm8  ;;  %v1736_v9 = vsel %vm8410_vm10, %v5786_v57, %v5725_v56 }
 0x30c   :  { %4005 = vmatpush.msk.msrb.mxu1 %vm8405_vm0, %v1754_v50  ;;  %vm8408_vm7 = vmmov %vm8406_vm5 }
 0x30d   :  { %3966 = vmatpush.msk.msrb.mxu2 %vm8407_vm12, %v1755_v22  ;;  %v1753_v37 = vsel %vm8408_vm7, %v5769_v11, %v5797_v54  ;;  %vm8409_vm8 = vmmov %vm8405_vm0  ;;  %vm8411_vm0 = vcmp.ge.s32.totalorder %v4988_v8, 7  ;;  %vm8413_vm12 = vcmp.ge.s32.totalorder %v5311_v46, 7 }
 0x30e   :  { %2053 = vrot.lane.b32.xlu0 %v4952_v53, %s4291_s24  ;;  %4006 = vmatpush.msk.msrb.mxu1 %vm8409_vm8, %v1753_v37  ;;  %vm8412_vm5 = vmmov %vm8410_vm10 }
 0x30f   :  { %v5930_v26 = vpop.permute.xlu0 %1845  ;;  %3967 = vmatpush.msk.msrb.mxu2 %vm8411_vm0, %v1736_v9  ;;  %v1734_v30 = vsel %vm8412_vm5, %v5725_v56, %v5786_v57  ;;  %vm8414_vm7 = vmmov %vm8412_vm5 }
 0x310   :  { %4007 = vmatpush.msk.msrb.mxu1 %vm8413_vm12, %v1734_v30  ;;  %v1735_v11 = vsel %vm8414_vm7, %v5512_v2, %v5761_v39  ;;  %v5944_v1 = vpop.permute.xlu1 %1869  ;;  %vm8415_vm8 = vmmov %vm8411_vm0 }
 0x311   :  { %3968 = vmatpush.msk.msrb.mxu2 %vm8415_vm8, %v1735_v11  ;;  %vm8416_vm10 = vmmov %vm8412_vm5  ;;  %vm8418_vm5 = vcmp.lt.s32.totalorder %v4988_v8, 8  ;;  %vm8421_vm8 = vcmp.ge.s32.totalorder %v5311_v46, 8 }
 0x312   :  { %v1733_v51 = vsel %vm8416_vm10, %v5761_v39, %v5512_v2  ;;  %vm8417_vm0 = vmmov %vm8413_vm12  ;;  %v1716_v56 = vsel %vm8418_vm5, %v5451_v14, %v5716_v17  ;;  %vm8419_vm12 = vcmp.ge.s32.totalorder %v4988_v8, 8  ;;  %v1713_v39 = vsel %vm8418_vm5, %v5393_v31, %v5665_v10 }
 0x313   :  { %4008 = vmatpush.msk.msrb.mxu1 %vm8417_vm0, %v1733_v51  ;;  %3969 = vmatpush.msk.msrb.mxu2 %vm8419_vm12, %v1716_v56  ;;  %vm8420_vm7 = vmmov %vm8418_vm5 }
 0x314   :  { %v1714_v57 = vsel %vm8420_vm7, %v5716_v17, %v5451_v14  ;;  %vm8422_vm10 = vmmov %vm8418_vm5  ;;  %v8425_v14 = vld [vmem:[#allocation81_spill] sm:$0xff]  ;;  %vm8426_vm7 = vcmp.ge.s32.totalorder %v4988_v8, 9  ;;  %vm8430_vm5 = vcmp.ge.s32.totalorder %v4988_v8, 10 }
 0x315   :  { %4009 = vmatpush.msk.msrb.mxu1 %vm8421_vm8, %v1714_v57  ;;  %v1715_v2 = vsel %vm8422_vm10, %v5665_v10, %v5393_v31  ;;  %vm8423_vm0 = vmmov %vm8419_vm12  ;;  %v1696_v17 = vsel %vm879_vm2, %v5593_v23, %v8425_v14  ;;  %v1694_v31 = vsel %vm879_vm2, %v8425_v14, %v5593_v23  ;;  %v1695_v10 = vsel %vm879_vm2, %v5652_v55, %v5522_v47  ;;  %v3843_v47 = vld [vmem:[%s8169_s3 + $0x30] sm:$0xff]  ;;  %v8432_v55 = vld [vmem:[#allocation80_spill] sm:$0xff] }
 0x316   :  { %3970 = vmatpush.msk.msrb.mxu2 %vm8423_vm0, %v1715_v2  ;;  %vm8424_vm12 = vmmov %vm8421_vm8  ;;  %vm8427_vm8 = vcmp.ge.s32.totalorder %v5311_v46, 9  ;;  %v1676_v23 = vsel %vm8267_vm4, %v5580_v40, %v5510_v35  ;;  %v1675_v42 = vsel %vm8267_vm4, %v8432_v55, %v5458_v18  ;;  %v1673_v35 = vsel %vm8267_vm4, %v5458_v18, %v8432_v55  ;;  %v1914_v40 = vpop.permute.xlu2 %1913 }
 0x317   :  { %4010 = vmatpush.msk.msrb.mxu1 %vm8424_vm12, %v1713_v39  ;;  %v5984_v36 = vpop.permute.xlu0 %1851  ;;  %vm8428_vm10 = vmmov %vm8426_vm7  ;;  %vm8431_vm12 = vcmp.ge.s32.totalorder %v5311_v46, 10 }
 0x318   :  { %3971 = vmatpush.msk.msrb.mxu2 %vm8426_vm7, %v1696_v17  ;;  %v5998_v54 = vpop.permute.xlu1 %1875  ;;  %vm8429_vm0 = vmmov %vm8427_vm8 }
 0x319   :  { %4011 = vmatpush.msk.msrb.mxu1 %vm8427_vm8, %v1694_v31  ;;  %vm8433_vm7 = vmmov %vm8430_vm5 }
 0x31a   :  { %3972 = vmatpush.msk.msrb.mxu2 %vm8428_vm10, %v1695_v10  ;;  %vm8434_vm8 = vmmov %vm8431_vm12  ;;  %vm8435_vm10 = vcmp.lt.s32.totalorder %v4988_v8, 123 }
 0x31b   :  { %4012 = vmatpush.msk.msrb.mxu1 %vm8429_vm0, %v1693_v60  ;;  %v1493_v0 = vpop.f32.mrf.mxu3  ;;  %vm8436_vm0 = vmmov %vm8435_vm10 }
 0x31c   :  { %3973 = vmatpush.msk.msrb.mxu2 %vm8430_vm5, %v1676_v23  ;;  %vm8437_vm5 = vmmov %vm8436_vm0 }
 0x31d   :  { %4013 = vmatpush.msk.msrb.mxu1 %vm8431_vm12, %v1674_v34  ;;  %vm8438_vm12 = vcmp.lt.s32.totalorder %v5311_v46, 123  ;;  %vm8441_vm4 = vmmov %vm8436_vm0 }
 0x31e   :  { %3974 = vmatpush.msk.msrb.mxu2 %vm8433_vm7, %v1675_v42  ;;  %v1932_v45 = vpop.permute.xlu2 %1931  ;;  %vm8439_vm7 = vmmov %vm8436_vm0  ;;  %v1471_v42 = vadd.f32 %v1470_v49, %v5395_v21 }
 0x31f   :  { %4014 = vmatpush.msk.msrb.mxu1 %vm8434_vm8, %v1673_v35  ;;  %2185 = vmatmul.f32.vlgmr.msrb.gmra.mxu2 %v3843_v47  ;;  %vm8440_vm8 = vmmov %vm8436_vm0 }
 0x320   :  { %2254 = vmatmul.f32.vlgmr.msrb.gmra.mxu1 %v3843_v47  ;;  %v6035_v62 = vpop.permute.xlu0 %1873 }
 0x321   :  { %v6037_v4 = vpop.permute.xlu1 %1893 }
 0x322   :  { %v1897_v49 = vsel %vm1135_vm13, %v5908_v19, %v6037_v4 }
 0x323   :  { %v6039_v13 = vpop.f32.mrf.mxu3 }
 0x326   :  { %v1950_v25 = vpop.permute.xlu2 %1949 }
 0x327   :  { %2188 = vmatmul.f32.gmra.mxu2 %v3846_v59 }
 0x328   :  { %v1892_v20 = vpop.permute.xlu0 %1891  ;;  %2257 = vmatmul.f32.gmra.mxu1 %v3846_v59 }
 0x329   :  { %v1898_v35 = vsel %vm1135_vm13, %v1892_v20, %v5976_v32 }
 0x32a   :  { %v1912_v63 = vpop.permute.xlu1 %1911 }
 0x32e   :  { %v1956_v28 = vpop.permute.xlu2 %1955 }
 0x330   :  { %v1910_v5 = vpop.permute.xlu0 %1909 }
 0x331   :  { %v1917_v47 = vsel %vm1160_vm15, %v1910_v5, %v1914_v40  ;;  %v1919_v55 = vsel %vm1160_vm15, %v1914_v40, %v1910_v5 }
 0x332   :  { %v1930_v61 = vpop.permute.xlu1 %1929 }
 0x336   :  { %v6046_v50 = vpop.permute.xlu2 %1973 }
 0x337   :  { %v1516_v48 = vpop.f32.mrf.mxu2 }
 0x338   :  { %v1916_v41 = vpop.permute.xlu0 %1915 }
 0x339   :  { %v1918_v10 = vsel %vm1160_vm15, %v1912_v63, %v1916_v41  ;;  %v1920_v60 = vsel %vm1160_vm15, %v1916_v41, %v1912_v63 }
 0x33a   :  { %v1936_v18 = vpop.permute.xlu1 %1935 }
 0x33b   :  { %v1938_v57 = vsel %vm1185_vm1, %v1932_v45, %v1936_v18  ;;  %v1940_v2 = vsel %vm1185_vm1, %v1936_v18, %v1932_v45  ;;  %v1900_v45 = vsel %vm1135_vm13, %v5976_v32, %v1892_v20  ;;  %v1899_v32 = vsel %vm1135_vm13, %v6037_v4, %v5908_v19 }
 0x33c   :  { %v1539_v38 = vpop.f32.mrf.mxu3  ;;  %v1474_v18 = vadd.f32 %v6041_v44, %v5449_v43 }
 0x33d   :  { %v1540_v40 = vadd.f32 %v1539_v38, %v5395_v21 }
 0x33e   :  { %v6088_v23 = vpop.permute.xlu2 %1991  ;;  %v1497_v38 = vadd.f32 %v6039_v13, %v1474_v18 }
 0x33f   :  { %v1519_v39 = vpop.f32.mrf.mxu2 }
 0x340   :  { %v1934_v58 = vpop.permute.xlu0 %1933 }
 0x341   :  { %v1937_v14 = vsel %vm1185_vm1, %v1930_v61, %v1934_v58  ;;  %v1939_v17 = vsel %vm1185_vm1, %v1934_v58, %v1930_v61  ;;  %v1494_v61 = vadd.f32 %v1493_v0, %v1471_v42 }
 0x342   :  { %v1954_v12 = vpop.permute.xlu1 %1953 }
 0x343   :  { %v1957_v11 = vsel %vm8439_vm7, %v1950_v25, %v1954_v12  ;;  %v1959_v51 = vsel %vm8440_vm8, %v1954_v12, %v1950_v25  ;;  %v6124_v20 = vadd.f32 %v1516_v48, %v1494_v61 }
 0x344   :  { %v1542_v56 = vpop.f32.mrf.mxu3 }
 0x346   :  { %v6160_v58 = vpop.permute.xlu2 %2009 }
 0x348   :  { %v1952_v22 = vpop.permute.xlu0 %1951 }
 0x349   :  { %v1958_v37 = vsel %vm8435_vm10, %v1952_v22, %v1956_v28  ;;  %v1960_v9 = vsel %vm8436_vm0, %v1956_v28, %v1952_v22  ;;  %vm8442_vm10 = vmmov %vm8438_vm12  ;;  %v6174_v22 = vadd.f32 %v1519_v39, %v1497_v38 }
 0x34a   :  { %v6052_v30 = vpop.permute.xlu1 %1971  ;;  %3975 = vmatpush.msk.msrb.mxu3 %vm8437_vm5, %v1958_v37  ;;  %4015 = vmatpush.msk.msra.mxu2 %vm8438_vm12, %v1960_v9  ;;  %vm8445_vm5 = vcmp.lt.s32.totalorder %v4988_v8, 127 }
 0x34b   :  { %v1878_v25 = vsel %vm8445_vm5, %v5849_v6, %v5998_v54  ;;  %vm8446_vm12 = vmmov %vm8445_vm5 }
 0x34c   :  { %3976 = vmatpush.msk.msrb.mxu3 %vm8441_vm4, %v1957_v11  ;;  %4016 = vmatpush.msk.msra.mxu2 %vm8442_vm10, %v1959_v51  ;;  %vm8443_vm4 = vcmp.lt.s32.totalorder %v5311_v46, 125  ;;  %v1880_v19 = vsel %vm8446_vm12, %v5998_v54, %v5849_v6  ;;  %vm8447_vm7 = vmmov %vm8445_vm5  ;;  %v1597_v54 = vmul.f32 %v6124_v20, %v6124_v20 }
 0x34d   :  { %vm8444_vm0 = vmmov %vm8443_vm4 }
 0x34e   :  { %3977 = vmatpush.msk.msrb.mxu3 %vm1185_vm1, %v1938_v57  ;;  %4017 = vmatpush.msk.msra.mxu2 %vm1191_vm14, %v1940_v2  ;;  %vm8448_vm8 = vmmov %vm8445_vm5  ;;  %v1834_v2 = vsel %vm1054_vm11, %v5875_v27, %v5809_v3 }
 0x34f   :  { %v1877_v28 = vsel %vm8448_vm8, %v5944_v1, %v6035_v62  ;;  %vm8449_vm10 = vmmov %vm8445_vm5 }
 0x350   :  { %v6078_v31 = vpop.permute.xlu0 %1969  ;;  %3978 = vmatpush.msk.msrb.mxu3 %vm1185_vm1, %v1937_v14  ;;  %4018 = vmatpush.msk.msra.mxu2 %vm1191_vm14, %v1939_v17  ;;  %v1585_v63 = vpop.f32.mrf.mxu3  ;;  %v1879_v6 = vsel %vm8449_vm10, %v6035_v62, %v5944_v1  ;;  %v1543_v1 = vadd.f32 %v1542_v56, %v5449_v43  ;;  %v3847_v14 = vld [vmem:[%s8169_s3 + $0x50] sm:$0xff] }
 0x351   :  { %v2016_v56 = vpop.permute.xlu2 %2015 }
 0x352   :  { %v6090_v34 = vpop.permute.xlu1 %1989  ;;  %3979 = vmatpush.msk.msrb.mxu3 %vm1160_vm15, %v1918_v10  ;;  %4019 = vmatpush.msk.msra.mxu2 %vm8443_vm4, %v1920_v60  ;;  %vm8450_vm4 = vmmov %vm8445_vm5  ;;  %vm8452_vm5 = vcmp.ge.s32.totalorder %v4988_v8, 1 }
 0x353   :  { %vm8455_vm8 = vmmov %vm8452_vm5 }
 0x354   :  { %3980 = vmatpush.msk.msrb.mxu3 %vm1160_vm15, %v1917_v47  ;;  %4020 = vmatpush.msk.msra.mxu2 %vm8444_vm0, %v1919_v55  ;;  %vm8451_vm0 = vcmp.lt.s32.totalorder %v4988_v8, 1 }
 0x355   :  { %v1856_v43 = vsel %vm8451_vm0, %v5984_v36, %v5889_v24  ;;  %vm8453_vm12 = vmmov %vm8451_vm0 }
 0x356   :  { %3981 = vmatpush.msk.msrb.mxu3 %vm1135_vm13, %v1898_v35  ;;  %4021 = vmatpush.msk.msra.mxu2 %vm1141_vm3, %v1900_v45  ;;  %vm8456_vm10 = vmmov %vm8451_vm0 }
 0x357   :  { %v1562_v5 = vpop.f32.mrf.mxu2 }
 0x358   :  { %v1563_v21 = vadd.f32 %v1562_v5, %v1540_v40  ;;  %v6126_v0 = vpop.permute.xlu0 %1975  ;;  %3982 = vmatpush.msk.msrb.mxu3 %vm1135_vm13, %v1897_v49  ;;  %4022 = vmatpush.msk.msra.mxu2 %vm1141_vm3, %v1899_v32  ;;  %v1588_v48 = vpop.f32.mrf.mxu3 }
 0x359   :  { %v2034_v17 = vpop.permute.xlu2 %2033 }
 0x35a   :  { %v6140_v4 = vadd.f32 %v1585_v63, %v1563_v21  ;;  %v6142_v41 = vpop.permute.xlu1 %1995  ;;  %3983 = vmatpush.msk.msrb.mxu3 %vm8447_vm7, %v1878_v25  ;;  %4023 = vmatpush.msk.msra.mxu2 %vm1116_vm6, %v1880_v19  ;;  %vm8454_vm7 = vmmov %vm8451_vm0  ;;  %vm8458_vm0 = vcmp.ge.s32.totalorder %v5311_v46, 2 }
 0x35c   :  { %v1598_v12 = vmul.f32 %v6140_v4, %v6140_v4  ;;  %v1591_v44 = vadd.f32 %v6140_v4, %v6124_v20  ;;  %3984 = vmatpush.msk.msrb.mxu3 %vm8450_vm4, %v1877_v28  ;;  %4024 = vmatpush.msk.msra.mxu2 %vm1116_vm6, %v1879_v6  ;;  %vm8457_vm4 = vcmp.ge.s32.totalorder %v4988_v8, 2 }
 0x35e   :  { %1592 = vadd.xlane.f32.xlu2 %v1591_v44  ;;  %v1601_v62 = vadd.f32 %v1598_v12, %v1597_v54  ;;  %2202 = vmatpush.msrb.mxu3 %v4968_v7  ;;  %v8504_v44 = vld [vmem:[#allocation38_spill] sm:$0xff] }
 0x35f   :  { %v1565_v59 = vpop.f32.mrf.mxu2  ;;  %2271 = vmatpush.msra.mxu2 %v4982_v15  ;;  %v1854_v15 = vsel %vm8453_vm12, %v5889_v24, %v5984_v36  ;;  %v1853_v24 = vsel %vm8456_vm10, %v5930_v26, %v5821_v33  ;;  %v1836_v36 = vsel %vm1054_vm11, %v5809_v3, %v5875_v27  ;;  %v1833_v3 = vsel %vm1054_vm11, %v5801_v16, %v5843_v29  ;;  %vm8460_vm12 = vmmov %vm8458_vm0 }
 0x360   :  { %v1566_v37 = vadd.f32 %v1565_v59, %v1543_v1  ;;  %1602 = vadd.xlane.f32.xlu0 %v1601_v62  ;;  %v6176_v9 = vpop.permute.xlu0 %1993  ;;  %2203 = vmatpush.msrb.mxu3 %v4954_v52  ;;  %v1599_v52 = vmul.f32 %v6174_v22, %v6174_v22  ;;  %v457_v38 = vmul.f32 0.00390625, %v8504_v44 }
 0x361   :  { %2272 = vmatpush.msra.mxu2 %v4952_v53  ;;  %v1855_v53 = vsel %vm8454_vm7, %v5821_v33, %v5930_v26  ;;  %v3844_v33 = vld [vmem:[%s8169_s3 + $0x38] sm:$0xff]  ;;  %v1835_v26 = vsel %vm1054_vm11, %v5843_v29, %v5801_v16  ;;  %v2052_v55 = vpop.permute.xlu2 %2051  ;;  %vm8461_vm7 = vcmp.lt.s32.totalorder %v4988_v8, 118 }
 0x362   :  { %v6184_v7 = vadd.f32 %v1588_v48, %v1566_v37  ;;  %v2014_v13 = vpop.permute.xlu1 %2013  ;;  %3985 = vmatpush.msk.msrb.mxu3 %vm8452_vm5, %v1856_v43  ;;  %vm8459_vm5 = vmmov %vm8457_vm4  ;;  %v8506_v48 = vld [vmem:[#allocation28_spill] sm:$0xff] }
 0x363   :  { %4025 = vmatpush.msk.msra.mxu2 %vm1085_vm9, %v1854_v15  ;;  %vm8463_vm10 = vmmov %vm8461_vm7  ;;  %v458_v37 = vmul.f32 0.00390625, %v8506_v48 }
 0x364   :  { %v1600_v11 = vmul.f32 %v6184_v7, %v6184_v7  ;;  %v1594_v51 = vadd.f32 %v6184_v7, %v6174_v22  ;;  %3986 = vmatpush.msk.msrb.mxu3 %vm8455_vm8, %v1855_v53  ;;  %vm8462_vm8 = vmmov %vm8461_vm7 }
 0x365   :  { %4026 = vmatpush.msk.msra.mxu2 %vm1085_vm9, %v1853_v24 }
 0x366   :  { %1595 = vadd.xlane.f32.xlu1 %v1594_v51  ;;  %v1604_v57 = vadd.f32 %v1600_v11, %v1599_v52  ;;  %3987 = vmatpush.msk.msrb.mxu3 %vm8457_vm4, %v1836_v36  ;;  %vm8464_vm4 = vcmp.lt.s32.totalorder %v5311_v46, 118 }
 0x367   :  { %4027 = vmatpush.msk.msra.mxu2 %vm8458_vm0, %v1834_v2  ;;  %vm8465_vm0 = vmmov %vm8461_vm7 }
 0x368   :  { %1605 = vadd.xlane.f32.xlu2 %v1604_v57  ;;  %v2012_v39 = vpop.permute.xlu0 %2011  ;;  %3988 = vmatpush.msk.msrb.mxu3 %vm8459_vm5, %v1835_v26  ;;  %vm8466_vm5 = vmmov %vm8465_vm0 }
 0x369   :  { %4028 = vmatpush.msk.msra.mxu2 %vm8460_vm12, %v1833_v3  ;;  %2208 = vmatmul.f32.vlgmr.msrb.gmra.mxu3 %v3844_v33  ;;  %vm8467_vm12 = vmmov %vm8465_vm0 }
 0x36a   :  { %v2032_v27 = vpop.permute.xlu1 %2031  ;;  %2277 = vmatmul.f32.vlgmr.msra.gmra.mxu2 %v3844_v33 }
 0x370   :  { %v2030_v10 = vpop.permute.xlu0 %2029 }
 0x371   :  { %2211 = vmatmul.f32.gmra.mxu3 %v3847_v14 }
 0x372   :  { %v2050_v60 = vpop.permute.xlu1 %2049  ;;  %2280 = vmatmul.f32.gmra.mxu2 %v3847_v14 }
 0x378   :  { %v2036_v47 = vpop.permute.xlu0 %2035 }
 0x37a   :  { %v2056_v42 = vpop.permute.xlu1 %2055 }
 0x37b   :  { %v2060_v16 = vsel %vm8461_vm7, %v2056_v42, %v2052_v55  ;;  %v2058_v29 = vsel %vm8462_vm8, %v2052_v55, %v2056_v42  ;;  %vm8468_vm7 = vmmov %vm8464_vm4  ;;  %vm8469_vm8 = vcmp.lt.s32.totalorder %v4988_v8, 119 }
 0x37c   :  { %3989 = vmatpush.msk.msrb.mxu0 %vm8463_vm10, %v2058_v29  ;;  %4029 = vmatpush.msk.msra.mxu3 %vm8464_vm4, %v2060_v16  ;;  %v2038_v61 = vsel %vm8469_vm8, %v2032_v27, %v2036_v47  ;;  %vm8470_vm10 = vmmov %vm8469_vm8 }
 0x37d   :  { %v2040_v40 = vsel %vm8470_vm10, %v2036_v47, %v2032_v27  ;;  %vm8471_vm4 = vmmov %vm8469_vm8  ;;  %vm8477_vm10 = vcmp.lt.s32.totalorder %v4988_v8, 120 }
 0x37e   :  { %v2018_v32 = vsel %vm8477_vm10, %v2012_v39, %v2016_v56 }
 0x380   :  { %v2054_v35 = vpop.permute.xlu0 %2053 }
 0x381   :  { %v2057_v45 = vsel %vm8465_vm0, %v2050_v60, %v2054_v35  ;;  %v2059_v63 = vsel %vm8466_vm5, %v2054_v35, %v2050_v60  ;;  %vm8472_vm0 = vcmp.lt.s32.totalorder %v5311_v46, 119  ;;  %vm8473_vm5 = vmmov %vm8471_vm4 }
 0x382   :  { %3990 = vmatpush.msk.msrb.mxu0 %vm8467_vm12, %v2057_v45  ;;  %4030 = vmatpush.msk.msra.mxu3 %vm8468_vm7, %v2059_v63  ;;  %v2037_v5 = vsel %vm8473_vm5, %v2030_v10, %v2034_v17  ;;  %vm8474_vm12 = vmmov %vm8471_vm4  ;;  %vm8480_vm5 = vcmp.lt.s32.totalorder %v5311_v46, 120 }
 0x383   :  { %v2039_v49 = vsel %vm8474_vm12, %v2034_v17, %v2030_v10  ;;  %vm8475_vm7 = vmmov %vm8471_vm4 }
 0x384   :  { %3991 = vmatpush.msk.msrb.mxu0 %vm8471_vm4, %v2038_v61  ;;  %4031 = vmatpush.msk.msra.mxu3 %vm8472_vm0, %v2040_v40  ;;  %vm8476_vm8 = vmmov %vm8472_vm0 }
 0x385   :  { %vm8478_vm4 = vmmov %vm8477_vm10 }
 0x386   :  { %3992 = vmatpush.msk.msrb.mxu0 %vm8475_vm7, %v2037_v5  ;;  %4032 = vmatpush.msk.msra.mxu3 %vm8476_vm8, %v2039_v49  ;;  %v2020_v21 = vsel %vm8478_vm4, %v2016_v56, %v2012_v39  ;;  %vm8479_vm0 = vmmov %vm8478_vm4  ;;  %vm8485_vm4 = vcmp.lt.s32.totalorder %v4988_v8, 121 }
 0x387   :  { %vm8481_vm12 = vmmov %vm8479_vm0  ;;  %v1998_v18 = vsel %vm8485_vm4, %v6088_v23, %v6142_v41 }
 0x388   :  { %3993 = vmatpush.msk.msrb.mxu0 %vm8479_vm0, %v2018_v32  ;;  %4033 = vmatpush.msk.msra.mxu3 %vm8480_vm5, %v2020_v21  ;;  %v2017_v25 = vsel %vm8481_vm12, %v6160_v58, %v2014_v13  ;;  %vm8482_vm7 = vmmov %vm8479_vm0  ;;  %vm8488_vm12 = vcmp.lt.s32.totalorder %v5311_v46, 121 }
 0x389   :  { %v2019_v19 = vsel %vm8482_vm7, %v2014_v13, %v6160_v58  ;;  %vm8483_vm8 = vmmov %vm8479_vm0  ;;  %v6357_v13 = vpop.permute.xlu2 %2155 }
 0x38a   :  { %3994 = vmatpush.msk.msrb.mxu0 %vm8483_vm8, %v2017_v25  ;;  %vm8484_vm10 = vmmov %vm8480_vm5 }
 0x38b   :  { %4034 = vmatpush.msk.msra.mxu3 %vm8484_vm10, %v2019_v19  ;;  %vm8486_vm0 = vmmov %vm8485_vm4 }
 0x38c   :  { %v2000_v28 = vsel %vm8486_vm0, %v6142_v41, %v6088_v23  ;;  %vm8487_vm5 = vmmov %vm8486_vm0 }
 0x38d   :  { %3995 = vmatpush.msk.msrb.mxu0 %vm8487_vm5, %v1998_v18  ;;  %4035 = vmatpush.msk.msra.mxu3 %vm8488_vm12, %v2000_v28  ;;  %vm8489_vm7 = vmmov %vm8486_vm0  ;;  %v8507_v28 = vld [vmem:[#allocation3_spill] sm:$0xff] }
 0x38e   :  { %v1997_v6 = vsel %vm8489_vm7, %v6090_v34, %v6176_v9  ;;  %vm8490_vm8 = vmmov %vm8486_vm0  ;;  %vm8496_vm7 = vcmp.lt.s32.totalorder %v5311_v46, 122 }
 0x38f   :  { %v1999_v54 = vsel %vm8490_vm8, %v6176_v9, %v6090_v34  ;;  %vm8491_vm10 = vmmov %vm8486_vm0  ;;  %vm8493_vm0 = vcmp.lt.s32.totalorder %v4988_v8, 122  ;;  %v3845_v34 = vld [vmem:[%s8169_s3 + $0x40] sm:$0xff] }
 0x390   :  { %3996 = vmatpush.msk.msrb.mxu0 %vm8491_vm10, %v1997_v6  ;;  %vm8492_vm4 = vmmov %vm8488_vm12  ;;  %v1978_v23 = vsel %vm8493_vm0, %v6052_v30, %v6126_v0 }
 0x391   :  { %4036 = vmatpush.msk.msra.mxu3 %vm8492_vm4, %v1999_v54  ;;  %vm8494_vm5 = vmmov %vm8493_vm0  ;;  %v8508_v54 = vld [vmem:[#allocation4_spill] sm:$0xff] }
 0x392   :  { %v1980_v41 = vsel %vm8494_vm5, %v6126_v0, %v6052_v30  ;;  %vm8495_vm12 = vmmov %vm8493_vm0  ;;  %vm8501_vm5 = vcmask 654336   ;;  %v8503_v0 = vld [vmem:[#allocation37_spill] sm:$0xff] }
 0x393   :  { %3997 = vmatpush.msk.msrb.mxu0 %vm8495_vm12, %v1978_v23  ;;  %4037 = vmatpush.msk.msra.mxu3 %vm8496_vm7, %v1980_v41  ;;  %vm8497_vm8 = vmmov %vm8493_vm0  ;;  %v6346_v12 = vmul.f32 0.00390625, %v8503_v0 }
 0x394   :  { %v1977_v58 = vsel %vm8497_vm8, %v6078_v31, %v6046_v50  ;;  %vm8498_vm10 = vmmov %vm8493_vm0 }
 0x395   :  { %v1979_v30 = vsel %vm8498_vm10, %v6046_v50, %v6078_v31  ;;  %vm8499_vm4 = vmmov %vm8493_vm0  ;;  %v473_v1 = vmul.f32 %v6346_v12, %v6346_v12  ;;  %v8505_v50 = vld [vmem:[#allocation27_spill] sm:$0xff]  ;;  %v521_v6 = vsub.f32 %v8507_v28, %v6346_v12  ;;  %v522_v23 = vsub.f32 %v8508_v54, %v6346_v12 }
 0x396   :  { %3998 = vmatpush.msk.msrb.mxu0 %vm8499_vm4, %v1977_v58  ;;  %vm8500_vm0 = vmmov %vm8496_vm7  ;;  %v6352_v31 = vmul.f32 0.00390625, %v8505_v50 }
 0x397   :  { %4038 = vmatpush.msk.msra.mxu3 %vm8500_vm0, %v1979_v30  ;;  %3851 = vmatmul.msk.f32.vlgmr.msrb.gmra.mxu0 %vm8501_vm5, %v3845_v34  ;;  %vm8502_vm12 = vmmov %vm8501_vm5  ;;  %v489_v62 = vsub.f32 %v457_v38, %v473_v1 }
 0x398   :  { %3853 = vmatmul.msk.f32.vlgmr.msra.gmra.mxu3 %vm8502_vm12, %v3845_v34  ;;  %v474_v43 = vmul.f32 %v6352_v31, %v6352_v31 }
 0x399   :  { %v505_v59 = vmax.f32 %v489_v62, 0.0 }
 0x39a   :  { %v490_v15 = vsub.f32 %v458_v37, %v474_v43 }
 0x39b   :  { %v553_v9 = vadd.f32 1e-05, %v505_v59 }
 0x39c   :  { %v506_v53 = vmax.f32 %v490_v15, 0.0  ;;  %v8509_v15 = vld [vmem:[#allocation5_spill] sm:$0xff] }
 0x39d   :  { %4231 = vrsqrt.f32 %v553_v9  ;;  %vm575_vm8 = vweird.f32 %v553_v9 }
 0x39e   :  { %v6359_v24 = vadd.f32 1e-05, %v506_v53  ;;  %v523_v53 = vsub.f32 %v8509_v15, %v6352_v31 }
 0x3a0   :  { %4233 = vrsqrt.f32 %v6359_v24 }
 0x3a3   :  { %v4232_v51 = vpop.eup %4231 }
 0x3a4   :  { %v570_v2 = vmul.f32 %v4232_v51, %v553_v9  ;;  %vm576_vm7 = vweird.f32 %v4232_v51 }
 0x3a5   :  { %vm577_vm10 = vmor %vm575_vm8, %vm576_vm7  ;;  %vm585_vm7 = vweird.f32 %v6359_v24 }
 0x3a6   :  { %v571_v3 = vmul.f32 %v4232_v51, %v570_v2  ;;  %v4234_v10 = vpop.eup %4233 }
 0x3a7   :  { %v580_v16 = vmul.f32 %v4234_v10, %v6359_v24  ;;  %vm586_vm12 = vweird.f32 %v4234_v10 }
 0x3a8   :  { %v572_v55 = vmul.f32 0.5, %v571_v3  ;;  %v8511_v3 = vld [vmem:[#allocation52_spill] sm:$0xff] }
 0x3a9   :  { %v581_v40 = vmul.f32 %v4234_v10, %v580_v16 }
 0x3aa   :  { %v573_v45 = vsub.f32 1.5, %v572_v55 }
 0x3ab   :  { %v582_v21 = vmul.f32 0.5, %v581_v40  ;;  %v8516_v40 = vld [vmem:[#allocation47_spill] sm:$0xff] }
 0x3ac   :  { %v574_v49 = vmul.f32 %v4232_v51, %v573_v45 }
 0x3ad   :  { %v583_v34 = vsub.f32 1.5, %v582_v21 }
 0x3ae   :  { %v578_v19 = vsel %vm577_vm10, %v4232_v51, %v574_v49  ;;  %vm587_vm10 = vmor %vm585_vm7, %vm586_vm12 }
 0x3af   :  { %v729_v44 = vmul.f32 %v578_v19, %v521_v6  ;;  %v730_v1 = vmul.f32 %v578_v19, %v522_v23  ;;  %v584_v48 = vmul.f32 %v4234_v10, %v583_v34 }
 0x3d1   :  { %v1593_v52 = vpop.xlane.xlu2 %1592 }
 0x3d2   :  { %v1607_v11 = vmul.f32 0.00390625, %v1593_v52  ;;  %v8510_v52 = vld [vmem:[#allocation6_spill] sm:$0xff] }
 0x3d3   :  { %v1603_v36 = vpop.xlane.xlu0 %1602 }
 0x3d4   :  { %v1609_v56 = vmul.f32 0.00390625, %v1603_v36  ;;  %v1611_v57 = vmul.f32 %v1607_v11, %v1607_v11  ;;  %v1617_v58 = vsub.f32 %v6124_v20, %v1607_v11  ;;  %v1618_v30 = vsub.f32 %v6140_v4, %v1607_v11 }
 0x3d5   :  { %v588_v4 = vsel %vm587_vm10, %v4234_v10, %v584_v48  ;;  %v524_v11 = vsub.f32 %v8510_v52, %v6352_v31  ;;  %v454_v31 = vmul.f32 0.00390625, %v8511_v3 }
 0x3d6   :  { %v1613_v33 = vsub.f32 %v1609_v56, %v1611_v57  ;;  %v731_v56 = vmul.f32 %v588_v4, %v523_v53 }
 0x3d7   :  { %v732_v57 = vmul.f32 %v588_v4, %v524_v11  ;;  %v3850_v4 = vld [vmem:[%s8168_s4 + $0x18] sm:$0xff] }
 0x3d8   :  { %v1615_v26 = vmax.f32 %v1613_v33, 0.0  ;;  %v8518_v11 = vld [vmem:[#allocation22_spill] sm:$0xff] }
 0x3d9   :  { %v1596_v39 = vpop.xlane.xlu1 %1595 }
 0x3da   :  { %v1621_v27 = vadd.f32 1e-05, %v1615_v26  ;;  %v6362_v14 = vmul.f32 0.00390625, %v1596_v39 }
 0x3db   :  { %v1606_v17 = vpop.xlane.xlu2 %1605 }
 0x3dc   :  { %4235 = vrsqrt.f32 %v1621_v27  ;;  %v1610_v60 = vmul.f32 0.00390625, %v1606_v17  ;;  %v1612_v47 = vmul.f32 %v6362_v14, %v6362_v14  ;;  %vm1629_vm0 = vweird.f32 %v1621_v27 }
 0x3dd   :  { %v1619_v51 = vsub.f32 %v6174_v22, %v6362_v14  ;;  %v1620_v24 = vsub.f32 %v6184_v7, %v6362_v14  ;;  %v3848_v22 = vld [vmem:[%s8169_s3 + $0x58] sm:$0xff]  ;;  %v486_v7 = vmul.f32 %v454_v31, %v454_v31  ;;  %v8514_v14 = vld [vmem:[#allocation44_spill] sm:$0xff] }
 0x3de   :  { %v1614_v42 = vsub.f32 %v1610_v60, %v1612_v47  ;;  %v470_v17 = vmul.f32 0.00390625, %v8514_v14 }
 0x3e0   :  { %v1616_v29 = vmax.f32 %v1614_v42, 0.0  ;;  %v502_v10 = vsub.f32 %v470_v17, %v486_v7  ;;  %v8515_v42 = vld [vmem:[#allocation46_spill] sm:$0xff]  ;;  %v8520_v7 = vld [vmem:[#allocation19_spill] sm:$0xff] }
 0x3e1   :  { %v6404_v16 = vmul.f32 0.00390625, %v8515_v42  ;;  %v8522_v42 = vld [vmem:[#allocation31_spill] sm:$0xff] }
 0x3e2   :  { %v4236_v35 = vpop.eup %4235  ;;  %v1622_v61 = vadd.f32 1e-05, %v1616_v29  ;;  %v518_v47 = vmax.f32 %v502_v10, 0.0 }
 0x3e3   :  { %v1624_v63 = vmul.f32 %v4236_v35, %v1621_v27  ;;  %vm1630_vm4 = vweird.f32 %v4236_v35  ;;  %v2186_v27 = vpop.f32.mrf.mxu2  ;;  %v485_v45 = vmul.f32 %v6404_v16, %v6404_v16 }
 0x3e4   :  { %4237 = vrsqrt.f32 %v1622_v61  ;;  %vm1631_vm5 = vmor %vm1629_vm0, %vm1630_vm4  ;;  %vm1639_vm4 = vweird.f32 %v1622_v61  ;;  %v566_v29 = vadd.f32 1e-05, %v518_v47 }
 0x3e5   :  { %v1625_v5 = vmul.f32 %v4236_v35, %v1624_v63  ;;  %v2255_v63 = vpop.f32.mrf.mxu1 }
 0x3e6   :  { %4239 = vrsqrt.f32 %v566_v29  ;;  %v2256_v21 = vadd.f32 %v2255_v63, %v6357_v13 }
 0x3e7   :  { %v1626_v32 = vmul.f32 0.5, %v1625_v5  ;;  %v469_v5 = vmul.f32 0.00390625, %v8516_v40 }
 0x3e9   :  { %v1627_v25 = vsub.f32 1.5, %v1626_v32  ;;  %v501_v19 = vsub.f32 %v469_v5, %v485_v45 }
 0x3ea   :  { %v4238_v18 = vpop.eup %4237 }
 0x3eb   :  { %v1628_v41 = vmul.f32 %v4236_v35, %v1627_v25  ;;  %v1634_v0 = vmul.f32 %v4238_v18, %v1622_v61  ;;  %vm1640_vm8 = vweird.f32 %v4238_v18  ;;  %v6401_v55 = vpop.f32.mrf.mxu2  ;;  %v2187_v61 = vadd.f32 %v2186_v27, %v6357_v13 }
 0x3ec   :  { %vm1641_vm0 = vmor %vm1639_vm4, %vm1640_vm8  ;;  %v2209_v60 = vpop.f32.mrf.mxu3  ;;  %v4240_v6 = vpop.eup %4239  ;;  %vm705_vm8 = vweird.f32 %v566_v29  ;;  %v545_v27 = vsub.f32 %v8520_v7, %v6404_v16 }
 0x3ed   :  { %v1632_v38 = vsel %vm1631_vm5, %v4236_v35, %v1628_v41  ;;  %v1635_v59 = vmul.f32 %v4238_v18, %v1634_v0  ;;  %vm8512_vm5 = vcmask 654336   ;;  %v2210_v25 = vadd.f32 %v2209_v60, %v2187_v61  ;;  %v8521_v60 = vld [vmem:[#allocation29_spill] sm:$0xff] }
 0x3ee   :  { %v1643_v62 = vmul.f32 %v1632_v38, %v1617_v58  ;;  %v1644_v50 = vmul.f32 %v1632_v38, %v1618_v30  ;;  %3854 = vmatmul.msk.f32.gmra.mxu3 %vm8512_vm5, %v3848_v22  ;;  %vm8513_vm12 = vmmov %vm8512_vm5  ;;  %v517_v41 = vmax.f32 %v501_v19, 0.0  ;;  %v700_v34 = vmul.f32 %v4240_v6, %v566_v29 }
 0x3ef   :  { %v1636_v12 = vmul.f32 0.5, %v1635_v59  ;;  %3852 = vmatmul.msk.f32.gmra.mxu0 %vm8513_vm12, %v3848_v22  ;;  %vm706_vm7 = vweird.f32 %v4240_v6  ;;  %v6457_v47 = vmul.f32 0.00390625, %v8521_v60 }
 0x3f0   :  { %v1647_v37 = vadd.f32 %v1643_v62, %v729_v44  ;;  %v1648_v9 = vadd.f32 %v1644_v50, %v730_v1  ;;  %v565_v44 = vadd.f32 1e-05, %v517_v41  ;;  %v701_v38 = vmul.f32 %v4240_v6, %v700_v34  ;;  %vm707_vm10 = vmor %vm705_vm8, %vm706_vm7 }
 0x3f1   :  { %v1637_v20 = vsub.f32 1.5, %v1636_v12  ;;  %v8517_v12 = vld [vmem:[#allocation21_spill] sm:$0xff]  ;;  %v475_v29 = vmul.f32 %v6457_v47, %v6457_v47 }
 0x3f2   :  { %1651 = vst [vmem:[%s8170_s5] sm:$0xff] %v1647_v37  ;;  %4241 = vrsqrt.f32 %v565_v44  ;;  %v702_v1 = vmul.f32 0.5, %v701_v38  ;;  %vm695_vm5 = vweird.f32 %v565_v44 }
 0x3f3   :  { %1652 = vst [vmem:[%s8170_s5 + $0x8] sm:$0xff] %v1648_v9  ;;  %v1638_v43 = vmul.f32 %v4238_v18, %v1637_v20  ;;  %v2278_v49 = vpop.f32.mrf.mxu2  ;;  %v547_v20 = vsub.f32 %v8517_v12, %v454_v31 }
 0x3f4   :  { %v6406_v35 = vpop.f32.mrf.mxu3  ;;  %v703_v62 = vsub.f32 1.5, %v702_v1 }
 0x3f5   :  { %v1642_v36 = vsel %vm1641_vm0, %v4238_v18, %v1638_v43  ;;  %v2279_v18 = vadd.f32 %v2278_v49, %v2256_v21 }
 0x3f6   :  { %v1645_v2 = vmul.f32 %v1642_v36, %v1619_v51  ;;  %v1646_v33 = vmul.f32 %v1642_v36, %v1620_v24  ;;  %v704_v48 = vmul.f32 %v4240_v6, %v703_v62  ;;  %v548_v51 = vsub.f32 %v8518_v11, %v454_v31  ;;  %v8523_v11 = vld [vmem:[#allocation7_spill] sm:$0xff] }
 0x3f8   :  { %v1649_v26 = vadd.f32 %v1645_v2, %v731_v56  ;;  %v1650_v39 = vadd.f32 %v1646_v33, %v732_v57  ;;  %v4242_v50 = vpop.eup %4241  ;;  %v708_v9 = vsel %vm707_vm10, %v4240_v6, %v704_v48  ;;  %v8519_v33 = vld [vmem:[#allocation20_spill] sm:$0xff] }
 0x3f9   :  { %v690_v59 = vmul.f32 %v4242_v50, %v565_v44  ;;  %v755_v43 = vmul.f32 %v708_v9, %v547_v20  ;;  %v756_v24 = vmul.f32 %v708_v9, %v548_v51  ;;  %vm696_vm0 = vweird.f32 %v4242_v50  ;;  %v8524_v51 = vld [vmem:[#allocation8_spill] sm:$0xff] }
 0x3fa   :  { %1653 = vst [vmem:[%s8170_s5 + $0x10] sm:$0xff] %v1649_v26  ;;  %vm697_vm12 = vmor %vm695_vm5, %vm696_vm0  ;;  %v546_v26 = vsub.f32 %v8519_v33, %v6404_v16  ;;  %v459_v16 = vmul.f32 0.00390625, %v8522_v42  ;;  %v8526_v42 = vld [vmem:[#allocation54_spill] sm:$0xff] }
 0x3fb   :  { %1654 = vst [vmem:[%s8170_s5 + $0x18] sm:$0xff] %v1650_v39  ;;  %v691_v37 = vmul.f32 %v4242_v50, %v690_v59  ;;  %v787_v53 = vmul.f32 0.2, %v755_v43  ;;  %vm771_vm4 = vcmp.gt.f32.partialorder %v755_v43, 0.0  ;;  %v788_v57 = vmul.f32 0.2, %v756_v24  ;;  %v2281_v62 = vpop.f32.mrf.mxu2 }
 0x3fc   :  { %vm772_vm7 = vcmp.gt.f32.partialorder %v756_v24, 0.0  ;;  %v491_v45 = vsub.f32 %v459_v16, %v475_v29  ;;  %v472_v16 = vmul.f32 0.00390625, %v8526_v42  ;;  %v8527_v29 = vld [vmem:[#allocation45_spill] sm:$0xff] }
 0x3fd   :  { %v692_v15 = vmul.f32 0.5, %v691_v37  ;;  %v6428_v36 = vsel %vm771_vm4, %v755_v43, %v787_v53  ;;  %v6434_v3 = vsel %vm772_vm7, %v756_v24, %v788_v57  ;;  %v526_v24 = vsub.f32 %v8524_v51, %v6457_v47 }
 0x3fe   :  { %v507_v63 = vmax.f32 %v491_v45, 0.0  ;;  %v6537_v45 = vmul.f32 0.00390625, %v8527_v29 }
 0x3ff   :  { %v693_v52 = vsub.f32 1.5, %v692_v15 }
 0x400   :  { %v555_v61 = vadd.f32 1e-05, %v507_v63 }
 0x401   :  { %v694_v56 = vmul.f32 %v4242_v50, %v693_v52 }
 0x402   :  { %4243 = vrsqrt.f32 %v555_v61  ;;  %vm595_vm0 = vweird.f32 %v555_v61 }
 0x403   :  { %v698_v2 = vsel %vm697_vm12, %v4242_v50, %v694_v56 }
 0x404   :  { %v754_v39 = vmul.f32 %v698_v2, %v546_v26  ;;  %v753_v14 = vmul.f32 %v698_v2, %v545_v27 }
 0x406   :  { %v786_v31 = vmul.f32 0.2, %v754_v39  ;;  %vm770_vm8 = vcmp.gt.f32.partialorder %v754_v39, 0.0  ;;  %v785_v17 = vmul.f32 0.2, %v753_v14  ;;  %vm769_vm10 = vcmp.gt.f32.partialorder %v753_v14, 0.0 }
 0x408   :  { %v6438_v22 = vsel %vm770_vm8, %v754_v39, %v786_v31  ;;  %v6446_v10 = vsel %vm769_vm10, %v753_v14, %v785_v17  ;;  %v4244_v49 = vpop.eup %4243  ;;  %v8525_v17 = vld [vmem:[#allocation53_spill] sm:$0xff] }
 0x409   :  { %v590_v19 = vmul.f32 %v4244_v49, %v555_v61  ;;  %vm596_vm4 = vweird.f32 %v4244_v49  ;;  %v6525_v60 = vmul.f32 0.00390625, %v8525_v17  ;;  %v487_v61 = vmul.f32 %v6537_v45, %v6537_v45 }
 0x40a   :  { %vm597_vm5 = vmor %vm595_vm0, %vm596_vm4 }
 0x414   :  { %v2232_v32 = vpop.f32.mrf.mxu0 }
 0x415   :  { %v6413_v28 = vadd.f32 %v2232_v32, %v2210_v25 }
 0x417   :  { %v2313_v58 = vmul.f32 %v6413_v28, %v6413_v28 }
 0x41b   :  { %v2301_v54 = vpop.f32.mrf.mxu3 }
 0x41c   :  { %v6415_v23 = vadd.f32 %v2301_v54, %v2279_v18  ;;  %v591_v54 = vmul.f32 %v4244_v49, %v590_v19 }
 0x41e   :  { %v2314_v30 = vmul.f32 %v6415_v23, %v6415_v23  ;;  %v2307_v13 = vadd.f32 %v6415_v23, %v6413_v28  ;;  %v592_v34 = vmul.f32 0.5, %v591_v54 }
 0x420   :  { %2308 = vadd.xlane.f32.xlu1 %v2307_v13  ;;  %v2317_v0 = vadd.f32 %v2314_v30, %v2313_v58  ;;  %v593_v30 = vsub.f32 1.5, %v592_v34 }
 0x422   :  { %2318 = vadd.xlane.f32.xlu0 %v2317_v0  ;;  %v2258_v0 = vpop.f32.mrf.mxu1  ;;  %v594_v38 = vmul.f32 %v4244_v49, %v593_v30 }
 0x424   :  { %v598_v43 = vsel %vm597_vm5, %v4244_v49, %v594_v38 }
 0x425   :  { %v734_v31 = vmul.f32 %v598_v43, %v526_v24 }
 0x436   :  { %2160 = vperm.xlu0 %4220, %v3850_v4  }
 0x43e   :  { %2383 = vrot.lane.b32.xlu0 %v6428_v36, %s4273_s7 }
 0x446   :  { %2387 = vrot.lane.b32.xlu0 %v6434_v3, %s4273_s7 }
 0x44e   :  { %2405 = vrot.lane.b32.xlu0 %v6438_v22, %s4272_s1 }
 0x456   :  { %2423 = vrot.lane.b32.xlu0 %v6428_v36, %s4275_s9 }
 0x45e   :  { %2441 = vrot.lane.b32.xlu0 %v6446_v10, %s4274_s8 }
 0x466   :  { %2447 = vrot.lane.b32.xlu0 %v6434_v3, %s4274_s8 }
 0x46c   :  { %v2235_v37 = vpop.f32.mrf.mxu0 }
 0x46e   :  { %2465 = vrot.lane.b32.xlu0 %v6438_v22, %s4276_s10 }
 0x471   :  { %v2304_v9 = vpop.f32.mrf.mxu3 }
 0x476   :  { %2483 = vrot.lane.b32.xlu0 %v6428_v36, %s4278_s12 }
 0x47e   :  { %2501 = vrot.lane.b32.xlu0 %v6446_v10, %s4277_s11 }
 0x486   :  { %2507 = vrot.lane.b32.xlu0 %v6434_v3, %s4277_s11 }
 0x48e   :  { %2525 = vrot.lane.b32.xlu0 %v6438_v22, %s4279_s13 }
 0x493   :  { %v2309_v40 = vpop.xlane.xlu1 %2308 }
 0x494   :  { %v2323_v5 = vmul.f32 0.00390625, %v2309_v40 }
 0x495   :  { %v2319_v32 = vpop.xlane.xlu0 %2318 }
 0x496   :  { %v2325_v21 = vmul.f32 0.00390625, %v2319_v32  ;;  %v2327_v25 = vmul.f32 %v2323_v5, %v2323_v5  ;;  %2543 = vrot.lane.b32.xlu0 %v6428_v36, %s4281_s15  ;;  %v2333_v56 = vsub.f32 %v6413_v28, %v2323_v5  ;;  %v2334_v57 = vsub.f32 %v6415_v23, %v2323_v5  ;;  %v8528_v5 = vld [vmem:[#allocation50_spill] sm:$0xff] }
 0x497   :  { %v471_v49 = vmul.f32 0.00390625, %v8528_v5 }
 0x498   :  { %v2329_v18 = vsub.f32 %v2325_v21, %v2327_v25 }
 0x499   :  { %v503_v32 = vsub.f32 %v471_v49, %v487_v61 }
 0x49a   :  { %v2331_v6 = vmax.f32 %v2329_v18, 0.0 }
 0x49b   :  { %v519_v25 = vmax.f32 %v503_v32, 0.0 }
 0x49c   :  { %v2337_v41 = vadd.f32 1e-05, %v2331_v6 }
 0x49d   :  { %v567_v18 = vadd.f32 1e-05, %v519_v25 }
 0x49e   :  { %4245 = vrsqrt.f32 %v2337_v41  ;;  %2561 = vrot.lane.b32.xlu0 %v6446_v10, %s4280_s14  ;;  %vm2345_vm7 = vweird.f32 %v2337_v41 }
 0x4a4   :  { %v4246_v58 = vpop.eup %4245 }
 0x4a5   :  { %v2340_v13 = vmul.f32 %v4246_v58, %v2337_v41  ;;  %vm2346_vm12 = vweird.f32 %v4246_v58 }
 0x4a6   :  { %2567 = vrot.lane.b32.xlu0 %v6434_v3, %s4280_s14  ;;  %vm2347_vm8 = vmor %vm2345_vm7, %vm2346_vm12  ;;  %vm715_vm12 = vweird.f32 %v567_v18 }
 0x4a7   :  { %v2341_v44 = vmul.f32 %v4246_v58, %v2340_v13 }
 0x4a8   :  { %v2161_v1 = vpop.permute.xlu0 %2160 }
 0x4a9   :  { %v2342_v50 = vmul.f32 0.5, %v2341_v44  ;;  %v2190_v59 = vadd.f32 %v6401_v55, %v2161_v1  ;;  %v2259_v48 = vadd.f32 %v2258_v0, %v2161_v1  ;;  %v525_v55 = vsub.f32 %v8523_v11, %v6457_v47  ;;  %v8529_v1 = vld [vmem:[#allocation30_spill] sm:$0xff] }
 0x4aa   :  { %v488_v47 = vmul.f32 %v6525_v60, %v6525_v60 }
 0x4ab   :  { %v2343_v12 = vsub.f32 1.5, %v2342_v50  ;;  %v2282_v20 = vadd.f32 %v2281_v62, %v2259_v48  ;;  %v2213_v4 = vadd.f32 %v6406_v35, %v2190_v59  ;;  %v733_v39 = vmul.f32 %v598_v43, %v525_v55 }
 0x4ac   :  { %v504_v63 = vsub.f32 %v472_v16, %v488_v47  ;;  %v6575_v62 = vmul.f32 0.00390625, %v8529_v1 }
 0x4ad   :  { %v2344_v15 = vmul.f32 %v4246_v58, %v2343_v12  ;;  %v6476_v53 = vadd.f32 %v2235_v37, %v2213_v4  ;;  %v6478_v52 = vadd.f32 %v2304_v9, %v2282_v20  ;;  %v8530_v37 = vld [vmem:[#allocation39_spill] sm:$0xff]  ;;  %v8531_v4 = vld [vmem:[#allocation26_spill] sm:$0xff] }
 0x4ae   :  { %2589 = vrot.lane.b32.xlu0 %v6438_v22, %s4282_s16  ;;  %v520_v40 = vmax.f32 %v504_v63, 0.0  ;;  %v476_v48 = vmul.f32 %v6575_v62, %v6575_v62  ;;  %v460_v9 = vmul.f32 0.00390625, %v8530_v37  ;;  %v552_v43 = vsub.f32 %v8531_v4, %v6525_v60 }
 0x4af   :  { %v2348_v35 = vsel %vm2347_vm8, %v4246_v58, %v2344_v15  ;;  %v2315_v2 = vmul.f32 %v6476_v53, %v6476_v53  ;;  %v2316_v33 = vmul.f32 %v6478_v52, %v6478_v52  ;;  %v2310_v26 = vadd.f32 %v6478_v52, %v6476_v53  ;;  %v3862_v15 = vld [vmem:[%s8168_s4 + $0x28] sm:$0xff] }
 0x4b0   :  { %v2359_v7 = vmul.f32 %v2348_v35, %v2333_v56  ;;  %v2360_v28 = vmul.f32 %v2348_v35, %v2334_v57  ;;  %v568_v21 = vadd.f32 1e-05, %v520_v40  ;;  %v6552_v19 = vpop.permute.xlu0 %2383  ;;  %v492_v11 = vsub.f32 %v460_v9, %v476_v48  ;;  %v8534_v9 = vld [vmem:[#allocation9_spill] sm:$0xff] }
 0x4b1   :  { %2311 = vadd.xlane.f32.xlu2 %v2310_v26  ;;  %v2320_v23 = vadd.f32 %v2316_v33, %v2315_v2  ;;  %v8532_v2 = vld [vmem:[#allocation24_spill] sm:$0xff] }
 0x4b2   :  { %v2363_v27 = vadd.f32 %v2359_v7, %v733_v39  ;;  %v2364_v14 = vadd.f32 %v2360_v28, %v734_v31  ;;  %4247 = vrsqrt.f32 %v568_v21  ;;  %vm725_vm4 = vweird.f32 %v568_v21 }
 0x4b3   :  { %2321 = vadd.xlane.f32.xlu1 %v2320_v23  ;;  %4249 = vrsqrt.f32 %v567_v18  ;;  %v508_v56 = vmax.f32 %v492_v11, 0.0  ;;  %v550_v33 = vsub.f32 %v8532_v2, %v6537_v45 }
 0x4b4   :  { %2367 = vst [vmem:[%s8170_s5 + $0x20] sm:$0xff] %v2363_v27 }
 0x4b5   :  { %2368 = vst [vmem:[%s8170_s5 + $0x28] sm:$0xff] %v2364_v14  ;;  %v556_v26 = vadd.f32 1e-05, %v508_v56 }
 0x4b6   :  { %2607 = vrot.lane.b32.xlu0 %v6428_v36, %s4284_s18 }
 0x4b7   :  { %4251 = vrsqrt.f32 %v556_v26 }
 0x4b8   :  { %v4248_v6 = vpop.eup %4247  ;;  %v6562_v41 = vpop.permute.xlu0 %2387 }
 0x4b9   :  { %v720_v54 = vmul.f32 %v4248_v6, %v568_v21  ;;  %v4250_v58 = vpop.eup %4249  ;;  %vm726_vm10 = vweird.f32 %v4248_v6 }
 0x4ba   :  { %v710_v30 = vmul.f32 %v4250_v58, %v567_v18  ;;  %vm727_vm0 = vmor %vm725_vm4, %vm726_vm10  ;;  %vm716_vm5 = vweird.f32 %v4250_v58 }
 0x4bb   :  { %v721_v34 = vmul.f32 %v4248_v6, %v720_v54  ;;  %vm717_vm7 = vmor %vm715_vm12, %vm716_vm5 }
 0x4bc   :  { %v711_v0 = vmul.f32 %v4250_v58, %v710_v30 }
 0x4bd   :  { %v722_v13 = vmul.f32 0.5, %v721_v34  ;;  %v4252_v17 = vpop.eup %4251 }
 0x4be   :  { %2625 = vrot.lane.b32.xlu0 %v6446_v10, %s4283_s17  ;;  %v712_v50 = vmul.f32 0.5, %v711_v0  ;;  %v600_v63 = vmul.f32 %v4252_v17, %v556_v26  ;;  %vm606_vm4 = vweird.f32 %v4252_v17  ;;  %v8533_v0 = vld [vmem:[#allocation25_spill] sm:$0xff] }
 0x4bf   :  { %v723_v44 = vsub.f32 1.5, %v722_v13 }
 0x4c0   :  { %v6572_v38 = vpop.permute.xlu0 %2405  ;;  %v713_v12 = vsub.f32 1.5, %v712_v50  ;;  %v601_v49 = vmul.f32 %v4252_v17, %v600_v63 }
 0x4c1   :  { %v724_v59 = vmul.f32 %v4248_v6, %v723_v44  ;;  %v551_v44 = vsub.f32 %v8533_v0, %v6525_v60 }
 0x4c2   :  { %v714_v24 = vmul.f32 %v4250_v58, %v713_v12  ;;  %v602_v21 = vmul.f32 0.5, %v601_v49  ;;  %v527_v12 = vsub.f32 %v8534_v9, %v6575_v62 }
 0x4c3   :  { %v6586_v20 = vsel %vm727_vm0, %v4248_v6, %v724_v59  ;;  %vm605_vm0 = vweird.f32 %v556_v26 }
 0x4c4   :  { %v760_v51 = vmul.f32 %v6586_v20, %v552_v43  ;;  %v6600_v35 = vsel %vm717_vm7, %v4250_v58, %v714_v24  ;;  %v603_v54 = vsub.f32 1.5, %v602_v21  ;;  %vm607_vm5 = vmor %vm605_vm0, %vm606_vm4  ;;  %v759_v37 = vmul.f32 %v6586_v20, %v551_v44  ;;  %v8535_v43 = vld [vmem:[#allocation10_spill] sm:$0xff] }
 0x4c5   :  { %v758_v39 = vmul.f32 %v6600_v35, %v550_v33  ;;  %vm8537_vm0 = vcmp.lt.s32.totalorder %v4988_v8, 3 }
 0x4c6   :  { %2631 = vrot.lane.b32.xlu0 %v6434_v3, %s4283_s17  ;;  %v792_v57 = vmul.f32 0.2, %v760_v51  ;;  %vm776_vm8 = vcmp.gt.f32.partialorder %v760_v51, 0.0  ;;  %v604_v30 = vmul.f32 %v4252_v17, %v603_v54 }
 0x4c7   :  { %v790_v28 = vmul.f32 0.2, %v758_v39  ;;  %vm774_vm10 = vcmp.gt.f32.partialorder %v758_v39, 0.0 }
 0x4c8   :  { %v6593_v55 = vpop.permute.xlu0 %2423  ;;  %v6607_v31 = vsel %vm776_vm8, %v760_v51, %v792_v57  ;;  %v608_v48 = vsel %vm607_vm5, %v4252_v17, %v604_v30  ;;  %v791_v57 = vmul.f32 0.2, %v759_v37  ;;  %vm8538_vm5 = vmmov %vm8537_vm0 }
 0x4c9   :  { %2381 = vrot.lane.b32.xlu2 %v6446_v10, %s4273_s7  ;;  %v6617_v27 = vsel %vm774_vm10, %v758_v39, %v790_v28  ;;  %v735_v24 = vmul.f32 %v608_v48, %v527_v12  ;;  %vm775_vm10 = vcmp.gt.f32.partialorder %v759_v37, 0.0 }
 0x4cc   :  { %2385 = vrot.lane.b32.xlu1 %v6438_v22, %s4273_s7 }
 0x4ce   :  { %2649 = vrot.lane.b32.xlu0 %v6438_v22, %s4285_s19 }
 0x4d0   :  { %v6609_v7 = vpop.permute.xlu0 %2441 }
 0x4d1   :  { %2401 = vrot.lane.b32.xlu2 %v6446_v10, %s4272_s1 }
 0x4d4   :  { %2403 = vrot.lane.b32.xlu1 %v6428_v36, %s4272_s1 }
 0x4d6   :  { %2667 = vrot.lane.b32.xlu0 %v6428_v36, %s4287_s20 }
 0x4d8   :  { %v6621_v29 = vpop.permute.xlu0 %2447 }
 0x4d9   :  { %2407 = vrot.lane.b32.xlu2 %v6434_v3, %s4272_s1 }
 0x4dc   :  { %2421 = vrot.lane.b32.xlu1 %v6446_v10, %s4275_s9 }
 0x4de   :  { %2685 = vrot.lane.b32.xlu0 %v6446_v10, %s4286_s2 }
 0x4e0   :  { %v6633_v25 = vpop.permute.xlu0 %2465 }
 0x4e1   :  { %2425 = vrot.lane.b32.xlu2 %v6438_v22, %s4275_s9 }
 0x4e4   :  { %2427 = vrot.lane.b32.xlu1 %v6434_v3, %s4275_s9 }
 0x4e6   :  { %2691 = vrot.lane.b32.xlu0 %v6434_v3, %s4286_s2 }
 0x4e8   :  { %v6645_v1 = vpop.permute.xlu0 %2483 }
 0x4e9   :  { %2443 = vrot.lane.b32.xlu2 %v6428_v36, %s4274_s8 }
 0x4ec   :  { %2445 = vrot.lane.b32.xlu1 %v6438_v22, %s4274_s8 }
 0x4ee   :  { %2709 = vrot.lane.b32.xlu0 %v6438_v22, %s4288_s21 }
 0x4f1   :  { %2461 = vrot.lane.b32.xlu2 %v6446_v10, %s4276_s10 }
 0x4f4   :  { %2463 = vrot.lane.b32.xlu1 %v6428_v36, %s4276_s10 }
 0x4f6   :  { %2727 = vrot.lane.b32.xlu0 %v6428_v36, %s4289_s22 }
 0x4f9   :  { %2467 = vrot.lane.b32.xlu2 %v6434_v3, %s4276_s10 }
 0x4fc   :  { %2481 = vrot.lane.b32.xlu1 %v6446_v10, %s4278_s12 }
 0x4fe   :  { %2745 = vrot.lane.b32.xlu0 %v6446_v10, %s4290_s23 }
 0x501   :  { %2485 = vrot.lane.b32.xlu2 %v6438_v22, %s4278_s12 }
 0x504   :  { %2487 = vrot.lane.b32.xlu1 %v6434_v3, %s4278_s12 }
 0x506   :  { %2751 = vrot.lane.b32.xlu0 %v6434_v3, %s4290_s23 }
 0x509   :  { %2503 = vrot.lane.b32.xlu2 %v6428_v36, %s4277_s11 }
 0x50c   :  { %2505 = vrot.lane.b32.xlu1 %v6438_v22, %s4277_s11 }
 0x50e   :  { %2769 = vrot.lane.b32.xlu0 %v6438_v22, %s4291_s24 }
 0x511   :  { %2521 = vrot.lane.b32.xlu2 %v6446_v10, %s4279_s13 }
 0x514   :  { %2523 = vrot.lane.b32.xlu1 %v6428_v36, %s4279_s13 }
 0x516   :  { %2876 = vperm.xlu0 %4220, %v3862_v15   ;;  %v528_v15 = vsub.f32 %v8535_v43, %v6575_v62 }
 0x518   :  { %v736_v56 = vmul.f32 %v608_v48, %v528_v15 }
 0x519   :  { %2527 = vrot.lane.b32.xlu2 %v6434_v3, %s4279_s13 }
 0x51c   :  { %2541 = vrot.lane.b32.xlu1 %v6446_v10, %s4281_s15 }
 0x51e   :  { %3243 = vrot.lane.b32.xlu0 %v6607_v31, %s4279_s13 }
 0x521   :  { %2545 = vrot.lane.b32.xlu2 %v6438_v22, %s4281_s15 }
 0x524   :  { %v2312_v23 = vpop.xlane.xlu2 %2311  ;;  %2547 = vrot.lane.b32.xlu1 %v6434_v3, %s4281_s15 }
 0x525   :  { %v2324_v14 = vmul.f32 0.00390625, %v2312_v23  ;;  %v8536_v23 = vld [vmem:[#allocation23_spill] sm:$0xff] }
 0x526   :  { %3241 = vrot.lane.b32.xlu0 %v6617_v27, %s4279_s13  ;;  %v2322_v47 = vpop.xlane.xlu1 %2321 }
 0x527   :  { %v2328_v42 = vmul.f32 %v2324_v14, %v2324_v14  ;;  %v2326_v16 = vmul.f32 0.00390625, %v2322_v47  ;;  %v2335_v11 = vsub.f32 %v6476_v53, %v2324_v14  ;;  %v2336_v51 = vsub.f32 %v6478_v52, %v2324_v14  ;;  %v6673_v52 = vpop.permute.xlu0 %2501 }
 0x528   :  { %v6668_v53 = vsel %vm775_vm10, %v759_v37, %v791_v57  ;;  %v549_v14 = vsub.f32 %v8536_v23, %v6537_v45  ;;  %vm8542_vm10 = vmmov %vm8537_vm0 }
 0x529   :  { %v2330_v61 = vsub.f32 %v2326_v16, %v2328_v42  ;;  %2563 = vrot.lane.b32.xlu2 %v6428_v36, %s4280_s14 }
 0x52a   :  { %v757_v47 = vmul.f32 %v6600_v35, %v549_v14 }
 0x52b   :  { %v2332_v40 = vmax.f32 %v2330_v61, 0.0 }
 0x52c   :  { %v6625_v5 = vpop.permute.xlu2 %2381  ;;  %2565 = vrot.lane.b32.xlu1 %v6438_v22, %s4280_s14  ;;  %v789_v63 = vmul.f32 0.2, %v757_v47  ;;  %vm773_vm4 = vcmp.gt.f32.partialorder %v757_v47, 0.0 }
 0x52d   :  { %v2338_v32 = vadd.f32 1e-05, %v2332_v40 }
 0x52e   :  { %3223 = vrot.lane.b32.xlu0 %v6607_v31, %s4277_s11  ;;  %v6701_v45 = vsel %vm773_vm4, %v757_v47, %v789_v63 }
 0x52f   :  { %4253 = vrsqrt.f32 %v2338_v32  ;;  %vm2355_vm7 = vweird.f32 %v2338_v32  ;;  %v2508_v16 = vpop.permute.xlu0 %2507 }
 0x531   :  { %2585 = vrot.lane.b32.xlu2 %v6446_v10, %s4282_s16 }
 0x534   :  { %v6635_v18 = vpop.permute.xlu2 %2401  ;;  %2587 = vrot.lane.b32.xlu1 %v6428_v36, %s4282_s16 }
 0x535   :  { %v4254_v6 = vpop.eup %4253 }
 0x536   :  { %v2350_v34 = vmul.f32 %v4254_v6, %v2338_v32  ;;  %3221 = vrot.lane.b32.xlu0 %v6617_v27, %s4277_s11  ;;  %vm2356_vm12 = vweird.f32 %v4254_v6 }
 0x537   :  { %vm2357_vm8 = vmor %vm2355_vm7, %vm2356_vm12  ;;  %v2526_v40 = vpop.permute.xlu0 %2525  ;;  %vm8539_vm12 = vcmp.ge.s32.totalorder %v4988_v8, 3  ;;  %vm8540_vm7 = vcmp.ge.s32.totalorder %v5311_v46, 3 }
 0x538   :  { %v2351_v58 = vmul.f32 %v4254_v6, %v2350_v34  ;;  %vm8543_vm4 = vmmov %vm8539_vm12 }
 0x539   :  { %2591 = vrot.lane.b32.xlu2 %v6434_v3, %s4282_s16 }
 0x53a   :  { %v2352_v13 = vmul.f32 0.5, %v2351_v58 }
 0x53c   :  { %v2353_v50 = vsub.f32 1.5, %v2352_v13  ;;  %v6647_v59 = vpop.permute.xlu2 %2407  ;;  %2605 = vrot.lane.b32.xlu1 %v6446_v10, %s4284_s18 }
 0x53e   :  { %v2354_v4 = vmul.f32 %v4254_v6, %v2353_v50  ;;  %3203 = vrot.lane.b32.xlu0 %v6607_v31, %s4278_s12  ;;  %v6656_v60 = vpop.permute.xlu1 %2385 }
 0x53f   :  { %v6719_v21 = vpop.permute.xlu0 %2543 }
 0x540   :  { %v2358_v20 = vsel %vm2357_vm8, %v4254_v6, %v2354_v4  ;;  %vm8541_vm8 = vmmov %vm8537_vm0 }
 0x541   :  { %v2361_v2 = vmul.f32 %v2358_v20, %v2335_v11  ;;  %v2362_v33 = vmul.f32 %v2358_v20, %v2336_v51  ;;  %2609 = vrot.lane.b32.xlu2 %v6438_v22, %s4284_s18 }
 0x543   :  { %v2365_v26 = vadd.f32 %v2361_v2, %v735_v24  ;;  %v2366_v39 = vadd.f32 %v2362_v33, %v736_v56 }
 0x544   :  { %v6664_v28 = vpop.permute.xlu2 %2425  ;;  %2611 = vrot.lane.b32.xlu1 %v6434_v3, %s4284_s18 }
 0x545   :  { %2369 = vst [vmem:[%s8170_s5 + $0x30] sm:$0xff] %v2365_v26 }
 0x546   :  { %2370 = vst [vmem:[%s8170_s5 + $0x38] sm:$0xff] %v2366_v39  ;;  %3383 = vrot.lane.b32.xlu0 %v6668_v53, %s4287_s20  ;;  %v6680_v62 = vpop.permute.xlu1 %2403 }
 0x547   :  { %v6729_v58 = vpop.permute.xlu0 %2561 }
 0x549   :  { %2627 = vrot.lane.b32.xlu2 %v6428_v36, %s4283_s17 }
 0x54c   :  { %v6686_v17 = vpop.permute.xlu2 %2443  ;;  %2629 = vrot.lane.b32.xlu1 %v6438_v22, %s4283_s17 }
 0x54e   :  { %3179 = vrot.lane.b32.xlu0 %v6668_v53, %s4276_s10  ;;  %v6693_v42 = vpop.permute.xlu1 %2421 }
 0x54f   :  { %v6739_v44 = vpop.permute.xlu0 %2567 }
 0x551   :  { %2645 = vrot.lane.b32.xlu2 %v6446_v10, %s4285_s19 }
 0x554   :  { %v6697_v61 = vpop.permute.xlu2 %2461  ;;  %2647 = vrot.lane.b32.xlu1 %v6428_v36, %s4285_s19 }
 0x556   :  { %3381 = vrot.lane.b32.xlu0 %v6701_v45, %s4287_s20  ;;  %v6705_v35 = vpop.permute.xlu1 %2427 }
 0x557   :  { %v6749_v37 = vpop.permute.xlu0 %2589 }
 0x559   :  { %2651 = vrot.lane.b32.xlu2 %v6434_v3, %s4285_s19 }
 0x55c   :  { %v6709_v49 = vpop.permute.xlu2 %2467  ;;  %2665 = vrot.lane.b32.xlu1 %v6446_v10, %s4287_s20 }
 0x55e   :  { %3181 = vrot.lane.b32.xlu0 %v6617_v27, %s4276_s10  ;;  %v6715_v32 = vpop.permute.xlu1 %2445 }
 0x55f   :  { %v6775_v24 = vpop.permute.xlu0 %2607 }
 0x561   :  { %2669 = vrot.lane.b32.xlu2 %v6438_v22, %s4287_s20 }
 0x564   :  { %v2486_v6 = vpop.permute.xlu2 %2485  ;;  %2671 = vrot.lane.b32.xlu1 %v6434_v3, %s4287_s20 }
 0x566   :  { %3483 = vrot.lane.b32.xlu0 %v6668_v53, %s4291_s24  ;;  %v2464_v54 = vpop.permute.xlu1 %2463 }
 0x569   :  { %2687 = vrot.lane.b32.xlu2 %v6428_v36, %s4286_s2 }
 0x56c   :  { %v2504_v34 = vpop.permute.xlu2 %2503  ;;  %2689 = vrot.lane.b32.xlu1 %v6438_v22, %s4286_s2 }
 0x56e   :  { %3163 = vrot.lane.b32.xlu0 %v6607_v31, %s4274_s8  ;;  %v2482_v30 = vpop.permute.xlu1 %2481 }
 0x571   :  { %2705 = vrot.lane.b32.xlu2 %v6446_v10, %s4288_s21 }
 0x574   :  { %v2522_v13 = vpop.permute.xlu2 %2521  ;;  %2707 = vrot.lane.b32.xlu1 %v6428_v36, %s4288_s21 }
 0x575   :  { %v2529_v15 = vsel %vm8541_vm8, %v2522_v13, %v2526_v40  ;;  %v2531_v11 = vsel %vm8542_vm10, %v2526_v40, %v2522_v13  ;;  %vm8548_vm8 = vcmp.ge.s32.totalorder %v5311_v46, 4 }
 0x576   :  { %3481 = vrot.lane.b32.xlu0 %v6701_v45, %s4291_s24  ;;  %v2488_v0 = vpop.permute.xlu1 %2487 }
 0x579   :  { %2711 = vrot.lane.b32.xlu2 %v6434_v3, %s4288_s21 }
 0x57c   :  { %v2528_v50 = vpop.permute.xlu2 %2527  ;;  %2725 = vrot.lane.b32.xlu1 %v6446_v10, %s4289_s22 }
 0x57e   :  { %3161 = vrot.lane.b32.xlu0 %v6617_v27, %s4274_s8  ;;  %v2506_v48 = vpop.permute.xlu1 %2505 }
 0x581   :  { %2729 = vrot.lane.b32.xlu2 %v6438_v22, %s4289_s22 }
 0x584   :  { %v2546_v9 = vpop.permute.xlu2 %2545  ;;  %2731 = vrot.lane.b32.xlu1 %v6434_v3, %s4289_s22 }
 0x586   :  { %3463 = vrot.lane.b32.xlu0 %v6668_v53, %s4290_s23  ;;  %v2524_v12 = vpop.permute.xlu1 %2523 }
 0x587   :  { %v2530_v4 = vsel %vm8537_vm0, %v2524_v12, %v2528_v50  ;;  %v2532_v43 = vsel %vm8538_vm5, %v2528_v50, %v2524_v12  ;;  %vm8544_vm0 = vmmov %vm8540_vm7  ;;  %vm8545_vm5 = vcmp.lt.s32.totalorder %v4988_v8, 4 }
 0x588   :  { %4039 = vmatpush.msk.msra.mxu0 %vm8539_vm12, %v2532_v43  ;;  %4079 = vmatpush.msk.msrb.mxu2 %vm8540_vm7, %v2530_v4  ;;  %v2512_v51 = vsel %vm8545_vm5, %v2508_v16, %v2504_v34  ;;  %vm8546_vm12 = vmmov %vm8545_vm5  ;;  %vm8547_vm7 = vcmp.ge.s32.totalorder %v4988_v8, 4 }
 0x589   :  { %2747 = vrot.lane.b32.xlu2 %v6428_v36, %s4290_s23  ;;  %v2510_v20 = vsel %vm8546_vm12, %v2504_v34, %v2508_v16  ;;  %vm8549_vm10 = vmmov %vm8545_vm5  ;;  %vm8553_vm12 = vcmp.lt.s32.totalorder %v4988_v8, 5 }
 0x58a   :  { %4040 = vmatpush.msk.msra.mxu0 %vm8543_vm4, %v2531_v11  ;;  %4080 = vmatpush.msk.msrb.mxu2 %vm8544_vm0, %v2529_v15  ;;  %v2511_v57 = vsel %vm8549_vm10, %v2506_v48, %v6673_v52  ;;  %vm8550_vm4 = vmmov %vm8547_vm7  ;;  %v2492_v23 = vsel %vm8553_vm12, %v2488_v0, %v6645_v1  ;;  %vm8556_vm10 = vcmp.ge.s32.totalorder %v5311_v46, 5 }
 0x58b   :  { %vm8551_vm0 = vmmov %vm8545_vm5 }
 0x58c   :  { %v6779_v56 = vpop.permute.xlu2 %2563  ;;  %2749 = vrot.lane.b32.xlu1 %v6438_v22, %s4290_s23  ;;  %4041 = vmatpush.msk.msra.mxu0 %vm8547_vm7, %v2512_v51  ;;  %v2509_v2 = vsel %vm8551_vm0, %v6673_v52, %v2506_v48  ;;  %vm8552_vm5 = vmmov %vm8548_vm8  ;;  %vm8554_vm7 = vcmp.ge.s32.totalorder %v4988_v8, 5  ;;  %v2409_v48 = vsel %vm879_vm2, %v6635_v18, %v6572_v38 }
 0x58d   :  { %4081 = vmatpush.msk.msrb.mxu2 %vm8548_vm8, %v2510_v20  ;;  %vm8555_vm8 = vmmov %vm8553_vm12 }
 0x58e   :  { %3143 = vrot.lane.b32.xlu0 %v6607_v31, %s4275_s9  ;;  %4042 = vmatpush.msk.msra.mxu0 %vm8550_vm4, %v2511_v57  ;;  %v2542_v33 = vpop.permute.xlu1 %2541  ;;  %v2490_v52 = vsel %vm8555_vm8, %v6645_v1, %v2488_v0  ;;  %vm8557_vm4 = vmmov %vm8555_vm8  ;;  %vm8562_vm8 = vcmp.ge.s32.totalorder %v4988_v8, 6 }
 0x58f   :  { %4082 = vmatpush.msk.msrb.mxu2 %vm8552_vm5, %v2509_v2  ;;  %v6801_v26 = vsel %vm1054_vm11, %v2542_v33, %v2546_v9  ;;  %v6805_v39 = vsel %vm1054_vm11, %v2546_v9, %v2542_v33  ;;  %v2491_v14 = vsel %vm8557_vm4, %v2486_v6, %v2482_v30  ;;  %vm8558_vm0 = vmmov %vm8554_vm7 }
 0x590   :  { %4043 = vmatpush.msk.msra.mxu0 %vm8554_vm7, %v2492_v23  ;;  %vm8559_vm5 = vmmov %vm8557_vm4  ;;  %vm8561_vm7 = vcmp.lt.s32.totalorder %v4988_v8, 6 }
 0x591   :  { %4083 = vmatpush.msk.msrb.mxu2 %vm8556_vm10, %v2490_v52  ;;  %2765 = vrot.lane.b32.xlu2 %v6446_v10, %s4291_s24  ;;  %v2489_v47 = vsel %vm8559_vm5, %v2482_v30, %v2486_v6  ;;  %vm8560_vm12 = vmmov %vm8556_vm10  ;;  %v2472_v1 = vsel %vm8561_vm7, %v6709_v49, %v2464_v54  ;;  %v6845_v6 = vpop.permute.xlu0 %2625  ;;  %v3861_v30 = vld [vmem:[%s8168_s4 + $0x20] sm:$0xff] }
 0x592   :  { %4044 = vmatpush.msk.msra.mxu0 %vm8558_vm0, %v2491_v14  ;;  %vm8563_vm10 = vmmov %vm8561_vm7  ;;  %vm8565_vm0 = vcmp.ge.s32.totalorder %v5311_v46, 6 }
 0x593   :  { %4084 = vmatpush.msk.msrb.mxu2 %vm8560_vm12, %v2489_v47  ;;  %v2470_v63 = vsel %vm8563_vm10, %v2464_v54, %v6709_v49  ;;  %vm8564_vm4 = vmmov %vm8561_vm7  ;;  %vm8568_vm7 = vcmp.lt.s32.totalorder %v4988_v8, 7 }
 0x594   :  { %v6830_v16 = vpop.permute.xlu2 %2585  ;;  %2767 = vrot.lane.b32.xlu1 %v6428_v36, %s4291_s24  ;;  %4045 = vmatpush.msk.msra.mxu0 %vm8562_vm8, %v2472_v1  ;;  %v2471_v40 = vsel %vm8564_vm4, %v6633_v25, %v6697_v61  ;;  %vm8566_vm5 = vmmov %vm8564_vm4  ;;  %v2452_v54 = vsel %vm8568_vm7, %v6621_v29, %v6686_v17  ;;  %vm8571_vm4 = vcmp.ge.s32.totalorder %v4988_v8, 7 }
 0x595   :  { %4085 = vmatpush.msk.msrb.mxu2 %vm8565_vm0, %v2470_v63  ;;  %v2469_v34 = vsel %vm8566_vm5, %v6697_v61, %v6633_v25  ;;  %vm8567_vm12 = vmmov %vm8562_vm8 }
 0x596   :  { %3461 = vrot.lane.b32.xlu0 %v6701_v45, %s4290_s23  ;;  %4046 = vmatpush.msk.msra.mxu0 %vm8567_vm12, %v2471_v40  ;;  %v6855_v49 = vpop.permute.xlu1 %2547  ;;  %vm8569_vm8 = vmmov %vm8565_vm0  ;;  %vm8572_vm0 = vcmp.ge.s32.totalorder %v5311_v46, 7 }
 0x597   :  { %4086 = vmatpush.msk.msrb.mxu2 %vm8569_vm8, %v2469_v34  ;;  %vm8570_vm10 = vmmov %vm8568_vm7 }
 0x598   :  { %v2450_v25 = vsel %vm8570_vm10, %v6686_v17, %v6621_v29  ;;  %4047 = vmatpush.msk.msra.mxu0 %vm8571_vm4, %v2452_v54  ;;  %vm8573_vm5 = vmmov %vm8568_vm7  ;;  %vm8577_vm10 = vcmp.lt.s32.totalorder %v4988_v8, 8 }
 0x599   :  { %4087 = vmatpush.msk.msrb.mxu2 %vm8572_vm0, %v2450_v25  ;;  %2771 = vrot.lane.b32.xlu2 %v6434_v3, %s4291_s24  ;;  %v2451_v61 = vsel %vm8573_vm5, %v6715_v32, %v6609_v7  ;;  %vm8574_vm12 = vmmov %vm8571_vm4  ;;  %v2432_v17 = vsel %vm8577_vm10, %v6705_v35, %v6593_v55  ;;  %vm8578_vm4 = vcmp.ge.s32.totalorder %v4988_v8, 8  ;;  %v6920_v50 = vpop.permute.xlu0 %2631 }
 0x59a   :  { %4048 = vmatpush.msk.msra.mxu0 %vm8574_vm12, %v2451_v61  ;;  %vm8575_vm7 = vmmov %vm8573_vm5  ;;  %vm8580_vm5 = vcmp.ge.s32.totalorder %v5311_v46, 8 }
 0x59b   :  { %v2449_v29 = vsel %vm8575_vm7, %v6609_v7, %v6715_v32  ;;  %vm8576_vm8 = vmmov %vm8572_vm0 }
 0x59c   :  { %4088 = vmatpush.msk.msrb.mxu2 %vm8576_vm8, %v2449_v29  ;;  %v2592_v13 = vpop.permute.xlu2 %2591  ;;  %2871 = vperm.xlu1 %4221, %v3861_v30   ;;  %vm8579_vm0 = vmmov %vm8577_vm10 }
 0x59d   :  { %4049 = vmatpush.msk.msra.mxu0 %vm8578_vm4, %v2432_v17  ;;  %v2430_v0 = vsel %vm8579_vm0, %v6593_v55, %v6705_v35  ;;  %vm8581_vm12 = vmmov %vm8579_vm0  ;;  %v2412_v35 = vsel %vm879_vm2, %v6647_v59, %v6680_v62 }
 0x59e   :  { %4089 = vmatpush.msk.msrb.mxu2 %vm8580_vm5, %v2430_v0  ;;  %v2431_v7 = vsel %vm8581_vm12, %v6664_v28, %v6693_v42  ;;  %3141 = vrot.lane.b32.xlu0 %v6617_v27, %s4275_s9  ;;  %vm8582_vm7 = vmmov %vm8578_vm4  ;;  %v6912_v55 = vpop.permute.xlu1 %2565  ;;  %vm8585_vm4 = vcmp.ge.s32.totalorder %v4988_v8, 9 }
 0x59f   :  { %4050 = vmatpush.msk.msra.mxu0 %vm8582_vm7, %v2431_v7  ;;  %vm8583_vm8 = vmmov %vm8579_vm0  ;;  %vm8586_vm0 = vcmp.ge.s32.totalorder %v5311_v46, 9  ;;  %vm8589_vm7 = vcmp.lt.s32.totalorder %v4988_v8, 10 }
 0x5a0   :  { %v2429_v32 = vsel %vm8583_vm8, %v6693_v42, %v6664_v28  ;;  %vm8584_vm10 = vmmov %vm8580_vm5  ;;  %v2410_v28 = vsel %vm879_vm2, %v6680_v62, %v6647_v59  ;;  %v2411_v42 = vsel %vm879_vm2, %v6572_v38, %v6635_v18  ;;  %v2392_v59 = vsel %vm8589_vm7, %v6562_v41, %v6552_v19  ;;  %v3855_v18 = vld [vmem:[%s8169_s3 + $0x60] sm:$0xff] }
 0x5a1   :  { %4090 = vmatpush.msk.msrb.mxu2 %vm8584_vm10, %v2429_v32  ;;  %4051 = vmatpush.msk.msra.mxu0 %vm8585_vm4, %v2412_v35  ;;  %vm8587_vm5 = vmmov %vm8585_vm4  ;;  %vm8590_vm8 = vcmp.ge.s32.totalorder %v4988_v8, 10  ;;  %vm8592_vm4 = vcmp.ge.s32.totalorder %v5311_v46, 10  ;;  %v6983_v43 = vpop.permute.xlu0 %2649 }
 0x5a2   :  { %vm8588_vm12 = vmmov %vm8586_vm0 }
 0x5a3   :  { %4091 = vmatpush.msk.msrb.mxu2 %vm8586_vm0, %v2410_v28  ;;  %4052 = vmatpush.msk.msra.mxu0 %vm8587_vm5, %v2411_v42  ;;  %vm8591_vm10 = vmmov %vm8589_vm7 }
 0x5a4   :  { %v6946_v62 = vpop.permute.xlu2 %2609  ;;  %3239 = vrot.lane.b32.xlu1 %v6668_v53, %s4279_s13  ;;  %v2390_v38 = vsel %vm8591_vm10, %v6552_v19, %v6562_v41  ;;  %vm8593_vm0 = vmmov %vm8589_vm7 }
 0x5a5   :  { %4092 = vmatpush.msk.msrb.mxu2 %vm8588_vm12, %v2409_v48  ;;  %4053 = vmatpush.msk.msra.mxu0 %vm8590_vm8, %v2392_v59  ;;  %v2391_v9 = vsel %vm8593_vm0, %v6656_v60, %v6625_v5  ;;  %vm8594_vm5 = vmmov %vm8590_vm8  ;;  %vm8597_vm8 = vcmp.lt.s32.totalorder %v4988_v8, 127 }
 0x5a6   :  { %3443 = vrot.lane.b32.xlu0 %v6668_v53, %s4289_s22  ;;  %vm8595_vm12 = vmmov %vm8593_vm0  ;;  %v2588_v41 = vpop.permute.xlu1 %2587 }
 0x5a7   :  { %4093 = vmatpush.msk.msrb.mxu2 %vm8592_vm4, %v2390_v38  ;;  %4054 = vmatpush.msk.msra.mxu0 %vm8594_vm5, %v2391_v9  ;;  %v2389_v19 = vsel %vm8595_vm12, %v6625_v5, %v6656_v60  ;;  %vm8596_vm7 = vmmov %vm8592_vm4  ;;  %v6977_v12 = vsel %vm8597_vm8, %v2588_v41, %v2592_v13  ;;  %v3858_v5 = vld [vmem:[%s8169_s3 + $0x78] sm:$0xff]  ;;  %vm8599_vm4 = vcmp.lt.s32.totalorder %v4988_v8, 123 }
 0x5a8   :  { %vm8598_vm10 = vmmov %vm8597_vm8  ;;  %2901 = vmatmul.f32.vlgmr.msra.gmra.mxu0 %v3855_v18 }
 0x5a9   :  { %4094 = vmatpush.msk.msrb.mxu2 %vm8596_vm7, %v2389_v19  ;;  %v6981_v4 = vsel %vm8598_vm10, %v2592_v13, %v2588_v41  ;;  %v6999_v51 = vpop.permute.xlu0 %2667  ;;  %vm8600_vm0 = vmmov %vm8599_vm4 }
 0x5aa   :  { %2970 = vmatmul.f32.vlgmr.msrb.gmra.mxu2 %v3855_v18  ;;  %vm8601_vm5 = vmmov %vm8600_vm0 }
 0x5ab   :  { %vm8602_vm12 = vmmov %vm8600_vm0 }
 0x5ac   :  { %v6985_v15 = vpop.permute.xlu2 %2627  ;;  %3237 = vrot.lane.b32.xlu1 %v6701_v45, %s4279_s13  ;;  %vm8603_vm7 = vmmov %vm8600_vm0 }
 0x5ad   :  { %v2634_v35 = vsel %vm1160_vm15, %v6985_v15, %v6920_v50  ;;  %vm8604_vm10 = vmmov %vm8597_vm8 }
 0x5ae   :  { %3123 = vrot.lane.b32.xlu0 %v6607_v31, %s4272_s1  ;;  %v2606_v60 = vpop.permute.xlu1 %2605  ;;  %v2593_v9 = vsel %vm8604_vm10, %v6830_v16, %v6749_v37 }
 0x5af   :  { %v6997_v11 = vsel %vm1135_vm13, %v6946_v62, %v2606_v60  ;;  %v2613_v48 = vsel %vm1135_vm13, %v2606_v60, %v6946_v62 }
 0x5b0   :  { %2904 = vmatmul.f32.gmra.mxu0 %v3858_v5 }
 0x5b1   :  { %v7011_v33 = vpop.permute.xlu0 %2685 }
 0x5b2   :  { %2973 = vmatmul.f32.gmra.mxu2 %v3858_v5  ;;  %v7144_v5 = vld [vmem:[%s8169_s3 + $0x68] sm:$0xff] }
 0x5b4   :  { %v7001_v20 = vpop.permute.xlu2 %2645  ;;  %3219 = vrot.lane.b32.xlu1 %v6668_v53, %s4277_s11 }
 0x5b5   :  { %v2653_v0 = vsel %vm1185_vm1, %v7001_v20, %v6983_v43 }
 0x5b6   :  { %3441 = vrot.lane.b32.xlu0 %v6701_v45, %s4289_s22  ;;  %v7007_v57 = vpop.permute.xlu1 %2611 }
 0x5b7   :  { %v2614_v42 = vsel %vm1135_vm13, %v6775_v24, %v7007_v57 }
 0x5b9   :  { %v7025_v1 = vpop.permute.xlu0 %2691 }
 0x5bc   :  { %v2652_v2 = vpop.permute.xlu2 %2651  ;;  %3217 = vrot.lane.b32.xlu1 %v6701_v45, %s4277_s11 }
 0x5be   :  { %3121 = vrot.lane.b32.xlu0 %v6617_v27, %s4272_s1  ;;  %v7015_v23 = vpop.permute.xlu1 %2629 }
 0x5bf   :  { %v2633_v28 = vsel %vm1160_vm15, %v6845_v6, %v7015_v23 }
 0x5c1   :  { %v7037_v54 = vpop.permute.xlu0 %2709 }
 0x5c4   :  { %v2670_v52 = vpop.permute.xlu2 %2669  ;;  %3199 = vrot.lane.b32.xlu1 %v6668_v53, %s4278_s12 }
 0x5c6   :  { %3423 = vrot.lane.b32.xlu0 %v6668_v53, %s4288_s21  ;;  %v2648_v14 = vpop.permute.xlu1 %2647 }
 0x5c7   :  { %v7023_v47 = vsel %vm1185_vm1, %v2652_v2, %v2648_v14  ;;  %v2654_v17 = vsel %vm1185_vm1, %v2648_v14, %v2652_v2  ;;  %v7157_v14 = vld [vmem:[%s8169_s3 + $0x80] sm:$0xff] }
 0x5c9   :  { %v7059_v13 = vpop.permute.xlu0 %2727 }
 0x5cc   :  { %v7027_v63 = vpop.permute.xlu2 %2687  ;;  %3201 = vrot.lane.b32.xlu1 %v6617_v27, %s4278_s12 }
 0x5ce   :  { %3103 = vrot.lane.b32.xlu0 %v6607_v31, %s4273_s7  ;;  %v2666_v40 = vpop.permute.xlu1 %2665 }
 0x5cf   :  { %v7035_v34 = vsel %vm8599_vm4, %v2670_v52, %v2666_v40  ;;  %v2673_v29 = vsel %vm8602_vm12, %v2666_v40, %v2670_v52  ;;  %vm8605_vm4 = vmmov %vm8597_vm8 }
 0x5d1   :  { %v2746_v59 = vpop.permute.xlu0 %2745 }
 0x5d4   :  { %v7039_v25 = vpop.permute.xlu2 %2705  ;;  %3387 = vrot.lane.b32.xlu1 %v6607_v31, %s4287_s20 }
 0x5d6   :  { %3421 = vrot.lane.b32.xlu0 %v6701_v45, %s4288_s21  ;;  %v7045_v61 = vpop.permute.xlu1 %2671 }
 0x5d7   :  { %v2674_v30 = vsel %vm8600_vm0, %v6999_v51, %v7045_v61  ;;  %vm8606_vm0 = vcmp.lt.s32.totalorder %v4988_v8, 1 }
 0x5d8   :  { %4055 = vmatpush.msk.msra.mxu1 %vm8601_vm5, %v2674_v30  ;;  %v2572_v19 = vsel %vm8606_vm0, %v6739_v44, %v6779_v56  ;;  %vm8607_vm5 = vcmp.ge.s32.totalorder %v4988_v8, 1  ;;  %vm8608_vm12 = vmmov %vm8606_vm0 }
 0x5d9   :  { %v2752_v41 = vpop.permute.xlu0 %2751 }
 0x5da   :  { %4056 = vmatpush.msk.msra.mxu1 %vm8603_vm7, %v2673_v29  ;;  %vm8609_vm7 = vmmov %vm8607_vm5 }
 0x5dc   :  { %3183 = vrot.lane.b32.xlu1 %v6607_v31, %s4276_s10  ;;  %4057 = vmatpush.msk.msra.mxu1 %vm1185_vm1, %v2654_v17  ;;  %v7069_v7 = vpop.permute.xlu2 %2711 }
 0x5de   :  { %3101 = vrot.lane.b32.xlu0 %v6617_v27, %s4273_s7  ;;  %4058 = vmatpush.msk.msra.mxu1 %vm1185_vm1, %v2653_v0  ;;  %v7075_v32 = vpop.permute.xlu1 %2689 }
 0x5e0   :  { %4059 = vmatpush.msk.msra.mxu1 %vm1160_vm15, %v2634_v35 }
 0x5e1   :  { %v2770_v2 = vpop.permute.xlu0 %2769 }
 0x5e2   :  { %4060 = vmatpush.msk.msra.mxu1 %vm1160_vm15, %v2633_v28 }
 0x5e4   :  { %3177 = vrot.lane.b32.xlu1 %v6701_v45, %s4276_s10  ;;  %4061 = vmatpush.msk.msra.mxu1 %vm1135_vm13, %v2614_v42  ;;  %v2730_v18 = vpop.permute.xlu2 %2729 }
 0x5e6   :  { %3401 = vrot.lane.b32.xlu0 %v6701_v45, %s4286_s2  ;;  %4062 = vmatpush.msk.msra.mxu1 %vm1135_vm13, %v2613_v48  ;;  %v7104_v38 = vpop.permute.xlu1 %2707 }
 0x5e8   :  { %4063 = vmatpush.msk.msra.mxu1 %vm8597_vm8, %v6977_v12  ;;  %vm8610_vm8 = vcmp.ge.s32.totalorder %v4988_v8, 2 }
 0x5e9   :  { %vm8611_vm10 = vmmov %vm8610_vm8 }
 0x5ea   :  { %4064 = vmatpush.msk.msra.mxu1 %vm8605_vm4, %v2593_v9  ;;  %vm8612_vm4 = vcmp.lt.s32.totalorder %v4988_v8, 118 }
 0x5eb   :  { %vm8613_vm0 = vmmov %vm8612_vm4 }
 0x5ec   :  { %3367 = vrot.lane.b32.xlu1 %v6607_v31, %s4285_s19  ;;  %2918 = vmatpush.msra.mxu1 %v6428_v36  ;;  %v2571_v36 = vsel %vm8608_vm12, %v6912_v55, %v6729_v58  ;;  %v2748_v12 = vpop.permute.xlu2 %2747  ;;  %vm8615_vm12 = vcmp.lt.s32.totalorder %v5311_v46, 118 }
 0x5ee   :  { %3283 = vrot.lane.b32.xlu0 %v6607_v31, %s4280_s14  ;;  %2919 = vmatpush.msra.mxu1 %v6446_v10  ;;  %v2726_v62 = vpop.permute.xlu1 %2725  ;;  %v2552_v10 = vsel %vm1054_vm11, %v6855_v49, %v6719_v21 }
 0x5f0   :  { %4065 = vmatpush.msk.msra.mxu1 %vm8607_vm5, %v2572_v19  ;;  %vm8614_vm5 = vmmov %vm8613_vm0 }
 0x5f2   :  { %4066 = vmatpush.msk.msra.mxu1 %vm8609_vm7, %v2571_v36  ;;  %vm8616_vm7 = vmmov %vm8613_vm0 }
 0x5f4   :  { %3159 = vrot.lane.b32.xlu1 %v6668_v53, %s4274_s8  ;;  %4067 = vmatpush.msk.msra.mxu1 %vm8610_vm8, %v2552_v10  ;;  %v2766_v52 = vpop.permute.xlu2 %2765  ;;  %vm8617_vm8 = vmmov %vm8613_vm0 }
 0x5f5   :  { %v2773_v35 = vsel %vm8616_vm7, %v2766_v52, %v2770_v2  ;;  %v2775_v28 = vsel %vm8617_vm8, %v2770_v2, %v2766_v52  ;;  %vm8624_vm8 = vcmp.lt.s32.totalorder %v5311_v46, 119 }
 0x5f6   :  { %3259 = vrot.lane.b32.xlu0 %v6668_v53, %s4281_s15  ;;  %4068 = vmatpush.msk.msra.mxu1 %vm8611_vm10, %v6805_v39  ;;  %v2732_v60 = vpop.permute.xlu1 %2731  ;;  %v7162_v39 = vpop.permute.xlu0 %2876  ;;  %vm8618_vm10 = vmmov %vm8613_vm0 }
 0x5f7   :  { %2924 = vmatmul.f32.vlgmr.msra.gmra.mxu1 %v7144_v5 }
 0x5fc   :  { %3365 = vrot.lane.b32.xlu1 %v6617_v27, %s4285_s19  ;;  %v2772_v30 = vpop.permute.xlu2 %2771 }
 0x5fe   :  { %3261 = vrot.lane.b32.xlu0 %v6617_v27, %s4281_s15  ;;  %v2750_v40 = vpop.permute.xlu1 %2749  ;;  %v7194_v19 = vpop.permute.xlu0 %3243 }
 0x5ff   :  { %2927 = vmatmul.f32.gmra.mxu1 %v7157_v14 }
 0x604   :  { %3157 = vrot.lane.b32.xlu1 %v6701_v45, %s4274_s8 }
 0x606   :  { %v2768_v29 = vpop.permute.xlu1 %2767 }
 0x607   :  { %v2774_v17 = vsel %vm8612_vm4, %v2768_v29, %v2772_v30  ;;  %v2776_v0 = vsel %vm8613_vm0, %v2772_v30, %v2768_v29  ;;  %vm8619_vm4 = vmmov %vm8615_vm12  ;;  %vm8620_vm0 = vcmp.lt.s32.totalorder %v4988_v8, 119 }
 0x608   :  { %4069 = vmatpush.msk.msrb.mxu3 %vm8614_vm5, %v2774_v17  ;;  %4109 = vmatpush.msk.msrb.mxu0 %vm8615_vm12, %v2776_v0  ;;  %v2754_v42 = vsel %vm8620_vm0, %v2748_v12, %v2752_v41  ;;  %vm8621_vm5 = vmmov %vm8620_vm0 }
 0x609   :  { %v2756_v48 = vsel %vm8621_vm5, %v2752_v41, %v2748_v12  ;;  %vm8622_vm12 = vmmov %vm8620_vm0 }
 0x60a   :  { %4070 = vmatpush.msk.msrb.mxu3 %vm8618_vm10, %v2773_v35  ;;  %4110 = vmatpush.msk.msrb.mxu0 %vm8619_vm4, %v2775_v28  ;;  %vm8623_vm7 = vmmov %vm8620_vm0 }
 0x60b   :  { %v2753_v9 = vsel %vm8623_vm7, %v2746_v59, %v2750_v40  ;;  %vm8625_vm10 = vmmov %vm8620_vm0 }
 0x60c   :  { %3347 = vrot.lane.b32.xlu1 %v6607_v31, %s4283_s17  ;;  %4071 = vmatpush.msk.msrb.mxu3 %vm8622_vm12, %v2754_v42  ;;  %v2755_v36 = vsel %vm8625_vm10, %v2750_v40, %v2746_v59  ;;  %vm8626_vm4 = vmmov %vm8620_vm0  ;;  %vm8627_vm0 = vcmp.lt.s32.totalorder %v4988_v8, 120  ;;  %vm8632_vm10 = vcmp.lt.s32.totalorder %v5311_v46, 120  ;;  %v7258_v40 = vpop.permute.xlu0 %3241  ;;  %v3874_v42 = vld [vmem:[%s8168_s4 + $0x38] sm:$0xff] }
 0x60d   :  { %4111 = vmatpush.msk.msrb.mxu0 %vm8624_vm8, %v2756_v48  ;;  %v2734_v12 = vsel %vm8627_vm0, %v7059_v13, %v2732_v60  ;;  %vm8628_vm5 = vmmov %vm8624_vm8 }
 0x60e   :  { %4072 = vmatpush.msk.msrb.mxu3 %vm8626_vm4, %v2753_v9  ;;  %v7200_v41 = vpop.permute.xlu1 %2871  ;;  %vm8629_vm12 = vmmov %vm8627_vm0 }
 0x60f   :  { %4112 = vmatpush.msk.msrb.mxu0 %vm8628_vm5, %v2755_v36  ;;  %v2736_v10 = vsel %vm8629_vm12, %v2732_v60, %v7059_v13  ;;  %vm8630_vm7 = vmmov %vm8627_vm0  ;;  %vm8634_vm5 = vcmp.lt.s32.totalorder %v4988_v8, 121 }
 0x610   :  { %4073 = vmatpush.msk.msrb.mxu3 %vm8630_vm7, %v2734_v12  ;;  %vm8631_vm8 = vmmov %vm8627_vm0  ;;  %v2714_v13 = vsel %vm8634_vm5, %v7104_v38, %v7069_v7 }
 0x611   :  { %v2733_v59 = vsel %vm8631_vm8, %v2726_v62, %v2730_v18  ;;  %4113 = vmatpush.msk.msrb.mxu0 %vm8632_vm10, %v2736_v10  ;;  %vm8633_vm4 = vmmov %vm8627_vm0 }
 0x612   :  { %v2735_v2 = vsel %vm8633_vm4, %v2730_v18, %v2726_v62  ;;  %4074 = vmatpush.msk.msrb.mxu3 %vm8627_vm0, %v2733_v59  ;;  %vm8635_vm12 = vmmov %vm8632_vm10  ;;  %vm8639_vm4 = vcmp.lt.s32.totalorder %v5311_v46, 121 }
 0x613   :  { %4114 = vmatpush.msk.msrb.mxu0 %vm8635_vm12, %v2735_v2  ;;  %vm8636_vm7 = vmmov %vm8634_vm5  ;;  %vm8642_vm12 = vcmp.lt.s32.totalorder %v4988_v8, 122 }
 0x614   :  { %v2716_v60 = vsel %vm8636_vm7, %v7069_v7, %v7104_v38  ;;  %3139 = vrot.lane.b32.xlu1 %v6668_v53, %s4275_s9  ;;  %vm8637_vm8 = vmmov %vm8634_vm5  ;;  %v2694_v38 = vsel %vm8642_vm12, %v7027_v63, %v7025_v1 }
 0x615   :  { %4075 = vmatpush.msk.msrb.mxu3 %vm8637_vm8, %v2714_v13  ;;  %vm8638_vm10 = vmmov %vm8634_vm5  ;;  %4115 = vmatpush.msk.msrb.mxu0 %vm8639_vm4, %v2716_v60  ;;  %vm8644_vm8 = vcmp.lt.s32.totalorder %v4988_v8, 3 }
 0x616   :  { %v2713_v18 = vsel %vm8638_vm10, %v7039_v25, %v7037_v54  ;;  %vm8640_vm0 = vmmov %vm8634_vm5  ;;  %v7246_v7 = vpop.permute.xlu1 %3239 }
 0x617   :  { %v2715_v62 = vsel %vm8640_vm0, %v7037_v54, %v7039_v25  ;;  %vm8641_vm5 = vmmov %vm8640_vm0  ;;  %v3248_v52 = vsel %vm8644_vm8, %v7194_v19, %v7246_v7  ;;  %vm8647_vm0 = vcmp.ge.s32.totalorder %v4988_v8, 3  ;;  %v3857_v25 = vld [vmem:[%s8169_s3 + $0x70] sm:$0xff] }
 0x618   :  { %4076 = vmatpush.msk.msrb.mxu3 %vm8641_vm5, %v2713_v18  ;;  %vm8643_vm7 = vmmov %vm8639_vm4  ;;  %4119 = vmatpush.msk.msrb.mxu1 %vm8647_vm0, %v3248_v52  ;;  %vm8654_vm0 = vcmask 654336  }
 0x619   :  { %4116 = vmatpush.msk.msrb.mxu0 %vm8643_vm7, %v2715_v62  ;;  %vm8645_vm10 = vmmov %vm8642_vm12  ;;  %vm8649_vm12 = vcmp.lt.s32.totalorder %v5311_v46, 122 }
 0x61a   :  { %v2696_v54 = vsel %vm8645_vm10, %v7025_v1, %v7027_v63  ;;  %vm8646_vm4 = vmmov %vm8645_vm10  ;;  %vm8652_vm10 = vcmp.lt.s32.totalorder %v4988_v8, 123 }
 0x61b   :  { %4077 = vmatpush.msk.msrb.mxu3 %vm8646_vm4, %v2694_v38  ;;  %vm8648_vm5 = vmmov %vm8646_vm4  ;;  %4117 = vmatpush.msk.msrb.mxu0 %vm8649_vm12, %v2696_v54  ;;  %v2676_v63 = vsel %vm8652_vm10, %v7045_v61, %v6999_v51  ;;  %vm8659_vm10 = vcmp.ge.s32.totalorder %v4988_v8, 3  ;;  %v3860_v61 = vld [vmem:[%s8169_s3 + $0x88] sm:$0xff] }
 0x61c   :  { %v2693_v30 = vsel %vm8648_vm5, %v7011_v33, %v7075_v32  ;;  %vm8650_vm7 = vmmov %vm8646_vm4  ;;  %vm8655_vm5 = vcmp.lt.s32.totalorder %v5311_v46, 123  ;;  %3345 = vrot.lane.b32.xlu1 %v6617_v27, %s4283_s17 }
 0x61d   :  { %v2695_v1 = vsel %vm8650_vm7, %v7075_v32, %v7011_v33  ;;  %vm8651_vm8 = vmmov %vm8646_vm4  ;;  %v3224_v32 = vpop.permute.xlu0 %3223 }
 0x61e   :  { %4078 = vmatpush.msk.msrb.mxu3 %vm8651_vm8, %v2693_v30  ;;  %vm8653_vm4 = vmmov %vm8649_vm12  ;;  %v3238_v33 = vpop.permute.xlu1 %3237  ;;  %vm8658_vm8 = vcmp.lt.s32.totalorder %v4988_v8, 3 }
 0x61f   :  { %4118 = vmatpush.msk.msrb.mxu0 %vm8653_vm4, %v2695_v1  ;;  %3863 = vmatmul.msk.f32.vlgmr.msrb.gmra.mxu3 %vm8654_vm0, %v3857_v25  ;;  %vm8656_vm12 = vmmov %vm8654_vm0  ;;  %v3247_v51 = vsel %vm8658_vm8, %v7258_v40, %v3238_v33  ;;  %vm8665_vm8 = vcmp.ge.s32.totalorder %v4988_v8, 4 }
 0x620   :  { %4095 = vmatpush.msk.msra.mxu3 %vm8655_vm5, %v2676_v63  ;;  %3865 = vmatmul.msk.f32.vlgmr.msrb.gmra.mxu0 %vm8656_vm12, %v3857_v25  ;;  %vm8657_vm7 = vmmov %vm8655_vm5 }
 0x621   :  { %4120 = vmatpush.msk.msrb.mxu1 %vm8659_vm10, %v3247_v51  ;;  %vm8660_vm4 = vmmov %vm8654_vm0  ;;  %vm8661_vm0 = vcmp.lt.s32.totalorder %v5311_v46, 125  ;;  %vm8666_vm10 = vcmp.lt.s32.totalorder %v4988_v8, 127 }
 0x622   :  { %4096 = vmatpush.msk.msra.mxu3 %vm8657_vm7, %v7035_v34  ;;  %v2655_v34 = vsel %vm1185_vm1, %v6983_v43, %v7001_v20  ;;  %v2635_v43 = vsel %vm1160_vm15, %v7015_v23, %v6845_v6  ;;  %vm8662_vm5 = vmmov %vm8660_vm4  ;;  %vm8664_vm7 = vcmp.lt.s32.totalorder %v4988_v8, 4 }
 0x623   :  { %vm8663_vm12 = vmmov %vm8661_vm0 }
 0x624   :  { %4097 = vmatpush.msk.msra.mxu3 %vm1191_vm14, %v7023_v47  ;;  %v2636_v47 = vsel %vm1160_vm15, %v6920_v50, %v6985_v15  ;;  %3137 = vrot.lane.b32.xlu1 %v6701_v45, %s4275_s9  ;;  %v2616_v50 = vsel %vm1135_vm13, %v7007_v57, %v6775_v24  ;;  %v2595_v24 = vsel %vm8666_vm10, %v6749_v37, %v6830_v16  ;;  %vm8673_vm10 = vcmp.ge.s32.totalorder %v4988_v8, 5 }
 0x625   :  { %v3222_v6 = vpop.permute.xlu0 %3221  ;;  %v2902_v12 = vpop.f32.mrf.mxu0 }
 0x626   :  { %4098 = vmatpush.msk.msra.mxu3 %vm1191_vm14, %v2655_v34  ;;  %v3220_v20 = vpop.permute.xlu1 %3219 }
 0x627   :  { %3864 = vmatmul.msk.f32.gmra.mxu3 %vm8660_vm4, %v3860_v61  ;;  %v3228_v15 = vsel %vm8664_vm7, %v3224_v32, %v3220_v20  ;;  %vm8667_vm4 = vmmov %vm8664_vm7  ;;  %vm8671_vm7 = vcmp.lt.s32.totalorder %v4988_v8, 5 }
 0x628   :  { %4099 = vmatpush.msk.msra.mxu3 %vm8661_vm0, %v2636_v47  ;;  %3866 = vmatmul.msk.f32.gmra.mxu0 %vm8662_vm5, %v3860_v61  ;;  %vm8668_vm0 = vmmov %vm8665_vm8  ;;  %vm8669_vm5 = vcmp.lt.s32.totalorder %v4988_v8, 1 }
 0x629   :  { %4121 = vmatpush.msk.msrb.mxu1 %vm8665_vm8, %v3228_v15  ;;  %vm8672_vm8 = vcmp.ge.s32.totalorder %v5311_v46, 2 }
 0x62a   :  { %4100 = vmatpush.msk.msra.mxu3 %vm8663_vm12, %v2635_v43  ;;  %vm8670_vm12 = vmmov %vm8669_vm5 }
 0x62c   :  { %4101 = vmatpush.msk.msra.mxu3 %vm1141_vm3, %v2616_v50  ;;  %3327 = vrot.lane.b32.xlu1 %v6607_v31, %s4284_s18 }
 0x62d   :  { %v3204_v37 = vpop.permute.xlu0 %3203  ;;  %v2905_v13 = vpop.f32.mrf.mxu0 }
 0x62e   :  { %4102 = vmatpush.msk.msra.mxu3 %vm1141_vm3, %v6997_v11  ;;  %v3218_v57 = vpop.permute.xlu1 %3217  ;;  %v2971_v62 = vpop.f32.mrf.mxu2  ;;  %v2906_v47 = vadd.f32 %v2905_v13, %v7162_v39 }
 0x62f   :  { %v3227_v11 = vsel %vm8667_vm4, %v3222_v6, %v3218_v57  ;;  %vm8674_vm4 = vmmov %vm8672_vm8  ;;  %v2972_v54 = vadd.f32 %v2971_v62, %v7200_v41 }
 0x630   :  { %4103 = vmatpush.msk.msra.mxu3 %vm1116_vm6, %v6981_v4  ;;  %4122 = vmatpush.msk.msrb.mxu1 %vm8668_vm0, %v3227_v11  ;;  %v2570_v4 = vsel %vm8669_vm5, %v6779_v56, %v6739_v44  ;;  %v2550_v44 = vsel %vm1054_vm11, %v6719_v21, %v6855_v49  ;;  %vm8675_vm0 = vcmp.lt.s32.totalorder %v4988_v8, 3  ;;  %vm8676_vm5 = vcmp.ge.s32.totalorder %v5311_v46, 3 }
 0x632   :  { %4104 = vmatpush.msk.msra.mxu3 %vm1116_vm6, %v2595_v24 }
 0x634   :  { %2987 = vmatpush.msra.mxu3 %v6434_v3  ;;  %3119 = vrot.lane.b32.xlu1 %v6668_v53, %s4272_s1  ;;  %v2569_v3 = vsel %vm8670_vm12, %v6729_v58, %v6912_v55  ;;  %v3246_v58 = vsel %vm8675_vm0, %v7246_v7, %v7194_v19  ;;  %vm8677_vm12 = vmmov %vm8675_vm0 }
 0x635   :  { %v3245_v21 = vsel %vm8677_vm12, %v3238_v33, %v7258_v40  ;;  %vm8684_vm12 = vcmp.ge.s32.totalorder %v5311_v46, 5  ;;  %v7419_v23 = vpop.permute.xlu0 %3383  ;;  %v2903_v40 = vadd.f32 %v2902_v12, %v7200_v41 }
 0x636   :  { %2988 = vmatpush.msra.mxu3 %v6438_v22  ;;  %v3200_v22 = vpop.permute.xlu1 %3199  ;;  %v2974_v61 = vpop.f32.mrf.mxu2 }
 0x637   :  { %v3208_v56 = vsel %vm8671_vm7, %v3204_v37, %v3200_v22  ;;  %vm8678_vm7 = vmmov %vm8676_vm5  ;;  %v2975_v43 = vadd.f32 %v2974_v61, %v7162_v39 }
 0x638   :  { %4105 = vmatpush.msk.msra.mxu3 %vm1085_vm9, %v2570_v4  ;;  %4123 = vmatpush.msk.msrb.mxu1 %vm8673_vm10, %v3208_v56  ;;  %vm8680_vm10 = vcmp.ge.s32.totalorder %v5311_v46, 4 }
 0x639   :  { %vm8682_vm0 = vmmov %vm8680_vm10 }
 0x63a   :  { %4106 = vmatpush.msk.msra.mxu3 %vm1085_vm9, %v2569_v3 }
 0x63c   :  { %4107 = vmatpush.msk.msra.mxu3 %vm8672_vm8, %v2550_v44  ;;  %3325 = vrot.lane.b32.xlu1 %v6617_v27, %s4284_s18  ;;  %vm8679_vm8 = vcmp.lt.s32.totalorder %v4988_v8, 4 }
 0x63d   :  { %v3226_v16 = vsel %vm8679_vm8, %v3220_v20, %v3224_v32 }
 0x63e   :  { %4108 = vmatpush.msk.msra.mxu3 %vm8674_vm4, %v6801_v26  ;;  %v7402_v26 = vpop.permute.xlu1 %3201  ;;  %vm8681_vm4 = vmmov %vm8679_vm8 }
 0x63f   :  { %2993 = vmatmul.f32.vlgmr.msra.gmra.mxu3 %v7144_v5  ;;  %v3225_v49 = vsel %vm8681_vm4, %v3218_v57, %v3222_v6 }
 0x640   :  { %4159 = vmatpush.msk.msrb.mxu3 %vm8676_vm5, %v3246_v58  ;;  %vm8683_vm5 = vcmp.lt.s32.totalorder %v4988_v8, 5 }
 0x641   :  { %v3206_v55 = vsel %vm8683_vm5, %v3200_v22, %v3204_v37  ;;  %vm8690_vm4 = vmmov %vm8683_vm5 }
 0x642   :  { %4160 = vmatpush.msk.msrb.mxu3 %vm8678_vm7, %v3245_v21  ;;  %vm8685_vm7 = vcmp.lt.s32.totalorder %v4988_v8, 123 }
 0x643   :  { %vm8686_vm8 = vmmov %vm8685_vm7 }
 0x644   :  { %4161 = vmatpush.msk.msrb.mxu3 %vm8680_vm10, %v3226_v16  ;;  %3117 = vrot.lane.b32.xlu1 %v6701_v45, %s4272_s1  ;;  %vm8689_vm10 = vmmov %vm8683_vm5 }
 0x645   :  { %vm8692_vm5 = vmmov %vm8684_vm12 }
 0x646   :  { %4162 = vmatpush.msk.msrb.mxu3 %vm8682_vm0, %v3225_v49  ;;  %v7421_v5 = vpop.permute.xlu1 %3387  ;;  %vm8691_vm0 = vcmp.ge.s32.totalorder %v4988_v8, 5 }
 0x647   :  { %2996 = vmatmul.f32.gmra.mxu3 %v7157_v14  ;;  %v3390_v29 = vsel %vm8685_vm7, %v7419_v23, %v7421_v5  ;;  %v7433_v14 = vpop.permute.xlu0 %3179 }
 0x648   :  { %4163 = vmatpush.msk.msrb.mxu3 %vm8684_vm12, %v3206_v55  ;;  %4135 = vmatpush.msk.msra.mxu2 %vm8686_vm8, %v3390_v29  ;;  %vm8693_vm12 = vcmp.lt.s32.totalorder %v4988_v8, 6  ;;  %vm8695_vm8 = vcmp.ge.s32.totalorder %v4988_v8, 6 }
 0x649   :  { %vm8694_vm7 = vmmov %vm8693_vm12 }
 0x64c   :  { %3307 = vrot.lane.b32.xlu1 %v6607_v31, %s4282_s16 }
 0x64e   :  { %v7464_v36 = vpop.permute.xlu1 %3183 }
 0x64f   :  { %v7439_v17 = vpop.permute.xlu0 %3381 }
 0x654   :  { %3099 = vrot.lane.b32.xlu1 %v6668_v53, %s4273_s7 }
 0x656   :  { %v7468_v2 = vpop.permute.xlu1 %3177 }
 0x657   :  { %v7443_v0 = vpop.permute.xlu0 %3181 }
 0x65c   :  { %3305 = vrot.lane.b32.xlu1 %v6617_v27, %s4282_s16 }
 0x65e   :  { %v7472_v38 = vpop.permute.xlu1 %3367 }
 0x65f   :  { %v7447_v35 = vpop.permute.xlu0 %3483 }
 0x664   :  { %3097 = vrot.lane.b32.xlu1 %v6701_v45, %s4273_s7 }
 0x666   :  { %v7486_v20 = vpop.permute.xlu1 %3159 }
 0x667   :  { %v7451_v28 = vpop.permute.xlu0 %3163 }
 0x66c   :  { %3407 = vrot.lane.b32.xlu1 %v6607_v31, %s4286_s2 }
 0x66e   :  { %v7496_v3 = vpop.permute.xlu1 %3365 }
 0x66f   :  { %v7458_v48 = vpop.permute.xlu0 %3481 }
 0x674   :  { %3279 = vrot.lane.b32.xlu1 %v6668_v53, %s4280_s14  ;;  %v2925_v7 = vpop.f32.mrf.mxu1 }
 0x675   :  { %v2926_v30 = vadd.f32 %v2925_v7, %v2903_v40 }
 0x676   :  { %v7504_v56 = vpop.permute.xlu1 %3157 }
 0x677   :  { %v7460_v9 = vpop.permute.xlu0 %3161 }
 0x67c   :  { %3281 = vrot.lane.b32.xlu1 %v6617_v27, %s4280_s14  ;;  %v2928_v32 = vpop.f32.mrf.mxu1 }
 0x67d   :  { %v2929_v15 = vadd.f32 %v2928_v32, %v2906_v47  ;;  %v8688_v32 = vld [vmem:[#allocation32_spill] sm:$0xff] }
 0x67e   :  { %v7510_v21 = vpop.permute.xlu1 %3347  ;;  %v461_v47 = vmul.f32 0.00390625, %v8688_v32  ;;  %v3188_v32 = vsel %vm8694_vm7, %v7464_v36, %v7433_v14 }
 0x67f   :  { %v7462_v19 = vpop.permute.xlu0 %3463 }
 0x684   :  { %3257 = vrot.lane.b32.xlu1 %v6701_v45, %s4281_s15 }
 0x686   :  { %v7516_v49 = vpop.permute.xlu1 %3139 }
 0x687   :  { %v7466_v10 = vpop.permute.xlu0 %3143 }
 0x68c   :  { %3592 = vperm.xlu1 %4221, %v3874_v42  }
 0x68e   :  { %v7524_v29 = vpop.permute.xlu1 %3345 }
 0x68f   :  { %v7470_v60 = vpop.permute.xlu0 %3461 }
 0x696   :  { %v7530_v12 = vpop.permute.xlu1 %3137 }
 0x697   :  { %v7476_v63 = vpop.permute.xlu0 %3141 }
 0x69d   :  { %v3017_v52 = vpop.f32.mrf.mxu0 }
 0x69e   :  { %v7536_v13 = vpop.permute.xlu1 %3327 }
 0x69f   :  { %v7492_v11 = vpop.permute.xlu0 %3443 }
 0x6a2   :  { %v2948_v59 = vpop.f32.mrf.mxu3 }
 0x6a3   :  { %v7478_v33 = vadd.f32 %v2948_v59, %v2926_v30  ;;  %v8687_v30 = vld [vmem:[#allocation41_spill] sm:$0xff] }
 0x6a5   :  { %v3020_v50 = vpop.f32.mrf.mxu0  ;;  %v3029_v37 = vmul.f32 %v7478_v33, %v7478_v33 }
 0x6a6   :  { %v7542_v62 = vpop.permute.xlu1 %3119 }
 0x6a7   :  { %v7502_v44 = vpop.permute.xlu0 %3123 }
 0x6aa   :  { %v2951_v18 = vpop.f32.mrf.mxu3 }
 0x6ab   :  { %v7488_v24 = vadd.f32 %v2951_v18, %v2929_v15 }
 0x6af   :  { %v7508_v58 = vpop.permute.xlu0 %3441 }
 0x6b7   :  { %v7514_v16 = vpop.permute.xlu0 %3121 }
 0x6bf   :  { %v7520_v55 = vpop.permute.xlu0 %3423 }
 0x6c2   :  { %v2994_v25 = vpop.f32.mrf.mxu3 }
 0x6c3   :  { %v2995_v1 = vadd.f32 %v2994_v25, %v2972_v54 }
 0x6c5   :  { %v7480_v51 = vadd.f32 %v3017_v52, %v2995_v1  ;;  %v7550_v52 = vpop.permute.xlu1 %3325  ;;  %v7563_v1 = vmul.f32 0.00390625, %v8687_v30 }
 0x6c7   :  { %v3023_v34 = vadd.f32 %v7480_v51, %v7478_v33  ;;  %v3030_v39 = vmul.f32 %v7480_v51, %v7480_v51  ;;  %v7526_v42 = vpop.permute.xlu0 %3103  ;;  %v477_v61 = vmul.f32 %v7563_v1, %v7563_v1 }
 0x6c9   :  { %3024 = vadd.xlane.f32.xlu2 %v3023_v34  ;;  %v3033_v22 = vadd.f32 %v3030_v39, %v3029_v37 }
 0x6ca   :  { %v2997_v41 = vpop.f32.mrf.mxu3 }
 0x6cb   :  { %v2998_v6 = vadd.f32 %v2997_v41, %v2975_v43  ;;  %v493_v43 = vsub.f32 %v461_v47, %v477_v61  ;;  %v3186_v61 = vsel %vm8693_vm12, %v7433_v14, %v7464_v36 }
 0x6cd   :  { %v7490_v57 = vadd.f32 %v3020_v50, %v2998_v6  ;;  %v7556_v54 = vpop.permute.xlu1 %3117  ;;  %v509_v15 = vmax.f32 %v493_v43, 0.0 }
 0x6cf   :  { %v3026_v4 = vadd.f32 %v7490_v57, %v7488_v24  ;;  %v7534_v59 = vpop.permute.xlu0 %3421 }
 0x6d1   :  { %3027 = vadd.xlane.f32.xlu0 %v3026_v4  ;;  %v7578_v4 = vadd.f32 1e-05, %v509_v15 }
 0x6d3   :  { %4255 = vrsqrt.f32 %v7578_v4 }
 0x6d5   :  { %v7567_v34 = vpop.permute.xlu1 %3307 }
 0x6d7   :  { %v7540_v18 = vpop.permute.xlu0 %3101 }
 0x6d9   :  { %3034 = vadd.xlane.f32.xlu0 %v3033_v22  ;;  %v7635_v15 = vpop.eup %4255 }
 0x6dd   :  { %v7574_v6 = vpop.permute.xlu1 %3099 }
 0x6df   :  { %v7546_v7 = vpop.permute.xlu0 %3401 }
 0x6e1   :  { %3197 = vrot.lane.b32.xlu2 %v6701_v45, %s4278_s12 }
 0x6e5   :  { %v7629_v36 = vpop.permute.xlu1 %3305 }
 0x6e7   :  { %v7552_v40 = vpop.permute.xlu0 %3283 }
 0x6e9   :  { %3385 = vrot.lane.b32.xlu2 %v6617_v27, %s4287_s20 }
 0x6ef   :  { %v7560_v25 = vpop.permute.xlu0 %3259 }
 0x6f1   :  { %3363 = vrot.lane.b32.xlu2 %v6668_v53, %s4285_s19 }
 0x6f7   :  { %v7572_v41 = vpop.permute.xlu0 %3261 }
 0x6f9   :  { %3487 = vrot.lane.b32.xlu2 %v6607_v31, %s4291_s24 }
 0x701   :  { %3361 = vrot.lane.b32.xlu2 %v6701_v45, %s4285_s19 }
 0x709   :  { %3485 = vrot.lane.b32.xlu2 %v6617_v27, %s4291_s24 }
 0x711   :  { %3343 = vrot.lane.b32.xlu2 %v6668_v53, %s4283_s17 }
 0x719   :  { %3467 = vrot.lane.b32.xlu2 %v6607_v31, %s4290_s23 }
 0x721   :  { %3341 = vrot.lane.b32.xlu2 %v6701_v45, %s4283_s17 }
 0x729   :  { %3465 = vrot.lane.b32.xlu2 %v6617_v27, %s4290_s23 }
 0x731   :  { %3323 = vrot.lane.b32.xlu2 %v6668_v53, %s4284_s18 }
 0x739   :  { %3447 = vrot.lane.b32.xlu2 %v6607_v31, %s4289_s22 }
 0x73c   :  { %v3025_v50 = vpop.xlane.xlu2 %3024 }
 0x73d   :  { %v7613_v43 = vmul.f32 0.00390625, %v3025_v50 }
 0x741   :  { %3321 = vrot.lane.b32.xlu2 %v6701_v45, %s4284_s18 }
 0x744   :  { %v7580_v39 = vpop.xlane.xlu0 %3027  ;;  %v3198_v37 = vpop.permute.xlu2 %3197 }
 0x745   :  { %v3205_v22 = vsel %vm8689_vm10, %v3198_v37, %v7402_v26  ;;  %v3207_v30 = vsel %vm8690_vm4, %v7402_v26, %v3198_v37  ;;  %vm8696_vm10 = vcmp.ge.s32.totalorder %v5311_v46, 6  ;;  %vm8697_vm4 = vmmov %vm8694_vm7  ;;  %vm8701_vm7 = vcmp.lt.s32.totalorder %v4988_v8, 7 }
 0x746   :  { %4124 = vmatpush.msk.msrb.mxu1 %vm8691_vm0, %v3207_v30  ;;  %4164 = vmatpush.msk.msrb.mxu3 %vm8692_vm5, %v3205_v22  ;;  %v3185_v26 = vsel %vm8697_vm4, %v7468_v2, %v7443_v0  ;;  %vm8698_vm0 = vmmov %vm8697_vm4  ;;  %v3166_v14 = vsel %vm8701_vm7, %v7486_v20, %v7451_v28  ;;  %vm8704_vm4 = vcmp.ge.s32.totalorder %v5311_v46, 7 }
 0x747   :  { %v3187_v47 = vsel %vm8698_vm0, %v7443_v0, %v7468_v2  ;;  %vm8699_vm5 = vmmov %vm8695_vm8 }
 0x748   :  { %4125 = vmatpush.msk.msrb.mxu1 %vm8695_vm8, %v3188_v32  ;;  %4165 = vmatpush.msk.msrb.mxu3 %vm8696_vm10, %v3186_v61  ;;  %vm8700_vm12 = vmmov %vm8696_vm10  ;;  %vm8703_vm10 = vcmp.ge.s32.totalorder %v4988_v8, 7 }
 0x749   :  { %3445 = vrot.lane.b32.xlu2 %v6617_v27, %s4289_s22  ;;  %vm8702_vm8 = vmmov %vm8701_vm7 }
 0x74a   :  { %4126 = vmatpush.msk.msrb.mxu1 %vm8699_vm5, %v3187_v47  ;;  %4166 = vmatpush.msk.msrb.mxu3 %vm8700_vm12, %v3185_v26  ;;  %v3168_v0 = vsel %vm8702_vm8, %v7451_v28, %v7486_v20  ;;  %vm8705_vm0 = vmmov %vm8701_vm7  ;;  %v3043_v28 = vmul.f32 %v7613_v43, %v7613_v43  ;;  %vm8706_vm5 = vcmp.lt.s32.totalorder %v4988_v8, 123  ;;  %v610_v26 = vmul.f32 %v7635_v15, %v7578_v4 }
 0x74b   :  { %v3167_v37 = vsel %vm8705_vm0, %v7460_v9, %v7504_v56  ;;  %vm8707_vm12 = vmmov %vm8705_vm0 }
 0x74c   :  { %v3035_v2 = vpop.xlane.xlu0 %3034  ;;  %v3386_v50 = vpop.permute.xlu2 %3385  ;;  %4127 = vmatpush.msk.msrb.mxu1 %vm8703_vm10, %v3168_v0  ;;  %4167 = vmatpush.msk.msrb.mxu3 %vm8704_vm4, %v3166_v14  ;;  %v3165_v30 = vsel %vm8707_vm12, %v7504_v56, %v7460_v9  ;;  %vm8708_vm7 = vmmov %vm8703_vm10  ;;  %vm8710_vm10 = vcmp.lt.s32.totalorder %v4988_v8, 8  ;;  %v611_v0 = vmul.f32 %v7635_v15, %v610_v26 }
 0x74d   :  { %v3041_v22 = vmul.f32 0.00390625, %v3035_v2  ;;  %v3389_v20 = vsel %vm8706_vm5, %v7439_v17, %v3386_v50  ;;  %vm8709_vm8 = vmmov %vm8706_vm5  ;;  %v3148_v61 = vsel %vm8710_vm10, %v7466_v10, %v7516_v49  ;;  %vm8712_vm5 = vcmp.ge.s32.totalorder %v4988_v8, 8 }
 0x74e   :  { %4128 = vmatpush.msk.msrb.mxu1 %vm8708_vm7, %v3167_v37  ;;  %4136 = vmatpush.msk.msra.mxu2 %vm8709_vm8, %v3389_v20  ;;  %vm8711_vm0 = vmmov %vm8710_vm10  ;;  %vm8714_vm7 = vcmp.ge.s32.totalorder %v5311_v46, 8  ;;  %v3126_v2 = vsel %vm879_vm2, %v7542_v62, %v7502_v44 }
 0x74f   :  { %v3045_v32 = vsub.f32 %v3041_v22, %v3043_v28  ;;  %4168 = vmatpush.msk.msrb.mxu3 %vm8704_vm4, %v3165_v30  ;;  %v3146_v9 = vsel %vm8711_vm0, %v7516_v49, %v7466_v10  ;;  %vm8713_vm12 = vmmov %vm8711_vm0  ;;  %v3128_v49 = vsel %vm879_vm2, %v7502_v44, %v7542_v62  ;;  %v3125_v44 = vsel %vm879_vm2, %v7556_v54, %v7514_v16  ;;  %v3098_v62 = vpop.permute.xlu1 %3097 }
 0x750   :  { %4129 = vmatpush.msk.msrb.mxu1 %vm8712_vm5, %v3148_v61  ;;  %v3147_v56 = vsel %vm8713_vm12, %v7476_v63, %v7530_v12  ;;  %vm8715_vm8 = vmmov %vm8711_vm0  ;;  %vm8718_vm0 = vcmp.ge.s32.totalorder %v4988_v8, 9  ;;  %v612_v28 = vmul.f32 0.5, %v611_v0 }
 0x751   :  { %v3047_v47 = vmax.f32 %v3045_v32, 0.0  ;;  %4169 = vmatpush.msk.msrb.mxu3 %vm8714_vm7, %v3146_v9  ;;  %3303 = vrot.lane.b32.xlu2 %v6668_v53, %s4282_s16  ;;  %v3145_v10 = vsel %vm8715_vm8, %v7530_v12, %v7476_v63  ;;  %vm8716_vm10 = vmmov %vm8712_vm5  ;;  %v3127_v12 = vsel %vm879_vm2, %v7514_v16, %v7556_v54  ;;  %vm8719_vm5 = vcmp.ge.s32.totalorder %v5311_v46, 9  ;;  %v3867_v54 = vld [vmem:[%s8169_s3 + $0x90] sm:$0xff] }
 0x752   :  { %4130 = vmatpush.msk.msrb.mxu1 %vm8716_vm10, %v3147_v56  ;;  %vm8717_vm4 = vmmov %vm8714_vm7  ;;  %vm8721_vm7 = vcmp.lt.s32.totalorder %v4988_v8, 10  ;;  %vm8724_vm10 = vcmp.ge.s32.totalorder %v4988_v8, 10  ;;  %v613_v61 = vsub.f32 1.5, %v612_v28 }
 0x753   :  { %v3053_v14 = vadd.f32 1e-05, %v3047_v47  ;;  %4170 = vmatpush.msk.msrb.mxu3 %vm8717_vm4, %v3145_v10  ;;  %vm8720_vm12 = vmmov %vm8718_vm0  ;;  %v3108_v22 = vsel %vm8721_vm7, %v7526_v42, %v7574_v6 }
 0x754   :  { %v3364_v63 = vpop.permute.xlu2 %3363  ;;  %4131 = vmatpush.msk.msrb.mxu1 %vm8718_vm0, %v3128_v49  ;;  %vm8722_vm8 = vmmov %vm8719_vm5  ;;  %vm8726_vm0 = vcmp.ge.s32.totalorder %v5311_v46, 10  ;;  %v614_v56 = vmul.f32 %v7635_v15, %v613_v61  ;;  %v8737_v49 = vld [vmem:[#allocation12_spill] sm:$0xff] }
 0x755   :  { %4257 = vrsqrt.f32 %v3053_v14  ;;  %v3370_v37 = vsel %vm1185_vm1, %v3364_v63, %v7472_v38  ;;  %4171 = vmatpush.msk.msrb.mxu3 %vm8719_vm5, %v3126_v2  ;;  %vm8723_vm2 = vmmov %vm8721_vm7  ;;  %vm8729_vm7 = vcmp.lt.s32.totalorder %v4988_v8, 123  ;;  %v3372_v9 = vsel %vm1185_vm1, %v7472_v38, %v3364_v63  ;;  %v8736_v38 = vld [vmem:[#allocation11_spill] sm:$0xff] }
 0x756   :  { %4132 = vmatpush.msk.msrb.mxu1 %vm8720_vm12, %v3127_v12  ;;  %4137 = vmatpush.msk.msra.mxu2 %vm1185_vm1, %v3370_v37  ;;  %v3106_v16 = vsel %vm8723_vm2, %v7574_v6, %v7526_v42  ;;  %vm8725_vm4 = vmmov %vm8723_vm2  ;;  %v3392_v30 = vsel %vm8729_vm7, %v7421_v5, %v7419_v23  ;;  %v529_v10 = vsub.f32 %v8736_v38, %v7563_v1 }
 0x757   :  { %4172 = vmatpush.msk.msrb.mxu3 %vm8722_vm8, %v3125_v44  ;;  %v3107_v20 = vsel %vm8725_vm4, %v7540_v18, %v3098_v62  ;;  %vm8727_vm5 = vmmov %vm8723_vm2  ;;  %vm8731_vm2 = vcmp.lt.s32.totalorder %v5311_v46, 123  ;;  %vm8733_vm4 = vcmp.lt.s32.totalorder %v4988_v8, 118  ;;  %v530_v0 = vsub.f32 %v8737_v49, %v7563_v1 }
 0x758   :  { %4133 = vmatpush.msk.msrb.mxu1 %vm8724_vm10, %v3108_v22  ;;  %v3105_v42 = vsel %vm8727_vm5, %v3098_v62, %v7540_v18  ;;  %vm8728_vm12 = vmmov %vm8724_vm10  ;;  %v3049_v37 = vsub.f32 %v7478_v33, %v7613_v43 }
 0x759   :  { %4173 = vmatpush.msk.msrb.mxu3 %vm8726_vm0, %v3106_v16  ;;  %3427 = vrot.lane.b32.xlu2 %v6607_v31, %s4288_s21  ;;  %vm8730_vm8 = vmmov %vm8726_vm0 }
 0x75a   :  { %4134 = vmatpush.msk.msrb.mxu1 %vm8728_vm12, %v3107_v20  ;;  %vm8732_vm10 = vmmov %vm8729_vm7  ;;  %vm616_vm12 = vweird.f32 %v7635_v15  ;;  %vm615_vm7 = vweird.f32 %v7578_v4  ;;  %v3050_v4 = vsub.f32 %v7480_v51, %v7613_v43 }
 0x75b   :  { %v4258_v6 = vpop.eup %4257  ;;  %4174 = vmatpush.msk.msrb.mxu3 %vm8730_vm8, %v3105_v42  ;;  %3617 = vmatmul.f32.vlgmr.msrb.gmra.mxu1 %v3867_v54  ;;  %v3391_v26 = vsel %vm8732_vm10, %v3386_v50, %v7439_v17  ;;  %vm8734_vm0 = vmmov %vm8731_vm2  ;;  %v3870_v50 = vld [vmem:[%s8169_s3 + $0xa8] sm:$0xff]  ;;  %vm3061_vm10 = vweird.f32 %v3053_v14 }
 0x75c   :  { %v3056_v32 = vmul.f32 %v4258_v6, %v3053_v14  ;;  %3686 = vmatmul.f32.vlgmr.msrb.gmra.mxu3 %v3867_v54  ;;  %4175 = vmatpush.msk.msra.mxu1 %vm8731_vm2, %v3392_v30  ;;  %v7747_v18 = vpop.permute.xlu2 %3487  ;;  %vm8735_vm5 = vmmov %vm8733_vm4  ;;  %vm3062_vm8 = vweird.f32 %v4258_v6 }
 0x75d   :  { %v3490_v23 = vsel %vm8733_vm4, %v7447_v35, %v7747_v18  ;;  %vm617_vm2 = vmor %vm615_vm7, %vm616_vm12 }
 0x75e   :  { %v3057_v5 = vmul.f32 %v4258_v6, %v3056_v32  ;;  %4176 = vmatpush.msk.msra.mxu1 %vm8734_vm0, %v3391_v26  ;;  %4149 = vmatpush.msk.msra.mxu0 %vm8735_vm5, %v3490_v23  ;;  %v618_v2 = vsel %vm617_vm2, %v7635_v15, %v614_v56  ;;  %vm3063_vm4 = vmor %vm3061_vm10, %vm3062_vm8  ;;  %vm8740_vm0 = vcmp.lt.s32.totalorder %v5311_v46, 125 }
 0x75f   :  { %v737_v33 = vmul.f32 %v618_v2, %v529_v10  ;;  %v738_v14 = vmul.f32 %v618_v2, %v530_v0  ;;  %vm8743_vm7 = vmmov %vm8740_vm0 }
 0x760   :  { %v3058_v17 = vmul.f32 0.5, %v3057_v5  ;;  %4177 = vmatpush.msk.msra.mxu1 %vm1191_vm14, %v3372_v9 }
 0x761   :  { %3301 = vrot.lane.b32.xlu2 %v6701_v45, %s4282_s16 }
 0x762   :  { %v3059_v47 = vsub.f32 1.5, %v3058_v17 }
 0x763   :  { %3620 = vmatmul.f32.gmra.mxu1 %v3870_v50 }
 0x764   :  { %v3060_v63 = vmul.f32 %v4258_v6, %v3059_v47  ;;  %3689 = vmatmul.f32.gmra.mxu3 %v3870_v50  ;;  %v3362_v12 = vpop.permute.xlu2 %3361 }
 0x765   :  { %v3369_v44 = vsel %vm1185_vm1, %v3362_v12, %v7496_v3  ;;  %v3371_v1 = vsel %vm1185_vm1, %v7496_v3, %v3362_v12  ;;  %v3408_v12 = vpop.permute.xlu1 %3407 }
 0x766   :  { %v3064_v15 = vsel %vm3063_vm4, %v4258_v6, %v3060_v63  ;;  %4138 = vmatpush.msk.msra.mxu2 %vm1185_vm1, %v3369_v44  ;;  %4178 = vmatpush.msk.msra.mxu1 %vm1191_vm14, %v3371_v1  ;;  %vm8738_vm14 = vmmov %vm8735_vm5 }
 0x767   :  { %v3075_v62 = vmul.f32 %v3064_v15, %v3049_v37  ;;  %v3076_v51 = vmul.f32 %v3064_v15, %v3050_v4  ;;  %vm8739_vm1 = vmmov %vm8735_vm5  ;;  %vm8741_vm5 = vcmp.lt.s32.totalorder %v4988_v8, 119 }
 0x768   :  { %vm8742_vm12 = vmmov %vm8741_vm5 }
 0x769   :  { %v3079_v43 = vadd.f32 %v3075_v62, %v737_v33  ;;  %v3080_v22 = vadd.f32 %v3076_v51, %v738_v14  ;;  %3425 = vrot.lane.b32.xlu2 %v6617_v27, %s4288_s21  ;;  %vm8744_vm8 = vmmov %vm8741_vm5  ;;  %v3869_v33 = vld [vmem:[%s8169_s3 + $0xa0] sm:$0xff] }
 0x76a   :  { %vm8745_vm2 = vmmov %vm8741_vm5 }
 0x76b   :  { %3083 = vst [vmem:[%s8170_s5 + $0x40] sm:$0xff] %v3079_v43 }
 0x76c   :  { %3084 = vst [vmem:[%s8170_s5 + $0x48] sm:$0xff] %v3080_v22  ;;  %v7800_v3 = vpop.permute.xlu2 %3485 }
 0x76d   :  { %v3489_v28 = vsel %vm8738_vm14, %v7458_v48, %v7800_v3  ;;  %v3280_v44 = vpop.permute.xlu1 %3279 }
 0x76e   :  { %4150 = vmatpush.msk.msra.mxu0 %vm8739_vm1, %v3489_v28  ;;  %vm8750_vm1 = vcmp.lt.s32.totalorder %v4988_v8, 127 }
 0x771   :  { %3403 = vrot.lane.b32.xlu2 %v6668_v53, %s4286_s2 }
 0x774   :  { %v3344_v16 = vpop.permute.xlu2 %3343 }
 0x775   :  { %v3350_v54 = vsel %vm1160_vm15, %v3344_v16, %v7510_v21  ;;  %v3352_v20 = vsel %vm1160_vm15, %v7510_v21, %v3344_v16  ;;  %v3282_v51 = vpop.permute.xlu1 %3281 }
 0x776   :  { %4139 = vmatpush.msk.msra.mxu2 %vm1160_vm15, %v3350_v54  ;;  %4179 = vmatpush.msk.msra.mxu1 %vm8740_vm0, %v3352_v20  ;;  %vm8751_vm0 = vmmov %vm8750_vm1 }
 0x779   :  { %3405 = vrot.lane.b32.xlu2 %v6617_v27, %s4286_s2 }
 0x77c   :  { %v7822_v42 = vpop.permute.xlu2 %3467 }
 0x77d   :  { %v3470_v6 = vsel %vm8741_vm5, %v7462_v19, %v7822_v42  ;;  %v3258_v28 = vpop.permute.xlu1 %3257 }
 0x77e   :  { %4151 = vmatpush.msk.msra.mxu0 %vm8742_vm12, %v3470_v6  ;;  %vm8755_vm12 = vmmov %vm8751_vm0 }
 0x781   :  { %3277 = vrot.lane.b32.xlu2 %v6701_v45, %s4280_s14 }
 0x784   :  { %v3342_v21 = vpop.permute.xlu2 %3341 }
 0x785   :  { %v3349_v30 = vsel %vm1160_vm15, %v3342_v21, %v7524_v29  ;;  %v3351_v61 = vsel %vm1160_vm15, %v7524_v29, %v3342_v21  ;;  %v3873_v29 = vld [vmem:[%s8168_s4 + $0x30] sm:$0xff] }
 0x786   :  { %4140 = vmatpush.msk.msra.mxu2 %vm1160_vm15, %v3349_v30  ;;  %4180 = vmatpush.msk.msra.mxu1 %vm8743_vm7, %v3351_v61  ;;  %vm8746_vm15 = vcmp.lt.s32.totalorder %v4988_v8, 120  ;;  %vm8756_vm7 = vmmov %vm8751_vm0 }
 0x787   :  { %vm8747_vm10 = vmmov %vm8746_vm15 }
 0x788   :  { %vm8748_vm4 = vmmov %vm8747_vm10 }
 0x789   :  { %3263 = vrot.lane.b32.xlu2 %v6607_v31, %s4281_s15  ;;  %vm8749_vm14 = vmmov %vm8748_vm4 }
 0x78c   :  { %v7844_v32 = vpop.permute.xlu2 %3465 }
 0x78d   :  { %v3469_v26 = vsel %vm8744_vm8, %v7470_v60, %v7844_v32  ;;  %vm8757_vm8 = vmmov %vm8751_vm0 }
 0x78e   :  { %4152 = vmatpush.msk.msra.mxu0 %vm8745_vm2, %v3469_v26  ;;  %vm8758_vm2 = vcmp.lt.s32.totalorder %v4988_v8, 1 }
 0x78f   :  { %v3286_v1 = vsel %vm8758_vm2, %v3280_v44, %v7552_v40 }
 0x791   :  { %3587 = vperm.xlu2 %4222, %v3873_v29  }
 0x794   :  { %v3324_v23 = vpop.permute.xlu2 %3323 }
 0x795   :  { %v3330_v5 = vsel %vm1135_vm13, %v3324_v23, %v7536_v13  ;;  %v3332_v9 = vsel %vm1135_vm13, %v7536_v13, %v3324_v23 }
 0x796   :  { %4141 = vmatpush.msk.msra.mxu2 %vm1135_vm13, %v3330_v5  ;;  %4181 = vmatpush.msk.msra.mxu1 %vm1141_vm3, %v3332_v9 }
 0x79c   :  { %v3448_v56 = vpop.permute.xlu2 %3447 }
 0x79d   :  { %v3450_v17 = vsel %vm8746_vm15, %v7492_v11, %v3448_v56  ;;  %vm8759_vm15 = vmmov %vm8758_vm2  ;;  %vm8772_vm2 = vcmp.lt.s32.totalorder %v4988_v8, 119 }
 0x79e   :  { %4153 = vmatpush.msk.msra.mxu0 %vm8747_vm10, %v3450_v17 }
 0x7a4   :  { %v3322_v50 = vpop.permute.xlu2 %3321 }
 0x7a5   :  { %v3329_v47 = vsel %vm1135_vm13, %v3322_v50, %v7550_v52  ;;  %v3331_v13 = vsel %vm1135_vm13, %v7550_v52, %v3322_v50  ;;  %v3593_v50 = vpop.permute.xlu1 %3592 }
 0x7a6   :  { %4142 = vmatpush.msk.msra.mxu2 %vm1135_vm13, %v3329_v47  ;;  %4182 = vmatpush.msk.msra.mxu1 %vm1141_vm3, %v3331_v13  ;;  %vm8752_vm13 = vmmov %vm8751_vm0  ;;  %vm8753_vm3 = vcmp.lt.s32.totalorder %v4988_v8, 121 }
 0x7a7   :  { %vm8754_vm5 = vmmov %vm8753_vm3 }
 0x7a8   :  { %vm8761_vm10 = vmmov %vm8753_vm3 }
 0x7ac   :  { %v3446_v38 = vpop.permute.xlu2 %3445 }
 0x7ad   :  { %v3449_v10 = vsel %vm8748_vm4, %v7508_v58, %v3446_v38  ;;  %vm8762_vm4 = vmmov %vm8753_vm3 }
 0x7ae   :  { %4154 = vmatpush.msk.msra.mxu0 %vm8749_vm14, %v3449_v10  ;;  %vm8763_vm14 = vcmp.lt.s32.totalorder %v4988_v8, 122 }
 0x7b4   :  { %v3304_v49 = vpop.permute.xlu2 %3303 }
 0x7b5   :  { %v3310_v0 = vsel %vm8750_vm1, %v3304_v49, %v7567_v34  ;;  %v3312_v52 = vsel %vm8751_vm0, %v7567_v34, %v3304_v49  ;;  %vm8764_vm1 = vmmov %vm8763_vm14 }
 0x7b6   :  { %4143 = vmatpush.msk.msra.mxu2 %vm8752_vm13, %v3310_v0  ;;  %4183 = vmatpush.msk.msra.mxu1 %vm1116_vm6, %v3312_v52  ;;  %vm8765_vm0 = vmmov %vm8764_vm1  ;;  %vm8766_vm13 = vcmp.lt.s32.totalorder %v4988_v8, 118 }
 0x7b7   :  { %v3492_v14 = vsel %vm8766_vm13, %v7747_v18, %v7447_v35  ;;  %v3472_v35 = vsel %vm8772_vm2, %v7822_v42, %v7462_v19  ;;  %v3872_v19 = vld [vmem:[%s8169_s3 + $0xb8] sm:$0xff]  ;;  %v3267_v42 = vsel %vm1054_vm11, %v7572_v41, %v3258_v28 }
 0x7bc   :  { %v3428_v2 = vpop.permute.xlu2 %3427 }
 0x7bd   :  { %v3430_v63 = vsel %vm8753_vm3, %v7520_v55, %v3428_v2  ;;  %vm8767_vm3 = vmmov %vm8765_vm0 }
 0x7be   :  { %4155 = vmatpush.msk.msra.mxu0 %vm8754_vm5, %v3430_v63  ;;  %vm8768_vm5 = vcmp.lt.s32.totalorder %v5311_v46, 118 }
 0x7c4   :  { %v3302_v37 = vpop.permute.xlu2 %3301 }
 0x7c5   :  { %v3309_v34 = vsel %vm8755_vm12, %v3302_v37, %v7629_v36  ;;  %v3311_v4 = vsel %vm8756_vm7, %v7629_v36, %v3302_v37  ;;  %v3288_v36 = vsel %vm8759_vm15, %v7552_v40, %v3280_v44  ;;  %vm8769_vm12 = vmmov %vm8766_vm13  ;;  %vm8770_vm7 = vcmask 654336  }
 0x7c6   :  { %4144 = vmatpush.msk.msra.mxu2 %vm8757_vm8, %v3309_v34  ;;  %4184 = vmatpush.msk.msra.mxu1 %vm1116_vm6, %v3311_v4  ;;  %vm8760_vm6 = vcmp.ge.s32.totalorder %v4988_v8, 1  ;;  %v3491_v62 = vsel %vm8769_vm12, %v7800_v3, %v7458_v48  ;;  %vm8771_vm8 = vmmov %vm8768_vm5  ;;  %vm8773_vm15 = vcmp.lt.s32.totalorder %v5311_v46, 119  ;;  %vm8780_vm13 = vcmp.lt.s32.totalorder %v5311_v46, 120 }
 0x7c7   :  { %vm8783_vm12 = vmmov %vm8780_vm13  ;;  %v3031_v4 = vmul.f32 %v7488_v24, %v7488_v24 }
 0x7c8   :  { %3634 = vmatpush.msra.mxu2 %v6668_v53  ;;  %3703 = vmatpush.msra.mxu1 %v6607_v31 }
 0x7ca   :  { %3635 = vmatpush.msra.mxu2 %v6701_v45  ;;  %3704 = vmatpush.msra.mxu1 %v6617_v27 }
 0x7cc   :  { %v3426_v15 = vpop.permute.xlu2 %3425  ;;  %4145 = vmatpush.msk.msra.mxu2 %vm8760_vm6, %v3288_v36  ;;  %4185 = vmatpush.msk.msra.mxu1 %vm1085_vm9, %v3286_v1  ;;  %vm8774_vm6 = vmmov %vm8772_vm2 }
 0x7cd   :  { %v3429_v31 = vsel %vm8761_vm10, %v7534_v59, %v3426_v15  ;;  %v3471_v18 = vsel %vm8774_vm6, %v7844_v32, %v7470_v60  ;;  %vm8775_vm10 = vcmp.lt.s32.totalorder %v4988_v8, 1  ;;  %vm8789_vm6 = vcmp.ge.s32.totalorder %v4988_v8, 2 }
 0x7ce   :  { %4156 = vmatpush.msk.msra.mxu0 %vm8762_vm4, %v3429_v31  ;;  %vm8776_vm4 = vmmov %vm8775_vm10 }
 0x7d4   :  { %v3404_v27 = vpop.permute.xlu2 %3403 }
 0x7d5   :  { %v3410_v53 = vsel %vm8763_vm14, %v3404_v27, %v3408_v12  ;;  %vm8777_vm14 = vmmov %vm8773_vm15 }
 0x7d6   :  { %4157 = vmatpush.msk.msra.mxu0 %vm8764_vm1, %v3410_v53  ;;  %vm8778_vm1 = vcmp.lt.s32.totalorder %v4988_v8, 120 }
 0x7d7   :  { %v3452_v3 = vsel %vm8778_vm1, %v3448_v56, %v7492_v11 }
 0x7d8   :  { %v3618_v21 = vpop.f32.mrf.mxu1 }
 0x7dc   :  { %v3406_v45 = vpop.permute.xlu2 %3405 }
 0x7dd   :  { %v3409_v40 = vsel %vm8765_vm0, %v7546_v7, %v3406_v45  ;;  %vm8779_vm0 = vcmp.ge.s32.totalorder %v4988_v8, 1 }
 0x7de   :  { %4158 = vmatpush.msk.msra.mxu0 %vm8767_vm3, %v3409_v40  ;;  %vm8781_vm3 = vmmov %vm8778_vm1 }
 0x7df   :  { %3875 = vmatmul.msk.f32.vlgmr.msra.gmra.mxu0 %vm8770_vm7, %v3869_v33  ;;  %v3451_v60 = vsel %vm8781_vm3, %v3446_v38, %v7508_v58 }
 0x7e0   :  { %4189 = vmatpush.msk.msrb.mxu0 %vm8768_vm5, %v3492_v14  ;;  %vm8782_vm5 = vmmov %vm8770_vm7  ;;  %vm8784_vm7 = vcmp.lt.s32.totalorder %v4988_v8, 121  ;;  %v3621_v61 = vpop.f32.mrf.mxu1 }
 0x7e1   :  { %v3432_v11 = vsel %vm8784_vm7, %v3428_v2, %v7520_v55  ;;  %vm8796_vm3 = vmmov %vm8782_vm5  ;;  %v3622_v2 = vadd.f32 %v3621_v61, %v3593_v50  ;;  %v8083_v61 = vmul.f32 0.00390625, %v7580_v39 }
 0x7e2   :  { %4190 = vmatpush.msk.msrb.mxu0 %vm8771_vm8, %v3491_v62  ;;  %vm8785_vm8 = vcmp.lt.s32.totalorder %v5311_v46, 121 }
 0x7e3   :  { %vm8787_vm2 = vmmov %vm8785_vm8 }
 0x7e4   :  { %4191 = vmatpush.msk.msrb.mxu0 %vm8773_vm15, %v3472_v35  ;;  %v3278_v48 = vpop.permute.xlu2 %3277  ;;  %vm8788_vm15 = vcmp.lt.s32.totalorder %v4988_v8, 122 }
 0x7e5   :  { %v3285_v43 = vsel %vm8775_vm10, %v3278_v48, %v3282_v51  ;;  %v3287_v22 = vsel %vm8776_vm4, %v3282_v51, %v3278_v48  ;;  %v3412_v55 = vsel %vm8788_vm15, %v3408_v12, %v3404_v27  ;;  %vm8790_vm10 = vcmp.ge.s32.totalorder %v5311_v46, 2  ;;  %v8799_v51 = vld [vmem:[#allocation43_spill] sm:$0xff] }
 0x7e6   :  { %4192 = vmatpush.msk.msrb.mxu0 %vm8777_vm14, %v3471_v18  ;;  %4146 = vmatpush.msk.msra.mxu2 %vm8779_vm0, %v3287_v22  ;;  %vm8791_vm4 = vcmp.lt.s32.totalorder %v5311_v46, 122  ;;  %vm8792_vm14 = vmmov %vm8789_vm6  ;;  %v3032_v12 = vmul.f32 %v7490_v57, %v7490_v57  ;;  %v8065_v35 = vmul.f32 0.00390625, %v8799_v51  ;;  %v8800_v18 = vld [vmem:[#allocation33_spill] sm:$0xff] }
 0x7e7   :  { %4186 = vmatpush.msk.msra.mxu1 %vm1085_vm9, %v3285_v43  ;;  %3876 = vmatmul.msk.f32.gmra.mxu0 %vm8782_vm5, %v3872_v19  ;;  %vm8786_vm9 = vmmov %vm8784_vm7  ;;  %v462_v48 = vmul.f32 0.00390625, %v8800_v18 }
 0x7e8   :  { %4193 = vmatpush.msk.msrb.mxu0 %vm8780_vm13, %v3452_v3  ;;  %v3431_v16 = vsel %vm8786_vm9, %v3426_v15, %v7534_v59  ;;  %v3868_v59 = vld [vmem:[%s8169_s3 + $0x98] sm:$0xff]  ;;  %vm8793_vm1 = vmmov %vm8790_vm10  ;;  %v3036_v36 = vadd.f32 %v3032_v12, %v3031_v4  ;;  %v480_v22 = vmul.f32 %v8065_v35, %v8065_v35 }
 0x7e9   :  { %vm8794_vm0 = vmmov %vm8788_vm15 }
 0x7ea   :  { %4194 = vmatpush.msk.msrb.mxu0 %vm8783_vm12, %v3451_v60  ;;  %v3411_v6 = vsel %vm8794_vm0, %v3406_v45, %v7546_v7  ;;  %vm8795_vm13 = vmmov %vm8791_vm4  ;;  %v3687_v7 = vpop.f32.mrf.mxu3  ;;  %v8802_v60 = vld [vmem:[#allocation36_spill] sm:$0xff] }
 0x7ec   :  { %4195 = vmatpush.msk.msrb.mxu0 %vm8785_vm8, %v3432_v11  ;;  %v3264_v54 = vpop.permute.xlu2 %3263  ;;  %v464_v11 = vmul.f32 0.00390625, %v8802_v60  ;;  %v8804_v60 = vld [vmem:[#allocation13_spill] sm:$0xff] }
 0x7ed   :  { %v3266_v58 = vsel %vm1054_vm11, %v7560_v25, %v3264_v54  ;;  %v3268_v20 = vsel %vm1054_vm11, %v3264_v54, %v7560_v25  ;;  %v3265_v25 = vsel %vm1054_vm11, %v3258_v28, %v7572_v41  ;;  %v3871_v41 = vld [vmem:[%s8169_s3 + $0xb0] sm:$0xff]  ;;  %vm8797_vm11 = vmmov %vm8796_vm3 }
 0x7ee   :  { %4196 = vmatpush.msk.msrb.mxu0 %vm8787_vm2, %v3431_v16  ;;  %4147 = vmatpush.msk.msra.mxu2 %vm8789_vm6, %v3268_v20  ;;  %v496_v16 = vsub.f32 %v464_v11, %v480_v22  ;;  %v8803_v20 = vld [vmem:[#allocation42_spill] sm:$0xff] }
 0x7ef   :  { %4187 = vmatpush.msk.msra.mxu1 %vm8790_vm10, %v3266_v58 }
 0x7f0   :  { %4197 = vmatpush.msk.msrb.mxu0 %vm8791_vm4, %v3412_v55  ;;  %4148 = vmatpush.msk.msra.mxu2 %vm8792_vm14, %v3267_v42  ;;  %v463_v55 = vmul.f32 0.00390625, %v8803_v20 }
 0x7f1   :  { %4188 = vmatpush.msk.msra.mxu1 %vm8793_vm1, %v3265_v25  ;;  %3640 = vmatmul.f32.vlgmr.msra.gmra.mxu2 %v3868_v59 }
 0x7f2   :  { %3709 = vmatmul.f32.vlgmr.msra.gmra.mxu1 %v3868_v59  ;;  %4198 = vmatpush.msk.msrb.mxu0 %vm8795_vm13, %v3411_v6  ;;  %v3690_v9 = vpop.f32.mrf.mxu3  ;;  %v512_v59 = vmax.f32 %v496_v16, 0.0 }
 0x7f3   :  { %3877 = vmatmul.msk.f32.vlgmr.msrb.gmra.mxu0 %vm8796_vm3, %v3869_v33  ;;  %v3691_v13 = vadd.f32 %v3690_v9, %v3593_v50  ;;  %v8798_v33 = vld [vmem:[#allocation34_spill] sm:$0xff] }
 0x7f4   :  { %v3588_v32 = vpop.permute.xlu2 %3587  ;;  %v8060_v14 = vmul.f32 0.00390625, %v8798_v33  ;;  %v8077_v42 = vadd.f32 1e-05, %v512_v59 }
 0x7f5   :  { %v3688_v46 = vadd.f32 %v3687_v7, %v3588_v32  ;;  %v3619_v23 = vadd.f32 %v3618_v21, %v3588_v32 }
 0x7f6   :  { %v478_v62 = vmul.f32 %v8060_v14, %v8060_v14  ;;  %v531_v11 = vsub.f32 %v8804_v60, %v8060_v14  ;;  %vm645_vm9 = vweird.f32 %v8077_v42 }
 0x7f8   :  { %v494_v43 = vsub.f32 %v462_v48, %v478_v62 }
 0x7f9   :  { %3643 = vmatmul.f32.gmra.mxu2 %v3871_v41 }
 0x7fa   :  { %3712 = vmatmul.f32.gmra.mxu1 %v3871_v41  ;;  %v510_v28 = vmax.f32 %v494_v43, 0.0 }
 0x7fb   :  { %3878 = vmatmul.msk.f32.gmra.mxu0 %vm8797_vm11, %v3872_v19  ;;  %v8801_v19 = vld [vmem:[#allocation35_spill] sm:$0xff] }
 0x7fc   :  { %v8071_v3 = vmul.f32 0.00390625, %v8801_v19  ;;  %v558_v58 = vadd.f32 1e-05, %v510_v28 }
 0x7fe   :  { %v479_v54 = vmul.f32 %v8071_v3, %v8071_v3  ;;  %4259 = vrsqrt.f32 %v558_v58  ;;  %vm625_vm12 = vweird.f32 %v558_v58 }
 0x7ff   :  { %4261 = vrsqrt.f32 %v8077_v42 }
 0x800   :  { %v495_v25 = vsub.f32 %v463_v55, %v479_v54  ;;  %v8805_v55 = vld [vmem:[#allocation14_spill] sm:$0xff] }
 0x801   :  { %v532_v59 = vsub.f32 %v8805_v55, %v8060_v14 }
 0x802   :  { %v511_v41 = vmax.f32 %v495_v25, 0.0  ;;  %v8806_v25 = vld [vmem:[#allocation17_spill] sm:$0xff] }
 0x804   :  { %v4260_v21 = vpop.eup %4259 }
 0x805   :  { %vm626_vm5 = vweird.f32 %v4260_v21 }
 0x806   :  { %vm627_vm7 = vmor %vm625_vm12, %vm626_vm5 }
 0x85c   :  { %v3664_v30 = vpop.f32.mrf.mxu0 }
 0x864   :  { %v3667_v8 = vpop.f32.mrf.mxu0 }
 0x86f   :  { %v3710_v26 = vpop.f32.mrf.mxu1 }
 0x870   :  { %v3733_v29 = vpop.f32.mrf.mxu0  ;;  %v3711_v5 = vadd.f32 %v3710_v26, %v3688_v46  ;;  %v8085_v26 = vpop.eup %4261 }
 0x871   :  { %v640_v39 = vmul.f32 %v8085_v26, %v8077_v42  ;;  %vm646_vm8 = vweird.f32 %v8085_v26  ;;  %v3052_v42 = vsub.f32 %v7490_v57, %v8083_v61 }
 0x872   :  { %v8035_v38 = vadd.f32 %v3733_v29, %v3711_v5  ;;  %v3044_v29 = vmul.f32 %v8083_v61, %v8083_v61  ;;  %vm647_vm10 = vmor %vm645_vm9, %vm646_vm8 }
 0x874   :  { %v3641_v56 = vpop.f32.mrf.mxu2  ;;  %v3746_v45 = vmul.f32 %v8035_v38, %v8035_v38 }
 0x875   :  { %v3642_v17 = vadd.f32 %v3641_v56, %v3619_v23 }
 0x877   :  { %v3713_v47 = vpop.f32.mrf.mxu1  ;;  %v8037_v10 = vadd.f32 %v3664_v30, %v3642_v17  ;;  %v8080_v30 = vadd.f32 1e-05, %v511_v41 }
 0x878   :  { %v3714_v49 = vadd.f32 %v3713_v47, %v3691_v13  ;;  %v3736_v52 = vpop.f32.mrf.mxu0 }
 0x879   :  { %v3739_v0 = vadd.f32 %v8035_v38, %v8037_v10  ;;  %v3745_v53 = vmul.f32 %v8037_v10, %v8037_v10  ;;  %4263 = vrsqrt.f32 %v8080_v30  ;;  %vm635_vm15 = vweird.f32 %v8080_v30 }
 0x87a   :  { %v8043_v37 = vadd.f32 %v3736_v52, %v3714_v49 }
 0x87b   :  { %3740 = vadd.xlane.f32.xlu2 %v3739_v0  ;;  %v3749_v40 = vadd.f32 %v3746_v45, %v3745_v53 }
 0x87c   :  { %v3644_v63 = vpop.f32.mrf.mxu2  ;;  %v3748_v1 = vmul.f32 %v8043_v37, %v8043_v37 }
 0x87d   :  { %v3645_v34 = vadd.f32 %v3644_v63, %v3622_v2  ;;  %v641_v63 = vmul.f32 %v8085_v26, %v640_v39 }
 0x87f   :  { %v8047_v44 = vadd.f32 %v3667_v8, %v3645_v34  ;;  %v620_v8 = vmul.f32 %v4260_v21, %v558_v58  ;;  %v8098_v0 = vpop.eup %4263  ;;  %v642_v53 = vmul.f32 0.5, %v641_v63  ;;  %v8807_v58 = vld [vmem:[#allocation18_spill] sm:$0xff] }
 0x880   :  { %v536_v41 = vsub.f32 %v8807_v58, %v8065_v35  ;;  %vm636_vm6 = vweird.f32 %v8098_v0 }
 0x881   :  { %v3742_v15 = vadd.f32 %v8043_v37, %v8047_v44  ;;  %v3747_v31 = vmul.f32 %v8047_v44, %v8047_v44  ;;  %v621_v17 = vmul.f32 %v4260_v21, %v620_v8  ;;  %v643_v18 = vsub.f32 1.5, %v642_v53  ;;  %vm637_vm3 = vmor %vm635_vm15, %vm636_vm6  ;;  %v8809_v53 = vld [vmem:[#allocation16_spill] sm:$0xff] }
 0x883   :  { %3037 = vadd.xlane.f32.xlu2 %v3036_v36  ;;  %3743 = vadd.xlane.f32.xlu1 %v3742_v15  ;;  %v3752_v27 = vadd.f32 %v3748_v1, %v3747_v31  ;;  %v622_v2 = vmul.f32 0.5, %v621_v17  ;;  %v630_v36 = vmul.f32 %v8098_v0, %v8080_v30  ;;  %v644_v54 = vmul.f32 %v8085_v26, %v643_v18  ;;  %v8808_v30 = vld [vmem:[#allocation15_spill] sm:$0xff] }
 0x885   :  { %3753 = vadd.xlane.f32.xlu0 %v3752_v27  ;;  %v623_v27 = vsub.f32 1.5, %v622_v2 }
 0x887   :  { %v624_v51 = vmul.f32 %v4260_v21, %v623_v27  ;;  %v533_v27 = vsub.f32 %v8808_v30, %v8071_v3 }
 0x889   :  { %v628_v16 = vsel %vm627_vm7, %v4260_v21, %v624_v51 }
 0x88a   :  { %v740_v17 = vmul.f32 %v628_v16, %v532_v59 }
 0x88b   :  { %3750 = vadd.xlane.f32.xlu1 %v3749_v40  ;;  %v631_v40 = vmul.f32 %v8098_v0, %v630_v36 }
 0x88d   :  { %v632_v22 = vmul.f32 0.5, %v631_v40 }
 0x8ee   :  { %v3741_v6 = vpop.xlane.xlu2 %3740 }
 0x8ef   :  { %v8096_v47 = vmul.f32 0.00390625, %v3741_v6  ;;  %v535_v6 = vsub.f32 %v8806_v25, %v8065_v35 }
 0x8f1   :  { %v3759_v4 = vmul.f32 %v8096_v47, %v8096_v47  ;;  %v3766_v40 = vsub.f32 %v8035_v38, %v8096_v47 }
 0x8f6   :  { %v3038_v7 = vpop.xlane.xlu2 %3037  ;;  %v3744_v32 = vpop.xlane.xlu1 %3743 }
 0x8f7   :  { %v3042_v46 = vmul.f32 0.00390625, %v3038_v7  ;;  %v8090_v23 = vmul.f32 0.00390625, %v3744_v32  ;;  %v633_v7 = vsub.f32 1.5, %v632_v22 }
 0x8f8   :  { %v3754_v5 = vpop.xlane.xlu0 %3753 }
 0x8f9   :  { %v3046_v9 = vsub.f32 %v3042_v46, %v3044_v29  ;;  %v3758_v56 = vmul.f32 0.00390625, %v3754_v5  ;;  %v3760_v50 = vmul.f32 %v8090_v23, %v8090_v23  ;;  %v739_v29 = vmul.f32 %v628_v16, %v531_v11 }
 0x8fa   :  { %v648_v46 = vsel %vm647_vm10, %v8085_v26, %v644_v54  ;;  %v634_v39 = vmul.f32 %v8098_v0, %v633_v7  ;;  %v3767_v63 = vsub.f32 %v8047_v44, %v8090_v23 }
 0x8fb   :  { %v3048_v13 = vmax.f32 %v3046_v9, 0.0  ;;  %v3762_v49 = vsub.f32 %v3758_v56, %v3760_v50  ;;  %v3051_v9 = vsub.f32 %v7488_v24, %v8083_v61  ;;  %v3768_v24 = vsub.f32 %v8043_v37, %v8090_v23 }
 0x8fc   :  { %v744_v61 = vmul.f32 %v648_v46, %v536_v41  ;;  %v638_v44 = vsel %vm637_vm3, %v8098_v0, %v634_v39  ;;  %v3765_v0 = vsub.f32 %v8037_v10, %v8096_v47 }
 0x8fd   :  { %v3054_v52 = vadd.f32 1e-05, %v3048_v13  ;;  %v3764_v12 = vmax.f32 %v3762_v49, 0.0  ;;  %v741_v51 = vmul.f32 %v638_v44, %v533_v27 }
 0x8fe   :  { %v3751_v34 = vpop.xlane.xlu1 %3750 }
 0x8ff   :  { %4265 = vrsqrt.f32 %v3054_v52  ;;  %v3757_v1 = vmul.f32 0.00390625, %v3751_v34  ;;  %v3770_v15 = vadd.f32 1e-05, %v3764_v12  ;;  %vm3071_vm4 = vweird.f32 %v3054_v52 }
 0x901   :  { %v3761_v31 = vsub.f32 %v3757_v1, %v3759_v4  ;;  %4267 = vrsqrt.f32 %v3770_v15  ;;  %vm3787_vm0 = vweird.f32 %v3770_v15 }
 0x903   :  { %v3763_v45 = vmax.f32 %v3761_v31, 0.0 }
 0x905   :  { %v4266_v33 = vpop.eup %4265  ;;  %v8106_v62 = vadd.f32 1e-05, %v3763_v45  ;;  %v534_v45 = vsub.f32 %v8809_v53, %v8071_v3 }
 0x906   :  { %v3066_v48 = vmul.f32 %v4266_v33, %v3054_v52  ;;  %vm3072_vm2 = vweird.f32 %v4266_v33  ;;  %v743_v52 = vmul.f32 %v648_v46, %v535_v6 }
 0x907   :  { %4269 = vrsqrt.f32 %v8106_v62  ;;  %v4268_v43 = vpop.eup %4267  ;;  %vm3073_vm14 = vmor %vm3071_vm4, %vm3072_vm2  ;;  %vm3777_vm5 = vweird.f32 %v8106_v62 }
 0x908   :  { %v3067_v19 = vmul.f32 %v4266_v33, %v3066_v48  ;;  %v3782_v28 = vmul.f32 %v4268_v43, %v3770_v15  ;;  %vm3788_vm1 = vweird.f32 %v4268_v43 }
 0x909   :  { %vm3789_vm13 = vmor %vm3787_vm0, %vm3788_vm1 }
 0x90a   :  { %v3068_v20 = vmul.f32 0.5, %v3067_v19  ;;  %v3783_v8 = vmul.f32 %v4268_v43, %v3782_v28 }
 0x90c   :  { %v3069_v32 = vsub.f32 1.5, %v3068_v20  ;;  %v3784_v14 = vmul.f32 0.5, %v3783_v8 }
 0x90d   :  { %v4270_v21 = vpop.eup %4269 }
 0x90e   :  { %v3070_v5 = vmul.f32 %v4266_v33, %v3069_v32  ;;  %v3772_v35 = vmul.f32 %v4270_v21, %v8106_v62  ;;  %v3785_v56 = vsub.f32 1.5, %v3784_v14  ;;  %vm3778_vm11 = vweird.f32 %v4270_v21 }
 0x90f   :  { %vm3779_vm12 = vmor %vm3777_vm5, %vm3778_vm11  ;;  %v742_v62 = vmul.f32 %v638_v44, %v534_v45 }
 0x910   :  { %v3074_v50 = vsel %vm3073_vm14, %v4266_v33, %v3070_v5  ;;  %v3773_v13 = vmul.f32 %v4270_v21, %v3772_v35  ;;  %v3786_v2 = vmul.f32 %v4268_v43, %v3785_v56 }
 0x911   :  { %v3077_v49 = vmul.f32 %v3074_v50, %v3051_v9  ;;  %v3078_v26 = vmul.f32 %v3074_v50, %v3052_v42 }
 0x912   :  { %v3774_v57 = vmul.f32 0.5, %v3773_v13  ;;  %v3790_v4 = vsel %vm3789_vm13, %v4268_v43, %v3786_v2 }
 0x913   :  { %v3081_v12 = vadd.f32 %v3077_v49, %v739_v29  ;;  %v3082_v34 = vadd.f32 %v3078_v26, %v740_v17  ;;  %v3793_v1 = vmul.f32 %v3790_v4, %v3767_v63  ;;  %v3794_v36 = vmul.f32 %v3790_v4, %v3768_v24 }
 0x914   :  { %v3775_v15 = vsub.f32 1.5, %v3774_v57 }
 0x915   :  { %3085 = vst [vmem:[%s8170_s5 + $0x50] sm:$0xff] %v3081_v12  ;;  %v3797_v37 = vadd.f32 %v3793_v1, %v743_v52  ;;  %v3798_v23 = vadd.f32 %v3794_v36, %v744_v61 }
 0x916   :  { %3086 = vst [vmem:[%s8170_s5 + $0x58] sm:$0xff] %v3082_v34  ;;  %v3776_v31 = vmul.f32 %v4270_v21, %v3775_v15 }
 0x917   :  { %3801 = vst [vmem:[%s8170_s5 + $0x70] sm:$0xff] %v3797_v37 }
 0x918   :  { %v3780_v33 = vsel %vm3779_vm12, %v4270_v21, %v3776_v31  ;;  %3802 = vst [vmem:[%s8170_s5 + $0x78] sm:$0xff] %v3798_v23 }
 0x919   :  { %v3791_v18 = vmul.f32 %v3780_v33, %v3765_v0  ;;  %v3792_v3 = vmul.f32 %v3780_v33, %v3766_v40 }
 0x91b   :  { %v3795_v48 = vadd.f32 %v3791_v18, %v741_v51  ;;  %v3796_v43 = vadd.f32 %v3792_v3, %v742_v62 }
 0x91d   :  { %3799 = vst [vmem:[%s8170_s5 + $0x60] sm:$0xff] %v3795_v48 }
 0x91e   :  { %3800 = vst [vmem:[%s8170_s5 + $0x68] sm:$0xff] %v3796_v43 }

</bundles_post_ra>
